<compile_context>
chip_gen: v6e
topology: v6e:2x2x1
jax: 0.10.0
libtpu: 0.0.40
codegen_flags: <defaults>
</compile_context>

<pallas_src>
import numpy as np
import jax
import jax.numpy as jnp
from jax.experimental import pallas as pl
from jax.experimental.pallas import tpu as pltpu

DIM = 73                 # real node feature width (matches `dim = 73`)
DP = 128                 # padded feature width (lane-aligned)
EDGE_FEAT = 5            # real edge_attr width
EF_PAD = 8               # padded edge_attr width (sublane-friendly)
HIDDEN = 128             # edge-network hidden width
K_PAD = 80               # padded contraction dim of W_e (73 -> 80, multiple of KCH)
KCH = 8                  # k-chunk size for the per-edge message contraction
TE = 16                  # edges per grid tile
S2S_STEPS = 3            # Set2Set processing steps
VMEM_LIMIT = 48 * 1024 * 1024


def _round_up(a, b):
    return ((a + b - 1) // b) * b


# --------------------------------------------------------------------------- #
# Fused NNConv (edge MLP + message + scatter-add) + GRU kernel, grid over edges
# --------------------------------------------------------------------------- #
def mp_step_kernel(dst_ref,                                   # SMEM: (E_pad,) int32 dst ids
                   ea_ref, xsrc_ref,                          # per-edge-tile inputs
                   w1_ref, b1_ref, w2_ref, b2_ref, cb_ref,    # edge MLP + NNConv bias
                   h_ref, gwi_ref, gwh_ref, gbi_ref, gbh_ref, # GRU state + packed weights
                   out_ref,                                   # (N_pad, DP) new hidden state
                   acc_ref):                                  # (N_pad, DP) message accumulator
    e_tile = pl.program_id(0)
    n_tiles = pl.num_programs(0)

    @pl.when(e_tile == 0)
    def _init():
        acc_ref[...] = jnp.zeros_like(acc_ref)

    # ---- edge MLP, fused (never written to HBM): hidden = relu(ea @ W1 + b1) ----
    hid = jnp.maximum(
        jnp.dot(ea_ref[...], w1_ref[...], preferred_element_type=jnp.float32)
        + b1_ref[...], 0.0)                                   # (TE, 128)
    hid_bf = hid.astype(jnp.bfloat16)

    # ---- per-edge message m_e = x_src[e] @ W_e --------------------------------
    # W_e is produced in lane-aligned 128-wide column blocks (one per contraction
    # index k); the contraction itself is a VPU fma over 73 blocks so the (TE,
    # 73, 128) tensor is never materialized.
    xs = xsrc_ref[...]                                        # (TE, DP)
    msgs = jnp.zeros((TE, DP), dtype=jnp.float32)
    for c in range(K_PAD // KCH):                             # 10 chunks of 8 k's
        col = c * KCH * DP
        wchunk = (jnp.dot(hid_bf, w2_ref[:, col:col + KCH * DP],
                          preferred_element_type=jnp.float32)
                  + b2_ref[:, col:col + KCH * DP])            # (TE, KCH*DP) f32
        for j in range(KCH):
            k = c * KCH + j
            if k >= DIM:
                continue                                      # padded k blocks are zero
            msgs = msgs + xs[:, k:k + 1] * wchunk[:, j * DP:(j + 1) * DP]

    # ---- scatter-add into the per-node VMEM accumulator (index-based) ---------
    e_base = e_tile * TE
    for i in range(TE):                                       # static unroll
        d = dst_ref[e_base + i]                               # dynamic scalar from SMEM
        row = acc_ref[pl.ds(d, 1), :]
        acc_ref[pl.ds(d, 1), :] = row + msgs[i:i + 1, :]

    # ---- last edge tile: finalize NNConv (bias + ReLU) and run the GRU cell ----
    @pl.when(e_tile == n_tiles - 1)
    def _finalize():
        m = jnp.maximum(acc_ref[...] + cb_ref[...], 0.0)      # (N_pad, DP)
        h = h_ref[...]
        # gate-packed GRU: one matmul per operand, gates r|z|n in 128-wide blocks
        gi = jnp.dot(m, gwi_ref[...], preferred_element_type=jnp.float32) + gbi_ref[...]
        gh = jnp.dot(h, gwh_ref[...], preferred_element_type=jnp.float32) + gbh_ref[...]
        r = jax.nn.sigmoid(gi[:, 0 * DP:1 * DP] + gh[:, 0 * DP:1 * DP])
        z = jax.nn.sigmoid(gi[:, 1 * DP:2 * DP] + gh[:, 1 * DP:2 * DP])
        n = jnp.tanh(gi[:, 2 * DP:3 * DP] + r * gh[:, 2 * DP:3 * DP])
        out_ref[...] = (1.0 - z) * n + z * h


# --------------------------------------------------------------------------- #
# Fused Set2Set (3 steps LSTM + segment softmax attention) + fc1 + fc2 kernel
# --------------------------------------------------------------------------- #
def set2set_fc_kernel(x_ref, mT_ref, lwi_ref, lwh_ref, lbi_ref, lbh_ref,
                      f1w_ref, f1b_ref, f2w_ref, f2b_ref, out_ref):
    x = x_ref[...]                                            # (N_pad, DP)
    mT = mT_ref[...]                                          # (N_pad, B_pad) graph one-hot
    Bp = mT.shape[1]

    q_star = jnp.zeros((Bp, 2 * DP), jnp.float32)
    hs = jnp.zeros((Bp, DP), jnp.float32)
    cs = jnp.zeros((Bp, DP), jnp.float32)
    lwi = lwi_ref[...]
    lwh = lwh_ref[...]
    lb = lbi_ref[...] + lbh_ref[...]

    for _ in range(S2S_STEPS):
        # gate-packed LSTM cell (i|f|g|o in 128-wide blocks)
        g = (jnp.dot(q_star, lwi, preferred_element_type=jnp.float32)
             + jnp.dot(hs, lwh, preferred_element_type=jnp.float32) + lb)
        ig = jax.nn.sigmoid(g[:, 0 * DP:1 * DP])
        fg = jax.nn.sigmoid(g[:, 1 * DP:2 * DP])
        gg = jnp.tanh(g[:, 2 * DP:3 * DP])
        og = jax.nn.sigmoid(g[:, 3 * DP:4 * DP])
        cs = fg * cs + ig * gg
        hs = og * jnp.tanh(cs)                                # q  (Bp, DP)

        # attention: e_i = <x_i, q_{batch[i]}>, segment softmax, r_b = sum alpha * x
        e = jnp.einsum('nd,bd->nb', x, hs, preferred_element_type=jnp.float32)
        e = jnp.where(mT > 0.5, e, jnp.float32(-1e30))
        ex = jnp.exp(e - jnp.max(e, axis=0, keepdims=True)) * mT
        denom = jnp.maximum(jnp.sum(ex, axis=0, keepdims=True), jnp.float32(1e-20))
        alpha = ex / denom
        r = jnp.einsum('nb,nd->bd', alpha, x, preferred_element_type=jnp.float32)
        q_star = jnp.concatenate([hs, r], axis=-1)            # (Bp, 2*DP)

    y1 = jnp.maximum(
        jnp.dot(q_star, f1w_ref[...], preferred_element_type=jnp.float32) + f1b_ref[...],
        0.0)
    out_ref[...] = (jnp.dot(y1, f2w_ref[...], preferred_element_type=jnp.float32)
                    + f2b_ref[...])


# --------------------------------------------------------------------------- #
# pallas_call builders
# --------------------------------------------------------------------------- #
def _full_spec(shape):
    nd = len(shape)
    return pl.BlockSpec(tuple(shape), lambda i, nd=nd: (0,) * nd)


def _build_mp_call(N_pad, E_pad):
    n_tiles = E_pad // TE
    in_specs = [
        pl.BlockSpec((TE, EF_PAD), lambda e, d: (e, 0)),          # edge_attr tile
        pl.BlockSpec((TE, DP), lambda e, d: (e, 0)),              # gathered x[src] tile
        pl.BlockSpec((EF_PAD, HIDDEN), lambda e, d: (0, 0)),      # edge-MLP W1
        pl.BlockSpec((1, HIDDEN), lambda e, d: (0, 0)),           # edge-MLP b1
        pl.BlockSpec((HIDDEN, K_PAD * DP), lambda e, d: (0, 0)),  # edge-MLP W2 (packed, bf16)
        pl.BlockSpec((1, K_PAD * DP), lambda e, d: (0, 0)),       # edge-MLP b2 (packed)
        pl.BlockSpec((1, DP), lambda e, d: (0, 0)),               # NNConv bias
        pl.BlockSpec((N_pad, DP), lambda e, d: (0, 0)),           # h (GRU hidden state)
        pl.BlockSpec((DP, 3 * DP), lambda e, d: (0, 0)),          # GRU W_i (gate packed)
        pl.BlockSpec((DP, 3 * DP), lambda e, d: (0, 0)),          # GRU W_h (gate packed)
        pl.BlockSpec((1, 3 * DP), lambda e, d: (0, 0)),           # GRU b_i
        pl.BlockSpec((1, 3 * DP), lambda e, d: (0, 0)),           # GRU b_h
    ]
    return pl.pallas_call(
        mp_step_kernel,
        out_shape=jax.ShapeDtypeStruct((N_pad, DP), jnp.float32),
        grid_spec=pltpu.PrefetchScalarGridSpec(
            num_scalar_prefetch=1,                               # dst indices -> SMEM
            grid=(n_tiles,),
            in_specs=in_specs,
            out_specs=pl.BlockSpec((N_pad, DP), lambda e, d: (0, 0)),
            scratch_shapes=[pltpu.VMEM((N_pad, DP), jnp.float32)],
        ),
        compiler_params=pltpu.CompilerParams(
            dimension_semantics=("arbitrary",),                  # accumulator across edge tiles
            vmem_limit_bytes=VMEM_LIMIT,
        ),
    )


def _build_s2s_call(N_pad, B_pad):
    shapes = [
        (N_pad, DP), (N_pad, B_pad),
        (2 * DP, 4 * DP), (DP, 4 * DP), (1, 4 * DP), (1, 4 * DP),
        (2 * DP, DP), (1, DP), (DP, 1), (1, 1),
    ]
    return pl.pallas_call(
        set2set_fc_kernel,
        out_shape=jax.ShapeDtypeStruct((B_pad, 1), jnp.float32),
        grid=(1,),
        in_specs=[_full_spec(s) for s in shapes],
        out_specs=_full_spec((B_pad, 1)),
        compiler_params=pltpu.CompilerParams(
            dimension_semantics=("arbitrary",),
            vmem_limit_bytes=VMEM_LIMIT,
        ),
    )


# --------------------------------------------------------------------------- #
# Parameter packing: pad 73 -> 128, pack recurrent gates, permute/pad W2 so the
# per-edge weight W_e comes out in lane-aligned (k, 128) column blocks.
# --------------------------------------------------------------------------- #
def pack_params(p):
    def zeros(*s):
        return np.zeros(s, np.float32)

    P = {}
    # edge MLP
    w1 = zeros(EF_PAD, HIDDEN)
    w1[:EDGE_FEAT, :] = np.asarray(p['enn_w1'], np.float32)
    P['w1'] = jnp.asarray(w1)
    P['b1'] = jnp.asarray(np.asarray(p['enn_b1'], np.float32).reshape(1, HIDDEN))

    w2 = np.asarray(p['enn_w2'], np.float32).reshape(HIDDEN, DIM, DIM)
    w2p = zeros(HIDDEN, K_PAD, DP)
    w2p[:, :DIM, :DIM] = w2
    P['w2'] = jnp.asarray(w2p.reshape(HIDDEN, K_PAD * DP), dtype=jnp.bfloat16)
    b2 = np.asarray(p['enn_b2'], np.float32).reshape(DIM, DIM)
    b2p = zeros(K_PAD, DP)
    b2p[:DIM, :DIM] = b2
    P['b2'] = jnp.asarray(b2p.reshape(1, K_PAD * DP))

    cb = zeros(1, DP)
    cb[0, :DIM] = np.asarray(p['conv_bias'], np.float32).reshape(DIM)
    P['conv_b'] = jnp.asarray(cb)

    # GRU (gates r, z, n packed into 128-wide blocks)
    gwi = zeros(DP, 3 * DP); gwh = zeros(DP, 3 * DP)
    gbi = zeros(1, 3 * DP); gbh = zeros(1, 3 * DP)
    gru_wi = np.asarray(p['gru_wi'], np.float32)
    gru_wh = np.asarray(p['gru_wh'], np.float32)
    gru_bi = np.asarray(p['gru_bi'], np.float32)
    gru_bh = np.asarray(p['gru_bh'], np.float32)
    for g in range(3):
        gwi[:DIM, g * DP:g * DP + DIM] = gru_wi[g]
        gwh[:DIM, g * DP:g * DP + DIM] = gru_wh[g]
        gbi[0, g * DP:g * DP + DIM] = gru_bi[g, 0]
        gbh[0, g * DP:g * DP + DIM] = gru_bh[g, 0]
    P['gru_wi'], P['gru_wh'] = jnp.asarray(gwi), jnp.asarray(gwh)
    P['gru_bi'], P['gru_bh'] = jnp.asarray(gbi), jnp.asarray(gbh)

    # Set2Set LSTM (gates i, f, g, o packed); input is [q | r] -> rows [0:DP]|[DP:2DP]
    lwi = zeros(2 * DP, 4 * DP); lwh = zeros(DP, 4 * DP)
    lbi = zeros(1, 4 * DP); lbh = zeros(1, 4 * DP)
    lstm_wi = np.asarray(p['lstm_wi'], np.float32)
    lstm_wh = np.asarray(p['lstm_wh'], np.float32)
    lstm_bi = np.asarray(p['lstm_bi'], np.float32)
    lstm_bh = np.asarray(p['lstm_bh'], np.float32)
    for g in range(4):
        lwi[:DIM, g * DP:g * DP + DIM] = lstm_wi[g, :DIM, :]
        lwi[DP:DP + DIM, g * DP:g * DP + DIM] = lstm_wi[g, DIM:, :]
        lwh[:DIM, g * DP:g * DP + DIM] = lstm_wh[g]
        lbi[0, g * DP:g * DP + DIM] = lstm_bi[g, 0]
        lbh[0, g * DP:g * DP + DIM] = lstm_bh[g, 0]
    P['lstm_wi'], P['lstm_wh'] = jnp.asarray(lwi), jnp.asarray(lwh)
    P['lstm_bi'], P['lstm_bh'] = jnp.asarray(lbi), jnp.asarray(lbh)

    # fc1 (2*dim -> dim), fc2 (dim -> 1)
    fc1_w = np.asarray(p['fc1_w'], np.float32)
    f1w = zeros(2 * DP, DP)
    f1w[:DIM, :DIM] = fc1_w[:DIM]
    f1w[DP:DP + DIM, :DIM] = fc1_w[DIM:]
    f1b = zeros(1, DP)
    f1b[0, :DIM] = np.asarray(p['fc1_b'], np.float32).reshape(DIM)
    f2w = zeros(DP, 1)
    f2w[:DIM, 0] = np.asarray(p['fc2_w'], np.float32).reshape(DIM)
    P['fc1_w'], P['fc1_b'] = jnp.asarray(f1w), jnp.asarray(f1b)
    P['fc2_w'] = jnp.asarray(f2w)
    P['fc2_b'] = jnp.asarray(np.asarray(p['fc2_b'], np.float32).reshape(1, 1))
    return P


# --------------------------------------------------------------------------- #
# Forward pass
# --------------------------------------------------------------------------- #
def forward(params, x, edge_index, edge_attr, batch, num_graphs):
    P = pack_params(params)

    N = x.shape[0]
    E = edge_attr.shape[0]
    B = int(num_graphs)
    N_pad = _round_up(N + 1, 8)              # >= 1 dummy row (scatter target for padded edges)
    E_pad = _round_up(max(E, TE), TE)
    B_pad = _round_up(B + 1, 8)              # >= 1 dummy graph column (for dummy nodes)

    # padded node features (zero lanes 73..127 and dummy rows)
    x_pad = jnp.zeros((N_pad, DP), jnp.float32).at[:N, :DIM].set(x.astype(jnp.float32))

    src = edge_index[0].astype(jnp.int32)
    dst = edge_index[1].astype(jnp.int32)
    src_pad = jnp.concatenate([src, jnp.zeros((E_pad - E,), jnp.int32)])
    dst_pad = jnp.concatenate([dst, jnp.full((E_pad - E,), N, jnp.int32)])  # dummy edges -> dummy node

    ea_pad = jnp.zeros((E_pad, EF_PAD), jnp.float32).at[:E, :EDGE_FEAT].set(
        edge_attr.astype(jnp.float32))

    batch_pad = jnp.concatenate([batch.astype(jnp.int32),
                                 jnp.full((N_pad - N,), B, jnp.int32)])
    maskT = jax.nn.one_hot(batch_pad, B_pad, dtype=jnp.float32)             # (N_pad, B_pad)

    mp_call = _build_mp_call(N_pad, E_pad)
    out = x_pad
    h = x_pad                                                               # h0 = data.x
    for _ in range(3):
        x_src = jnp.take(out, src_pad, axis=0)                              # gather x[src] (glue)
        h = mp_call(dst_pad, ea_pad, x_src,
                    P['w1'], P['b1'], P['w2'], P['b2'], P['conv_b'],
                    h, P['gru_wi'], P['gru_wh'], P['gru_bi'], P['gru_bh'])
        out = h                                                             # seq_len==1 -> out == h

    s2s_call = _build_s2s_call(N_pad, B_pad)
    y = s2s_call(out, maskT,
                 P['lstm_wi'], P['lstm_wh'], P['lstm_bi'], P['lstm_bh'],
                 P['fc1_w'], P['fc1_b'], P['fc2_w'], P['fc2_b'])
    return y[:B, 0]


# --------------------------------------------------------------------------- #
if __name__ == "__main__":
    keys = list(jax.random.split(jax.random.PRNGKey(0), 32))

    def uinit(shape, fan_in):
        k = keys.pop()
        bound = 1.0 / float(np.sqrt(fan_in))
        return jax.random.uniform(k, shape, jnp.float32, -bound, bound)

    params = dict(
        # edge network: Linear(5,128) -> ReLU -> Linear(128, 73*73)
        enn_w1=uinit((EDGE_FEAT, HIDDEN), EDGE_FEAT),
        enn_b1=uinit((1, HIDDEN), EDGE_FEAT),
        enn_w2=uinit((HIDDEN, DIM * DIM), HIDDEN),
        enn_b2=uinit((1, DIM * DIM), HIDDEN),
        # NNConv bias (root_weight=False, bias=True)
        conv_bias=uinit((1, DIM), DIM),
        # GRU(dim, dim): gates r, z, n
        gru_wi=uinit((3, DIM, DIM), DIM),
        gru_wh=uinit((3, DIM, DIM), DIM),
        gru_bi=uinit((3, 1, DIM), DIM),
        gru_bh=uinit((3, 1, DIM), DIM),
        # Set2Set LSTM(2*dim -> dim): gates i, f, g, o
        lstm_wi=uinit((4, 2 * DIM, DIM), 2 * DIM),
        lstm_wh=uinit((4, DIM, DIM), DIM),
        lstm_bi=uinit((4, 1, DIM), DIM),
        lstm_bh=uinit((4, 1, DIM), DIM),
        # fc1: Linear(2*dim, dim), fc2: Linear(dim, 1)
        fc1_w=uinit((2 * DIM, DIM), 2 * DIM),
        fc1_b=uinit((1, DIM), 2 * DIM),
        fc2_w=uinit((DIM, 1), DIM),
        fc2_b=uinit((1, 1), DIM),
    )

    # small synthetic batch: 2 graphs x 6 nodes, bidirectional ring edges
    nodes_per_graph = 6
    num_graphs = 2
    N = nodes_per_graph * num_graphs
    src, dst = [], []
    for g in range(num_graphs):
        off = g * nodes_per_graph
        for i in range(nodes_per_graph):
            a, b = off + i, off + (i + 1) % nodes_per_graph
            src += [a, b]
            dst += [b, a]
    edge_index = jnp.array([src, dst], dtype=jnp.int32)          # (2, E)
    E = edge_index.shape[1]

    x = jax.random.normal(keys.pop(), (N, DIM), jnp.float32)
    edge_attr = jax.random.normal(keys.pop(), (E, EDGE_FEAT), jnp.float32)
    batch = jnp.repeat(jnp.arange(num_graphs, dtype=jnp.int32), nodes_per_graph)

    y = forward(params, x, edge_index, edge_attr, batch, num_graphs)
    y = jax.block_until_ready(y)
    assert y.shape == (num_graphs,) and bool(jnp.all(jnp.isfinite(y)))
    print("KERNEL_OK")
</pallas_src>

<mosaic_0001>
module attributes {stable_mosaic.version = 11 : i64} {
  func.func @mp_step_kernel(%arg0: i32, %arg1: memref<32xi32, #tpu.memory_space<smem>>, %arg2: memref<16x8xf32, #tpu.memory_space<vmem>>, %arg3: memref<16x128xf32, #tpu.memory_space<vmem>>, %arg4: memref<8x128xf32, #tpu.memory_space<vmem>>, %arg5: memref<1x128xf32, #tpu.memory_space<vmem>>, %arg6: memref<128x10240xbf16, #tpu.memory_space<vmem>>, %arg7: memref<1x10240xf32, #tpu.memory_space<vmem>>, %arg8: memref<1x128xf32, #tpu.memory_space<vmem>>, %arg9: memref<16x128xf32, #tpu.memory_space<vmem>>, %arg10: memref<128x384xf32, #tpu.memory_space<vmem>>, %arg11: memref<128x384xf32, #tpu.memory_space<vmem>>, %arg12: memref<1x384xf32, #tpu.memory_space<vmem>>, %arg13: memref<1x384xf32, #tpu.memory_space<vmem>>, %arg14: memref<16x128xf32, #tpu.memory_space<vmem>>, %arg15: memref<16x128xf32, #tpu.memory_space<vmem>>) attributes {dimension_semantics = [#tpu.dimension_semantics<arbitrary>], iteration_bounds = array<i64: 2>, scalar_prefetch = 1 : i64, scratch_operands = 1 : i64, tpu.core_type = #tpu.core_type<tc>, window_params = [{transform_indices = @transform_0, window_bounds = array<i64: 16, 8>}, {transform_indices = @transform_1, window_bounds = array<i64: 16, 128>}, {pipeline_mode = #tpu.pipeline_mode<synchronous>, transform_indices = @transform_2, window_bounds = array<i64: 8, 128>}, {pipeline_mode = #tpu.pipeline_mode<synchronous>, transform_indices = @transform_3, window_bounds = array<i64: 1, 128>}, {pipeline_mode = #tpu.pipeline_mode<synchronous>, transform_indices = @transform_4, window_bounds = array<i64: 128, 10240>}, {pipeline_mode = #tpu.pipeline_mode<synchronous>, transform_indices = @transform_5, window_bounds = array<i64: 1, 10240>}, {pipeline_mode = #tpu.pipeline_mode<synchronous>, transform_indices = @transform_6, window_bounds = array<i64: 1, 128>}, {pipeline_mode = #tpu.pipeline_mode<synchronous>, transform_indices = @transform_7, window_bounds = array<i64: 16, 128>}, {pipeline_mode = #tpu.pipeline_mode<synchronous>, transform_indices = @transform_8, window_bounds = array<i64: 128, 384>}, {pipeline_mode = #tpu.pipeline_mode<synchronous>, transform_indices = @transform_9, window_bounds = array<i64: 128, 384>}, {pipeline_mode = #tpu.pipeline_mode<synchronous>, transform_indices = @transform_10, window_bounds = array<i64: 1, 384>}, {pipeline_mode = #tpu.pipeline_mode<synchronous>, transform_indices = @transform_11, window_bounds = array<i64: 1, 384>}, {pipeline_mode = #tpu.pipeline_mode<synchronous>, transform_indices = @transform_12, window_bounds = array<i64: 16, 128>}]} {
    %c0_i32 = arith.constant 0 : i32
    %0 = arith.cmpi eq, %arg0, %c0_i32 : i32
    %1 = arith.extui %0 : i1 to i32
    %c0_i32_0 = arith.constant 0 : i32
    %2 = arith.cmpi ne, %1, %c0_i32_0 : i32
    scf.if %2 {
      %cst_86 = arith.constant 0.000000e+00 : f32
      %577 = vector.broadcast %cst_86 : f32 to vector<16x128xf32>
      %c0_87 = arith.constant 0 : index
      %c0_88 = arith.constant 0 : index
      %578 = vector.load %arg15[%c0_87, %c0_88] : memref<16x128xf32, #tpu.memory_space<vmem>>, vector<16x128xf32>
      tpu.vector_store %arg15[%c0_87, %c0_88], %577 {strides = array<i32>} : memref<16x128xf32, #tpu.memory_space<vmem>>, vector<16x128xf32>,
    } else {
    }
    %c0 = arith.constant 0 : index
    %c0_1 = arith.constant 0 : index
    %3 = vector.load %arg2[%c0, %c0_1] : memref<16x8xf32, #tpu.memory_space<vmem>>, vector<16x8xf32>
    %c0_2 = arith.constant 0 : index
    %c0_3 = arith.constant 0 : index
    %4 = vector.load %arg4[%c0_2, %c0_3] : memref<8x128xf32, #tpu.memory_space<vmem>>, vector<8x128xf32>
    %cst = arith.constant dense<0.000000e+00> : vector<16x128xf32>
    %5 = tpu.matmul %3, %4, %cst {dimension_numbers = #tpu.dot_dimension_numbers<[1], [0], [0], [1], [0, 0, 1, 1], [], []>} : vector<16x8xf32>, vector<8x128xf32>, vector<16x128xf32> -> vector<16x128xf32>
    %c0_4 = arith.constant 0 : index
    %c0_5 = arith.constant 0 : index
    %6 = vector.load %arg5[%c0_4, %c0_5] : memref<1x128xf32, #tpu.memory_space<vmem>>, vector<1x128xf32>
    %7 = vector.broadcast %6 : vector<1x128xf32> to vector<16x128xf32>
    %8 = arith.addf %5, %7 : vector<16x128xf32>
    %cst_6 = arith.constant 0.000000e+00 : f32
    %9 = vector.broadcast %cst_6 : f32 to vector<16x128xf32>
    %10 = arith.maximumf %8, %9 : vector<16x128xf32>
    %11 = arith.truncf %10 : vector<16x128xf32> to vector<16x128xbf16>
    %c0_7 = arith.constant 0 : index
    %c0_8 = arith.constant 0 : index
    %12 = vector.load %arg3[%c0_7, %c0_8] : memref<16x128xf32, #tpu.memory_space<vmem>>, vector<16x128xf32>
    %cst_9 = arith.constant 0.000000e+00 : f32
    %13 = vector.broadcast %cst_9 : f32 to vector<16x128xf32>
    %c0_10 = arith.constant 0 : index
    %c0_11 = arith.constant 0 : index
    %14 = vector.load %arg6[%c0_10, %c0_11] : memref<128x10240xbf16, #tpu.memory_space<vmem>>, vector<128x1024xbf16>
    %cst_12 = arith.constant dense<0.000000e+00> : vector<16x1024xf32>
    %15 = tpu.matmul %11, %14, %cst_12 {dimension_numbers = #tpu.dot_dimension_numbers<[1], [0], [0], [1], [0, 0, 1, 1], [], []>} : vector<16x128xbf16>, vector<128x1024xbf16>, vector<16x1024xf32> -> vector<16x1024xf32>
    %c0_13 = arith.constant 0 : index
    %c0_14 = arith.constant 0 : index
    %16 = vector.load %arg7[%c0_13, %c0_14] : memref<1x10240xf32, #tpu.memory_space<vmem>>, vector<1x1024xf32>
    %17 = vector.broadcast %16 : vector<1x1024xf32> to vector<16x1024xf32>
    %18 = arith.addf %15, %17 : vector<16x1024xf32>
    %19 = vector.extract_strided_slice %12 {offsets = [0, 0], sizes = [16, 1], strides = [1, 1]} : vector<16x128xf32> to vector<16x1xf32>
    %20 = vector.extract_strided_slice %18 {offsets = [0, 0], sizes = [16, 128], strides = [1, 1]} : vector<16x1024xf32> to vector<16x128xf32>
    %21 = vector.broadcast %19 : vector<16x1xf32> to vector<16x128xf32>
    %22 = arith.mulf %21, %20 : vector<16x128xf32>
    %23 = arith.addf %13, %22 : vector<16x128xf32>
    %24 = vector.extract_strided_slice %12 {offsets = [0, 1], sizes = [16, 1], strides = [1, 1]} : vector<16x128xf32> to vector<16x1xf32>
    %25 = vector.extract_strided_slice %18 {offsets = [0, 128], sizes = [16, 128], strides = [1, 1]} : vector<16x1024xf32> to vector<16x128xf32>
    %26 = vector.broadcast %24 : vector<16x1xf32> to vector<16x128xf32>
    %27 = arith.mulf %26, %25 : vector<16x128xf32>
    %28 = arith.addf %23, %27 : vector<16x128xf32>
    %29 = vector.extract_strided_slice %12 {offsets = [0, 2], sizes = [16, 1], strides = [1, 1]} : vector<16x128xf32> to vector<16x1xf32>
    %30 = vector.extract_strided_slice %18 {offsets = [0, 256], sizes = [16, 128], strides = [1, 1]} : vector<16x1024xf32> to vector<16x128xf32>
    %31 = vector.broadcast %29 : vector<16x1xf32> to vector<16x128xf32>
    %32 = arith.mulf %31, %30 : vector<16x128xf32>
    %33 = arith.addf %28, %32 : vector<16x128xf32>
    %34 = vector.extract_strided_slice %12 {offsets = [0, 3], sizes = [16, 1], strides = [1, 1]} : vector<16x128xf32> to vector<16x1xf32>
    %35 = vector.extract_strided_slice %18 {offsets = [0, 384], sizes = [16, 128], strides = [1, 1]} : vector<16x1024xf32> to vector<16x128xf32>
    %36 = vector.broadcast %34 : vector<16x1xf32> to vector<16x128xf32>
    %37 = arith.mulf %36, %35 : vector<16x128xf32>
    %38 = arith.addf %33, %37 : vector<16x128xf32>
    %39 = vector.extract_strided_slice %12 {offsets = [0, 4], sizes = [16, 1], strides = [1, 1]} : vector<16x128xf32> to vector<16x1xf32>
    %40 = vector.extract_strided_slice %18 {offsets = [0, 512], sizes = [16, 128], strides = [1, 1]} : vector<16x1024xf32> to vector<16x128xf32>
    %41 = vector.broadcast %39 : vector<16x1xf32> to vector<16x128xf32>
    %42 = arith.mulf %41, %40 : vector<16x128xf32>
    %43 = arith.addf %38, %42 : vector<16x128xf32>
    %44 = vector.extract_strided_slice %12 {offsets = [0, 5], sizes = [16, 1], strides = [1, 1]} : vector<16x128xf32> to vector<16x1xf32>
    %45 = vector.extract_strided_slice %18 {offsets = [0, 640], sizes = [16, 128], strides = [1, 1]} : vector<16x1024xf32> to vector<16x128xf32>
    %46 = vector.broadcast %44 : vector<16x1xf32> to vector<16x128xf32>
    %47 = arith.mulf %46, %45 : vector<16x128xf32>
    %48 = arith.addf %43, %47 : vector<16x128xf32>
    %49 = vector.extract_strided_slice %12 {offsets = [0, 6], sizes = [16, 1], strides = [1, 1]} : vector<16x128xf32> to vector<16x1xf32>
    %50 = vector.extract_strided_slice %18 {offsets = [0, 768], sizes = [16, 128], strides = [1, 1]} : vector<16x1024xf32> to vector<16x128xf32>
    %51 = vector.broadcast %49 : vector<16x1xf32> to vector<16x128xf32>
    %52 = arith.mulf %51, %50 : vector<16x128xf32>
    %53 = arith.addf %48, %52 : vector<16x128xf32>
    %54 = vector.extract_strided_slice %12 {offsets = [0, 7], sizes = [16, 1], strides = [1, 1]} : vector<16x128xf32> to vector<16x1xf32>
    %55 = vector.extract_strided_slice %18 {offsets = [0, 896], sizes = [16, 128], strides = [1, 1]} : vector<16x1024xf32> to vector<16x128xf32>
    %56 = vector.broadcast %54 : vector<16x1xf32> to vector<16x128xf32>
    %57 = arith.mulf %56, %55 : vector<16x128xf32>
    %58 = arith.addf %53, %57 : vector<16x128xf32>
    %c0_15 = arith.constant 0 : index
    %c1024 = arith.constant 1024 : index
    %59 = vector.load %arg6[%c0_15, %c1024] : memref<128x10240xbf16, #tpu.memory_space<vmem>>, vector<128x1024xbf16>
    %cst_16 = arith.constant dense<0.000000e+00> : vector<16x1024xf32>
    %60 = tpu.matmul %11, %59, %cst_16 {dimension_numbers = #tpu.dot_dimension_numbers<[1], [0], [0], [1], [0, 0, 1, 1], [], []>} : vector<16x128xbf16>, vector<128x1024xbf16>, vector<16x1024xf32> -> vector<16x1024xf32>
    %c0_17 = arith.constant 0 : index
    %c1024_18 = arith.constant 1024 : index
    %61 = vector.load %arg7[%c0_17, %c1024_18] : memref<1x10240xf32, #tpu.memory_space<vmem>>, vector<1x1024xf32>
    %62 = vector.broadcast %61 : vector<1x1024xf32> to vector<16x1024xf32>
    %63 = arith.addf %60, %62 : vector<16x1024xf32>
    %64 = vector.extract_strided_slice %12 {offsets = [0, 8], sizes = [16, 1], strides = [1, 1]} : vector<16x128xf32> to vector<16x1xf32>
    %65 = vector.extract_strided_slice %63 {offsets = [0, 0], sizes = [16, 128], strides = [1, 1]} : vector<16x1024xf32> to vector<16x128xf32>
    %66 = vector.broadcast %64 : vector<16x1xf32> to vector<16x128xf32>
    %67 = arith.mulf %66, %65 : vector<16x128xf32>
    %68 = arith.addf %58, %67 : vector<16x128xf32>
    %69 = vector.extract_strided_slice %12 {offsets = [0, 9], sizes = [16, 1], strides = [1, 1]} : vector<16x128xf32> to vector<16x1xf32>
    %70 = vector.extract_strided_slice %63 {offsets = [0, 128], sizes = [16, 128], strides = [1, 1]} : vector<16x1024xf32> to vector<16x128xf32>
    %71 = vector.broadcast %69 : vector<16x1xf32> to vector<16x128xf32>
    %72 = arith.mulf %71, %70 : vector<16x128xf32>
    %73 = arith.addf %68, %72 : vector<16x128xf32>
    %74 = vector.extract_strided_slice %12 {offsets = [0, 10], sizes = [16, 1], strides = [1, 1]} : vector<16x128xf32> to vector<16x1xf32>
    %75 = vector.extract_strided_slice %63 {offsets = [0, 256], sizes = [16, 128], strides = [1, 1]} : vector<16x1024xf32> to vector<16x128xf32>
    %76 = vector.broadcast %74 : vector<16x1xf32> to vector<16x128xf32>
    %77 = arith.mulf %76, %75 : vector<16x128xf32>
    %78 = arith.addf %73, %77 : vector<16x128xf32>
    %79 = vector.extract_strided_slice %12 {offsets = [0, 11], sizes = [16, 1], strides = [1, 1]} : vector<16x128xf32> to vector<16x1xf32>
    %80 = vector.extract_strided_slice %63 {offsets = [0, 384], sizes = [16, 128], strides = [1, 1]} : vector<16x1024xf32> to vector<16x128xf32>
    %81 = vector.broadcast %79 : vector<16x1xf32> to vector<16x128xf32>
    %82 = arith.mulf %81, %80 : vector<16x128xf32>
    %83 = arith.addf %78, %82 : vector<16x128xf32>
    %84 = vector.extract_strided_slice %12 {offsets = [0, 12], sizes = [16, 1], strides = [1, 1]} : vector<16x128xf32> to vector<16x1xf32>
    %85 = vector.extract_strided_slice %63 {offsets = [0, 512], sizes = [16, 128], strides = [1, 1]} : vector<16x1024xf32> to vector<16x128xf32>
    %86 = vector.broadcast %84 : vector<16x1xf32> to vector<16x128xf32>
    %87 = arith.mulf %86, %85 : vector<16x128xf32>
    %88 = arith.addf %83, %87 : vector<16x128xf32>
    %89 = vector.extract_strided_slice %12 {offsets = [0, 13], sizes = [16, 1], strides = [1, 1]} : vector<16x128xf32> to vector<16x1xf32>
    %90 = vector.extract_strided_slice %63 {offsets = [0, 640], sizes = [16, 128], strides = [1, 1]} : vector<16x1024xf32> to vector<16x128xf32>
    %91 = vector.broadcast %89 : vector<16x1xf32> to vector<16x128xf32>
    %92 = arith.mulf %91, %90 : vector<16x128xf32>
    %93 = arith.addf %88, %92 : vector<16x128xf32>
    %94 = vector.extract_strided_slice %12 {offsets = [0, 14], sizes = [16, 1], strides = [1, 1]} : vector<16x128xf32> to vector<16x1xf32>
    %95 = vector.extract_strided_slice %63 {offsets = [0, 768], sizes = [16, 128], strides = [1, 1]} : vector<16x1024xf32> to vector<16x128xf32>
    %96 = vector.broadcast %94 : vector<16x1xf32> to vector<16x128xf32>
    %97 = arith.mulf %96, %95 : vector<16x128xf32>
    %98 = arith.addf %93, %97 : vector<16x128xf32>
    %99 = vector.extract_strided_slice %12 {offsets = [0, 15], sizes = [16, 1], strides = [1, 1]} : vector<16x128xf32> to vector<16x1xf32>
    %100 = vector.extract_strided_slice %63 {offsets = [0, 896], sizes = [16, 128], strides = [1, 1]} : vector<16x1024xf32> to vector<16x128xf32>
    %101 = vector.broadcast %99 : vector<16x1xf32> to vector<16x128xf32>
    %102 = arith.mulf %101, %100 : vector<16x128xf32>
    %103 = arith.addf %98, %102 : vector<16x128xf32>
    %c0_19 = arith.constant 0 : index
    %c2048 = arith.constant 2048 : index
    %104 = vector.load %arg6[%c0_19, %c2048] : memref<128x10240xbf16, #tpu.memory_space<vmem>>, vector<128x1024xbf16>
    %cst_20 = arith.constant dense<0.000000e+00> : vector<16x1024xf32>
    %105 = tpu.matmul %11, %104, %cst_20 {dimension_numbers = #tpu.dot_dimension_numbers<[1], [0], [0], [1], [0, 0, 1, 1], [], []>} : vector<16x128xbf16>, vector<128x1024xbf16>, vector<16x1024xf32> -> vector<16x1024xf32>
    %c0_21 = arith.constant 0 : index
    %c2048_22 = arith.constant 2048 : index
    %106 = vector.load %arg7[%c0_21, %c2048_22] : memref<1x10240xf32, #tpu.memory_space<vmem>>, vector<1x1024xf32>
    %107 = vector.broadcast %106 : vector<1x1024xf32> to vector<16x1024xf32>
    %108 = arith.addf %105, %107 : vector<16x1024xf32>
    %109 = vector.extract_strided_slice %12 {offsets = [0, 16], sizes = [16, 1], strides = [1, 1]} : vector<16x128xf32> to vector<16x1xf32>
    %110 = vector.extract_strided_slice %108 {offsets = [0, 0], sizes = [16, 128], strides = [1, 1]} : vector<16x1024xf32> to vector<16x128xf32>
    %111 = vector.broadcast %109 : vector<16x1xf32> to vector<16x128xf32>
    %112 = arith.mulf %111, %110 : vector<16x128xf32>
    %113 = arith.addf %103, %112 : vector<16x128xf32>
    %114 = vector.extract_strided_slice %12 {offsets = [0, 17], sizes = [16, 1], strides = [1, 1]} : vector<16x128xf32> to vector<16x1xf32>
    %115 = vector.extract_strided_slice %108 {offsets = [0, 128], sizes = [16, 128], strides = [1, 1]} : vector<16x1024xf32> to vector<16x128xf32>
    %116 = vector.broadcast %114 : vector<16x1xf32> to vector<16x128xf32>
    %117 = arith.mulf %116, %115 : vector<16x128xf32>
    %118 = arith.addf %113, %117 : vector<16x128xf32>
    %119 = vector.extract_strided_slice %12 {offsets = [0, 18], sizes = [16, 1], strides = [1, 1]} : vector<16x128xf32> to vector<16x1xf32>
    %120 = vector.extract_strided_slice %108 {offsets = [0, 256], sizes = [16, 128], strides = [1, 1]} : vector<16x1024xf32> to vector<16x128xf32>
    %121 = vector.broadcast %119 : vector<16x1xf32> to vector<16x128xf32>
    %122 = arith.mulf %121, %120 : vector<16x128xf32>
    %123 = arith.addf %118, %122 : vector<16x128xf32>
    %124 = vector.extract_strided_slice %12 {offsets = [0, 19], sizes = [16, 1], strides = [1, 1]} : vector<16x128xf32> to vector<16x1xf32>
    %125 = vector.extract_strided_slice %108 {offsets = [0, 384], sizes = [16, 128], strides = [1, 1]} : vector<16x1024xf32> to vector<16x128xf32>
    %126 = vector.broadcast %124 : vector<16x1xf32> to vector<16x128xf32>
    %127 = arith.mulf %126, %125 : vector<16x128xf32>
    %128 = arith.addf %123, %127 : vector<16x128xf32>
    %129 = vector.extract_strided_slice %12 {offsets = [0, 20], sizes = [16, 1], strides = [1, 1]} : vector<16x128xf32> to vector<16x1xf32>
    %130 = vector.extract_strided_slice %108 {offsets = [0, 512], sizes = [16, 128], strides = [1, 1]} : vector<16x1024xf32> to vector<16x128xf32>
    %131 = vector.broadcast %129 : vector<16x1xf32> to vector<16x128xf32>
    %132 = arith.mulf %131, %130 : vector<16x128xf32>
    %133 = arith.addf %128, %132 : vector<16x128xf32>
    %134 = vector.extract_strided_slice %12 {offsets = [0, 21], sizes = [16, 1], strides = [1, 1]} : vector<16x128xf32> to vector<16x1xf32>
    %135 = vector.extract_strided_slice %108 {offsets = [0, 640], sizes = [16, 128], strides = [1, 1]} : vector<16x1024xf32> to vector<16x128xf32>
    %136 = vector.broadcast %134 : vector<16x1xf32> to vector<16x128xf32>
    %137 = arith.mulf %136, %135 : vector<16x128xf32>
    %138 = arith.addf %133, %137 : vector<16x128xf32>
    %139 = vector.extract_strided_slice %12 {offsets = [0, 22], sizes = [16, 1], strides = [1, 1]} : vector<16x128xf32> to vector<16x1xf32>
    %140 = vector.extract_strided_slice %108 {offsets = [0, 768], sizes = [16, 128], strides = [1, 1]} : vector<16x1024xf32> to vector<16x128xf32>
    %141 = vector.broadcast %139 : vector<16x1xf32> to vector<16x128xf32>
    %142 = arith.mulf %141, %140 : vector<16x128xf32>
    %143 = arith.addf %138, %142 : vector<16x128xf32>
    %144 = vector.extract_strided_slice %12 {offsets = [0, 23], sizes = [16, 1], strides = [1, 1]} : vector<16x128xf32> to vector<16x1xf32>
    %145 = vector.extract_strided_slice %108 {offsets = [0, 896], sizes = [16, 128], strides = [1, 1]} : vector<16x1024xf32> to vector<16x128xf32>
    %146 = vector.broadcast %144 : vector<16x1xf32> to vector<16x128xf32>
    %147 = arith.mulf %146, %145 : vector<16x128xf32>
    %148 = arith.addf %143, %147 : vector<16x128xf32>
    %c0_23 = arith.constant 0 : index
    %c3072 = arith.constant 3072 : index
    %149 = vector.load %arg6[%c0_23, %c3072] : memref<128x10240xbf16, #tpu.memory_space<vmem>>, vector<128x1024xbf16>
    %cst_24 = arith.constant dense<0.000000e+00> : vector<16x1024xf32>
    %150 = tpu.matmul %11, %149, %cst_24 {dimension_numbers = #tpu.dot_dimension_numbers<[1], [0], [0], [1], [0, 0, 1, 1], [], []>} : vector<16x128xbf16>, vector<128x1024xbf16>, vector<16x1024xf32> -> vector<16x1024xf32>
    %c0_25 = arith.constant 0 : index
    %c3072_26 = arith.constant 3072 : index
    %151 = vector.load %arg7[%c0_25, %c3072_26] : memref<1x10240xf32, #tpu.memory_space<vmem>>, vector<1x1024xf32>
    %152 = vector.broadcast %151 : vector<1x1024xf32> to vector<16x1024xf32>
    %153 = arith.addf %150, %152 : vector<16x1024xf32>
    %154 = vector.extract_strided_slice %12 {offsets = [0, 24], sizes = [16, 1], strides = [1, 1]} : vector<16x128xf32> to vector<16x1xf32>
    %155 = vector.extract_strided_slice %153 {offsets = [0, 0], sizes = [16, 128], strides = [1, 1]} : vector<16x1024xf32> to vector<16x128xf32>
    %156 = vector.broadcast %154 : vector<16x1xf32> to vector<16x128xf32>
    %157 = arith.mulf %156, %155 : vector<16x128xf32>
    %158 = arith.addf %148, %157 : vector<16x128xf32>
    %159 = vector.extract_strided_slice %12 {offsets = [0, 25], sizes = [16, 1], strides = [1, 1]} : vector<16x128xf32> to vector<16x1xf32>
    %160 = vector.extract_strided_slice %153 {offsets = [0, 128], sizes = [16, 128], strides = [1, 1]} : vector<16x1024xf32> to vector<16x128xf32>
    %161 = vector.broadcast %159 : vector<16x1xf32> to vector<16x128xf32>
    %162 = arith.mulf %161, %160 : vector<16x128xf32>
    %163 = arith.addf %158, %162 : vector<16x128xf32>
    %164 = vector.extract_strided_slice %12 {offsets = [0, 26], sizes = [16, 1], strides = [1, 1]} : vector<16x128xf32> to vector<16x1xf32>
    %165 = vector.extract_strided_slice %153 {offsets = [0, 256], sizes = [16, 128], strides = [1, 1]} : vector<16x1024xf32> to vector<16x128xf32>
    %166 = vector.broadcast %164 : vector<16x1xf32> to vector<16x128xf32>
    %167 = arith.mulf %166, %165 : vector<16x128xf32>
    %168 = arith.addf %163, %167 : vector<16x128xf32>
    %169 = vector.extract_strided_slice %12 {offsets = [0, 27], sizes = [16, 1], strides = [1, 1]} : vector<16x128xf32> to vector<16x1xf32>
    %170 = vector.extract_strided_slice %153 {offsets = [0, 384], sizes = [16, 128], strides = [1, 1]} : vector<16x1024xf32> to vector<16x128xf32>
    %171 = vector.broadcast %169 : vector<16x1xf32> to vector<16x128xf32>
    %172 = arith.mulf %171, %170 : vector<16x128xf32>
    %173 = arith.addf %168, %172 : vector<16x128xf32>
    %174 = vector.extract_strided_slice %12 {offsets = [0, 28], sizes = [16, 1], strides = [1, 1]} : vector<16x128xf32> to vector<16x1xf32>
    %175 = vector.extract_strided_slice %153 {offsets = [0, 512], sizes = [16, 128], strides = [1, 1]} : vector<16x1024xf32> to vector<16x128xf32>
    %176 = vector.broadcast %174 : vector<16x1xf32> to vector<16x128xf32>
    %177 = arith.mulf %176, %175 : vector<16x128xf32>
    %178 = arith.addf %173, %177 : vector<16x128xf32>
    %179 = vector.extract_strided_slice %12 {offsets = [0, 29], sizes = [16, 1], strides = [1, 1]} : vector<16x128xf32> to vector<16x1xf32>
    %180 = vector.extract_strided_slice %153 {offsets = [0, 640], sizes = [16, 128], strides = [1, 1]} : vector<16x1024xf32> to vector<16x128xf32>
    %181 = vector.broadcast %179 : vector<16x1xf32> to vector<16x128xf32>
    %182 = arith.mulf %181, %180 : vector<16x128xf32>
    %183 = arith.addf %178, %182 : vector<16x128xf32>
    %184 = vector.extract_strided_slice %12 {offsets = [0, 30], sizes = [16, 1], strides = [1, 1]} : vector<16x128xf32> to vector<16x1xf32>
    %185 = vector.extract_strided_slice %153 {offsets = [0, 768], sizes = [16, 128], strides = [1, 1]} : vector<16x1024xf32> to vector<16x128xf32>
    %186 = vector.broadcast %184 : vector<16x1xf32> to vector<16x128xf32>
    %187 = arith.mulf %186, %185 : vector<16x128xf32>
    %188 = arith.addf %183, %187 : vector<16x128xf32>
    %189 = vector.extract_strided_slice %12 {offsets = [0, 31], sizes = [16, 1], strides = [1, 1]} : vector<16x128xf32> to vector<16x1xf32>
    %190 = vector.extract_strided_slice %153 {offsets = [0, 896], sizes = [16, 128], strides = [1, 1]} : vector<16x1024xf32> to vector<16x128xf32>
    %191 = vector.broadcast %189 : vector<16x1xf32> to vector<16x128xf32>
    %192 = arith.mulf %191, %190 : vector<16x128xf32>
    %193 = arith.addf %188, %192 : vector<16x128xf32>
    %c0_27 = arith.constant 0 : index
    %c4096 = arith.constant 4096 : index
    %194 = vector.load %arg6[%c0_27, %c4096] : memref<128x10240xbf16, #tpu.memory_space<vmem>>, vector<128x1024xbf16>
    %cst_28 = arith.constant dense<0.000000e+00> : vector<16x1024xf32>
    %195 = tpu.matmul %11, %194, %cst_28 {dimension_numbers = #tpu.dot_dimension_numbers<[1], [0], [0], [1], [0, 0, 1, 1], [], []>} : vector<16x128xbf16>, vector<128x1024xbf16>, vector<16x1024xf32> -> vector<16x1024xf32>
    %c0_29 = arith.constant 0 : index
    %c4096_30 = arith.constant 4096 : index
    %196 = vector.load %arg7[%c0_29, %c4096_30] : memref<1x10240xf32, #tpu.memory_space<vmem>>, vector<1x1024xf32>
    %197 = vector.broadcast %196 : vector<1x1024xf32> to vector<16x1024xf32>
    %198 = arith.addf %195, %197 : vector<16x1024xf32>
    %199 = vector.extract_strided_slice %12 {offsets = [0, 32], sizes = [16, 1], strides = [1, 1]} : vector<16x128xf32> to vector<16x1xf32>
    %200 = vector.extract_strided_slice %198 {offsets = [0, 0], sizes = [16, 128], strides = [1, 1]} : vector<16x1024xf32> to vector<16x128xf32>
    %201 = vector.broadcast %199 : vector<16x1xf32> to vector<16x128xf32>
    %202 = arith.mulf %201, %200 : vector<16x128xf32>
    %203 = arith.addf %193, %202 : vector<16x128xf32>
    %204 = vector.extract_strided_slice %12 {offsets = [0, 33], sizes = [16, 1], strides = [1, 1]} : vector<16x128xf32> to vector<16x1xf32>
    %205 = vector.extract_strided_slice %198 {offsets = [0, 128], sizes = [16, 128], strides = [1, 1]} : vector<16x1024xf32> to vector<16x128xf32>
    %206 = vector.broadcast %204 : vector<16x1xf32> to vector<16x128xf32>
    %207 = arith.mulf %206, %205 : vector<16x128xf32>
    %208 = arith.addf %203, %207 : vector<16x128xf32>
    %209 = vector.extract_strided_slice %12 {offsets = [0, 34], sizes = [16, 1], strides = [1, 1]} : vector<16x128xf32> to vector<16x1xf32>
    %210 = vector.extract_strided_slice %198 {offsets = [0, 256], sizes = [16, 128], strides = [1, 1]} : vector<16x1024xf32> to vector<16x128xf32>
    %211 = vector.broadcast %209 : vector<16x1xf32> to vector<16x128xf32>
    %212 = arith.mulf %211, %210 : vector<16x128xf32>
    %213 = arith.addf %208, %212 : vector<16x128xf32>
    %214 = vector.extract_strided_slice %12 {offsets = [0, 35], sizes = [16, 1], strides = [1, 1]} : vector<16x128xf32> to vector<16x1xf32>
    %215 = vector.extract_strided_slice %198 {offsets = [0, 384], sizes = [16, 128], strides = [1, 1]} : vector<16x1024xf32> to vector<16x128xf32>
    %216 = vector.broadcast %214 : vector<16x1xf32> to vector<16x128xf32>
    %217 = arith.mulf %216, %215 : vector<16x128xf32>
    %218 = arith.addf %213, %217 : vector<16x128xf32>
    %219 = vector.extract_strided_slice %12 {offsets = [0, 36], sizes = [16, 1], strides = [1, 1]} : vector<16x128xf32> to vector<16x1xf32>
    %220 = vector.extract_strided_slice %198 {offsets = [0, 512], sizes = [16, 128], strides = [1, 1]} : vector<16x1024xf32> to vector<16x128xf32>
    %221 = vector.broadcast %219 : vector<16x1xf32> to vector<16x128xf32>
    %222 = arith.mulf %221, %220 : vector<16x128xf32>
    %223 = arith.addf %218, %222 : vector<16x128xf32>
    %224 = vector.extract_strided_slice %12 {offsets = [0, 37], sizes = [16, 1], strides = [1, 1]} : vector<16x128xf32> to vector<16x1xf32>
    %225 = vector.extract_strided_slice %198 {offsets = [0, 640], sizes = [16, 128], strides = [1, 1]} : vector<16x1024xf32> to vector<16x128xf32>
    %226 = vector.broadcast %224 : vector<16x1xf32> to vector<16x128xf32>
    %227 = arith.mulf %226, %225 : vector<16x128xf32>
    %228 = arith.addf %223, %227 : vector<16x128xf32>
    %229 = vector.extract_strided_slice %12 {offsets = [0, 38], sizes = [16, 1], strides = [1, 1]} : vector<16x128xf32> to vector<16x1xf32>
    %230 = vector.extract_strided_slice %198 {offsets = [0, 768], sizes = [16, 128], strides = [1, 1]} : vector<16x1024xf32> to vector<16x128xf32>
    %231 = vector.broadcast %229 : vector<16x1xf32> to vector<16x128xf32>
    %232 = arith.mulf %231, %230 : vector<16x128xf32>
    %233 = arith.addf %228, %232 : vector<16x128xf32>
    %234 = vector.extract_strided_slice %12 {offsets = [0, 39], sizes = [16, 1], strides = [1, 1]} : vector<16x128xf32> to vector<16x1xf32>
    %235 = vector.extract_strided_slice %198 {offsets = [0, 896], sizes = [16, 128], strides = [1, 1]} : vector<16x1024xf32> to vector<16x128xf32>
    %236 = vector.broadcast %234 : vector<16x1xf32> to vector<16x128xf32>
    %237 = arith.mulf %236, %235 : vector<16x128xf32>
    %238 = arith.addf %233, %237 : vector<16x128xf32>
    %c0_31 = arith.constant 0 : index
    %c5120 = arith.constant 5120 : index
    %239 = vector.load %arg6[%c0_31, %c5120] : memref<128x10240xbf16, #tpu.memory_space<vmem>>, vector<128x1024xbf16>
    %cst_32 = arith.constant dense<0.000000e+00> : vector<16x1024xf32>
    %240 = tpu.matmul %11, %239, %cst_32 {dimension_numbers = #tpu.dot_dimension_numbers<[1], [0], [0], [1], [0, 0, 1, 1], [], []>} : vector<16x128xbf16>, vector<128x1024xbf16>, vector<16x1024xf32> -> vector<16x1024xf32>
    %c0_33 = arith.constant 0 : index
    %c5120_34 = arith.constant 5120 : index
    %241 = vector.load %arg7[%c0_33, %c5120_34] : memref<1x10240xf32, #tpu.memory_space<vmem>>, vector<1x1024xf32>
    %242 = vector.broadcast %241 : vector<1x1024xf32> to vector<16x1024xf32>
    %243 = arith.addf %240, %242 : vector<16x1024xf32>
    %244 = vector.extract_strided_slice %12 {offsets = [0, 40], sizes = [16, 1], strides = [1, 1]} : vector<16x128xf32> to vector<16x1xf32>
    %245 = vector.extract_strided_slice %243 {offsets = [0, 0], sizes = [16, 128], strides = [1, 1]} : vector<16x1024xf32> to vector<16x128xf32>
    %246 = vector.broadcast %244 : vector<16x1xf32> to vector<16x128xf32>
    %247 = arith.mulf %246, %245 : vector<16x128xf32>
    %248 = arith.addf %238, %247 : vector<16x128xf32>
    %249 = vector.extract_strided_slice %12 {offsets = [0, 41], sizes = [16, 1], strides = [1, 1]} : vector<16x128xf32> to vector<16x1xf32>
    %250 = vector.extract_strided_slice %243 {offsets = [0, 128], sizes = [16, 128], strides = [1, 1]} : vector<16x1024xf32> to vector<16x128xf32>
    %251 = vector.broadcast %249 : vector<16x1xf32> to vector<16x128xf32>
    %252 = arith.mulf %251, %250 : vector<16x128xf32>
    %253 = arith.addf %248, %252 : vector<16x128xf32>
    %254 = vector.extract_strided_slice %12 {offsets = [0, 42], sizes = [16, 1], strides = [1, 1]} : vector<16x128xf32> to vector<16x1xf32>
    %255 = vector.extract_strided_slice %243 {offsets = [0, 256], sizes = [16, 128], strides = [1, 1]} : vector<16x1024xf32> to vector<16x128xf32>
    %256 = vector.broadcast %254 : vector<16x1xf32> to vector<16x128xf32>
    %257 = arith.mulf %256, %255 : vector<16x128xf32>
    %258 = arith.addf %253, %257 : vector<16x128xf32>
    %259 = vector.extract_strided_slice %12 {offsets = [0, 43], sizes = [16, 1], strides = [1, 1]} : vector<16x128xf32> to vector<16x1xf32>
    %260 = vector.extract_strided_slice %243 {offsets = [0, 384], sizes = [16, 128], strides = [1, 1]} : vector<16x1024xf32> to vector<16x128xf32>
    %261 = vector.broadcast %259 : vector<16x1xf32> to vector<16x128xf32>
    %262 = arith.mulf %261, %260 : vector<16x128xf32>
    %263 = arith.addf %258, %262 : vector<16x128xf32>
    %264 = vector.extract_strided_slice %12 {offsets = [0, 44], sizes = [16, 1], strides = [1, 1]} : vector<16x128xf32> to vector<16x1xf32>
    %265 = vector.extract_strided_slice %243 {offsets = [0, 512], sizes = [16, 128], strides = [1, 1]} : vector<16x1024xf32> to vector<16x128xf32>
    %266 = vector.broadcast %264 : vector<16x1xf32> to vector<16x128xf32>
    %267 = arith.mulf %266, %265 : vector<16x128xf32>
    %268 = arith.addf %263, %267 : vector<16x128xf32>
    %269 = vector.extract_strided_slice %12 {offsets = [0, 45], sizes = [16, 1], strides = [1, 1]} : vector<16x128xf32> to vector<16x1xf32>
    %270 = vector.extract_strided_slice %243 {offsets = [0, 640], sizes = [16, 128], strides = [1, 1]} : vector<16x1024xf32> to vector<16x128xf32>
    %271 = vector.broadcast %269 : vector<16x1xf32> to vector<16x128xf32>
    %272 = arith.mulf %271, %270 : vector<16x128xf32>
    %273 = arith.addf %268, %272 : vector<16x128xf32>
    %274 = vector.extract_strided_slice %12 {offsets = [0, 46], sizes = [16, 1], strides = [1, 1]} : vector<16x128xf32> to vector<16x1xf32>
    %275 = vector.extract_strided_slice %243 {offsets = [0, 768], sizes = [16, 128], strides = [1, 1]} : vector<16x1024xf32> to vector<16x128xf32>
    %276 = vector.broadcast %274 : vector<16x1xf32> to vector<16x128xf32>
    %277 = arith.mulf %276, %275 : vector<16x128xf32>
    %278 = arith.addf %273, %277 : vector<16x128xf32>
    %279 = vector.extract_strided_slice %12 {offsets = [0, 47], sizes = [16, 1], strides = [1, 1]} : vector<16x128xf32> to vector<16x1xf32>
    %280 = vector.extract_strided_slice %243 {offsets = [0, 896], sizes = [16, 128], strides = [1, 1]} : vector<16x1024xf32> to vector<16x128xf32>
    %281 = vector.broadcast %279 : vector<16x1xf32> to vector<16x128xf32>
    %282 = arith.mulf %281, %280 : vector<16x128xf32>
    %283 = arith.addf %278, %282 : vector<16x128xf32>
    %c0_35 = arith.constant 0 : index
    %c6144 = arith.constant 6144 : index
    %284 = vector.load %arg6[%c0_35, %c6144] : memref<128x10240xbf16, #tpu.memory_space<vmem>>, vector<128x1024xbf16>
    %cst_36 = arith.constant dense<0.000000e+00> : vector<16x1024xf32>
    %285 = tpu.matmul %11, %284, %cst_36 {dimension_numbers = #tpu.dot_dimension_numbers<[1], [0], [0], [1], [0, 0, 1, 1], [], []>} : vector<16x128xbf16>, vector<128x1024xbf16>, vector<16x1024xf32> -> vector<16x1024xf32>
    %c0_37 = arith.constant 0 : index
    %c6144_38 = arith.constant 6144 : index
    %286 = vector.load %arg7[%c0_37, %c6144_38] : memref<1x10240xf32, #tpu.memory_space<vmem>>, vector<1x1024xf32>
    %287 = vector.broadcast %286 : vector<1x1024xf32> to vector<16x1024xf32>
    %288 = arith.addf %285, %287 : vector<16x1024xf32>
    %289 = vector.extract_strided_slice %12 {offsets = [0, 48], sizes = [16, 1], strides = [1, 1]} : vector<16x128xf32> to vector<16x1xf32>
    %290 = vector.extract_strided_slice %288 {offsets = [0, 0], sizes = [16, 128], strides = [1, 1]} : vector<16x1024xf32> to vector<16x128xf32>
    %291 = vector.broadcast %289 : vector<16x1xf32> to vector<16x128xf32>
    %292 = arith.mulf %291, %290 : vector<16x128xf32>
    %293 = arith.addf %283, %292 : vector<16x128xf32>
    %294 = vector.extract_strided_slice %12 {offsets = [0, 49], sizes = [16, 1], strides = [1, 1]} : vector<16x128xf32> to vector<16x1xf32>
    %295 = vector.extract_strided_slice %288 {offsets = [0, 128], sizes = [16, 128], strides = [1, 1]} : vector<16x1024xf32> to vector<16x128xf32>
    %296 = vector.broadcast %294 : vector<16x1xf32> to vector<16x128xf32>
    %297 = arith.mulf %296, %295 : vector<16x128xf32>
    %298 = arith.addf %293, %297 : vector<16x128xf32>
    %299 = vector.extract_strided_slice %12 {offsets = [0, 50], sizes = [16, 1], strides = [1, 1]} : vector<16x128xf32> to vector<16x1xf32>
    %300 = vector.extract_strided_slice %288 {offsets = [0, 256], sizes = [16, 128], strides = [1, 1]} : vector<16x1024xf32> to vector<16x128xf32>
    %301 = vector.broadcast %299 : vector<16x1xf32> to vector<16x128xf32>
    %302 = arith.mulf %301, %300 : vector<16x128xf32>
    %303 = arith.addf %298, %302 : vector<16x128xf32>
    %304 = vector.extract_strided_slice %12 {offsets = [0, 51], sizes = [16, 1], strides = [1, 1]} : vector<16x128xf32> to vector<16x1xf32>
    %305 = vector.extract_strided_slice %288 {offsets = [0, 384], sizes = [16, 128], strides = [1, 1]} : vector<16x1024xf32> to vector<16x128xf32>
    %306 = vector.broadcast %304 : vector<16x1xf32> to vector<16x128xf32>
    %307 = arith.mulf %306, %305 : vector<16x128xf32>
    %308 = arith.addf %303, %307 : vector<16x128xf32>
    %309 = vector.extract_strided_slice %12 {offsets = [0, 52], sizes = [16, 1], strides = [1, 1]} : vector<16x128xf32> to vector<16x1xf32>
    %310 = vector.extract_strided_slice %288 {offsets = [0, 512], sizes = [16, 128], strides = [1, 1]} : vector<16x1024xf32> to vector<16x128xf32>
    %311 = vector.broadcast %309 : vector<16x1xf32> to vector<16x128xf32>
    %312 = arith.mulf %311, %310 : vector<16x128xf32>
    %313 = arith.addf %308, %312 : vector<16x128xf32>
    %314 = vector.extract_strided_slice %12 {offsets = [0, 53], sizes = [16, 1], strides = [1, 1]} : vector<16x128xf32> to vector<16x1xf32>
    %315 = vector.extract_strided_slice %288 {offsets = [0, 640], sizes = [16, 128], strides = [1, 1]} : vector<16x1024xf32> to vector<16x128xf32>
    %316 = vector.broadcast %314 : vector<16x1xf32> to vector<16x128xf32>
    %317 = arith.mulf %316, %315 : vector<16x128xf32>
    %318 = arith.addf %313, %317 : vector<16x128xf32>
    %319 = vector.extract_strided_slice %12 {offsets = [0, 54], sizes = [16, 1], strides = [1, 1]} : vector<16x128xf32> to vector<16x1xf32>
    %320 = vector.extract_strided_slice %288 {offsets = [0, 768], sizes = [16, 128], strides = [1, 1]} : vector<16x1024xf32> to vector<16x128xf32>
    %321 = vector.broadcast %319 : vector<16x1xf32> to vector<16x128xf32>
    %322 = arith.mulf %321, %320 : vector<16x128xf32>
    %323 = arith.addf %318, %322 : vector<16x128xf32>
    %324 = vector.extract_strided_slice %12 {offsets = [0, 55], sizes = [16, 1], strides = [1, 1]} : vector<16x128xf32> to vector<16x1xf32>
    %325 = vector.extract_strided_slice %288 {offsets = [0, 896], sizes = [16, 128], strides = [1, 1]} : vector<16x1024xf32> to vector<16x128xf32>
    %326 = vector.broadcast %324 : vector<16x1xf32> to vector<16x128xf32>
    %327 = arith.mulf %326, %325 : vector<16x128xf32>
    %328 = arith.addf %323, %327 : vector<16x128xf32>
    %c0_39 = arith.constant 0 : index
    %c7168 = arith.constant 7168 : index
    %329 = vector.load %arg6[%c0_39, %c7168] : memref<128x10240xbf16, #tpu.memory_space<vmem>>, vector<128x1024xbf16>
    %cst_40 = arith.constant dense<0.000000e+00> : vector<16x1024xf32>
    %330 = tpu.matmul %11, %329, %cst_40 {dimension_numbers = #tpu.dot_dimension_numbers<[1], [0], [0], [1], [0, 0, 1, 1], [], []>} : vector<16x128xbf16>, vector<128x1024xbf16>, vector<16x1024xf32> -> vector<16x1024xf32>
    %c0_41 = arith.constant 0 : index
    %c7168_42 = arith.constant 7168 : index
    %331 = vector.load %arg7[%c0_41, %c7168_42] : memref<1x10240xf32, #tpu.memory_space<vmem>>, vector<1x1024xf32>
    %332 = vector.broadcast %331 : vector<1x1024xf32> to vector<16x1024xf32>
    %333 = arith.addf %330, %332 : vector<16x1024xf32>
    %334 = vector.extract_strided_slice %12 {offsets = [0, 56], sizes = [16, 1], strides = [1, 1]} : vector<16x128xf32> to vector<16x1xf32>
    %335 = vector.extract_strided_slice %333 {offsets = [0, 0], sizes = [16, 128], strides = [1, 1]} : vector<16x1024xf32> to vector<16x128xf32>
    %336 = vector.broadcast %334 : vector<16x1xf32> to vector<16x128xf32>
    %337 = arith.mulf %336, %335 : vector<16x128xf32>
    %338 = arith.addf %328, %337 : vector<16x128xf32>
    %339 = vector.extract_strided_slice %12 {offsets = [0, 57], sizes = [16, 1], strides = [1, 1]} : vector<16x128xf32> to vector<16x1xf32>
    %340 = vector.extract_strided_slice %333 {offsets = [0, 128], sizes = [16, 128], strides = [1, 1]} : vector<16x1024xf32> to vector<16x128xf32>
    %341 = vector.broadcast %339 : vector<16x1xf32> to vector<16x128xf32>
    %342 = arith.mulf %341, %340 : vector<16x128xf32>
    %343 = arith.addf %338, %342 : vector<16x128xf32>
    %344 = vector.extract_strided_slice %12 {offsets = [0, 58], sizes = [16, 1], strides = [1, 1]} : vector<16x128xf32> to vector<16x1xf32>
    %345 = vector.extract_strided_slice %333 {offsets = [0, 256], sizes = [16, 128], strides = [1, 1]} : vector<16x1024xf32> to vector<16x128xf32>
    %346 = vector.broadcast %344 : vector<16x1xf32> to vector<16x128xf32>
    %347 = arith.mulf %346, %345 : vector<16x128xf32>
    %348 = arith.addf %343, %347 : vector<16x128xf32>
    %349 = vector.extract_strided_slice %12 {offsets = [0, 59], sizes = [16, 1], strides = [1, 1]} : vector<16x128xf32> to vector<16x1xf32>
    %350 = vector.extract_strided_slice %333 {offsets = [0, 384], sizes = [16, 128], strides = [1, 1]} : vector<16x1024xf32> to vector<16x128xf32>
    %351 = vector.broadcast %349 : vector<16x1xf32> to vector<16x128xf32>
    %352 = arith.mulf %351, %350 : vector<16x128xf32>
    %353 = arith.addf %348, %352 : vector<16x128xf32>
    %354 = vector.extract_strided_slice %12 {offsets = [0, 60], sizes = [16, 1], strides = [1, 1]} : vector<16x128xf32> to vector<16x1xf32>
    %355 = vector.extract_strided_slice %333 {offsets = [0, 512], sizes = [16, 128], strides = [1, 1]} : vector<16x1024xf32> to vector<16x128xf32>
    %356 = vector.broadcast %354 : vector<16x1xf32> to vector<16x128xf32>
    %357 = arith.mulf %356, %355 : vector<16x128xf32>
    %358 = arith.addf %353, %357 : vector<16x128xf32>
    %359 = vector.extract_strided_slice %12 {offsets = [0, 61], sizes = [16, 1], strides = [1, 1]} : vector<16x128xf32> to vector<16x1xf32>
    %360 = vector.extract_strided_slice %333 {offsets = [0, 640], sizes = [16, 128], strides = [1, 1]} : vector<16x1024xf32> to vector<16x128xf32>
    %361 = vector.broadcast %359 : vector<16x1xf32> to vector<16x128xf32>
    %362 = arith.mulf %361, %360 : vector<16x128xf32>
    %363 = arith.addf %358, %362 : vector<16x128xf32>
    %364 = vector.extract_strided_slice %12 {offsets = [0, 62], sizes = [16, 1], strides = [1, 1]} : vector<16x128xf32> to vector<16x1xf32>
    %365 = vector.extract_strided_slice %333 {offsets = [0, 768], sizes = [16, 128], strides = [1, 1]} : vector<16x1024xf32> to vector<16x128xf32>
    %366 = vector.broadcast %364 : vector<16x1xf32> to vector<16x128xf32>
    %367 = arith.mulf %366, %365 : vector<16x128xf32>
    %368 = arith.addf %363, %367 : vector<16x128xf32>
    %369 = vector.extract_strided_slice %12 {offsets = [0, 63], sizes = [16, 1], strides = [1, 1]} : vector<16x128xf32> to vector<16x1xf32>
    %370 = vector.extract_strided_slice %333 {offsets = [0, 896], sizes = [16, 128], strides = [1, 1]} : vector<16x1024xf32> to vector<16x128xf32>
    %371 = vector.broadcast %369 : vector<16x1xf32> to vector<16x128xf32>
    %372 = arith.mulf %371, %370 : vector<16x128xf32>
    %373 = arith.addf %368, %372 : vector<16x128xf32>
    %c0_43 = arith.constant 0 : index
    %c8192 = arith.constant 8192 : index
    %374 = vector.load %arg6[%c0_43, %c8192] : memref<128x10240xbf16, #tpu.memory_space<vmem>>, vector<128x1024xbf16>
    %cst_44 = arith.constant dense<0.000000e+00> : vector<16x1024xf32>
    %375 = tpu.matmul %11, %374, %cst_44 {dimension_numbers = #tpu.dot_dimension_numbers<[1], [0], [0], [1], [0, 0, 1, 1], [], []>} : vector<16x128xbf16>, vector<128x1024xbf16>, vector<16x1024xf32> -> vector<16x1024xf32>
    %c0_45 = arith.constant 0 : index
    %c8192_46 = arith.constant 8192 : index
    %376 = vector.load %arg7[%c0_45, %c8192_46] : memref<1x10240xf32, #tpu.memory_space<vmem>>, vector<1x1024xf32>
    %377 = vector.broadcast %376 : vector<1x1024xf32> to vector<16x1024xf32>
    %378 = arith.addf %375, %377 : vector<16x1024xf32>
    %379 = vector.extract_strided_slice %12 {offsets = [0, 64], sizes = [16, 1], strides = [1, 1]} : vector<16x128xf32> to vector<16x1xf32>
    %380 = vector.extract_strided_slice %378 {offsets = [0, 0], sizes = [16, 128], strides = [1, 1]} : vector<16x1024xf32> to vector<16x128xf32>
    %381 = vector.broadcast %379 : vector<16x1xf32> to vector<16x128xf32>
    %382 = arith.mulf %381, %380 : vector<16x128xf32>
    %383 = arith.addf %373, %382 : vector<16x128xf32>
    %384 = vector.extract_strided_slice %12 {offsets = [0, 65], sizes = [16, 1], strides = [1, 1]} : vector<16x128xf32> to vector<16x1xf32>
    %385 = vector.extract_strided_slice %378 {offsets = [0, 128], sizes = [16, 128], strides = [1, 1]} : vector<16x1024xf32> to vector<16x128xf32>
    %386 = vector.broadcast %384 : vector<16x1xf32> to vector<16x128xf32>
    %387 = arith.mulf %386, %385 : vector<16x128xf32>
    %388 = arith.addf %383, %387 : vector<16x128xf32>
    %389 = vector.extract_strided_slice %12 {offsets = [0, 66], sizes = [16, 1], strides = [1, 1]} : vector<16x128xf32> to vector<16x1xf32>
    %390 = vector.extract_strided_slice %378 {offsets = [0, 256], sizes = [16, 128], strides = [1, 1]} : vector<16x1024xf32> to vector<16x128xf32>
    %391 = vector.broadcast %389 : vector<16x1xf32> to vector<16x128xf32>
    %392 = arith.mulf %391, %390 : vector<16x128xf32>
    %393 = arith.addf %388, %392 : vector<16x128xf32>
    %394 = vector.extract_strided_slice %12 {offsets = [0, 67], sizes = [16, 1], strides = [1, 1]} : vector<16x128xf32> to vector<16x1xf32>
    %395 = vector.extract_strided_slice %378 {offsets = [0, 384], sizes = [16, 128], strides = [1, 1]} : vector<16x1024xf32> to vector<16x128xf32>
    %396 = vector.broadcast %394 : vector<16x1xf32> to vector<16x128xf32>
    %397 = arith.mulf %396, %395 : vector<16x128xf32>
    %398 = arith.addf %393, %397 : vector<16x128xf32>
    %399 = vector.extract_strided_slice %12 {offsets = [0, 68], sizes = [16, 1], strides = [1, 1]} : vector<16x128xf32> to vector<16x1xf32>
    %400 = vector.extract_strided_slice %378 {offsets = [0, 512], sizes = [16, 128], strides = [1, 1]} : vector<16x1024xf32> to vector<16x128xf32>
    %401 = vector.broadcast %399 : vector<16x1xf32> to vector<16x128xf32>
    %402 = arith.mulf %401, %400 : vector<16x128xf32>
    %403 = arith.addf %398, %402 : vector<16x128xf32>
    %404 = vector.extract_strided_slice %12 {offsets = [0, 69], sizes = [16, 1], strides = [1, 1]} : vector<16x128xf32> to vector<16x1xf32>
    %405 = vector.extract_strided_slice %378 {offsets = [0, 640], sizes = [16, 128], strides = [1, 1]} : vector<16x1024xf32> to vector<16x128xf32>
    %406 = vector.broadcast %404 : vector<16x1xf32> to vector<16x128xf32>
    %407 = arith.mulf %406, %405 : vector<16x128xf32>
    %408 = arith.addf %403, %407 : vector<16x128xf32>
    %409 = vector.extract_strided_slice %12 {offsets = [0, 70], sizes = [16, 1], strides = [1, 1]} : vector<16x128xf32> to vector<16x1xf32>
    %410 = vector.extract_strided_slice %378 {offsets = [0, 768], sizes = [16, 128], strides = [1, 1]} : vector<16x1024xf32> to vector<16x128xf32>
    %411 = vector.broadcast %409 : vector<16x1xf32> to vector<16x128xf32>
    %412 = arith.mulf %411, %410 : vector<16x128xf32>
    %413 = arith.addf %408, %412 : vector<16x128xf32>
    %414 = vector.extract_strided_slice %12 {offsets = [0, 71], sizes = [16, 1], strides = [1, 1]} : vector<16x128xf32> to vector<16x1xf32>
    %415 = vector.extract_strided_slice %378 {offsets = [0, 896], sizes = [16, 128], strides = [1, 1]} : vector<16x1024xf32> to vector<16x128xf32>
    %416 = vector.broadcast %414 : vector<16x1xf32> to vector<16x128xf32>
    %417 = arith.mulf %416, %415 : vector<16x128xf32>
    %418 = arith.addf %413, %417 : vector<16x128xf32>
    %c0_47 = arith.constant 0 : index
    %c9216 = arith.constant 9216 : index
    %419 = vector.load %arg6[%c0_47, %c9216] : memref<128x10240xbf16, #tpu.memory_space<vmem>>, vector<128x1024xbf16>
    %cst_48 = arith.constant dense<0.000000e+00> : vector<16x1024xf32>
    %420 = tpu.matmul %11, %419, %cst_48 {dimension_numbers = #tpu.dot_dimension_numbers<[1], [0], [0], [1], [0, 0, 1, 1], [], []>} : vector<16x128xbf16>, vector<128x1024xbf16>, vector<16x1024xf32> -> vector<16x1024xf32>
    %c0_49 = arith.constant 0 : index
    %c9216_50 = arith.constant 9216 : index
    %421 = vector.load %arg7[%c0_49, %c9216_50] : memref<1x10240xf32, #tpu.memory_space<vmem>>, vector<1x1024xf32>
    %422 = vector.broadcast %421 : vector<1x1024xf32> to vector<16x1024xf32>
    %423 = arith.addf %420, %422 : vector<16x1024xf32>
    %424 = vector.extract_strided_slice %12 {offsets = [0, 72], sizes = [16, 1], strides = [1, 1]} : vector<16x128xf32> to vector<16x1xf32>
    %425 = vector.extract_strided_slice %423 {offsets = [0, 0], sizes = [16, 128], strides = [1, 1]} : vector<16x1024xf32> to vector<16x128xf32>
    %426 = vector.broadcast %424 : vector<16x1xf32> to vector<16x128xf32>
    %427 = arith.mulf %426, %425 : vector<16x128xf32>
    %428 = arith.addf %418, %427 : vector<16x128xf32>
    %c16_i32 = arith.constant 16 : i32
    %429 = arith.muli %arg0, %c16_i32 : i32
    %c0_i32_51 = arith.constant 0 : i32
    %430 = arith.addi %429, %c0_i32_51 : i32
    %431 = arith.index_cast %430 : i32 to index
    %432 = memref.load %arg1[%431] : memref<32xi32, #tpu.memory_space<smem>>
    %433 = arith.index_cast %432 : i32 to index
    %c0_52 = arith.constant 0 : index
    %434 = vector.load %arg15[%433, %c0_52] : memref<16x128xf32, #tpu.memory_space<vmem>>, vector<1x128xf32>
    %435 = vector.extract_strided_slice %428 {offsets = [0, 0], sizes = [1, 128], strides = [1, 1]} : vector<16x128xf32> to vector<1x128xf32>
    %436 = arith.addf %434, %435 : vector<1x128xf32>
    %437 = arith.index_cast %432 : i32 to index
    %c0_53 = arith.constant 0 : index
    %438 = vector.load %arg15[%437, %c0_53] : memref<16x128xf32, #tpu.memory_space<vmem>>, vector<1x128xf32>
    tpu.vector_store %arg15[%437, %c0_53], %436 {strides = array<i32>} : memref<16x128xf32, #tpu.memory_space<vmem>>, vector<1x128xf32>,
    %c1_i32 = arith.constant 1 : i32
    %439 = arith.addi %429, %c1_i32 : i32
    %440 = arith.index_cast %439 : i32 to index
    %441 = memref.load %arg1[%440] : memref<32xi32, #tpu.memory_space<smem>>
    %442 = arith.index_cast %441 : i32 to index
    %c0_54 = arith.constant 0 : index
    %443 = vector.load %arg15[%442, %c0_54] : memref<16x128xf32, #tpu.memory_space<vmem>>, vector<1x128xf32>
    %444 = vector.extract_strided_slice %428 {offsets = [1, 0], sizes = [1, 128], strides = [1, 1]} : vector<16x128xf32> to vector<1x128xf32>
    %445 = arith.addf %443, %444 : vector<1x128xf32>
    %446 = arith.index_cast %441 : i32 to index
    %c0_55 = arith.constant 0 : index
    %447 = vector.load %arg15[%446, %c0_55] : memref<16x128xf32, #tpu.memory_space<vmem>>, vector<1x128xf32>
    tpu.vector_store %arg15[%446, %c0_55], %445 {strides = array<i32>} : memref<16x128xf32, #tpu.memory_space<vmem>>, vector<1x128xf32>,
    %c2_i32 = arith.constant 2 : i32
    %448 = arith.addi %429, %c2_i32 : i32
    %449 = arith.index_cast %448 : i32 to index
    %450 = memref.load %arg1[%449] : memref<32xi32, #tpu.memory_space<smem>>
    %451 = arith.index_cast %450 : i32 to index
    %c0_56 = arith.constant 0 : index
    %452 = vector.load %arg15[%451, %c0_56] : memref<16x128xf32, #tpu.memory_space<vmem>>, vector<1x128xf32>
    %453 = vector.extract_strided_slice %428 {offsets = [2, 0], sizes = [1, 128], strides = [1, 1]} : vector<16x128xf32> to vector<1x128xf32>
    %454 = arith.addf %452, %453 : vector<1x128xf32>
    %455 = arith.index_cast %450 : i32 to index
    %c0_57 = arith.constant 0 : index
    %456 = vector.load %arg15[%455, %c0_57] : memref<16x128xf32, #tpu.memory_space<vmem>>, vector<1x128xf32>
    tpu.vector_store %arg15[%455, %c0_57], %454 {strides = array<i32>} : memref<16x128xf32, #tpu.memory_space<vmem>>, vector<1x128xf32>,
    %c3_i32 = arith.constant 3 : i32
    %457 = arith.addi %429, %c3_i32 : i32
    %458 = arith.index_cast %457 : i32 to index
    %459 = memref.load %arg1[%458] : memref<32xi32, #tpu.memory_space<smem>>
    %460 = arith.index_cast %459 : i32 to index
    %c0_58 = arith.constant 0 : index
    %461 = vector.load %arg15[%460, %c0_58] : memref<16x128xf32, #tpu.memory_space<vmem>>, vector<1x128xf32>
    %462 = vector.extract_strided_slice %428 {offsets = [3, 0], sizes = [1, 128], strides = [1, 1]} : vector<16x128xf32> to vector<1x128xf32>
    %463 = arith.addf %461, %462 : vector<1x128xf32>
    %464 = arith.index_cast %459 : i32 to index
    %c0_59 = arith.constant 0 : index
    %465 = vector.load %arg15[%464, %c0_59] : memref<16x128xf32, #tpu.memory_space<vmem>>, vector<1x128xf32>
    tpu.vector_store %arg15[%464, %c0_59], %463 {strides = array<i32>} : memref<16x128xf32, #tpu.memory_space<vmem>>, vector<1x128xf32>,
    %c4_i32 = arith.constant 4 : i32
    %466 = arith.addi %429, %c4_i32 : i32
    %467 = arith.index_cast %466 : i32 to index
    %468 = memref.load %arg1[%467] : memref<32xi32, #tpu.memory_space<smem>>
    %469 = arith.index_cast %468 : i32 to index
    %c0_60 = arith.constant 0 : index
    %470 = vector.load %arg15[%469, %c0_60] : memref<16x128xf32, #tpu.memory_space<vmem>>, vector<1x128xf32>
    %471 = vector.extract_strided_slice %428 {offsets = [4, 0], sizes = [1, 128], strides = [1, 1]} : vector<16x128xf32> to vector<1x128xf32>
    %472 = arith.addf %470, %471 : vector<1x128xf32>
    %473 = arith.index_cast %468 : i32 to index
    %c0_61 = arith.constant 0 : index
    %474 = vector.load %arg15[%473, %c0_61] : memref<16x128xf32, #tpu.memory_space<vmem>>, vector<1x128xf32>
    tpu.vector_store %arg15[%473, %c0_61], %472 {strides = array<i32>} : memref<16x128xf32, #tpu.memory_space<vmem>>, vector<1x128xf32>,
    %c5_i32 = arith.constant 5 : i32
    %475 = arith.addi %429, %c5_i32 : i32
    %476 = arith.index_cast %475 : i32 to index
    %477 = memref.load %arg1[%476] : memref<32xi32, #tpu.memory_space<smem>>
    %478 = arith.index_cast %477 : i32 to index
    %c0_62 = arith.constant 0 : index
    %479 = vector.load %arg15[%478, %c0_62] : memref<16x128xf32, #tpu.memory_space<vmem>>, vector<1x128xf32>
    %480 = vector.extract_strided_slice %428 {offsets = [5, 0], sizes = [1, 128], strides = [1, 1]} : vector<16x128xf32> to vector<1x128xf32>
    %481 = arith.addf %479, %480 : vector<1x128xf32>
    %482 = arith.index_cast %477 : i32 to index
    %c0_63 = arith.constant 0 : index
    %483 = vector.load %arg15[%482, %c0_63] : memref<16x128xf32, #tpu.memory_space<vmem>>, vector<1x128xf32>
    tpu.vector_store %arg15[%482, %c0_63], %481 {strides = array<i32>} : memref<16x128xf32, #tpu.memory_space<vmem>>, vector<1x128xf32>,
    %c6_i32 = arith.constant 6 : i32
    %484 = arith.addi %429, %c6_i32 : i32
    %485 = arith.index_cast %484 : i32 to index
    %486 = memref.load %arg1[%485] : memref<32xi32, #tpu.memory_space<smem>>
    %487 = arith.index_cast %486 : i32 to index
    %c0_64 = arith.constant 0 : index
    %488 = vector.load %arg15[%487, %c0_64] : memref<16x128xf32, #tpu.memory_space<vmem>>, vector<1x128xf32>
    %489 = vector.extract_strided_slice %428 {offsets = [6, 0], sizes = [1, 128], strides = [1, 1]} : vector<16x128xf32> to vector<1x128xf32>
    %490 = arith.addf %488, %489 : vector<1x128xf32>
    %491 = arith.index_cast %486 : i32 to index
    %c0_65 = arith.constant 0 : index
    %492 = vector.load %arg15[%491, %c0_65] : memref<16x128xf32, #tpu.memory_space<vmem>>, vector<1x128xf32>
    tpu.vector_store %arg15[%491, %c0_65], %490 {strides = array<i32>} : memref<16x128xf32, #tpu.memory_space<vmem>>, vector<1x128xf32>,
    %c7_i32 = arith.constant 7 : i32
    %493 = arith.addi %429, %c7_i32 : i32
    %494 = arith.index_cast %493 : i32 to index
    %495 = memref.load %arg1[%494] : memref<32xi32, #tpu.memory_space<smem>>
    %496 = arith.index_cast %495 : i32 to index
    %c0_66 = arith.constant 0 : index
    %497 = vector.load %arg15[%496, %c0_66] : memref<16x128xf32, #tpu.memory_space<vmem>>, vector<1x128xf32>
    %498 = vector.extract_strided_slice %428 {offsets = [7, 0], sizes = [1, 128], strides = [1, 1]} : vector<16x128xf32> to vector<1x128xf32>
    %499 = arith.addf %497, %498 : vector<1x128xf32>
    %500 = arith.index_cast %495 : i32 to index
    %c0_67 = arith.constant 0 : index
    %501 = vector.load %arg15[%500, %c0_67] : memref<16x128xf32, #tpu.memory_space<vmem>>, vector<1x128xf32>
    tpu.vector_store %arg15[%500, %c0_67], %499 {strides = array<i32>} : memref<16x128xf32, #tpu.memory_space<vmem>>, vector<1x128xf32>,
    %c8_i32 = arith.constant 8 : i32
    %502 = arith.addi %429, %c8_i32 : i32
    %503 = arith.index_cast %502 : i32 to index
    %504 = memref.load %arg1[%503] : memref<32xi32, #tpu.memory_space<smem>>
    %505 = arith.index_cast %504 : i32 to index
    %c0_68 = arith.constant 0 : index
    %506 = vector.load %arg15[%505, %c0_68] : memref<16x128xf32, #tpu.memory_space<vmem>>, vector<1x128xf32>
    %507 = vector.extract_strided_slice %428 {offsets = [8, 0], sizes = [1, 128], strides = [1, 1]} : vector<16x128xf32> to vector<1x128xf32>
    %508 = arith.addf %506, %507 : vector<1x128xf32>
    %509 = arith.index_cast %504 : i32 to index
    %c0_69 = arith.constant 0 : index
    %510 = vector.load %arg15[%509, %c0_69] : memref<16x128xf32, #tpu.memory_space<vmem>>, vector<1x128xf32>
    tpu.vector_store %arg15[%509, %c0_69], %508 {strides = array<i32>} : memref<16x128xf32, #tpu.memory_space<vmem>>, vector<1x128xf32>,
    %c9_i32 = arith.constant 9 : i32
    %511 = arith.addi %429, %c9_i32 : i32
    %512 = arith.index_cast %511 : i32 to index
    %513 = memref.load %arg1[%512] : memref<32xi32, #tpu.memory_space<smem>>
    %514 = arith.index_cast %513 : i32 to index
    %c0_70 = arith.constant 0 : index
    %515 = vector.load %arg15[%514, %c0_70] : memref<16x128xf32, #tpu.memory_space<vmem>>, vector<1x128xf32>
    %516 = vector.extract_strided_slice %428 {offsets = [9, 0], sizes = [1, 128], strides = [1, 1]} : vector<16x128xf32> to vector<1x128xf32>
    %517 = arith.addf %515, %516 : vector<1x128xf32>
    %518 = arith.index_cast %513 : i32 to index
    %c0_71 = arith.constant 0 : index
    %519 = vector.load %arg15[%518, %c0_71] : memref<16x128xf32, #tpu.memory_space<vmem>>, vector<1x128xf32>
    tpu.vector_store %arg15[%518, %c0_71], %517 {strides = array<i32>} : memref<16x128xf32, #tpu.memory_space<vmem>>, vector<1x128xf32>,
    %c10_i32 = arith.constant 10 : i32
    %520 = arith.addi %429, %c10_i32 : i32
    %521 = arith.index_cast %520 : i32 to index
    %522 = memref.load %arg1[%521] : memref<32xi32, #tpu.memory_space<smem>>
    %523 = arith.index_cast %522 : i32 to index
    %c0_72 = arith.constant 0 : index
    %524 = vector.load %arg15[%523, %c0_72] : memref<16x128xf32, #tpu.memory_space<vmem>>, vector<1x128xf32>
    %525 = vector.extract_strided_slice %428 {offsets = [10, 0], sizes = [1, 128], strides = [1, 1]} : vector<16x128xf32> to vector<1x128xf32>
    %526 = arith.addf %524, %525 : vector<1x128xf32>
    %527 = arith.index_cast %522 : i32 to index
    %c0_73 = arith.constant 0 : index
    %528 = vector.load %arg15[%527, %c0_73] : memref<16x128xf32, #tpu.memory_space<vmem>>, vector<1x128xf32>
    tpu.vector_store %arg15[%527, %c0_73], %526 {strides = array<i32>} : memref<16x128xf32, #tpu.memory_space<vmem>>, vector<1x128xf32>,
    %c11_i32 = arith.constant 11 : i32
    %529 = arith.addi %429, %c11_i32 : i32
    %530 = arith.index_cast %529 : i32 to index
    %531 = memref.load %arg1[%530] : memref<32xi32, #tpu.memory_space<smem>>
    %532 = arith.index_cast %531 : i32 to index
    %c0_74 = arith.constant 0 : index
    %533 = vector.load %arg15[%532, %c0_74] : memref<16x128xf32, #tpu.memory_space<vmem>>, vector<1x128xf32>
    %534 = vector.extract_strided_slice %428 {offsets = [11, 0], sizes = [1, 128], strides = [1, 1]} : vector<16x128xf32> to vector<1x128xf32>
    %535 = arith.addf %533, %534 : vector<1x128xf32>
    %536 = arith.index_cast %531 : i32 to index
    %c0_75 = arith.constant 0 : index
    %537 = vector.load %arg15[%536, %c0_75] : memref<16x128xf32, #tpu.memory_space<vmem>>, vector<1x128xf32>
    tpu.vector_store %arg15[%536, %c0_75], %535 {strides = array<i32>} : memref<16x128xf32, #tpu.memory_space<vmem>>, vector<1x128xf32>,
    %c12_i32 = arith.constant 12 : i32
    %538 = arith.addi %429, %c12_i32 : i32
    %539 = arith.index_cast %538 : i32 to index
    %540 = memref.load %arg1[%539] : memref<32xi32, #tpu.memory_space<smem>>
    %541 = arith.index_cast %540 : i32 to index
    %c0_76 = arith.constant 0 : index
    %542 = vector.load %arg15[%541, %c0_76] : memref<16x128xf32, #tpu.memory_space<vmem>>, vector<1x128xf32>
    %543 = vector.extract_strided_slice %428 {offsets = [12, 0], sizes = [1, 128], strides = [1, 1]} : vector<16x128xf32> to vector<1x128xf32>
    %544 = arith.addf %542, %543 : vector<1x128xf32>
    %545 = arith.index_cast %540 : i32 to index
    %c0_77 = arith.constant 0 : index
    %546 = vector.load %arg15[%545, %c0_77] : memref<16x128xf32, #tpu.memory_space<vmem>>, vector<1x128xf32>
    tpu.vector_store %arg15[%545, %c0_77], %544 {strides = array<i32>} : memref<16x128xf32, #tpu.memory_space<vmem>>, vector<1x128xf32>,
    %c13_i32 = arith.constant 13 : i32
    %547 = arith.addi %429, %c13_i32 : i32
    %548 = arith.index_cast %547 : i32 to index
    %549 = memref.load %arg1[%548] : memref<32xi32, #tpu.memory_space<smem>>
    %550 = arith.index_cast %549 : i32 to index
    %c0_78 = arith.constant 0 : index
    %551 = vector.load %arg15[%550, %c0_78] : memref<16x128xf32, #tpu.memory_space<vmem>>, vector<1x128xf32>
    %552 = vector.extract_strided_slice %428 {offsets = [13, 0], sizes = [1, 128], strides = [1, 1]} : vector<16x128xf32> to vector<1x128xf32>
    %553 = arith.addf %551, %552 : vector<1x128xf32>
    %554 = arith.index_cast %549 : i32 to index
    %c0_79 = arith.constant 0 : index
    %555 = vector.load %arg15[%554, %c0_79] : memref<16x128xf32, #tpu.memory_space<vmem>>, vector<1x128xf32>
    tpu.vector_store %arg15[%554, %c0_79], %553 {strides = array<i32>} : memref<16x128xf32, #tpu.memory_space<vmem>>, vector<1x128xf32>,
    %c14_i32 = arith.constant 14 : i32
    %556 = arith.addi %429, %c14_i32 : i32
    %557 = arith.index_cast %556 : i32 to index
    %558 = memref.load %arg1[%557] : memref<32xi32, #tpu.memory_space<smem>>
    %559 = arith.index_cast %558 : i32 to index
    %c0_80 = arith.constant 0 : index
    %560 = vector.load %arg15[%559, %c0_80] : memref<16x128xf32, #tpu.memory_space<vmem>>, vector<1x128xf32>
    %561 = vector.extract_strided_slice %428 {offsets = [14, 0], sizes = [1, 128], strides = [1, 1]} : vector<16x128xf32> to vector<1x128xf32>
    %562 = arith.addf %560, %561 : vector<1x128xf32>
    %563 = arith.index_cast %558 : i32 to index
    %c0_81 = arith.constant 0 : index
    %564 = vector.load %arg15[%563, %c0_81] : memref<16x128xf32, #tpu.memory_space<vmem>>, vector<1x128xf32>
    tpu.vector_store %arg15[%563, %c0_81], %562 {strides = array<i32>} : memref<16x128xf32, #tpu.memory_space<vmem>>, vector<1x128xf32>,
    %c15_i32 = arith.constant 15 : i32
    %565 = arith.addi %429, %c15_i32 : i32
    %566 = arith.index_cast %565 : i32 to index
    %567 = memref.load %arg1[%566] : memref<32xi32, #tpu.memory_space<smem>>
    %568 = arith.index_cast %567 : i32 to index
    %c0_82 = arith.constant 0 : index
    %569 = vector.load %arg15[%568, %c0_82] : memref<16x128xf32, #tpu.memory_space<vmem>>, vector<1x128xf32>
    %570 = vector.extract_strided_slice %428 {offsets = [15, 0], sizes = [1, 128], strides = [1, 1]} : vector<16x128xf32> to vector<1x128xf32>
    %571 = arith.addf %569, %570 : vector<1x128xf32>
    %572 = arith.index_cast %567 : i32 to index
    %c0_83 = arith.constant 0 : index
    %573 = vector.load %arg15[%572, %c0_83] : memref<16x128xf32, #tpu.memory_space<vmem>>, vector<1x128xf32>
    tpu.vector_store %arg15[%572, %c0_83], %571 {strides = array<i32>} : memref<16x128xf32, #tpu.memory_space<vmem>>, vector<1x128xf32>,
    %c1_i32_84 = arith.constant 1 : i32
    %574 = arith.cmpi eq, %arg0, %c1_i32_84 : i32
    %575 = arith.extui %574 : i1 to i32
    %c0_i32_85 = arith.constant 0 : i32
    %576 = arith.cmpi ne, %575, %c0_i32_85 : i32
    scf.if %576 {
      %c0_86 = arith.constant 0 : index
      %c0_87 = arith.constant 0 : index
      %577 = vector.load %arg15[%c0_86, %c0_87] : memref<16x128xf32, #tpu.memory_space<vmem>>, vector<16x128xf32>
      %c0_88 = arith.constant 0 : index
      %c0_89 = arith.constant 0 : index
      %578 = vector.load %arg8[%c0_88, %c0_89] : memref<1x128xf32, #tpu.memory_space<vmem>>, vector<1x128xf32>
      %579 = vector.broadcast %578 : vector<1x128xf32> to vector<16x128xf32>
      %580 = arith.addf %577, %579 : vector<16x128xf32>
      %cst_90 = arith.constant 0.000000e+00 : f32
      %581 = vector.broadcast %cst_90 : f32 to vector<16x128xf32>
      %582 = arith.maximumf %580, %581 : vector<16x128xf32>
      %c0_91 = arith.constant 0 : index
      %c0_92 = arith.constant 0 : index
      %583 = vector.load %arg9[%c0_91, %c0_92] : memref<16x128xf32, #tpu.memory_space<vmem>>, vector<16x128xf32>
      %c0_93 = arith.constant 0 : index
      %c0_94 = arith.constant 0 : index
      %584 = vector.load %arg10[%c0_93, %c0_94] : memref<128x384xf32, #tpu.memory_space<vmem>>, vector<128x384xf32>
      %cst_95 = arith.constant dense<0.000000e+00> : vector<16x384xf32>
      %585 = tpu.matmul %582, %584, %cst_95 {dimension_numbers = #tpu.dot_dimension_numbers<[1], [0], [0], [1], [0, 0, 1, 1], [], []>} : vector<16x128xf32>, vector<128x384xf32>, vector<16x384xf32> -> vector<16x384xf32>
      %c0_96 = arith.constant 0 : index
      %c0_97 = arith.constant 0 : index
      %586 = vector.load %arg12[%c0_96, %c0_97] : memref<1x384xf32, #tpu.memory_space<vmem>>, vector<1x384xf32>
      %587 = vector.broadcast %586 : vector<1x384xf32> to vector<16x384xf32>
      %588 = arith.addf %585, %587 : vector<16x384xf32>
      %c0_98 = arith.constant 0 : index
      %c0_99 = arith.constant 0 : index
      %589 = vector.load %arg11[%c0_98, %c0_99] : memref<128x384xf32, #tpu.memory_space<vmem>>, vector<128x384xf32>
      %cst_100 = arith.constant dense<0.000000e+00> : vector<16x384xf32>
      %590 = tpu.matmul %583, %589, %cst_100 {dimension_numbers = #tpu.dot_dimension_numbers<[1], [0], [0], [1], [0, 0, 1, 1], [], []>} : vector<16x128xf32>, vector<128x384xf32>, vector<16x384xf32> -> vector<16x384xf32>
      %c0_101 = arith.constant 0 : index
      %c0_102 = arith.constant 0 : index
      %591 = vector.load %arg13[%c0_101, %c0_102] : memref<1x384xf32, #tpu.memory_space<vmem>>, vector<1x384xf32>
      %592 = vector.broadcast %591 : vector<1x384xf32> to vector<16x384xf32>
      %593 = arith.addf %590, %592 : vector<16x384xf32>
      %594 = vector.extract_strided_slice %588 {offsets = [0, 0], sizes = [16, 128], strides = [1, 1]} : vector<16x384xf32> to vector<16x128xf32>
      %595 = vector.extract_strided_slice %593 {offsets = [0, 0], sizes = [16, 128], strides = [1, 1]} : vector<16x384xf32> to vector<16x128xf32>
      %596 = arith.addf %594, %595 : vector<16x128xf32>
      %597 = arith.negf %596 : vector<16x128xf32>
      %598 = math.exp %597 : vector<16x128xf32>
      %cst_103 = arith.constant 1.000000e+00 : f32
      %599 = vector.broadcast %cst_103 : f32 to vector<16x128xf32>
      %600 = arith.addf %599, %598 : vector<16x128xf32>
      %601 = arith.divf %599, %600 : vector<16x128xf32>
      %602 = vector.extract_strided_slice %588 {offsets = [0, 128], sizes = [16, 128], strides = [1, 1]} : vector<16x384xf32> to vector<16x128xf32>
      %603 = vector.extract_strided_slice %593 {offsets = [0, 128], sizes = [16, 128], strides = [1, 1]} : vector<16x384xf32> to vector<16x128xf32>
      %604 = arith.addf %602, %603 : vector<16x128xf32>
      %605 = arith.negf %604 : vector<16x128xf32>
      %606 = math.exp %605 : vector<16x128xf32>
      %cst_104 = arith.constant 1.000000e+00 : f32
      %607 = vector.broadcast %cst_104 : f32 to vector<16x128xf32>
      %608 = arith.addf %607, %606 : vector<16x128xf32>
      %609 = arith.divf %607, %608 : vector<16x128xf32>
      %610 = vector.extract_strided_slice %588 {offsets = [0, 256], sizes = [16, 128], strides = [1, 1]} : vector<16x384xf32> to vector<16x128xf32>
      %611 = vector.extract_strided_slice %593 {offsets = [0, 256], sizes = [16, 128], strides = [1, 1]} : vector<16x384xf32> to vector<16x128xf32>
      %612 = arith.mulf %601, %611 : vector<16x128xf32>
      %613 = arith.addf %610, %612 : vector<16x128xf32>
      %614 = math.tanh %613 : vector<16x128xf32>
      %cst_105 = arith.constant 1.000000e+00 : f32
      %615 = vector.broadcast %cst_105 : f32 to vector<16x128xf32>
      %616 = arith.subf %615, %609 : vector<16x128xf32>
      %617 = arith.mulf %616, %614 : vector<16x128xf32>
      %618 = arith.mulf %609, %583 : vector<16x128xf32>
      %619 = arith.addf %617, %618 : vector<16x128xf32>
      %c0_106 = arith.constant 0 : index
      %c0_107 = arith.constant 0 : index
      %620 = vector.load %arg14[%c0_106, %c0_107] : memref<16x128xf32, #tpu.memory_space<vmem>>, vector<16x128xf32>
      tpu.vector_store %arg14[%c0_106, %c0_107], %619 {strides = array<i32>} : memref<16x128xf32, #tpu.memory_space<vmem>>, vector<16x128xf32>,
    } else {
    }
    return
  }
  func.func @transform_0(%arg0: i32, %arg1: memref<32xi32, #tpu.memory_space<smem>>) -> (i32, i32) {
    %c0_i32 = arith.constant 0 : i32
    %c0_i32_0 = arith.constant 0 : i32
    return %arg0, %c0_i32 : i32, i32
  }
  func.func @transform_1(%arg0: i32, %arg1: memref<32xi32, #tpu.memory_space<smem>>) -> (i32, i32) {
    %c0_i32 = arith.constant 0 : i32
    %c0_i32_0 = arith.constant 0 : i32
    return %arg0, %c0_i32 : i32, i32
  }
  func.func @transform_2(%arg0: i32, %arg1: memref<32xi32, #tpu.memory_space<smem>>) -> (i32, i32) {
    %c0_i32 = arith.constant 0 : i32
    %c0_i32_0 = arith.constant 0 : i32
    %c0_i32_1 = arith.constant 0 : i32
    return %c0_i32, %c0_i32_0 : i32, i32
  }
  func.func @transform_3(%arg0: i32, %arg1: memref<32xi32, #tpu.memory_space<smem>>) -> (i32, i32) {
    %c0_i32 = arith.constant 0 : i32
    %c0_i32_0 = arith.constant 0 : i32
    %c0_i32_1 = arith.constant 0 : i32
    return %c0_i32, %c0_i32_0 : i32, i32
  }
  func.func @transform_4(%arg0: i32, %arg1: memref<32xi32, #tpu.memory_space<smem>>) -> (i32, i32) {
    %c0_i32 = arith.constant 0 : i32
    %c0_i32_0 = arith.constant 0 : i32
    %c0_i32_1 = arith.constant 0 : i32
    return %c0_i32, %c0_i32_0 : i32, i32
  }
  func.func @transform_5(%arg0: i32, %arg1: memref<32xi32, #tpu.memory_space<smem>>) -> (i32, i32) {
    %c0_i32 = arith.constant 0 : i32
    %c0_i32_0 = arith.constant 0 : i32
    %c0_i32_1 = arith.constant 0 : i32
    return %c0_i32, %c0_i32_0 : i32, i32
  }
  func.func @transform_6(%arg0: i32, %arg1: memref<32xi32, #tpu.memory_space<smem>>) -> (i32, i32) {
    %c0_i32 = arith.constant 0 : i32
    %c0_i32_0 = arith.constant 0 : i32
    %c0_i32_1 = arith.constant 0 : i32
    return %c0_i32, %c0_i32_0 : i32, i32
  }
  func.func @transform_7(%arg0: i32, %arg1: memref<32xi32, #tpu.memory_space<smem>>) -> (i32, i32) {
    %c0_i32 = arith.constant 0 : i32
    %c0_i32_0 = arith.constant 0 : i32
    %c0_i32_1 = arith.constant 0 : i32
    return %c0_i32, %c0_i32_0 : i32, i32
  }
  func.func @transform_8(%arg0: i32, %arg1: memref<32xi32, #tpu.memory_space<smem>>) -> (i32, i32) {
    %c0_i32 = arith.constant 0 : i32
    %c0_i32_0 = arith.constant 0 : i32
    %c0_i32_1 = arith.constant 0 : i32
    return %c0_i32, %c0_i32_0 : i32, i32
  }
  func.func @transform_9(%arg0: i32, %arg1: memref<32xi32, #tpu.memory_space<smem>>) -> (i32, i32) {
    %c0_i32 = arith.constant 0 : i32
    %c0_i32_0 = arith.constant 0 : i32
    %c0_i32_1 = arith.constant 0 : i32
    return %c0_i32, %c0_i32_0 : i32, i32
  }
  func.func @transform_10(%arg0: i32, %arg1: memref<32xi32, #tpu.memory_space<smem>>) -> (i32, i32) {
    %c0_i32 = arith.constant 0 : i32
    %c0_i32_0 = arith.constant 0 : i32
    %c0_i32_1 = arith.constant 0 : i32
    return %c0_i32, %c0_i32_0 : i32, i32
  }
  func.func @transform_11(%arg0: i32, %arg1: memref<32xi32, #tpu.memory_space<smem>>) -> (i32, i32) {
    %c0_i32 = arith.constant 0 : i32
    %c0_i32_0 = arith.constant 0 : i32
    %c0_i32_1 = arith.constant 0 : i32
    return %c0_i32, %c0_i32_0 : i32, i32
  }
  func.func @transform_12(%arg0: i32, %arg1: memref<32xi32, #tpu.memory_space<smem>>) -> (i32, i32) {
    %c0_i32 = arith.constant 0 : i32
    %c0_i32_0 = arith.constant 0 : i32
    %c0_i32_1 = arith.constant 0 : i32
    return %c0_i32, %c0_i32_0 : i32, i32
  }
}

</mosaic_0001>

<bundles_post_ra>
// kernel: tpu_custom_call.1
= control target key start
LH: loop header
LB: loop body
LE: loop exit
PB: predicated region body
PF: predicated region fallthrough
CT: control target
= control target key end

     0   :  { %s9417_s25 = smov [#allocation4]   ;;  %s11258_s0 = inlined_call_operand.hbm [shape: s32[32], index: 0, kind: input, shape index: {}]   ;;  %s11259_s1 = inlined_call_operand.vmem [shape: f32[32,8], index: 1, kind: input, shape index: {}]   ;;  %s11260_s2 = inlined_call_operand.hbm [shape: f32[32,128], index: 2, kind: input, shape index: {}]   ;;  %s11261_s3 = inlined_call_operand.hbm [shape: f32[8,128], index: 3, kind: input, shape index: {}]   ;;  %s11262_s4 = inlined_call_operand.hbm [shape: f32[1,128], index: 4, kind: input, shape index: {}]   ;;  %s11263_s5 = inlined_call_operand.hbm [shape: bf16[128,10240], index: 5, kind: input, shape index: {}]   ;;  %s11264_s6 = inlined_call_operand.hbm [shape: f32[1,10240], index: 6, kind: input, shape index: {}]   ;;  %s11265_s7 = inlined_call_operand.hbm [shape: f32[1,128], index: 7, kind: input, shape index: {}]   ;;  %s11266_s8 = inlined_call_operand.hbm [shape: f32[16,128], index: 8, kind: input, shape index: {}]   ;;  %s11267_s9 = inlined_call_operand.hbm [shape: f32[128,384], index: 9, kind: input, shape index: {}]   ;;  %s11268_s10 = inlined_call_operand.hbm [shape: f32[128,384], index: 10, kind: input, shape index: {}]   ;;  %s11269_s11 = inlined_call_operand.hbm [shape: f32[1,384], index: 11, kind: input, shape index: {}]   ;;  %s11270_s12 = inlined_call_operand.hbm [shape: f32[1,384], index: 12, kind: input, shape index: {}]   ;;  %s11271_s13 = inlined_call_operand.hbm [shape: f32[16,128], index: 13, kind: output, shape index: {}]  }
   0x1   :  { %11348 = sst [smem:[#allocation171_spill]] %s11261_s3 }
   0x2   :  { %11349 = sst [smem:[#allocation172_spill]] %s11262_s4 }
   0x3   :  { %19 = dma.hbm_to_smem %s11258_s0, 16, %s9417_s25, [#allocation3] }
   0x4   :  { %9371 = dma.done.wait [#allocation3], 16 }
   0x5   :  { %9372 = vsyncadd [#allocation3], 4294967280 }
   0x6   :  { %21 = sfence }
   0x7   :  { %22 = vsyncpa [#allocation6], 0 }
   0x8   :  { %24 = vsyncpa [#allocation6 + $0x1], 0 }
   0x9   :  { %25 = vsyncpa [#allocation9], 0 }
   0xa   :  { %26 = vsyncpa [#allocation12], 0 }
   0xb   :  { %27 = vsyncpa [#allocation15], 0 }
   0xc   :  { %28 = vsyncpa [#allocation18], 0 }
   0xd   :  { %29 = vsyncpa [#allocation21], 0 }
   0xe   :  { %30 = vsyncpa [#allocation7], 0  ;;  %s9586_s28 = smov 0   ;;  %s9588_s29 = smov 0  }
   0xf   :  { %s9590_s30 = smov 0   ;;  %s9592_s14 = smov 0  }
  0x10 LB: > { %s9418_s0 = smov [#allocation8]   ;;  %s9607_s16 = sadd.s32 4294967295, %s9415_s14   ;;  %s9415_s14 = sphi %s9592_s14, %s11706_s14   ;;  %s9411_s30 = sphi %s9590_s30, %s11705_s30   ;;  %s9407_s29 = sphi %s9588_s29, %s11704_s29   ;;  %s9403_s28 = sphi %s9586_s28, %s11703_s28  }
  0x11   : > { %s337_s15 = sshll.u32 %s9418_s0, 4  ;;  %p7895_p0 = scmp.ge.s32.totalorder %s9415_s14, 1  ;;  %s338_s15 = int_to_ptr.vmem [resolvable:$true] %s337_s15 }
  0x12   : > { %p11272_p1 = scmp.eq.s32.totalorder %s9607_s16, 0  ;;  %p324_p2 = scmp.lt.s32.totalorder %s9415_s14, 3 }
  0x13   : > { %s9419_s18 = smov [#allocation11]   ;;  %s9420_s21 = smov [#allocation14]  }
  0x14   : > { %p9613_p4 = pnand %p7895_p0, %p324_p2  ;;  %s358_s19 = sshll.u32 %s9419_s18, 4  ;;  %s9619_s19 = int_to_ptr.vmem [resolvable:$true] %s358_s19 }
  0x15   : > { %s383_s22 = sshll.u32 %s9420_s21, 4  ;;  %s9054_s24 = scalar_lea.vmem %s338_s15, 128  ;;  %s9627_s22 = int_to_ptr.vmem [resolvable:$true] %s383_s22 }
  0x16   : > { %s11350_s17 = scalar_select %p9613_p4, 1, 0 }
  0x17   : > { %p8692_p5 = pneg %p9613_p4  ;;  %p9055_p8 = scmp.ne.s32.totalorder %s338_s15, %s9054_s24 }
  0x18   : > { %p9062_p11 = scmp.lt.s32.totalorder %s338_s15, %s338_s15  ;;  %p9063_p12 = scmp.lt.s32.totalorder %s9054_s24, %s9054_s24 }
  0x19   : > { %p9623_p6 = pnand %p8692_p5, %p11272_p1 }
  0x1a   : > { %p9064_p13 = por %p9063_p12, %p9062_p11 }
  0x1b   : > { %p9631_p7 = pneg %p9623_p6 }
  0x1d   : > { %p9057_p9 = pnand %p9055_p8, %p9631_p7 }
  0x1f   : > { %p9058_p10 = pneg %p9057_p9 }
  0x21   : > { %p9065_p0 = pnand %p9064_p13, %p9058_p10 }
  0x23   : > { %9068 = shalt.err (!%p9065_p0)
}
  0x24   : > { %s11353_s3 = sld [smem:[#allocation171_spill]]  ;;  %s9080_s27 = scalar_lea.vmem %s9619_s19, 81920 }
  0x25   : > { %p9081_p2 = scmp.ne.s32.totalorder %s9619_s19, %s9080_s27  ;;  %p9088_p9 = scmp.lt.s32.totalorder %s9619_s19, %s9619_s19 }
  0x26   : > { %p9089_p11 = scmp.lt.s32.totalorder %s9080_s27, %s9080_s27 }
  0x27   : > { %p9083_p5 = pnand %p9081_p2, %p9631_p7 }
  0x28   : > { %p9090_p10 = por %p9089_p11, %p9088_p9 }
  0x29   : > { %p9084_p8 = pneg %p9083_p5 }
  0x2a   : > { %8695 = dma.hbm_to_vmem [thread:$0]  (!%p9623_p6), %s11353_s3, 128, %s338_s15, [#allocation9]  }
  0x2b   : > { %p9091_p12 = pnand %p9090_p10, %p9084_p8 }
  0x2d   : > { %9094 = shalt.err (!%p9091_p12)
}
  0x2e   : > { %s9421_s0 = smov 5120   ;;  %s9422_s15 = smov 320  }
  0x2f   : > { %8701 = dma.hbm_to_vmem [thread:$0]  (!%p9623_p6), %s11263_s5, 81920, %s9619_s19, [#allocation12], %s9421_s0, %s9421_s0, %s9422_s15  }
  0x30   : > { %s9106_s24 = scalar_lea.vmem %s9627_s22, 16  ;;  %s9113_s25 = scalar_lea.vmem %s9627_s22, 32 }
  0x31   : > { %p9107_p13 = scmp.ne.s32.totalorder %s9627_s22, %s9106_s24  ;;  %p9114_p5 = scmp.lt.s32.totalorder %s9627_s22, %s9627_s22 }
  0x32   : > { %p9115_p8 = scmp.lt.s32.totalorder %s9113_s25, %s9106_s24 }
  0x33   : > { %p9109_p0 = pnand %p9107_p13, %p9631_p7 }
  0x34   : > { %p9116_p9 = por %p9115_p8, %p9114_p5 }
  0x35   : > { %p9110_p2 = pneg %p9109_p0 }
  0x37   : > { %p9117_p11 = pnand %p9116_p9, %p9110_p2 }
  0x39   : > { %9120 = shalt.err (!%p9117_p11)
}
  0x3a   : > { %8707 = dma.hbm_to_vmem [thread:$0]  (!%p9623_p6), %s11265_s7, 16, %s9627_s22, [#allocation15]  }
  0x3b   : > { %s9423_s19 = smov [#allocation17]  }
  0x3c   : > { %s406_s0 = sshll.u32 %s9423_s19, 4  ;;  %s407_s0 = int_to_ptr.vmem [resolvable:$true] %s406_s0 }
  0x3d   : > { %s9132_s15 = scalar_lea.vmem %s407_s0, 6144  ;;  %p9140_p0 = scmp.lt.s32.totalorder %s407_s0, %s407_s0 }
  0x3e   : > { %p9133_p10 = scmp.ne.s32.totalorder %s407_s0, %s9132_s15  ;;  %p9141_p5 = scmp.lt.s32.totalorder %s9132_s15, %s9132_s15 }
  0x40   : > { %p9135_p12 = pnand %p9133_p10, %p9631_p7  ;;  %p9142_p2 = por %p9141_p5, %p9140_p0 }
  0x42   : > { %p9136_p13 = pneg %p9135_p12 }
  0x44   : > { %p9143_p8 = pnand %p9142_p2, %p9136_p13 }
  0x46   : > { %9146 = shalt.err (!%p9143_p8)
}
  0x47   : > { %s11274_s18 = smov 384   ;;  %s9425_s21 = smov 24  }
  0x48   : > { %8713 = dma.hbm_to_vmem [thread:$0]  (!%p9623_p6), %s11267_s9, 6144, %s407_s0, [#allocation18], %s11274_s18, %s11274_s18, %s9425_s21  }
  0x49   : > { %s9426_s25 = smov [#allocation20]   ;;  %s9427_s27 = smov [#allocation10]  }
  0x4a   : > { %s433_s26 = sshll.u32 %s9426_s25, 4  ;;  %s348_s19 = sshll.u32 %s9427_s27, 4  ;;  %s434_s26 = int_to_ptr.vmem [resolvable:$true] %s433_s26  ;;  %s349_s19 = int_to_ptr.vmem [resolvable:$true] %s348_s19 }
  0x4b   : > { %s9158_s15 = scalar_lea.vmem %s434_s26, 48  ;;  %s9165_s3 = scalar_lea.vmem %s434_s26, 64 }
  0x4c   : > { %p9159_p9 = scmp.ne.s32.totalorder %s434_s26, %s9158_s15  ;;  %p9166_p12 = scmp.lt.s32.totalorder %s434_s26, %s434_s26 }
  0x4d   : > { %p9167_p13 = scmp.lt.s32.totalorder %s9165_s3, %s9158_s15 }
  0x4e   : > { %p9161_p11 = pnand %p9159_p9, %p9631_p7 }
  0x4f   : > { %p9168_p0 = por %p9167_p13, %p9166_p12 }
  0x50   : > { %p9162_p10 = pneg %p9161_p11 }
  0x52   : > { %p9169_p5 = pnand %p9168_p0, %p9162_p10 }
  0x54   : > { %9172 = shalt.err (!%p9169_p5)
}
  0x55   : > { %8719 = dma.hbm_to_vmem [thread:$0]  (!%p9623_p6), %s11269_s11, 48, %s434_s26, [#allocation21]  }
  0x56   : > { %s9184_s24 = scalar_lea.vmem %s349_s19, 16  ;;  %s9191_s25 = scalar_lea.vmem %s349_s19, 32 }
  0x57   : > { %p9185_p2 = scmp.ne.s32.totalorder %s349_s19, %s9184_s24  ;;  %p9192_p9 = scmp.lt.s32.totalorder %s349_s19, %s349_s19 }
  0x58   : > { %p9193_p11 = scmp.lt.s32.totalorder %s9191_s25, %s9184_s24 }
  0x59   : > { %p9187_p8 = pnand %p9185_p2, %p9631_p7 }
  0x5a   : > { %p9194_p1 = por %p9193_p11, %p9192_p9 }
  0x5b   : > { %p9188_p3 = pneg %p9187_p8 }
  0x5d   : > { %p9195_p4 = pnand %p9194_p1, %p9188_p3 }
  0x5f   : > { %9198 = shalt.err (!%p9195_p4)
}
  0x60   : > { %s11354_s4 = sld [smem:[#allocation172_spill]]  ;;  %s9428_s15 = smov [#allocation13]  }
  0x61   : > { %s372_s26 = sshll.u32 %s9428_s15, 4  ;;  %s9429_s0 = smov [#allocation16]   ;;  %s373_s26 = int_to_ptr.vmem [resolvable:$true] %s372_s26 }
  0x62   : > { %s393_s22 = sshll.u32 %s9429_s0, 4  ;;  %s9210_s18 = scalar_lea.vmem %s373_s26, 1280  ;;  %s394_s22 = int_to_ptr.vmem [resolvable:$true] %s393_s22 }
  0x63   : > { %p9211_p10 = scmp.ne.s32.totalorder %s373_s26, %s9210_s18  ;;  %p9218_p1 = scmp.lt.s32.totalorder %s373_s26, %s373_s26 }
  0x64   : > { %p9219_p3 = scmp.lt.s32.totalorder %s9210_s18, %s9210_s18 }
  0x65   : > { %p9213_p12 = pnand %p9211_p10, %p9631_p7 }
  0x66   : > { %8698 = dma.hbm_to_vmem [thread:$0]  (!%p9623_p6), %s11354_s4, 16, %s349_s19, [#allocation9]  }
  0x67   : > { %p9214_p13 = pneg %p9213_p12  ;;  %p9220_p4 = por %p9219_p3, %p9218_p1 }
  0x69   : > { %p9221_p0 = pnand %p9220_p4, %p9214_p13 }
  0x6b   : > { %9224 = shalt.err (!%p9221_p0)
}
  0x6c   : > { %8704 = dma.hbm_to_vmem [thread:$0]  (!%p9623_p6), %s11264_s6, 1280, %s373_s26, [#allocation12]  }
  0x6d   : > { %s9236_s25 = scalar_lea.vmem %s394_s22, 256  ;;  %p9244_p9 = scmp.lt.s32.totalorder %s394_s22, %s394_s22 }
  0x6e   : > { %p9237_p5 = scmp.ne.s32.totalorder %s394_s22, %s9236_s25  ;;  %p9245_p11 = scmp.lt.s32.totalorder %s9236_s25, %s9236_s25 }
  0x70   : > { %p9239_p2 = pnand %p9237_p5, %p9631_p7  ;;  %p9246_p10 = por %p9245_p11, %p9244_p9 }
  0x72   : > { %p9240_p8 = pneg %p9239_p2 }
  0x74   : > { %p9247_p12 = pnand %p9246_p10, %p9240_p8 }
  0x76   : > { %9250 = shalt.err (!%p9247_p12)
}
  0x77   : > { %s11275_s18 = smov 128   ;;  %s11276_s3 = smov 8  }
  0x78   : > { %8710 = dma.hbm_to_vmem [thread:$0]  (!%p9623_p6), %s11266_s8, 256, %s394_s22, [#allocation15], %s11275_s18, %s11275_s18, %s11276_s3  }
  0x79   : > { %s9432_s26 = smov [#allocation19]   ;;  %s9433_s24 = smov [#allocation22]  }
  0x7a   : > { %s419_s0 = sshll.u32 %s9432_s26, 4  ;;  %s444_s19 = sshll.u32 %s9433_s24, 4  ;;  %s420_s0 = int_to_ptr.vmem [resolvable:$true] %s419_s0  ;;  %s445_s19 = int_to_ptr.vmem [resolvable:$true] %s444_s19 }
  0x7b   : > { %s9262_s25 = scalar_lea.vmem %s420_s0, 6144  ;;  %p9270_p4 = scmp.lt.s32.totalorder %s420_s0, %s420_s0 }
  0x7c   : > { %p9263_p13 = scmp.ne.s32.totalorder %s420_s0, %s9262_s25  ;;  %p9271_p0 = scmp.lt.s32.totalorder %s9262_s25, %s9262_s25 }
  0x7e   : > { %p9265_p1 = pnand %p9263_p13, %p9631_p7  ;;  %p9272_p5 = por %p9271_p0, %p9270_p4 }
  0x80   : > { %p9266_p3 = pneg %p9265_p1 }
  0x82   : > { %p9273_p2 = pnand %p9272_p5, %p9266_p3 }
  0x84   : > { %9276 = shalt.err (!%p9273_p2)
}
  0x85   : > { %s11355_s22 = smov 384   ;;  %s9288_s26 = scalar_lea.vmem %s445_s19, 48 }
  0x86   : > { %8716 = dma.hbm_to_vmem [thread:$0]  (!%p9623_p6), %s11268_s10, 6144, %s420_s0, [#allocation18], %s11355_s22, %s11355_s22, %s9425_s21  }
  0x87   : > { %p9289_p8 = scmp.ne.s32.totalorder %s445_s19, %s9288_s26  ;;  %s9295_s24 = scalar_lea.vmem %s445_s19, 64 }
  0x88   : > { %p9296_p10 = scmp.lt.s32.totalorder %s445_s19, %s445_s19  ;;  %p9297_p12 = scmp.lt.s32.totalorder %s9295_s24, %s9288_s26 }
  0x89   : > { %p9291_p9 = pnand %p9289_p8, %p9631_p7 }
  0x8a   : > { %p9298_p13 = por %p9297_p12, %p9296_p10 }
  0x8b   : > { %p9292_p11 = pneg %p9291_p9 }
  0x8d   : > { %p9299_p1 = pnand %p9298_p13, %p9292_p11 }
  0x8f   : > { %9302 = shalt.err (!%p9299_p1)
}
  0x90   : > { %8722 = dma.hbm_to_vmem [thread:$0]  (!%p9623_p6), %s11270_s12, 48, %s445_s19, [#allocation21]  }
  0x91   : > { %s9726_s23 = sadd.s32 1, %s9415_s14   ;;  %s69_s20 = sadd.s32 1, %s9411_s30 }
  0x92   : > { %s66_s21 = ssub.s32 %s9415_s14, %s9726_s23  ;;  %p76_p7 = scmp.ne.s32.totalorder %s9411_s30, %s9407_s29 }
  0x93   : > { %p67_p3 = scmp.eq.s32.totalorder %s66_s21, 0  ;;  %p77_p4 = scmp.eq.s32.totalorder %s9415_s14, 0 }
  0x94   : > { %p82_p0 = scmp.ne.s32.totalorder %s9407_s29, %s9403_s28  ;;  %p8737_p5 = scmp.lt.s32.totalorder %s9415_s14, 2 }
  0x95   : > { %s9738_s18 = scalar_select %p67_p3, %s9411_s30, %s69_s20  }
  0x96   : > { %p78_p2 = por %p77_p4, %p76_p7  ;;  %p11356_p8 = scmp.eq.s32.totalorder %s9607_s16, 0 }
  0x97   : > { %s464_s22 = sand.u32 1, %s9411_s30   ;;  %s8531_s19 = sshll.u32 %s9415_s14, 8 }
  0x98   : > { %p9742_p9 = por %p11356_p8, %p82_p0  ;;  %s7907_s27 = sshll.u32 %s464_s22, 4 }
  0x99   : > { %s9751_s24 = scalar_lea.hbm %s11260_s2, %s8531_s19  ;;  %s468_s28 = scalar_lea.vmem [#allocation5], %s7907_s27 }
  0x9a   : > { %s11357_s0 = scalar_select %p9742_p9, 1, 0 }
  0x9b   : > { %s475_s25 = sshll.u32 %s468_s28, 4  ;;  %p9753_p6 = pnand %p8737_p5, %p78_p2  ;;  %s9757_s25 = int_to_ptr.vmem [resolvable:$true] %s475_s25 }
  0x9c   : > { %s9759_s21 = scalar_lea.sflag [#allocation6], %s464_s22  ;;  %s9303_s14 = scalar_lea.hbm %s9751_s24, 256 }
  0x9d   : > { %p9304_p11 = scmp.ne.s32.totalorder %s9751_s24, %s9303_s14  ;;  %p9305_p10 = pneg %p9753_p6 }
  0x9e   : > { %s9308_s27 = scalar_lea.hbm %s11260_s2, 512  ;;  %p9309_p1 = scmp.lt.s32.totalorder %s9751_s24, %s11260_s2 }
  0x9f   : > { %p9306_p12 = pnand %p9305_p10, %p9304_p11  ;;  %p9310_p7 = scmp.lt.s32.totalorder %s9308_s27, %s9303_s14 }
  0xa1   : > { %p9307_p13 = pneg %p9306_p12  ;;  %p9311_p3 = por %p9310_p7, %p9309_p1 }
  0xa3   : > { %p9312_p4 = pnand %p9311_p3, %p9307_p13 }
  0xa5   : > { %9315 = shalt.err (!%p9312_p4)
}
  0xa6   : > { %s9316_s22 = scalar_lea.vmem %s9757_s25, 256  ;;  %s9434_s3 = smov [#allocation5]  }
  0xa7   : > { %p9317_p0 = scmp.ne.s32.totalorder %s9757_s25, %s9316_s22  ;;  %s9321_s4 = sshll.u32 %s9434_s3, 4  ;;  %s9322_s4 = int_to_ptr.vmem [resolvable:$false] %s9321_s4 }
  0xa8   : > { %s9323_s19 = scalar_lea.vmem %s9322_s4, 512  ;;  %p9324_p8 = scmp.lt.s32.totalorder %s9757_s25, %s9322_s4 }
  0xa9   : > { %p9319_p5 = pnand %p9317_p0, %p9305_p10  ;;  %p9325_p11 = scmp.lt.s32.totalorder %s9323_s19, %s9316_s22 }
  0xab   : > { %p9320_p2 = pneg %p9319_p5  ;;  %p9326_p12 = por %p9325_p11, %p9324_p8 }
  0xad   : > { %p9327_p9 = pnand %p9326_p12, %p9320_p2 }
  0xaf   : > { %9330 = shalt.err (!%p9327_p9)
}
  0xb0   : > { %s11359_s14 = smov 8   ;;  %s11360_s15 = smov 128  }
  0xb1   : > { %8726 = dma.hbm_to_vmem [thread:$0]  (!%p9753_p6), %s9751_s24, 256, %s9757_s25, %s9759_s21, %s11360_s15, %s11360_s15, %s11359_s14  }
  0xb2   : > { %p11361_p10 = scmp.ne.s32.totalorder %s11350_s17, 0 }
  0xb4   : > { %487 = sbr.rel (%p11361_p10) target bundleno = 1683 (0x693), region = 68 }
  0xb9   : > { %s489_s3 = sand.u32 1, %s9407_s29   ;;  %p11362_p9 = scmp.ne.s32.totalorder %s11357_s0, 0 }
  0xba   : > { %s7911_s4 = sshll.u32 %s489_s3, 4  ;;  %s490_s27 = scalar_lea.sflag [#allocation6], %s489_s3 }
  0xbb   : > { %s9786_s26 = scalar_lea.vmem [#allocation5], %s7911_s4 }
  0xbc   : > { %9374 = dma.done.wait (%p11362_p9), %s490_s27, 256  }
  0xbd   : > { %9376 = vsyncadd (%p11362_p9), %s490_s27, 4294967040  ;;  %p11363_p13 = scmp.eq.s32.totalorder %s9607_s16, 0 }
  0xbf   : > { %9378 = dma.done.wait (%p11363_p13), [#allocation9], 144   ;;  %p11364_p6 = pmov %p11363_p13 }
  0xc1   : > { %9380 = vsyncadd (%p11364_p6), [#allocation9], 4294967152  ;;  %p11365_p1 = pmov %p11364_p6 }
  0xc3   : > { %9382 = dma.done.wait (%p11365_p1), [#allocation12], 83200   ;;  %p11366_p7 = pmov %p11365_p1 }
  0xc4   : > { %p11367_p3 = pmov %p11365_p1 }
  0xc5   : > { %9384 = vsyncadd (%p11366_p7), [#allocation12], 4294884096 }
  0xc6   : > { %9386 = dma.done.wait (%p11367_p3), [#allocation15], 272   ;;  %p11368_p4 = pmov %p11365_p1 }
  0xc7   : > { %p11369_p0 = pmov %p11365_p1 }
  0xc8   : > { %9388 = vsyncadd (%p11368_p4), [#allocation15], 4294967024 }
  0xc9   : > { %9390 = dma.done.wait (%p11369_p0), [#allocation18], 12288   ;;  %p11370_p5 = pmov %p11369_p0 }
  0xca   : > { %p11371_p2 = pmov %p11369_p0 }
  0xcb   : > { %9392 = vsyncadd (%p11370_p5), [#allocation18], 4294955008 }
  0xcc   : > { %9394 = dma.done.wait (%p11371_p2), [#allocation21], 96   ;;  %p11372_p8 = pmov %p11369_p0 }
  0xcd   : > { %s7922_s17 = sshll.u32 %s9607_s16, 1  ;;  %p11373_p12 = scmp.ne.s32.totalorder %s9607_s16, 0 }
  0xce   : > { %9396 = vsyncadd (%p11372_p8), [#allocation21], 4294967200  ;;  %p575_p11 = scmp.lt.s32.totalorder %s7922_s17, 3 }
  0xcf   : > { %585 = sbr.rel (%p11373_p12) target bundleno = 214 (0xd6), region = 116 }
  0xd0   : > { %s11708_s17 = smov (!%p575_p11, %s7922_s17), 3 }
  0xd1   : > { %s7923_s0 = sshll.u32 %s11708_s17, 3 }
  0xd2   : > { %s578_s20 = scalar_lea.vmem %s11259_s1, %s7923_s0 }
  0xd4   : > { %v9435_v0 = vmov 0.0  }
  0xd5   : > { %586 = vst [vmem:[#allocation2] sm:$0xff] %v9435_v0  ;;  %587 = vst [vmem:[#allocation2 + $0x8] sm:$0xff] %v9435_v0 }
  0xd6 PF: > { %v590_v1 = vld [vmem:[#allocation8] sm:$0xff]  ;;  %v588_v2 = vld [vmem:[%s578_s20] sm:$0xff]  ;;  %vm598_vm0 = vcmask 64512   ;;  %v589_v3 = vld [vmem:[%s578_s20 + $0x8] sm:$0xff]  ;;  %s11172_s21 = sshll.u32 %s9607_s16, 4  ;;  %p8521_p10 = scmp.ne.s32.totalorder %s9607_s16, 1 }
  0xd7   : > { %8571 = vmatprep.subr.mxu0 %v590_v1  ;;  %8573 = vmatprep.mubr.msk.f32.mxu0 %vm598_vm0, %v588_v2  ;;  %v741_v4 = vld [vmem:[#allocation11 + $0x1180] sm:$0xff]  ;;  %v742_v6 = vld [vmem:[#allocation11 + $0x1188] sm:$0xff]  ;;  %s7090_s28 = sld [smem:[#allocation4 + %s11172_s21]]  ;;  %s7095_s22 = sadd.s32 1, %s11172_s21 }
  0xd8   : > { %v745_v5 = vld [vmem:[#allocation11 + $0x12c0] sm:$0xff]  ;;  %8572 = vmatpush3.msra.mxu0 %v590_v1  ;;  %v746_v8 = vld [vmem:[#allocation11 + $0x12c8] sm:$0xff]  ;;  %s7096_s14 = sld [smem:[#allocation4 + %s7095_s22]]  ;;  %s7104_s15 = sadd.s32 2, %s11172_s21 }
  0xd9   : > { %v7985_v7 = vcombine.high %v741_v4, %v745_v5  ;;  %v7984_v9 = vcombine.low %v741_v4, %v745_v5  ;;  %v733_v10 = vld [vmem:[#allocation11 + $0xf00] sm:$0xff]  ;;  %8574 = vmatmul.mubr.msk.f32.vlgmr.msra.gmra.mxu0 %vm598_vm0, %v589_v3  ;;  %v7986_v12 = vcombine.low %v742_v6, %v746_v8  ;;  %v7987_v13 = vcombine.high %v742_v6, %v746_v8  ;;  %v734_v15 = vld [vmem:[#allocation11 + $0xf08] sm:$0xff]  ;;  %v9818_v4 = vld [vmem:[#allocation11 + $0x1190] sm:$0xff]  ;;  %s7105_s3 = sld [smem:[#allocation4 + %s7104_s15]]  ;;  %s7112_s27 = sadd.s32 3, %s11172_s21 }
  0xda   : > { %v737_v11 = vld [vmem:[#allocation11 + $0x1040] sm:$0xff]  ;;  %v738_v16 = vld [vmem:[#allocation11 + $0x1048] sm:$0xff]  ;;  %v9820_v5 = vld [vmem:[#allocation11 + $0x12d0] sm:$0xff]  ;;  %s7120_s0 = sadd.s32 4, %s11172_s21  ;;  %s7128_s20 = sadd.s32 5, %s11172_s21 }
  0xdb   : > { %v7977_v14 = vcombine.high %v733_v10, %v737_v11  ;;  %v725_v17 = vld [vmem:[#allocation11 + $0xc80] sm:$0xff]  ;;  %1111 = vmatprep.subr.bf16.mxu1 %v7985_v7  ;;  %v7979_v18 = vcombine.high %v734_v15, %v738_v16  ;;  %v726_v20 = vld [vmem:[#allocation11 + $0xc88] sm:$0xff]  ;;  %1154 = vmatprep.subr.bf16.mxu0 %v7987_v13  ;;  %v7976_v22 = vcombine.low %v733_v10, %v737_v11  ;;  %v9822_v6 = vld [vmem:[#allocation11 + $0x1198] sm:$0xff]  ;;  %v9437_v13 = vmov 1   ;;  %s7121_s24 = sld [smem:[#allocation4 + %s7120_s0]] }
  0xdc   : > { %v729_v19 = vld [vmem:[#allocation11 + $0xdc0] sm:$0xff]  ;;  %v730_v21 = vld [vmem:[#allocation11 + $0xdc8] sm:$0xff]  ;;  %1112 = vmatpush1.bf16.msra.mxu1 %v7984_v9  ;;  %1155 = vmatpush1.bf16.msra.mxu0 %v7986_v12  ;;  %v7978_v23 = vcombine.low %v734_v15, %v738_v16  ;;  %v7989_v7 = vcombine.high %v9818_v4, %v9820_v5  ;;  %v9826_v8 = vld [vmem:[#allocation11 + $0x12d8] sm:$0xff]  ;;  %v7988_v9 = vcombine.low %v9818_v4, %v9820_v5  ;;  %v11289_v12 = vmov 0  }
  0xdd   : > { %1113 = vmatprep.subr.bf16.mxu1 %v7977_v14  ;;  %v7969_v24 = vcombine.high %v725_v17, %v729_v19  ;;  %1156 = vmatprep.subr.bf16.mxu0 %v7979_v18  ;;  %v7971_v25 = vcombine.high %v726_v20, %v730_v21  ;;  %v717_v26 = vld [vmem:[#allocation11 + $0xa00] sm:$0xff]  ;;  %v718_v28 = vld [vmem:[#allocation11 + $0xa08] sm:$0xff]  ;;  %v7968_v30 = vcombine.low %v725_v17, %v729_v19  ;;  %v9438_v16 = vmov 2   ;;  %v716_v4 = vld [vmem:[#allocation11 + $0x8d8] sm:$0xff]  ;;  %s7091_s19 = scalar_lea.vmem [#allocation2], %s7090_s28  ;;  %s7129_s28 = sld [smem:[#allocation4 + %s7128_s20]] }
  0xde   : > { %v721_v27 = vld [vmem:[#allocation11 + $0xb40] sm:$0xff]  ;;  %v722_v29 = vld [vmem:[#allocation11 + $0xb48] sm:$0xff]  ;;  %v7970_v31 = vcombine.low %v726_v20, %v730_v21  ;;  %v7990_v10 = vcombine.low %v9822_v6, %v9826_v8  ;;  %v7991_v11 = vcombine.high %v9822_v6, %v9826_v8  ;;  %1143 = vmatprep.mubr.bf16.mxu1 %v11289_v12  ;;  %1186 = vmatprep.mubr.bf16.mxu0 %v11289_v12  ;;  %v9439_v17 = vmov 3   ;;  %s7097_s4 = scalar_lea.vmem [#allocation2], %s7096_s14 }
  0xdf   : > { %v7961_v32 = vcombine.high %v717_v26, %v721_v27  ;;  %v7963_v33 = vcombine.high %v718_v28, %v722_v29  ;;  %v709_v34 = vld [vmem:[#allocation11 + $0x780] sm:$0xff]  ;;  %v710_v36 = vld [vmem:[#allocation11 + $0x788] sm:$0xff]  ;;  %v7960_v38 = vcombine.low %v717_v26, %v721_v27  ;;  %v7962_v39 = vcombine.low %v718_v28, %v722_v29  ;;  %8877 = vset.pattern.permute.xlu0 %v11289_v12  ;;  %s7106_s17 = scalar_lea.vmem [#allocation2], %s7105_s3  ;;  %s7144_s3 = sadd.s32 7, %s11172_s21 }
  0xe0   : > { %1114 = vmatpush1.bf16.msra.mxu1 %v7976_v22  ;;  %1157 = vmatpush1.bf16.msra.mxu0 %v7978_v23  ;;  %v713_v35 = vld [vmem:[#allocation11 + $0x8c0] sm:$0xff]  ;;  %v714_v37 = vld [vmem:[#allocation11 + $0x8c8] sm:$0xff]  ;;  %v9440_v18 = vmov 4   ;;  %v9441_v19 = vmov 5   ;;  %v9442_v20 = vmov 6   ;;  %v9443_v21 = vmov 7  }
  0xe1   : > { %1115 = vmatprep.subr.bf16.mxu1 %v7969_v24  ;;  %1158 = vmatprep.subr.bf16.mxu0 %v7971_v25  ;;  %v7953_v40 = vcombine.high %v709_v34, %v713_v35  ;;  %v7955_v41 = vcombine.high %v710_v36, %v714_v37  ;;  %v701_v42 = vld [vmem:[#allocation11 + $0x500] sm:$0xff]  ;;  %v702_v44 = vld [vmem:[#allocation11 + $0x508] sm:$0xff]  ;;  %v7952_v46 = vcombine.low %v709_v34, %v713_v35  ;;  %v9444_v22 = vmov 8   ;;  %s7122_s22 = scalar_lea.vmem [#allocation2], %s7121_s24  ;;  %s7158_s24 = sadd.s32 9, %s11172_s21 }
  0xe2   : > { %v705_v43 = vld [vmem:[#allocation11 + $0x640] sm:$0xff]  ;;  %v706_v45 = vld [vmem:[#allocation11 + $0x648] sm:$0xff]  ;;  %v7954_v47 = vcombine.low %v710_v36, %v714_v37  ;;  %8878 = vset.pattern.permute.xlu1 %v9437_v13  ;;  %v9445_v23 = vmov 9   ;;  %v9446_v24 = vmov 10   ;;  %v9447_v25 = vmov 11   ;;  %v708_v13 = vld [vmem:[#allocation11 + $0x658] sm:$0xff] }
  0xe3   : > { %v7945_v48 = vcombine.high %v701_v42, %v705_v43  ;;  %v7947_v49 = vcombine.high %v702_v44, %v706_v45  ;;  %v7944_v50 = vcombine.low %v701_v42, %v705_v43  ;;  %v7946_v51 = vcombine.low %v702_v44, %v706_v45  ;;  %v693_v52 = vld [vmem:[#allocation11 + $0x280] sm:$0xff]  ;;  %v694_v54 = vld [vmem:[#allocation11 + $0x288] sm:$0xff]  ;;  %s7130_s15 = scalar_lea.vmem [#allocation2], %s7129_s28  ;;  %s7167_s28 = sadd.s32 10, %s11172_s21 }
  0xe4   : > { %1116 = vmatpush1.bf16.msra.mxu1 %v7968_v30  ;;  %1159 = vmatpush1.bf16.msra.mxu0 %v7970_v31  ;;  %v697_v53 = vld [vmem:[#allocation11 + $0x3c0] sm:$0xff]  ;;  %v698_v56 = vld [vmem:[#allocation11 + $0x3c8] sm:$0xff]  ;;  %v9448_v26 = vmov 12   ;;  %v9449_v27 = vmov 13   ;;  %v9450_v28 = vmov 14   ;;  %v9451_v29 = vmov 15  }
  0xe5   : > { %1117 = vmatprep.subr.bf16.mxu1 %v7961_v32  ;;  %1160 = vmatprep.subr.bf16.mxu0 %v7963_v33  ;;  %v7937_v55 = vcombine.high %v693_v52, %v697_v53  ;;  %v7938_v57 = vcombine.low %v694_v54, %v698_v56  ;;  %v7939_v58 = vcombine.high %v694_v54, %v698_v56  ;;  %v685_v60 = vld [vmem:[#allocation11] sm:$0xff]  ;;  %v686_v62 = vld [vmem:[#allocation11 + $0x8] sm:$0xff]  ;;  %v9452_v30 = vmov 16   ;;  %v7925_v32 = vld [vmem:[#allocation10] ss:$0 sm:$0xff] }
  0xe6   : > { %v7936_v59 = vcombine.low %v693_v52, %v697_v53  ;;  %v689_v61 = vld [vmem:[#allocation11 + $0x140] sm:$0xff]  ;;  %v690_v0 = vld [vmem:[#allocation11 + $0x148] sm:$0xff]  ;;  %v9453_v31 = vmov 17   ;;  %v9454_v33 = vmov 18   ;;  %v9455_v42 = vmov 19   ;;  %v719_v56 = vld [vmem:[#allocation11 + $0xa10] sm:$0xff] }
  0xe7   : > { %v7929_v63 = vcombine.high %v685_v60, %v689_v61  ;;  %v7930_v1 = vcombine.low %v686_v62, %v690_v0  ;;  %v7931_v2 = vcombine.high %v686_v62, %v690_v0  ;;  %v7928_v3 = vcombine.low %v685_v60, %v689_v61  ;;  %v9838_v14 = vld [vmem:[%s9786_s26] sm:$0xff]  ;;  %v9843_v15 = vld [vmem:[%s9786_s26 + $0x8] sm:$0xff] }
  0xe8   : > { %1118 = vmatpush1.bf16.msra.mxu1 %v7960_v38  ;;  %1161 = vmatpush1.bf16.msra.mxu0 %v7962_v39  ;;  %v735_v38 = vld [vmem:[#allocation11 + $0xf10] sm:$0xff]  ;;  %v9456_v60 = vmov 20  }
  0xe9   : > { %1119 = vmatprep.subr.bf16.mxu1 %v7953_v40  ;;  %1162 = vmatprep.subr.bf16.mxu0 %v7955_v41  ;;  %v739_v39 = vld [vmem:[#allocation11 + $0x1050] sm:$0xff]  ;;  %v736_v40 = vld [vmem:[#allocation11 + $0xf18] sm:$0xff] }
  0xea   : > { %1298 = vperm.xlu1 %8878, %v9838_v14   ;;  %1285 = vperm.xlu0 %8877, %v9838_v14   ;;  %v740_v41 = vld [vmem:[#allocation11 + $0x1058] sm:$0xff]  ;;  %v7980_v52 = vcombine.low %v735_v38, %v739_v39 }
  0xeb   : > { %v7982_v53 = vcombine.low %v736_v40, %v740_v41 }
  0xec   : > { %1120 = vmatpush1.bf16.msra.mxu1 %v7952_v46  ;;  %1163 = vmatpush1.bf16.msra.mxu0 %v7954_v47  ;;  %v7981_v46 = vcombine.high %v735_v38, %v739_v39  ;;  %v7983_v47 = vcombine.high %v736_v40, %v740_v41  ;;  %v1437_v38 = vld [vmem:[#allocation11 + $0x11a0] sm:$0xff]  ;;  %v1438_v40 = vld [vmem:[#allocation11 + $0x11a8] sm:$0xff] }
  0xed   : > { %1121 = vmatprep.subr.bf16.mxu1 %v7945_v48  ;;  %1164 = vmatprep.subr.bf16.mxu0 %v7947_v49  ;;  %v727_v48 = vld [vmem:[#allocation11 + $0xc90] sm:$0xff]  ;;  %v1441_v39 = vld [vmem:[#allocation11 + $0x12e0] sm:$0xff]  ;;  %v1442_v41 = vld [vmem:[#allocation11 + $0x12e8] sm:$0xff] }
  0xee   : > { %1302 = vperm.xlu1 %8878, %v9843_v15   ;;  %1290 = vperm.xlu0 %8877, %v9843_v15   ;;  %v731_v49 = vld [vmem:[#allocation11 + $0xdd0] sm:$0xff] }
  0xef   : > { %v7973_v54 = vcombine.high %v727_v48, %v731_v49  ;;  %v7972_v61 = vcombine.low %v727_v48, %v731_v49  ;;  %v1429_v48 = vld [vmem:[#allocation11 + $0xf20] sm:$0xff] }
  0xf0   : > { %1122 = vmatpush1.bf16.msra.mxu1 %v7944_v50  ;;  %1165 = vmatpush1.bf16.msra.mxu0 %v7946_v51  ;;  %v728_v50 = vld [vmem:[#allocation11 + $0xc98] sm:$0xff]  ;;  %v1433_v49 = vld [vmem:[#allocation11 + $0x1060] sm:$0xff] }
  0xf1   : > { %1123 = vmatprep.subr.bf16.mxu1 %v7937_v55  ;;  %1166 = vmatprep.subr.bf16.mxu0 %v7939_v58  ;;  %v732_v51 = vld [vmem:[#allocation11 + $0xdd8] sm:$0xff] }
  0xf2   : > { %8880 = vset.pattern.permute.xlu1 %v9438_v16  ;;  %8879 = vset.pattern.permute.xlu0 %v9438_v16  ;;  %v7975_v55 = vcombine.high %v728_v50, %v732_v51  ;;  %v720_v58 = vld [vmem:[#allocation11 + $0xa18] sm:$0xff]  ;;  %v7974_v62 = vcombine.low %v728_v50, %v732_v51  ;;  %v9457_v16 = vmov 21   ;;  %v1430_v50 = vld [vmem:[#allocation11 + $0xf28] sm:$0xff] }
  0xf3   : > { %1314 = vperm.xlu1 %8880, %v9843_v15   ;;  %1310 = vperm.xlu0 %8879, %v9838_v14   ;;  %v1434_v51 = vld [vmem:[#allocation11 + $0x1068] sm:$0xff] }
  0xf4   : > { %1124 = vmatpush1.bf16.msra.mxu1 %v7936_v59  ;;  %1167 = vmatpush1.bf16.msra.mxu0 %v7938_v57  ;;  %v723_v57 = vld [vmem:[#allocation11 + $0xb50] sm:$0xff]  ;;  %v724_v59 = vld [vmem:[#allocation11 + $0xb58] sm:$0xff] }
  0xf5   : > { %1125 = vmatprep.subr.bf16.mxu1 %v7929_v63  ;;  %1168 = vmatprep.subr.bf16.mxu0 %v7931_v2  ;;  %v7965_v63 = vcombine.high %v719_v56, %v723_v57  ;;  %v7967_v0 = vcombine.high %v720_v58, %v724_v59  ;;  %v715_v2 = vld [vmem:[#allocation11 + $0x8d0] sm:$0xff]  ;;  %v7964_v5 = vcombine.low %v719_v56, %v723_v57  ;;  %v1421_v57 = vld [vmem:[#allocation11 + $0xca0] sm:$0xff] }
  0xf6   : > { %v7966_v6 = vcombine.low %v720_v58, %v724_v59  ;;  %v8043_v56 = vcombine.high %v1430_v50, %v1434_v51  ;;  %v1425_v58 = vld [vmem:[#allocation11 + $0xde0] sm:$0xff]  ;;  %v1422_v59 = vld [vmem:[#allocation11 + $0xca8] sm:$0xff] }
  0xf7   : > { %8881 = vset.pattern.permute.xlu1 %v9439_v17  ;;  %8882 = vset.pattern.permute.xlu0 %v9439_v17 }
  0xf8   : > { %1126 = vmatpush1.bf16.msra.mxu1 %v7928_v3  ;;  %1169 = vmatpush1.bf16.msra.mxu0 %v7930_v1  ;;  %v711_v1 = vld [vmem:[#allocation11 + $0x790] sm:$0xff]  ;;  %v712_v3 = vld [vmem:[#allocation11 + $0x798] sm:$0xff] }
  0xf9   : > { %1197 = vmatprep.subr.bf16.mxu1 %v7989_v7  ;;  %1240 = vmatprep.subr.bf16.mxu0 %v7991_v11  ;;  %v7957_v7 = vcombine.high %v711_v1, %v715_v2  ;;  %v7959_v8 = vcombine.high %v712_v3, %v716_v4  ;;  %v704_v11 = vld [vmem:[#allocation11 + $0x518] sm:$0xff]  ;;  %v7956_v17 = vcombine.low %v711_v1, %v715_v2  ;;  %v1413_v1 = vld [vmem:[#allocation11 + $0xa20] sm:$0xff] }
  0xfa   : > { %1322 = vperm.xlu1 %8881, %v9838_v14   ;;  %1326 = vperm.xlu0 %8882, %v9843_v15   ;;  %v1417_v2 = vld [vmem:[#allocation11 + $0xb60] sm:$0xff] }
  0xfe   : > { %8883 = vset.pattern.permute.xlu1 %v9440_v18  ;;  %8884 = vset.pattern.permute.xlu0 %v9441_v19  ;;  %v7958_v18 = vcombine.low %v712_v3, %v716_v4  ;;  %v1414_v3 = vld [vmem:[#allocation11 + $0xa28] sm:$0xff] }
  0xff   : > { %1334 = vperm.xlu1 %8883, %v9838_v14   ;;  %1346 = vperm.xlu0 %8884, %v9838_v14   ;;  %v1418_v4 = vld [vmem:[#allocation11 + $0xb68] sm:$0xff] }
 0x103   : > { %1338 = vperm.xlu1 %8883, %v9843_v15   ;;  %8887 = vset.pattern.permute.xlu0 %v9442_v20 }
 0x104   : > { %1362 = vperm.xlu0 %8887, %v9843_v15  }
 0x107   : > { %8885 = vset.pattern.permute.xlu1 %v9441_v19 }
 0x108   : > { %1350 = vperm.xlu1 %8885, %v9843_v15   ;;  %8889 = vset.pattern.permute.xlu0 %v9444_v22 }
 0x109   : > { %1980 = vperm.xlu0 %8889, %v9838_v14  }
 0x10c   : > { %8886 = vset.pattern.permute.xlu1 %v9442_v20  ;;  %v7951_v20 = vcombine.high %v704_v11, %v708_v13 }
 0x10d   : > { %1358 = vperm.xlu1 %8886, %v9838_v14   ;;  %8892 = vset.pattern.permute.xlu0 %v9445_v23 }
 0x10e   : > { %1996 = vperm.xlu0 %8892, %v9843_v15  }
 0x111   : > { %8888 = vset.pattern.permute.xlu1 %v9443_v21  ;;  %v695_v21 = vld [vmem:[#allocation11 + $0x290] sm:$0xff] }
 0x112   : > { %1370 = vperm.xlu1 %8888, %v9838_v14   ;;  %8894 = vset.pattern.permute.xlu0 %v9447_v25 }
 0x113   : > { %2016 = vperm.xlu0 %8894, %v9838_v14  }
 0x116   : > { %1374 = vperm.xlu1 %8888, %v9843_v15  }
 0x117   : > { %8897 = vset.pattern.permute.xlu0 %v9448_v26 }
 0x118   : > { %2032 = vperm.xlu0 %8897, %v9843_v15  }
 0x11a   : > { %8890 = vset.pattern.permute.xlu1 %v9444_v22  ;;  %v699_v22 = vld [vmem:[#allocation11 + $0x3d0] sm:$0xff] }
 0x11b   : > { %1984 = vperm.xlu1 %8890, %v9843_v15  }
 0x11c   : > { %8899 = vset.pattern.permute.xlu0 %v9450_v28 }
 0x11d   : > { %2052 = vperm.xlu0 %8899, %v9838_v14  }
 0x11f   : > { %8891 = vset.pattern.permute.xlu1 %v9445_v23  ;;  %v696_v23 = vld [vmem:[#allocation11 + $0x298] sm:$0xff] }
 0x120   : > { %1992 = vperm.xlu1 %8891, %v9838_v14  }
 0x121   : > { %8902 = vset.pattern.permute.xlu0 %v9451_v29 }
 0x122   : > { %2068 = vperm.xlu0 %8902, %v9843_v15  }
 0x124   : > { %8893 = vset.pattern.permute.xlu1 %v9446_v24  ;;  %v700_v24 = vld [vmem:[#allocation11 + $0x3d8] sm:$0xff] }
 0x125   : > { %2004 = vperm.xlu1 %8893, %v9838_v14  }
 0x126   : > { %8904 = vset.pattern.permute.xlu0 %v9453_v31 }
 0x127   : > { %2686 = vperm.xlu0 %8904, %v9838_v14  }
 0x129   : > { %2008 = vperm.xlu1 %8893, %v9843_v15  }
 0x12b   : > { %8907 = vset.pattern.permute.xlu0 %v9454_v33 }
 0x12c   : > { %2702 = vperm.xlu0 %8907, %v9843_v15  }
 0x12d   : > { %8895 = vset.pattern.permute.xlu1 %v9447_v25 }
 0x12e   : > { %2020 = vperm.xlu1 %8895, %v9843_v15  }
 0x130   : > { %8909 = vset.pattern.permute.xlu0 %v9456_v60 }
 0x131   : > { %2722 = vperm.xlu0 %8909, %v9838_v14  }
 0x132   : > { %8896 = vset.pattern.permute.xlu1 %v9448_v26  ;;  %v7950_v26 = vcombine.low %v704_v11, %v708_v13  ;;  %v1406_v11 = vld [vmem:[#allocation11 + $0x7a8] sm:$0xff] }
 0x133   : > { %2028 = vperm.xlu1 %8896, %v9838_v14   ;;  %v1410_v13 = vld [vmem:[#allocation11 + $0x8e8] sm:$0xff] }
 0x135   : > { %8912 = vset.pattern.permute.xlu0 %v9457_v16 }
 0x136   : > { %2738 = vperm.xlu0 %8912, %v9843_v15  }
 0x137   : > { %8898 = vset.pattern.permute.xlu1 %v9449_v27  ;;  %v7941_v27 = vcombine.high %v695_v21, %v699_v22 }
 0x138   : > { %2040 = vperm.xlu1 %8898, %v9838_v14  }
 0x13c   : > { %2044 = vperm.xlu1 %8898, %v9843_v15  }
 0x140   : > { %8900 = vset.pattern.permute.xlu1 %v9450_v28  ;;  %v7943_v28 = vcombine.high %v696_v23, %v700_v24 }
 0x141   : > { %2056 = vperm.xlu1 %8900, %v9843_v15  }
 0x145   : > { %8901 = vset.pattern.permute.xlu1 %v9451_v29  ;;  %v687_v29 = vld [vmem:[#allocation11 + $0x10] sm:$0xff] }
 0x146   : > { %2064 = vperm.xlu1 %8901, %v9838_v14  }
 0x14a   : > { %8903 = vset.pattern.permute.xlu1 %v9452_v30  ;;  %v691_v30 = vld [vmem:[#allocation11 + $0x150] sm:$0xff] }
 0x14b   : > { %2674 = vperm.xlu1 %8903, %v9838_v14  }
 0x14f   : > { %2678 = vperm.xlu1 %8903, %v9843_v15  }
 0x153   : > { %8905 = vset.pattern.permute.xlu1 %v9453_v31  ;;  %v688_v31 = vld [vmem:[#allocation11 + $0x18] sm:$0xff] }
 0x154   : > { %2690 = vperm.xlu1 %8905, %v9843_v15  }
 0x158   : > { %8906 = vset.pattern.permute.xlu1 %v9454_v33  ;;  %v9458_v33 = vmov 22  }
 0x159   : > { %2698 = vperm.xlu1 %8906, %v9838_v14  }
 0x15d   : > { %8908 = vset.pattern.permute.xlu1 %v9455_v42  ;;  %v9459_v42 = vmov 23  }
 0x15e   : > { %2710 = vperm.xlu1 %8908, %v9838_v14   ;;  %8914 = vset.pattern.permute.xlu0 %v9459_v42 }
 0x15f   : > { %2758 = vperm.xlu0 %8914, %v9838_v14  }
 0x162   : > { %2714 = vperm.xlu1 %8908, %v9843_v15  }
 0x166   : > { %8910 = vset.pattern.permute.xlu1 %v9456_v60  ;;  %v1426_v60 = vld [vmem:[#allocation11 + $0xde8] sm:$0xff] }
 0x167   : > { %2726 = vperm.xlu1 %8910, %v9843_v15  }
 0x16b   : > { %8911 = vset.pattern.permute.xlu1 %v9457_v16  ;;  %v8024_v16 = vcombine.low %v1413_v1, %v1417_v2 }
 0x16c   : > { %2734 = vperm.xlu1 %8911, %v9838_v14  }
 0x170   : > { %8913 = vset.pattern.permute.xlu1 %v9458_v33  ;;  %v9462_v33 = vmov 25  }
 0x171   : > { %2746 = vperm.xlu1 %8913, %v9838_v14  }
 0x175   : > { %2750 = vperm.xlu1 %8913, %v9843_v15  }
 0x179   : > { %8915 = vset.pattern.permute.xlu1 %v9459_v42  ;;  %v1386_v42 = vld [vmem:[#allocation11 + $0x168] sm:$0xff] }
 0x17a   : > { %2762 = vperm.xlu1 %8915, %v9843_v15  }
 0x199   : > { %v8575_v34 = vpop.f32.mrf.mxu0 }
 0x19a   : > { %v677_v35 = vadd.f32 %v8575_v34, %v7925_v32  ;;  %v7940_v34 = vcombine.low %v695_v21, %v699_v22  ;;  %v1401_v21 = vld [vmem:[#allocation11 + $0x660] sm:$0xff]  ;;  %v1398_v22 = vld [vmem:[#allocation11 + $0x528] sm:$0xff] }
 0x19b   : > { %v671_v36 = vpop.f32.mrf.mxu0 }
 0x19c   : > { %v672_v37 = vadd.f32 %v7925_v32, %v671_v36  ;;  %v681_v43 = vmax.f32 %v677_v35, 0.0  ;;  %v692_v32 = vld [vmem:[#allocation11 + $0x158] sm:$0xff]  ;;  %v7942_v35 = vcombine.low %v696_v23, %v700_v24  ;;  %v7933_v36 = vcombine.high %v687_v29, %v691_v30  ;;  %v1402_v23 = vld [vmem:[#allocation11 + $0x668] sm:$0xff] }
 0x19d   : > { %v9461_v24 = vmov 26  }
 0x19e   : > { %v680_v44 = vmax.f32 %v672_v37, 0.0  ;;  %v7935_v37 = vcombine.high %v688_v31, %v692_v32 }
 0x1a0   : > { %v9882_v45 = vpack.c.bf16 %v681_v43, %v680_v44  ;;  %v7932_v43 = vcombine.low %v687_v29, %v691_v30  ;;  %v7934_v44 = vcombine.low %v688_v31, %v692_v32  ;;  %v1389_v29 = vld [vmem:[#allocation11 + $0x2a0] sm:$0xff]  ;;  %v1390_v31 = vld [vmem:[#allocation11 + $0x2a8] sm:$0xff] }
 0x1a1   : > { %v1393_v30 = vld [vmem:[#allocation11 + $0x3e0] sm:$0xff]  ;;  %v1394_v32 = vld [vmem:[#allocation11 + $0x3e8] sm:$0xff] }
 0x1a2   : > { %1144 = vmatmul.mubr.bf16.vlgmr.msra.gmra.mxu1 %v9882_v45  ;;  %1187 = vmatmul.mubr.bf16.vlgmr.msra.gmra.mxu0 %v9882_v45 }
 0x1a3   : > { %1198 = vmatpush1.bf16.msra.mxu1 %v7988_v9  ;;  %1241 = vmatpush1.bf16.msra.mxu0 %v7990_v10  ;;  %v703_v9 = vld [vmem:[#allocation11 + $0x510] sm:$0xff] }
 0x1a4   : > { %1199 = vmatprep.subr.bf16.mxu1 %v7981_v46  ;;  %1242 = vmatprep.subr.bf16.mxu0 %v7983_v47  ;;  %v707_v10 = vld [vmem:[#allocation11 + $0x650] sm:$0xff]  ;;  %v8049_v46 = vcombine.high %v1437_v38, %v1441_v39  ;;  %v8051_v47 = vcombine.high %v1438_v40, %v1442_v41 }
 0x1a5   : > { %1229 = vmatprep.mubr.bf16.mxu1 %v11289_v12  ;;  %1272 = vmatprep.mubr.bf16.mxu0 %v11289_v12  ;;  %v7949_v19 = vcombine.high %v703_v9, %v707_v10  ;;  %v7948_v25 = vcombine.low %v703_v9, %v707_v10  ;;  %v1405_v9 = vld [vmem:[#allocation11 + $0x7a0] sm:$0xff] }
 0x1a6   : > { %v1409_v10 = vld [vmem:[#allocation11 + $0x8e0] sm:$0xff] }
 0x1a7   : > { %1200 = vmatpush1.bf16.msra.mxu1 %v7980_v52  ;;  %1243 = vmatpush1.bf16.msra.mxu0 %v7982_v53  ;;  %v9460_v52 = vmov 24   ;;  %v8048_v53 = vcombine.low %v1437_v38, %v1441_v39  ;;  %v8003_v38 = vcombine.high %v1390_v31, %v1394_v32  ;;  %v1381_v39 = vld [vmem:[#allocation11 + $0x20] sm:$0xff] }
 0x1a8   : > { %1201 = vmatprep.subr.bf16.mxu1 %v7973_v54  ;;  %1244 = vmatprep.subr.bf16.mxu0 %v7975_v55  ;;  %v8050_v54 = vcombine.low %v1438_v40, %v1442_v41  ;;  %v8041_v55 = vcombine.high %v1429_v48, %v1433_v49  ;;  %v1385_v40 = vld [vmem:[#allocation11 + $0x160] sm:$0xff]  ;;  %v1382_v41 = vld [vmem:[#allocation11 + $0x28] sm:$0xff] }
 0x1a9   : > { %8917 = vset.pattern.permute.xlu0 %v9460_v52  ;;  %8916 = vset.pattern.permute.xlu1 %v9460_v52  ;;  %v7992_v52 = vcombine.low %v1381_v39, %v1385_v40 }
 0x1aa   : > { %3372 = vperm.xlu0 %8917, %v9843_v15   ;;  %3368 = vperm.xlu1 %8916, %v9838_v14  }
 0x1ab   : > { %1202 = vmatpush1.bf16.msra.mxu1 %v7972_v61  ;;  %1245 = vmatpush1.bf16.msra.mxu0 %v7974_v62  ;;  %v8040_v61 = vcombine.low %v1429_v48, %v1433_v49  ;;  %v8042_v62 = vcombine.low %v1430_v50, %v1434_v51  ;;  %v1439_v48 = vld [vmem:[#allocation11 + $0x11b0] sm:$0xff]  ;;  %v1440_v50 = vld [vmem:[#allocation11 + $0x11b8] sm:$0xff] }
 0x1ac   : > { %1203 = vmatprep.subr.bf16.mxu1 %v7965_v63  ;;  %1246 = vmatprep.subr.bf16.mxu0 %v7967_v0  ;;  %v8033_v63 = vcombine.high %v1421_v57, %v1425_v58  ;;  %v8035_v0 = vcombine.high %v1422_v59, %v1426_v60  ;;  %v1443_v49 = vld [vmem:[#allocation11 + $0x12f0] sm:$0xff]  ;;  %v1444_v51 = vld [vmem:[#allocation11 + $0x12f8] sm:$0xff] }
 0x1ae   : > { %8919 = vset.pattern.permute.xlu0 %v9461_v24  ;;  %8918 = vset.pattern.permute.xlu1 %v9462_v33  ;;  %v1399_v33 = vld [vmem:[#allocation11 + $0x530] sm:$0xff] }
 0x1af   : > { %1204 = vmatpush1.bf16.msra.mxu1 %v7964_v5  ;;  %1247 = vmatpush1.bf16.msra.mxu0 %v7966_v6  ;;  %v8032_v5 = vcombine.low %v1421_v57, %v1425_v58  ;;  %v8034_v6 = vcombine.low %v1422_v59, %v1426_v60  ;;  %v1435_v57 = vld [vmem:[#allocation11 + $0x1070] sm:$0xff]  ;;  %v1432_v58 = vld [vmem:[#allocation11 + $0xf38] sm:$0xff]  ;;  %v9464_v60 = vmov 29  }
 0x1b0   : > { %1205 = vmatprep.subr.bf16.mxu1 %v7957_v7  ;;  %1248 = vmatprep.subr.bf16.mxu0 %v7959_v8  ;;  %v8025_v7 = vcombine.high %v1413_v1, %v1417_v2  ;;  %v8027_v8 = vcombine.high %v1414_v3, %v1418_v4  ;;  %v1436_v59 = vld [vmem:[#allocation11 + $0x1078] sm:$0xff]  ;;  %v1423_v2 = vld [vmem:[#allocation11 + $0xcb0] sm:$0xff] }
 0x1b1   : > { %3392 = vperm.xlu0 %8919, %v9838_v14   ;;  %3380 = vperm.xlu1 %8918, %v9838_v14   ;;  %v8047_v1 = vcombine.high %v1432_v58, %v1436_v59 }
 0x1b3   : > { %1206 = vmatpush1.bf16.msra.mxu1 %v7956_v17  ;;  %1249 = vmatpush1.bf16.msra.mxu0 %v7958_v18  ;;  %v8026_v17 = vcombine.low %v1414_v3, %v1418_v4  ;;  %v8017_v18 = vcombine.high %v1405_v9, %v1409_v10  ;;  %v1427_v3 = vld [vmem:[#allocation11 + $0xdf0] sm:$0xff]  ;;  %v1424_v4 = vld [vmem:[#allocation11 + $0xcb8] sm:$0xff] }
 0x1b4   : > { %1207 = vmatprep.subr.bf16.mxu1 %v7949_v19  ;;  %1250 = vmatprep.subr.bf16.mxu0 %v7951_v20  ;;  %v8019_v19 = vcombine.high %v1406_v11, %v1410_v13  ;;  %v1397_v20 = vld [vmem:[#allocation11 + $0x520] sm:$0xff] }
 0x1b5   : > { %3384 = vperm.xlu1 %8918, %v9843_v15  }
 0x1b7   : > { %1208 = vmatpush1.bf16.msra.mxu1 %v7948_v25  ;;  %1251 = vmatpush1.bf16.msra.mxu0 %v7950_v26  ;;  %v8016_v25 = vcombine.low %v1405_v9, %v1409_v10  ;;  %v8018_v26 = vcombine.low %v1406_v11, %v1410_v13  ;;  %v1415_v10 = vld [vmem:[#allocation11 + $0xa30] sm:$0xff] }
 0x1b8   : > { %1209 = vmatprep.subr.bf16.mxu1 %v7941_v27  ;;  %1252 = vmatprep.subr.bf16.mxu0 %v7943_v28  ;;  %v8009_v27 = vcombine.high %v1397_v20, %v1401_v21  ;;  %v8011_v28 = vcombine.high %v1398_v22, %v1402_v23  ;;  %v1419_v13 = vld [vmem:[#allocation11 + $0xb70] sm:$0xff] }
 0x1b9   : > { %8920 = vset.pattern.permute.xlu1 %v9461_v24  ;;  %v1411_v24 = vld [vmem:[#allocation11 + $0x8f0] sm:$0xff] }
 0x1ba   : > { %3396 = vperm.xlu1 %8920, %v9843_v15  }
 0x1bb   : > { %1210 = vmatpush1.bf16.msra.mxu1 %v7940_v34  ;;  %1253 = vmatpush1.bf16.msra.mxu0 %v7942_v35  ;;  %v9463_v34 = vmov 27   ;;  %v8008_v35 = vcombine.low %v1397_v20, %v1401_v21  ;;  %v8029_v21 = vcombine.high %v1415_v10, %v1419_v13 }
 0x1bc   : > { %1211 = vmatprep.subr.bf16.mxu1 %v7933_v36  ;;  %1254 = vmatprep.subr.bf16.mxu0 %v7935_v37  ;;  %v8010_v36 = vcombine.low %v1398_v22, %v1402_v23  ;;  %v8001_v37 = vcombine.high %v1389_v29, %v1393_v30  ;;  %v1407_v23 = vld [vmem:[#allocation11 + $0x7b0] sm:$0xff] }
 0x1bd   : > { %8922 = vset.pattern.permute.xlu0 %v9463_v34 }
 0x1be   : > { %3408 = vperm.xlu0 %8922, %v9843_v15   ;;  %8921 = vset.pattern.permute.xlu1 %v9463_v34  ;;  %v1403_v34 = vld [vmem:[#allocation11 + $0x670] sm:$0xff] }
 0x1bf   : > { %1212 = vmatpush1.bf16.msra.mxu1 %v7932_v43  ;;  %1255 = vmatpush1.bf16.msra.mxu0 %v7934_v44  ;;  %v8000_v43 = vcombine.low %v1389_v29, %v1393_v30  ;;  %v8002_v44 = vcombine.low %v1390_v31, %v1394_v32  ;;  %v8028_v29 = vcombine.low %v1415_v10, %v1419_v13  ;;  %v2127_v10 = vld [vmem:[#allocation11 + $0x1080] sm:$0xff]  ;;  %v2124_v13 = vld [vmem:[#allocation11 + $0xf48] sm:$0xff] }
 0x1c0   : > { %1807 = vmatprep.subr.bf16.mxu1 %v8049_v46  ;;  %1850 = vmatprep.subr.bf16.mxu0 %v8051_v47  ;;  %v7993_v46 = vcombine.high %v1381_v39, %v1385_v40  ;;  %v7995_v47 = vcombine.high %v1382_v41, %v1386_v42  ;;  %v8021_v31 = vcombine.high %v1407_v23, %v1411_v24 }
 0x1c1   : > { %3404 = vperm.xlu1 %8921, %v9838_v14   ;;  %v8013_v39 = vcombine.high %v1399_v33, %v1403_v34 }
 0x1c2   : > { %1230 = vmatmul.mubr.bf16.vlgmr.msra.gmra.mxu1 %v9882_v45  ;;  %1273 = vmatmul.mubr.bf16.vlgmr.msra.gmra.mxu0 %v9882_v45 }
 0x1c3   : > { %1808 = vmatpush1.bf16.msra.mxu1 %v8048_v53  ;;  %1851 = vmatpush1.bf16.msra.mxu0 %v8050_v54  ;;  %v7994_v53 = vcombine.low %v1382_v41, %v1386_v42  ;;  %v8053_v54 = vcombine.high %v1439_v48, %v1443_v49  ;;  %v1391_v41 = vld [vmem:[#allocation11 + $0x2b0] sm:$0xff] }
 0x1c4   : > { %1809 = vmatprep.subr.bf16.mxu1 %v8041_v55  ;;  %1852 = vmatprep.subr.bf16.mxu0 %v8043_v56  ;;  %v8055_v55 = vcombine.high %v1440_v50, %v1444_v51  ;;  %v1431_v56 = vld [vmem:[#allocation11 + $0xf30] sm:$0xff] }
 0x1c5   : > { %1839 = vmatprep.mubr.bf16.mxu1 %v11289_v12  ;;  %1882 = vmatprep.mubr.bf16.mxu0 %v11289_v12 }
 0x1c6   : > { %8924 = vset.pattern.permute.xlu0 %v9464_v60 }
 0x1c7   : > { %1810 = vmatpush1.bf16.msra.mxu1 %v8040_v61  ;;  %1853 = vmatpush1.bf16.msra.mxu0 %v8042_v62  ;;  %v9915_v61 = vpop.permute.xlu1 %1298  ;;  %v8052_v62 = vcombine.low %v1439_v48, %v1443_v49  ;;  %v8012_v48 = vcombine.low %v1399_v33, %v1403_v34  ;;  %v2111_v33 = vld [vmem:[#allocation11 + $0xb80] sm:$0xff]  ;;  %v2108_v34 = vld [vmem:[#allocation11 + $0xa48] sm:$0xff] }
 0x1c8   : > { %1811 = vmatprep.subr.bf16.mxu1 %v8033_v63  ;;  %1854 = vmatprep.subr.bf16.mxu0 %v8035_v0  ;;  %v8054_v63 = vcombine.low %v1440_v50, %v1444_v51  ;;  %v8045_v0 = vcombine.high %v1431_v56, %v1435_v57 }
 0x1c9   : > { %3428 = vperm.xlu0 %8924, %v9838_v14  }
 0x1cb   : > { %1812 = vmatpush1.bf16.msra.mxu1 %v8032_v5  ;;  %1855 = vmatpush1.bf16.msra.mxu0 %v8034_v6  ;;  %v1428_v5 = vld [vmem:[#allocation11 + $0xdf8] sm:$0xff]  ;;  %v8044_v6 = vcombine.low %v1431_v56, %v1435_v57  ;;  %v9920_v11 = vpop.permute.xlu1 %1302 }
 0x1cc   : > { %1813 = vmatprep.subr.bf16.mxu1 %v8025_v7  ;;  %1856 = vmatprep.subr.bf16.mxu0 %v8027_v8  ;;  %v8046_v7 = vcombine.low %v1432_v58, %v1436_v59  ;;  %v8037_v8 = vcombine.high %v1423_v2, %v1427_v3  ;;  %v8039_v9 = vcombine.high %v1424_v4, %v1428_v5  ;;  %v1388_v56 = vld [vmem:[#allocation11 + $0x178] sm:$0xff] }
 0x1cd   : > { %v8038_v20 = vcombine.low %v1424_v4, %v1428_v5  ;;  %v9468_v4 = vmov 33  }
 0x1cf   : > { %1814 = vmatpush1.bf16.msra.mxu1 %v8024_v16  ;;  %1857 = vmatpush1.bf16.msra.mxu0 %v8026_v17  ;;  %v1416_v16 = vld [vmem:[#allocation11 + $0xa38] sm:$0xff] }
 0x1d0   : > { %1815 = vmatprep.subr.bf16.mxu1 %v8017_v18  ;;  %1858 = vmatprep.subr.bf16.mxu0 %v8019_v19  ;;  %v1420_v17 = vld [vmem:[#allocation11 + $0xb78] sm:$0xff]  ;;  %v9465_v18 = vmov 30   ;;  %v8036_v19 = vcombine.low %v1423_v2, %v1427_v3  ;;  %v2132_v2 = vld [vmem:[#allocation11 + $0x11c8] sm:$0xff] }
 0x1d1   : > { %8927 = vset.pattern.permute.xlu0 %v9465_v18  ;;  %v8031_v22 = vcombine.high %v1416_v16, %v1420_v17  ;;  %v8030_v30 = vcombine.low %v1416_v16, %v1420_v17  ;;  %v2136_v3 = vld [vmem:[#allocation11 + $0x1308] sm:$0xff] }
 0x1d2   : > { %3444 = vperm.xlu0 %8927, %v9843_v15   ;;  %v2128_v16 = vld [vmem:[#allocation11 + $0x1088] sm:$0xff] }
 0x1d3   : > { %1816 = vmatpush1.bf16.msra.mxu1 %v8016_v25  ;;  %1859 = vmatpush1.bf16.msra.mxu0 %v8018_v26  ;;  %v1408_v25 = vld [vmem:[#allocation11 + $0x7b8] sm:$0xff] }
 0x1d4   : > { %1817 = vmatprep.subr.bf16.mxu1 %v8009_v27  ;;  %1860 = vmatprep.subr.bf16.mxu0 %v8011_v28  ;;  %v1412_v26 = vld [vmem:[#allocation11 + $0x8f8] sm:$0xff]  ;;  %v9466_v27 = vmov 28   ;;  %v9927_v28 = vpop.permute.xlu1 %1314 }
 0x1d5   : > { %8923 = vset.pattern.permute.xlu1 %v9466_v27  ;;  %v8023_v32 = vcombine.high %v1408_v25, %v1412_v26 }
 0x1d6   : > { %3416 = vperm.xlu1 %8923, %v9838_v14  }
 0x1d7   : > { %1818 = vmatpush1.bf16.msra.mxu1 %v8008_v35  ;;  %1861 = vmatpush1.bf16.msra.mxu0 %v8010_v36  ;;  %v1400_v35 = vld [vmem:[#allocation11 + $0x538] sm:$0xff] }
 0x1d8   : > { %1819 = vmatprep.subr.bf16.mxu1 %v8001_v37  ;;  %1862 = vmatprep.subr.bf16.mxu0 %v8003_v38  ;;  %v1404_v36 = vld [vmem:[#allocation11 + $0x678] sm:$0xff]  ;;  %v8020_v37 = vcombine.low %v1407_v23, %v1411_v24  ;;  %v8022_v38 = vcombine.low %v1408_v25, %v1412_v26  ;;  %v9930_v42 = vpop.permute.xlu1 %1322  ;;  %v2119_v23 = vld [vmem:[#allocation11 + $0xe00] sm:$0xff]  ;;  %v2116_v24 = vld [vmem:[#allocation11 + $0xcc8] sm:$0xff]  ;;  %v9469_v26 = vmov 31  }
 0x1d9   : > { %v8015_v40 = vcombine.high %v1400_v35, %v1404_v36  ;;  %11374 = vst [vmem:[#allocation32_spill] sm:$0xff] %v9930_v42  ;;  %v8014_v49 = vcombine.low %v1400_v35, %v1404_v36  ;;  %v2120_v25 = vld [vmem:[#allocation11 + $0xe08] sm:$0xff] }
 0x1da   : > { %3420 = vperm.xlu1 %8923, %v9843_v15   ;;  %v2112_v35 = vld [vmem:[#allocation11 + $0xb88] sm:$0xff] }
 0x1db   : > { %1820 = vmatpush1.bf16.msra.mxu1 %v8000_v43  ;;  %1863 = vmatpush1.bf16.msra.mxu0 %v8002_v44  ;;  %v1395_v43 = vld [vmem:[#allocation11 + $0x3f0] sm:$0xff]  ;;  %v1392_v44 = vld [vmem:[#allocation11 + $0x2b8] sm:$0xff] }
 0x1dc   : > { %1821 = vmatprep.subr.bf16.mxu1 %v7993_v46  ;;  %1864 = vmatprep.subr.bf16.mxu0 %v7995_v47  ;;  %v1396_v46 = vld [vmem:[#allocation11 + $0x3f8] sm:$0xff]  ;;  %v9467_v47 = vmov 32   ;;  %v8005_v50 = vcombine.high %v1391_v41, %v1395_v43  ;;  %v8004_v57 = vcombine.low %v1391_v41, %v1395_v43  ;;  %v8091_v41 = vcombine.high %v2108_v34, %v2112_v35  ;;  %v2099_v43 = vld [vmem:[#allocation11 + $0x7c0] sm:$0xff] }
 0x1dd   : > { %8929 = vset.pattern.permute.xlu0 %v9467_v47  ;;  %v8007_v51 = vcombine.high %v1392_v44, %v1396_v46  ;;  %v8006_v58 = vcombine.low %v1392_v44, %v1396_v46  ;;  %v2103_v44 = vld [vmem:[#allocation11 + $0x900] sm:$0xff]  ;;  %v2100_v46 = vld [vmem:[#allocation11 + $0x7c8] sm:$0xff] }
 0x1de   : > { %8925 = vset.pattern.permute.xlu1 %v9464_v60  ;;  %4062 = vperm.xlu0 %8929, %v9838_v14  }
 0x1df   : > { %1822 = vmatpush1.bf16.msra.mxu1 %v7992_v52  ;;  %1865 = vmatpush1.bf16.msra.mxu0 %v7994_v53  ;;  %v1383_v52 = vld [vmem:[#allocation11 + $0x30] sm:$0xff]  ;;  %v9934_v53 = vpop.permute.xlu1 %1334 }
 0x1e0   : > { %1893 = vmatprep.subr.bf16.mxu1 %v8053_v54  ;;  %1936 = vmatprep.subr.bf16.mxu0 %v8055_v55  ;;  %11375 = vst [vmem:[#allocation33_spill] sm:$0xff] %v9934_v53  ;;  %v1387_v54 = vld [vmem:[#allocation11 + $0x170] sm:$0xff]  ;;  %v1384_v55 = vld [vmem:[#allocation11 + $0x38] sm:$0xff] }
 0x1e1   : > { %3432 = vperm.xlu1 %8925, %v9843_v15   ;;  %v7997_v59 = vcombine.high %v1383_v52, %v1387_v54  ;;  %v7996_v60 = vcombine.low %v1383_v52, %v1387_v54  ;;  %v7998_v5 = vcombine.low %v1384_v55, %v1388_v56  ;;  %v8081_v52 = vcombine.high %v2099_v43, %v2103_v44 }
 0x1e2   : > { %1840 = vmatmul.mubr.bf16.vlgmr.msra.gmra.mxu1 %v9882_v45  ;;  %1883 = vmatmul.mubr.bf16.vlgmr.msra.gmra.mxu0 %v9882_v45 }
 0x1e3   : > { %1894 = vmatpush1.bf16.msra.mxu1 %v8052_v62  ;;  %1937 = vmatpush1.bf16.msra.mxu0 %v8054_v63  ;;  %v7999_v62 = vcombine.high %v1384_v55, %v1388_v56  ;;  %v2131_v63 = vld [vmem:[#allocation11 + $0x11c0] sm:$0xff] }
 0x1e4   : > { %1895 = vmatprep.subr.bf16.mxu1 %v8045_v0  ;;  %1938 = vmatprep.subr.bf16.mxu0 %v8047_v1  ;;  %v9939_v0 = vpop.permute.xlu1 %1338  ;;  %v2135_v1 = vld [vmem:[#allocation11 + $0x1300] sm:$0xff] }
 0x1e5   : > { %1925 = vmatprep.mubr.bf16.mxu1 %v11289_v12  ;;  %1968 = vmatprep.mubr.bf16.mxu0 %v11289_v12  ;;  %v8112_v17 = vcombine.low %v2131_v63, %v2135_v1  ;;  %v2091_v55 = vld [vmem:[#allocation11 + $0x540] sm:$0xff] }
 0x1e6   : > { %8932 = vset.pattern.permute.xlu0 %v9468_v4  ;;  %8926 = vset.pattern.permute.xlu1 %v9465_v18  ;;  %v8114_v18 = vcombine.low %v2132_v2, %v2136_v3  ;;  %v2095_v56 = vld [vmem:[#allocation11 + $0x680] sm:$0xff] }
 0x1e7   : > { %1896 = vmatpush1.bf16.msra.mxu1 %v8044_v6  ;;  %1939 = vmatpush1.bf16.msra.mxu0 %v8046_v7  ;;  %v8113_v6 = vcombine.high %v2131_v63, %v2135_v1  ;;  %v8115_v7 = vcombine.high %v2132_v2, %v2136_v3  ;;  %v8073_v1 = vcombine.high %v2091_v55, %v2095_v56  ;;  %v2083_v3 = vld [vmem:[#allocation11 + $0x2c0] sm:$0xff] }
 0x1e8   : > { %1897 = vmatprep.subr.bf16.mxu1 %v8037_v8  ;;  %1940 = vmatprep.subr.bf16.mxu0 %v8039_v9  ;;  %v2123_v8 = vld [vmem:[#allocation11 + $0xf40] sm:$0xff]  ;;  %v9944_v9 = vpop.permute.xlu1 %1350 }
 0x1e9   : > { %4078 = vperm.xlu0 %8932, %v9843_v15   ;;  %3440 = vperm.xlu1 %8926, %v9838_v14   ;;  %v8104_v27 = vcombine.low %v2123_v8, %v2127_v10 }
 0x1eb   : > { %1898 = vmatpush1.bf16.msra.mxu1 %v8036_v19  ;;  %1941 = vmatpush1.bf16.msra.mxu0 %v8038_v20  ;;  %v8105_v19 = vcombine.high %v2123_v8, %v2127_v10  ;;  %v8107_v20 = vcombine.high %v2124_v13, %v2128_v16 }
 0x1ec   : > { %1899 = vmatprep.subr.bf16.mxu1 %v8029_v21  ;;  %1942 = vmatprep.subr.bf16.mxu0 %v8031_v22  ;;  %v2115_v21 = vld [vmem:[#allocation11 + $0xcc0] sm:$0xff]  ;;  %v9947_v22 = vpop.permute.xlu1 %1358 }
 0x1ed   : > { %11376 = vst [vmem:[#allocation34_spill] sm:$0xff] %v9947_v22  ;;  %8928 = vset.pattern.permute.xlu1 %v9469_v26  ;;  %v2133_v26 = vld [vmem:[#allocation11 + $0x11d0] sm:$0xff] }
 0x1ee   : > { %3452 = vperm.xlu1 %8928, %v9838_v14  }
 0x1ef   : > { %1900 = vmatpush1.bf16.msra.mxu1 %v8028_v29  ;;  %1943 = vmatpush1.bf16.msra.mxu0 %v8030_v30  ;;  %v8106_v29 = vcombine.low %v2124_v13, %v2128_v16  ;;  %v8097_v30 = vcombine.high %v2115_v21, %v2119_v23  ;;  %v2075_v13 = vld [vmem:[#allocation11 + $0x40] sm:$0xff] }
 0x1f0   : > { %1901 = vmatprep.subr.bf16.mxu1 %v8021_v31  ;;  %1944 = vmatprep.subr.bf16.mxu0 %v8023_v32  ;;  %v8099_v31 = vcombine.high %v2116_v24, %v2120_v25  ;;  %v2107_v32 = vld [vmem:[#allocation11 + $0xa40] sm:$0xff]  ;;  %v9953_v36 = vpop.permute.xlu1 %1370 }
 0x1f1   : > { %11377 = vst [vmem:[#allocation35_spill] sm:$0xff] %v9953_v36  ;;  %v2079_v16 = vld [vmem:[#allocation11 + $0x180] sm:$0xff]  ;;  %v2788_v36 = vld [vmem:[#allocation11 + $0x578] sm:$0xff] }
 0x1f2   : > { %3456 = vperm.xlu1 %8928, %v9843_v15   ;;  %v8080_v15 = vcombine.low %v2099_v43, %v2103_v44 }
 0x1f3   : > { %1902 = vmatpush1.bf16.msra.mxu1 %v8020_v37  ;;  %1945 = vmatpush1.bf16.msra.mxu0 %v8022_v38  ;;  %v9470_v37 = vmov 35   ;;  %v8096_v38 = vcombine.low %v2115_v21, %v2119_v23 }
 0x1f4   : > { %1903 = vmatprep.subr.bf16.mxu1 %v8013_v39  ;;  %1946 = vmatprep.subr.bf16.mxu0 %v8015_v40  ;;  %v8098_v39 = vcombine.low %v2116_v24, %v2120_v25  ;;  %v8089_v40 = vcombine.high %v2107_v32, %v2111_v33  ;;  %v8057_v24 = vcombine.high %v2075_v13, %v2079_v16 }
 0x1f5   : > { %8934 = vset.pattern.permute.xlu0 %v9470_v37 }
 0x1f6   : > { %4098 = vperm.xlu0 %8934, %v9838_v14   ;;  %8930 = vset.pattern.permute.xlu1 %v9467_v47  ;;  %v9964_v14 = vld [vmem:[%s9786_s26 + $0x8] sm:$0xff]  ;;  %v8072_v47 = vcombine.low %v2091_v55, %v2095_v56 }
 0x1f7   : > { %1904 = vmatpush1.bf16.msra.mxu1 %v8012_v48  ;;  %1947 = vmatpush1.bf16.msra.mxu0 %v8014_v49  ;;  %v2104_v48 = vld [vmem:[#allocation11 + $0x908] sm:$0xff]  ;;  %v9957_v49 = vpop.permute.xlu1 %1374 }
 0x1f8   : > { %1905 = vmatprep.subr.bf16.mxu1 %v8005_v50  ;;  %1948 = vmatprep.subr.bf16.mxu0 %v8007_v51  ;;  %v8088_v50 = vcombine.low %v2107_v32, %v2111_v33  ;;  %v8090_v51 = vcombine.low %v2108_v34, %v2112_v35  ;;  %v8083_v54 = vcombine.high %v2100_v46, %v2104_v48 }
 0x1f9   : > { %4066 = vperm.xlu1 %8930, %v9964_v14  }
 0x1fb   : > { %1906 = vmatpush1.bf16.msra.mxu1 %v8004_v57  ;;  %1949 = vmatpush1.bf16.msra.mxu0 %v8006_v58  ;;  %v2092_v57 = vld [vmem:[#allocation11 + $0x548] sm:$0xff]  ;;  %v9967_v63 = vpop.permute.xlu1 %1984 }
 0x1fc   : > { %1907 = vmatprep.subr.bf16.mxu1 %v7997_v59  ;;  %1950 = vmatprep.subr.bf16.mxu0 %v7999_v62  ;;  %v2096_v58 = vld [vmem:[#allocation11 + $0x688] sm:$0xff]  ;;  %v9471_v59 = vmov 36   ;;  %v8082_v62 = vcombine.low %v2100_v46, %v2104_v48 }
 0x1fd   : > { %8937 = vset.pattern.permute.xlu0 %v9471_v59  ;;  %v8075_v2 = vcombine.high %v2092_v57, %v2096_v58  ;;  %8931 = vset.pattern.permute.xlu1 %v9468_v4  ;;  %v8056_v4 = vcombine.low %v2075_v13, %v2079_v16  ;;  %v2102_v13 = vld [vmem:[#allocation11 + $0x7d8] sm:$0xff] }
 0x1fe   : > { %4114 = vperm.xlu0 %8937, %v9964_v14   ;;  %v2106_v16 = vld [vmem:[#allocation11 + $0x918] sm:$0xff] }
 0x1ff   : > { %1908 = vmatpush1.bf16.msra.mxu1 %v7996_v60  ;;  %1951 = vmatpush1.bf16.msra.mxu0 %v7998_v5  ;;  %v2087_v60 = vld [vmem:[#allocation11 + $0x400] sm:$0xff]  ;;  %v2084_v5 = vld [vmem:[#allocation11 + $0x2c8] sm:$0xff] }
 0x200   : > { %2501 = vmatprep.subr.bf16.mxu1 %v8113_v6  ;;  %2544 = vmatprep.subr.bf16.mxu0 %v8115_v7  ;;  %v2088_v6 = vld [vmem:[#allocation11 + $0x408] sm:$0xff]  ;;  %v8074_v7 = vcombine.low %v2092_v57, %v2096_v58  ;;  %v8065_v8 = vcombine.high %v2083_v3, %v2087_v60  ;;  %v8064_v21 = vcombine.low %v2083_v3, %v2087_v60  ;;  %v2114_v3 = vld [vmem:[#allocation11 + $0xb98] sm:$0xff] }
 0x201   : > { %v8067_v10 = vcombine.high %v2084_v5, %v2088_v6  ;;  %v8066_v23 = vcombine.low %v2084_v5, %v2088_v6 }
 0x202   : > { %1926 = vmatmul.mubr.bf16.vlgmr.msra.gmra.mxu1 %v9882_v45  ;;  %1969 = vmatmul.mubr.bf16.vlgmr.msra.gmra.mxu0 %v9882_v45 }
 0x203   : > { %2502 = vmatpush1.bf16.msra.mxu1 %v8112_v17  ;;  %2545 = vmatpush1.bf16.msra.mxu0 %v8114_v18  ;;  %v2076_v17 = vld [vmem:[#allocation11 + $0x48] sm:$0xff] }
 0x204   : > { %2503 = vmatprep.subr.bf16.mxu1 %v8105_v19  ;;  %2546 = vmatprep.subr.bf16.mxu0 %v8107_v20  ;;  %v2080_v18 = vld [vmem:[#allocation11 + $0x188] sm:$0xff]  ;;  %v9971_v19 = vpop.permute.xlu1 %1992 }
 0x205   : > { %2533 = vmatprep.mubr.bf16.mxu1 %v11289_v12  ;;  %2576 = vmatprep.mubr.bf16.mxu0 %v11289_v12  ;;  %11378 = vst [vmem:[#allocation36_spill] sm:$0xff] %v9971_v19  ;;  %v9974_v20 = vld [vmem:[%s9786_s26] sm:$0xff]  ;;  %v8059_v25 = vcombine.high %v2076_v17, %v2080_v18  ;;  %v8058_v32 = vcombine.low %v2076_v17, %v2080_v18 }
 0x206   : > { %4074 = vperm.xlu1 %8931, %v9974_v20   ;;  %v2787_v19 = vld [vmem:[#allocation11 + $0x570] sm:$0xff] }
 0x207   : > { %2504 = vmatpush1.bf16.msra.mxu1 %v8104_v27  ;;  %2547 = vmatpush1.bf16.msra.mxu0 %v8106_v29  ;;  %v2137_v27 = vld [vmem:[#allocation11 + $0x1310] sm:$0xff]  ;;  %v2134_v29 = vld [vmem:[#allocation11 + $0x11d8] sm:$0xff] }
 0x208   : > { %2505 = vmatprep.subr.bf16.mxu1 %v8097_v30  ;;  %2548 = vmatprep.subr.bf16.mxu0 %v8099_v31  ;;  %v2138_v30 = vld [vmem:[#allocation11 + $0x1318] sm:$0xff]  ;;  %v9472_v31 = vmov 34   ;;  %v9977_v33 = vpop.permute.xlu1 %2004  ;;  %v8117_v34 = vcombine.high %v2133_v26, %v2137_v27  ;;  %v8116_v43 = vcombine.low %v2133_v26, %v2137_v27 }
 0x209   : > { %11379 = vst [vmem:[#allocation37_spill] sm:$0xff] %v9977_v33  ;;  %v8119_v35 = vcombine.high %v2134_v29, %v2138_v30  ;;  %v8118_v44 = vcombine.low %v2134_v29, %v2138_v30  ;;  %v2098_v26 = vld [vmem:[#allocation11 + $0x698] sm:$0xff]  ;;  %v8086_v29 = vcombine.low %v2102_v13, %v2106_v16 }
 0x20a   : > { %8933 = vset.pattern.permute.xlu1 %v9472_v31 }
 0x20b   : > { %2506 = vmatpush1.bf16.msra.mxu1 %v8096_v38  ;;  %2549 = vmatpush1.bf16.msra.mxu0 %v8098_v39  ;;  %v2125_v38 = vld [vmem:[#allocation11 + $0xf50] sm:$0xff] }
 0x20c   : > { %2507 = vmatprep.subr.bf16.mxu1 %v8089_v40  ;;  %2550 = vmatprep.subr.bf16.mxu0 %v8091_v41  ;;  %v2129_v39 = vld [vmem:[#allocation11 + $0x1090] sm:$0xff]  ;;  %v2126_v40 = vld [vmem:[#allocation11 + $0xf58] sm:$0xff]  ;;  %v9981_v55 = vpop.permute.xlu1 %2008 }
 0x20d   : > { %v2130_v41 = vld [vmem:[#allocation11 + $0x1098] sm:$0xff]  ;;  %4086 = vperm.xlu1 %8933, %v9974_v20   ;;  %v8109_v46 = vcombine.high %v2125_v38, %v2129_v39  ;;  %v8108_v56 = vcombine.low %v2125_v38, %v2129_v39  ;;  %v11285_v38 = vmov 37  }
 0x20e   : > { %v8111_v48 = vcombine.high %v2126_v40, %v2130_v41  ;;  %v8110_v57 = vcombine.low %v2126_v40, %v2130_v41 }
 0x20f   : > { %2508 = vmatpush1.bf16.msra.mxu1 %v8088_v50  ;;  %2551 = vmatpush1.bf16.msra.mxu0 %v8090_v51  ;;  %v2117_v50 = vld [vmem:[#allocation11 + $0xcd0] sm:$0xff] }
 0x210   : > { %2509 = vmatprep.subr.bf16.mxu1 %v8081_v52  ;;  %2552 = vmatprep.subr.bf16.mxu0 %v8083_v54  ;;  %v2121_v51 = vld [vmem:[#allocation11 + $0xe10] sm:$0xff]  ;;  %v2118_v52 = vld [vmem:[#allocation11 + $0xcd8] sm:$0xff]  ;;  %v9988_v6 = vpop.permute.xlu1 %2020 }
 0x211   : > { %v2122_v54 = vld [vmem:[#allocation11 + $0xe18] sm:$0xff]  ;;  %4090 = vperm.xlu1 %8933, %v9964_v14   ;;  %v8101_v58 = vcombine.high %v2117_v50, %v2121_v51  ;;  %v8100_v60 = vcombine.low %v2117_v50, %v2121_v51 }
 0x212   : > { %v8102_v5 = vcombine.low %v2118_v52, %v2122_v54  ;;  %v2082_v50 = vld [vmem:[#allocation11 + $0x198] sm:$0xff] }
 0x213   : > { %2510 = vmatpush1.bf16.msra.mxu1 %v8080_v15  ;;  %2553 = vmatpush1.bf16.msra.mxu0 %v8082_v62  ;;  %v8103_v15 = vcombine.high %v2118_v52, %v2122_v54  ;;  %v2109_v62 = vld [vmem:[#allocation11 + $0xa50] sm:$0xff] }
 0x214   : > { %2511 = vmatprep.subr.bf16.mxu1 %v8073_v1  ;;  %2554 = vmatprep.subr.bf16.mxu0 %v8075_v2  ;;  %v2113_v1 = vld [vmem:[#allocation11 + $0xb90] sm:$0xff]  ;;  %v2110_v2 = vld [vmem:[#allocation11 + $0xa58] sm:$0xff]  ;;  %v9992_v27 = vpop.permute.xlu1 %2028 }
 0x215   : > { %8935 = vset.pattern.permute.xlu1 %v9470_v37  ;;  %v8092_v17 = vcombine.low %v2109_v62, %v2113_v1  ;;  %v8094_v37 = vcombine.low %v2110_v2, %v2114_v3  ;;  %11380 = vst [vmem:[#allocation38_spill] sm:$0xff] %v9992_v27 }
 0x216   : > { %4102 = vperm.xlu1 %8935, %v9964_v14  }
 0x217   : > { %2512 = vmatpush1.bf16.msra.mxu1 %v8072_v47  ;;  %2555 = vmatpush1.bf16.msra.mxu0 %v8074_v7  ;;  %v8093_v47 = vcombine.high %v2109_v62, %v2113_v1  ;;  %v8095_v7 = vcombine.high %v2110_v2, %v2114_v3  ;;  %v2830_v62 = vld [vmem:[#allocation11 + $0x1328] sm:$0xff]  ;;  %v11284_v1 = vmov 38  }
 0x218   : > { %2513 = vmatprep.subr.bf16.mxu1 %v8065_v8  ;;  %2556 = vmatprep.subr.bf16.mxu0 %v8067_v10  ;;  %v2101_v8 = vld [vmem:[#allocation11 + $0x7d0] sm:$0xff]  ;;  %v9996_v40 = vpop.permute.xlu1 %2040 }
 0x219   : > { %v2105_v10 = vld [vmem:[#allocation11 + $0x910] sm:$0xff]  ;;  %11381 = vst [vmem:[#allocation39_spill] sm:$0xff] %v9996_v40 }
 0x21a   : > { %v8085_v18 = vcombine.high %v2101_v8, %v2105_v10  ;;  %8936 = vset.pattern.permute.xlu1 %v9471_v59  ;;  %v8084_v14 = vcombine.low %v2101_v8, %v2105_v10  ;;  %v2821_v8 = vld [vmem:[#allocation11 + $0x10a0] sm:$0xff]  ;;  %v2818_v10 = vld [vmem:[#allocation11 + $0xf68] sm:$0xff] }
 0x21b   : > { %2514 = vmatpush1.bf16.msra.mxu1 %v8064_v21  ;;  %2557 = vmatpush1.bf16.msra.mxu0 %v8066_v23  ;;  %v8087_v21 = vcombine.high %v2102_v13, %v2106_v16  ;;  %v2093_v23 = vld [vmem:[#allocation11 + $0x550] sm:$0xff]  ;;  %v2822_v13 = vld [vmem:[#allocation11 + $0x10a8] sm:$0xff]  ;;  %v11283_v16 = vmov 40  }
 0x21c   : > { %2515 = vmatprep.subr.bf16.mxu1 %v8057_v24  ;;  %2558 = vmatprep.subr.bf16.mxu0 %v8059_v25  ;;  %v2097_v24 = vld [vmem:[#allocation11 + $0x690] sm:$0xff]  ;;  %v2094_v25 = vld [vmem:[#allocation11 + $0x558] sm:$0xff]  ;;  %v10000_v2 = vpop.permute.xlu1 %2044 }
 0x21d   : > { %4110 = vperm.xlu1 %8936, %v9974_v20   ;;  %v8077_v30 = vcombine.high %v2093_v23, %v2097_v24  ;;  %v8079_v31 = vcombine.high %v2094_v25, %v2098_v26  ;;  %v8076_v59 = vcombine.low %v2093_v23, %v2097_v24  ;;  %v8078_v39 = vcombine.low %v2094_v25, %v2098_v26  ;;  %v2809_v24 = vld [vmem:[#allocation11 + $0xce0] sm:$0xff]  ;;  %v2810_v26 = vld [vmem:[#allocation11 + $0xce8] sm:$0xff] }
 0x21e   : > { %v8171_v23 = vcombine.high %v2818_v10, %v2822_v13  ;;  %v2813_v25 = vld [vmem:[#allocation11 + $0xe20] sm:$0xff] }
 0x21f   : > { %2516 = vmatpush1.bf16.msra.mxu1 %v8056_v4  ;;  %2559 = vmatpush1.bf16.msra.mxu0 %v8058_v32  ;;  %v2085_v4 = vld [vmem:[#allocation11 + $0x2d0] sm:$0xff] }
 0x220   : > { %2587 = vmatprep.subr.bf16.mxu1 %v8117_v34  ;;  %2630 = vmatprep.subr.bf16.mxu0 %v8119_v35  ;;  %v2089_v32 = vld [vmem:[#allocation11 + $0x410] sm:$0xff]  ;;  %v2086_v34 = vld [vmem:[#allocation11 + $0x2d8] sm:$0xff] }
 0x221   : > { %v2090_v35 = vld [vmem:[#allocation11 + $0x418] sm:$0xff]  ;;  %8938 = vset.pattern.permute.xlu1 %v11285_v38  ;;  %v8069_v41 = vcombine.high %v2085_v4, %v2089_v32  ;;  %v8068_v51 = vcombine.low %v2085_v4, %v2089_v32  ;;  %v2801_v32 = vld [vmem:[#allocation11 + $0xa60] sm:$0xff] }
 0x222   : > { %2534 = vmatmul.mubr.bf16.vlgmr.msra.gmra.mxu1 %v9882_v45  ;;  %2577 = vmatmul.mubr.bf16.vlgmr.msra.gmra.mxu0 %v9882_v45  ;;  %v8070_v52 = vcombine.low %v2086_v34, %v2090_v35 }
 0x223   : > { %2588 = vmatpush1.bf16.msra.mxu1 %v8116_v43  ;;  %2631 = vmatpush1.bf16.msra.mxu0 %v8118_v44  ;;  %v8071_v43 = vcombine.high %v2086_v34, %v2090_v35  ;;  %v2077_v44 = vld [vmem:[#allocation11 + $0x50] sm:$0xff]  ;;  %v2805_v34 = vld [vmem:[#allocation11 + $0xba0] sm:$0xff]  ;;  %v2802_v35 = vld [vmem:[#allocation11 + $0xa68] sm:$0xff] }
 0x224   : > { %2589 = vmatprep.subr.bf16.mxu1 %v8109_v46  ;;  %2632 = vmatprep.subr.bf16.mxu0 %v8111_v48  ;;  %v2081_v46 = vld [vmem:[#allocation11 + $0x190] sm:$0xff]  ;;  %v2078_v48 = vld [vmem:[#allocation11 + $0x58] sm:$0xff] }
 0x225   : > { %2619 = vmatprep.mubr.bf16.mxu1 %v11289_v12  ;;  %2662 = vmatprep.mubr.bf16.mxu0 %v11289_v12  ;;  %v8061_v54 = vcombine.high %v2077_v44, %v2081_v46  ;;  %v8060_v3 = vcombine.low %v2077_v44, %v2081_v46  ;;  %v8153_v46 = vcombine.high %v2801_v32, %v2805_v34 }
 0x226   : > { %4122 = vperm.xlu1 %8938, %v9974_v20  }
 0x227   : > { %2590 = vmatpush1.bf16.msra.mxu1 %v8108_v56  ;;  %2633 = vmatpush1.bf16.msra.mxu0 %v8110_v57  ;;  %v8063_v56 = vcombine.high %v2078_v48, %v2082_v50  ;;  %v2825_v57 = vld [vmem:[#allocation11 + $0x11e0] sm:$0xff] }
 0x228   : > { %2591 = vmatprep.subr.bf16.mxu1 %v8101_v58  ;;  %2634 = vmatprep.subr.bf16.mxu0 %v8103_v15  ;;  %v2829_v58 = vld [vmem:[#allocation11 + $0x1320] sm:$0xff]  ;;  %v2826_v15 = vld [vmem:[#allocation11 + $0x11e8] sm:$0xff] }
 0x22a   : > { %8939 = vset.pattern.permute.xlu1 %v11284_v1 }
 0x22b   : > { %2592 = vmatpush1.bf16.msra.mxu1 %v8100_v60  ;;  %2635 = vmatpush1.bf16.msra.mxu0 %v8102_v5  ;;  %v8062_v60 = vcombine.low %v2078_v48, %v2082_v50  ;;  %v8177_v5 = vcombine.high %v2825_v57, %v2829_v58  ;;  %v2793_v50 = vld [vmem:[#allocation11 + $0x7e0] sm:$0xff] }
 0x22c   : > { %2593 = vmatprep.subr.bf16.mxu1 %v8093_v47  ;;  %2636 = vmatprep.subr.bf16.mxu0 %v8095_v7  ;;  %v8179_v47 = vcombine.high %v2826_v15, %v2830_v62  ;;  %v2817_v7 = vld [vmem:[#allocation11 + $0xf60] sm:$0xff] }
 0x22d   : > { %4134 = vperm.xlu1 %8939, %v9974_v20  }
 0x22f   : > { %2594 = vmatpush1.bf16.msra.mxu1 %v8092_v17  ;;  %2637 = vmatpush1.bf16.msra.mxu0 %v8094_v37  ;;  %v8176_v17 = vcombine.low %v2825_v57, %v2829_v58  ;;  %v8178_v37 = vcombine.low %v2826_v15, %v2830_v62 }
 0x230   : > { %2595 = vmatprep.subr.bf16.mxu1 %v8085_v18  ;;  %2638 = vmatprep.subr.bf16.mxu0 %v8087_v21  ;;  %v10004_v18 = vpop.permute.xlu1 %2056  ;;  %v8169_v21 = vcombine.high %v2817_v7, %v2821_v8 }
 0x231   : > { %8941 = vset.pattern.permute.xlu1 %v11283_v16 }
 0x232   : > { %4756 = vperm.xlu1 %8941, %v9974_v20  }
 0x233   : > { %2596 = vmatpush1.bf16.msra.mxu1 %v8084_v14  ;;  %2639 = vmatpush1.bf16.msra.mxu0 %v8086_v29  ;;  %v2814_v14 = vld [vmem:[#allocation11 + $0xe28] sm:$0xff]  ;;  %v8168_v29 = vcombine.low %v2817_v7, %v2821_v8  ;;  %v11281_v7 = vmov 43  }
 0x234   : > { %2597 = vmatprep.subr.bf16.mxu1 %v8077_v30  ;;  %2640 = vmatprep.subr.bf16.mxu0 %v8079_v31  ;;  %v8170_v30 = vcombine.low %v2818_v10, %v2822_v13  ;;  %v8161_v31 = vcombine.high %v2809_v24, %v2813_v25  ;;  %v8163_v4 = vcombine.high %v2810_v26, %v2814_v14 }
 0x235   : > { %v8162_v44 = vcombine.low %v2810_v26, %v2814_v14  ;;  %v11280_v26 = vmov 44   ;;  %v11288_v14 = vmov 39  }
 0x236   : > { %8940 = vset.pattern.permute.xlu0 %v11288_v14 }
 0x237   : > { %2598 = vmatpush1.bf16.msra.mxu1 %v8076_v59  ;;  %2641 = vmatpush1.bf16.msra.mxu0 %v8078_v39  ;;  %v2806_v59 = vld [vmem:[#allocation11 + $0xba8] sm:$0xff]  ;;  %v10011_v39 = vpop.permute.xlu1 %2064 }
 0x238   : > { %2599 = vmatprep.subr.bf16.mxu1 %v8069_v41  ;;  %2642 = vmatprep.subr.bf16.mxu0 %v8071_v43  ;;  %11382 = vst [vmem:[#allocation40_spill] sm:$0xff] %v10011_v39  ;;  %v11282_v41 = vmov 41   ;;  %v8160_v43 = vcombine.low %v2809_v24, %v2813_v25  ;;  %v8155_v48 = vcombine.high %v2802_v35, %v2806_v59  ;;  %v2782_v24 = vld [vmem:[#allocation11 + $0x428] sm:$0xff]  ;;  %v2799_v39 = vld [vmem:[#allocation11 + $0x930] sm:$0xff] }
 0x239   : > { %8942 = vset.pattern.permute.xlu1 %v11282_v41  ;;  %v8154_v57 = vcombine.low %v2802_v35, %v2806_v59  ;;  %v2770_v35 = vld [vmem:[#allocation11 + $0x68] sm:$0xff]  ;;  %4146 = vperm.xlu0 %8940, %v9974_v20   ;;  %v11291_v41 = vmov 49  }
 0x23a   : > { %4768 = vperm.xlu1 %8942, %v9974_v20   ;;  %v2774_v59 = vld [vmem:[#allocation11 + $0x1a8] sm:$0xff] }
 0x23b   : > { %2600 = vmatpush1.bf16.msra.mxu1 %v8068_v51  ;;  %2643 = vmatpush1.bf16.msra.mxu0 %v8070_v52  ;;  %v2797_v51 = vld [vmem:[#allocation11 + $0x920] sm:$0xff]  ;;  %v2794_v52 = vld [vmem:[#allocation11 + $0x7e8] sm:$0xff]  ;;  %v10015_v58 = vpop.permute.xlu1 %2674 }
 0x23c   : > { %2601 = vmatprep.subr.bf16.mxu1 %v8061_v54  ;;  %2644 = vmatprep.subr.bf16.mxu0 %v8063_v56  ;;  %v2798_v54 = vld [vmem:[#allocation11 + $0x928] sm:$0xff]  ;;  %v8152_v56 = vcombine.low %v2801_v32, %v2805_v34  ;;  %11383 = vst [vmem:[#allocation41_spill] sm:$0xff] %v10015_v58  ;;  %v8145_v15 = vcombine.high %v2793_v50, %v2797_v51  ;;  %v2769_v32 = vld [vmem:[#allocation11 + $0x60] sm:$0xff] }
 0x23d   : > { %v8147_v62 = vcombine.high %v2794_v52, %v2798_v54  ;;  %v8144_v8 = vcombine.low %v2793_v50, %v2797_v51  ;;  %v8146_v10 = vcombine.low %v2794_v52, %v2798_v54  ;;  %v2773_v34 = vld [vmem:[#allocation11 + $0x1a0] sm:$0xff]  ;;  %v8123_v50 = vcombine.high %v2770_v35, %v2774_v59  ;;  %v2827_v51 = vld [vmem:[#allocation11 + $0x11f0] sm:$0xff]  ;;  %v2828_v54 = vld [vmem:[#allocation11 + $0x11f8] sm:$0xff] }
 0x23e   : > { %8944 = vset.pattern.permute.xlu1 %v11281_v7  ;;  %v2831_v52 = vld [vmem:[#allocation11 + $0x1330] sm:$0xff]  ;;  %v2808_v7 = vld [vmem:[#allocation11 + $0xbb8] sm:$0xff] }
 0x23f   : > { %2602 = vmatpush1.bf16.msra.mxu1 %v8060_v3  ;;  %2645 = vmatpush1.bf16.msra.mxu0 %v8062_v60  ;;  %v2785_v3 = vld [vmem:[#allocation11 + $0x560] sm:$0xff]  ;;  %v10019_v25 = vpop.permute.xlu1 %2678 }
 0x240   : > { %3195 = vmatprep.subr.bf16.mxu1 %v8177_v5  ;;  %3238 = vmatprep.subr.bf16.mxu0 %v8179_v47  ;;  %v2789_v60 = vld [vmem:[#allocation11 + $0x6a0] sm:$0xff]  ;;  %v2786_v5 = vld [vmem:[#allocation11 + $0x568] sm:$0xff] }
 0x241   : > { %v2790_v47 = vld [vmem:[#allocation11 + $0x6a8] sm:$0xff]  ;;  %4792 = vperm.xlu1 %8944, %v9974_v20   ;;  %v8137_v13 = vcombine.high %v2785_v3, %v2789_v60 }
 0x242   : > { %2620 = vmatmul.mubr.bf16.vlgmr.msra.gmra.mxu1 %v9882_v45  ;;  %2663 = vmatmul.mubr.bf16.vlgmr.msra.gmra.mxu0 %v9882_v45 }
 0x243   : > { %3196 = vmatpush1.bf16.msra.mxu1 %v8176_v17  ;;  %3239 = vmatpush1.bf16.msra.mxu0 %v8178_v37  ;;  %v8139_v17 = vcombine.high %v2786_v5, %v2790_v47  ;;  %v2777_v37 = vld [vmem:[#allocation11 + $0x2e0] sm:$0xff] }
 0x244   : > { %3197 = vmatprep.subr.bf16.mxu1 %v8169_v21  ;;  %3240 = vmatprep.subr.bf16.mxu0 %v8171_v23  ;;  %v2781_v21 = vld [vmem:[#allocation11 + $0x420] sm:$0xff]  ;;  %v2778_v23 = vld [vmem:[#allocation11 + $0x2e8] sm:$0xff] }
 0x245   : > { %3227 = vmatprep.mubr.bf16.mxu1 %v11289_v12  ;;  %3270 = vmatprep.mubr.bf16.mxu0 %v11289_v12 }
 0x246   : > { %8945 = vset.pattern.permute.xlu1 %v11280_v26 }
 0x247   : > { %3198 = vmatpush1.bf16.msra.mxu1 %v8168_v29  ;;  %3241 = vmatpush1.bf16.msra.mxu0 %v8170_v30  ;;  %v8136_v29 = vcombine.low %v2785_v3, %v2789_v60  ;;  %v8138_v30 = vcombine.low %v2786_v5, %v2790_v47  ;;  %v10031_v3 = vpop.permute.xlu0 %1285  ;;  %v8120_v60 = vcombine.low %v2769_v32, %v2773_v34 }
 0x248   : > { %3199 = vmatprep.subr.bf16.mxu1 %v8161_v31  ;;  %3242 = vmatprep.subr.bf16.mxu0 %v8163_v4  ;;  %v8129_v31 = vcombine.high %v2777_v37, %v2781_v21  ;;  %v8131_v4 = vcombine.high %v2778_v23, %v2782_v24  ;;  %11384 = vst [vmem:[#allocation42_spill] sm:$0xff] %v10031_v3  ;;  %v4185_v3 = vld [vmem:[#allocation11 + $0x960] sm:$0xff] }
 0x249   : > { %4804 = vperm.xlu1 %8945, %v9974_v20   ;;  %v8122_v5 = vcombine.low %v2770_v35, %v2774_v59  ;;  %v8181_v47 = vcombine.high %v2827_v51, %v2831_v52 }
 0x24b   : > { %3200 = vmatpush1.bf16.msra.mxu1 %v8160_v43  ;;  %3243 = vmatpush1.bf16.msra.mxu0 %v8162_v44  ;;  %v8128_v43 = vcombine.low %v2777_v37, %v2781_v21  ;;  %v8130_v44 = vcombine.low %v2778_v23, %v2782_v24  ;;  %v2820_v37 = vld [vmem:[#allocation11 + $0xf78] sm:$0xff]  ;;  %v11278_v24 = vmov 47  }
 0x24c   : > { %3201 = vmatprep.subr.bf16.mxu1 %v8153_v46  ;;  %3244 = vmatprep.subr.bf16.mxu0 %v8155_v48  ;;  %v10025_v46 = vpop.permute.xlu1 %2690  ;;  %v8121_v48 = vcombine.high %v2769_v32, %v2773_v34  ;;  %v2824_v21 = vld [vmem:[#allocation11 + $0x10b8] sm:$0xff]  ;;  %v10039_v34 = vpop.permute.xlu0 %1290 }
 0x24d   : > { %v8175_v32 = vcombine.high %v2820_v37, %v2824_v21 }
 0x24f   : > { %3202 = vmatpush1.bf16.msra.mxu1 %v8152_v56  ;;  %3245 = vmatpush1.bf16.msra.mxu0 %v8154_v57  ;;  %v2832_v56 = vld [vmem:[#allocation11 + $0x1338] sm:$0xff]  ;;  %v751_v57 = vlaneseq }
 0x250   : > { %3203 = vmatprep.subr.bf16.mxu1 %v8145_v15  ;;  %3246 = vmatprep.subr.bf16.mxu0 %v8147_v62  ;;  %v11279_v15 = vmov 46   ;;  %v11287_v62 = vmov 42   ;;  %v10035_v23 = vpop.permute.xlu1 %2698  ;;  %v10087_v16 = vpop.permute.xlu0 %1310 }
 0x251   : > { %8947 = vset.pattern.permute.xlu1 %v11279_v15  ;;  %8943 = vset.pattern.permute.xlu0 %v11287_v62  ;;  %11385 = vst [vmem:[#allocation43_spill] sm:$0xff] %v10035_v23  ;;  %11388 = vst [vmem:[#allocation46_spill] sm:$0xff] %v10087_v16  ;;  %v3489_v16 = vld [vmem:[#allocation11 + $0x810] sm:$0xff] }
 0x252   : > { %4828 = vperm.xlu1 %8947, %v9974_v20   ;;  %4780 = vperm.xlu0 %8943, %v9974_v20  }
 0x253   : > { %3204 = vmatpush1.bf16.msra.mxu1 %v8144_v8  ;;  %3247 = vmatpush1.bf16.msra.mxu0 %v8146_v10  ;;  %v8183_v8 = vcombine.high %v2828_v54, %v2832_v56  ;;  %v2819_v10 = vld [vmem:[#allocation11 + $0xf70] sm:$0xff] }
 0x254   : > { %3205 = vmatprep.subr.bf16.mxu1 %v8137_v13  ;;  %3248 = vmatprep.subr.bf16.mxu0 %v8139_v17  ;;  %v10033_v13 = vshrl.u32 %v751_v57, 7  ;;  %v2823_v17 = vld [vmem:[#allocation11 + $0x10b0] sm:$0xff] }
 0x255   : > { %v8172_v57 = vcombine.low %v2819_v10, %v2823_v17 }
 0x256   : > { %8948 = vset.pattern.permute.xlu1 %v11278_v24  ;;  %v10042_v35 = vsub.s32 0, %v10033_v13  ;;  %v10045_v59 = vsub.s32 2, %v10033_v13  ;;  %v8174_v24 = vcombine.low %v2820_v37, %v2824_v21 }
 0x257   : > { %3206 = vmatpush1.bf16.msra.mxu1 %v8136_v29  ;;  %3249 = vmatpush1.bf16.msra.mxu0 %v8138_v30  ;;  %v11286_v29 = vmov 45   ;;  %v8180_v30 = vcombine.low %v2827_v51, %v2831_v52  ;;  %v10060_v52 = vsub.s32 1, %v10033_v13 }
 0x258   : > { %3207 = vmatprep.subr.bf16.mxu1 %v8129_v31  ;;  %3250 = vmatprep.subr.bf16.mxu0 %v8131_v4  ;;  %v8182_v31 = vcombine.low %v2828_v54, %v2832_v56  ;;  %v8173_v4 = vcombine.high %v2819_v10, %v2823_v17  ;;  %v2812_v54 = vld [vmem:[#allocation11 + $0xcf8] sm:$0xff] }
 0x259   : > { %8946 = vset.pattern.permute.xlu0 %v11286_v29  ;;  %4840 = vperm.xlu1 %8948, %v9974_v20   ;;  %v2816_v56 = vld [vmem:[#allocation11 + $0xe38] sm:$0xff] }
 0x25a   : > { %4816 = vperm.xlu0 %8946, %v9974_v20   ;;  %v8167_v17 = vcombine.high %v2812_v54, %v2816_v56 }
 0x25b   : > { %3208 = vmatpush1.bf16.msra.mxu1 %v8128_v43  ;;  %3251 = vmatpush1.bf16.msra.mxu0 %v8130_v44  ;;  %v10047_v43 = vld [vmem:[#allocation11 + $0xcf0] sm:$0xff] }
 0x25c   : > { %3209 = vmatprep.subr.bf16.mxu1 %v8121_v48  ;;  %3252 = vmatprep.subr.bf16.mxu0 %v8123_v50  ;;  %v2815_v44 = vld [vmem:[#allocation11 + $0xe30] sm:$0xff]  ;;  %v10053_v48 = vld [vmem:[#allocation13] sm:$0xff] }
 0x25d   : > { %v8165_v15 = vcombine.high %v10047_v43, %v2815_v44  ;;  %v10074_v26 = vrot.slane %v10053_v48, %v10042_v35  ;;  %v10078_v10 = vrot.slane %v10053_v48, %v10045_v59  ;;  %8950 = vset.pattern.permute.xlu1 %v11291_v41  ;;  %v8164_v29 = vcombine.low %v10047_v43, %v2815_v44  ;;  %v2796_v44 = vld [vmem:[#allocation11 + $0x7f8] sm:$0xff] }
 0x25e   : > { %5462 = vperm.xlu1 %8950, %v9974_v20  }
 0x25f   : > { %3210 = vmatpush1.bf16.msra.mxu1 %v8120_v60  ;;  %3253 = vmatpush1.bf16.msra.mxu0 %v8122_v5  ;;  %v10062_v60 = vpop.permute.xlu1 %2710 }
 0x260   : > { %3281 = vmatprep.subr.bf16.mxu1 %v8181_v47  ;;  %3324 = vmatprep.subr.bf16.mxu0 %v8183_v8  ;;  %11386 = vst [vmem:[#allocation44_spill] sm:$0xff] %v10062_v60  ;;  %v10067_v47 = vsub.s32 3, %v10033_v13 }
 0x262   : > { %3228 = vmatmul.mubr.bf16.vlgmr.msra.gmra.mxu1 %v9882_v45  ;;  %3271 = vmatmul.mubr.bf16.vlgmr.msra.gmra.mxu0 %v9882_v45  ;;  %v10055_v50 = vpop.f32.mrf.mxu1  ;;  %v10057_v51 = vpop.f32.mrf.mxu0  ;;  %v10094_v62 = vrot.slane %v10053_v48, %v10067_v47 }
 0x263   : > { %3282 = vmatpush1.bf16.msra.mxu1 %v8180_v30  ;;  %3325 = vmatpush1.bf16.msra.mxu0 %v8182_v31  ;;  %v2803_v30 = vld [vmem:[#allocation11 + $0xa70] sm:$0xff] }
 0x264   : > { %v10064_v5 = vpop.f32.mrf.mxu1  ;;  %v10069_v8 = vpop.f32.mrf.mxu0  ;;  %3283 = vmatprep.subr.bf16.mxu1 %v8173_v4  ;;  %3326 = vmatprep.subr.bf16.mxu0 %v8175_v32  ;;  %v2807_v31 = vld [vmem:[#allocation11 + $0xbb0] sm:$0xff]  ;;  %v10083_v4 = vrot.slane %v10053_v48, %v10060_v52  ;;  %v2804_v32 = vld [vmem:[#allocation11 + $0xa78] sm:$0xff]  ;;  %11389 = vst [vmem:[#allocation47_spill] sm:$0xff] %v10094_v62 }
 0x265   : > { %11387 = vst [vmem:[#allocation45_spill] sm:$0xff] %v10069_v8  ;;  %3313 = vmatprep.mubr.bf16.mxu1 %v11289_v12  ;;  %3356 = vmatprep.mubr.bf16.mxu0 %v11289_v12  ;;  %v8166_v12 = vcombine.low %v2812_v54, %v2816_v56  ;;  %v8157_v23 = vcombine.high %v2803_v30, %v2807_v31  ;;  %v1327_v56 = vpop.permute.xlu0 %1326  ;;  %v3492_v8 = vld [vmem:[#allocation11 + $0x948] sm:$0xff] }
 0x266   : > { %v1149_v37 = vpop.f32.mrf.mxu1  ;;  %v1192_v21 = vpop.f32.mrf.mxu0  ;;  %v8159_v58 = vcombine.high %v2804_v32, %v2808_v7 }
 0x267   : > { %v1150_v1 = vadd.f32 %v1149_v37, %v10074_v26  ;;  %v1193_v38 = vadd.f32 %v1192_v21, %v10078_v10  ;;  %3284 = vmatpush1.bf16.msra.mxu1 %v8172_v57  ;;  %3327 = vmatpush1.bf16.msra.mxu0 %v8174_v24  ;;  %v2795_v37 = vld [vmem:[#allocation11 + $0x7f0] sm:$0xff]  ;;  %v10097_v21 = vpop.permute.xlu1 %2714  ;;  %v2800_v57 = vld [vmem:[#allocation11 + $0x938] sm:$0xff]  ;;  %v11292_v24 = vmov 48  }
 0x268   : > { %v1151_v14 = vpop.f32.mrf.mxu1  ;;  %v1194_v60 = vpop.f32.mrf.mxu0  ;;  %3285 = vmatprep.subr.bf16.mxu1 %v8165_v15  ;;  %3328 = vmatprep.subr.bf16.mxu0 %v8167_v17  ;;  %v8158_v17 = vcombine.low %v2804_v32, %v2808_v7  ;;  %v8151_v33 = vcombine.high %v2796_v44, %v2800_v57  ;;  %v11295_v32 = vmov 52  }
 0x269   : > { %v1152_v41 = vadd.f32 %v1151_v14, %v10083_v4  ;;  %v1195_v43 = vadd.f32 %v1194_v60, %v10094_v62  ;;  %8949 = vset.pattern.permute.xlu0 %v11292_v24  ;;  %v1294_v15 = vmul.f32 %v10039_v34, %v1150_v1  ;;  %v8156_v14 = vcombine.low %v2803_v30, %v2807_v31  ;;  %v2791_v24 = vld [vmem:[#allocation11 + $0x6b0] sm:$0xff]  ;;  %v2792_v1 = vld [vmem:[#allocation11 + $0x6b8] sm:$0xff] }
 0x26a   : > { %5450 = vperm.xlu0 %8949, %v9974_v20   ;;  %v8149_v60 = vcombine.high %v2795_v37, %v2799_v39  ;;  %v1318_v40 = vmul.f32 %v9927_v28, %v1193_v38  ;;  %v11296_v34 = vmov 50   ;;  %v8150_v28 = vcombine.low %v2796_v44, %v2800_v57  ;;  %v2783_v30 = vld [vmem:[#allocation11 + $0x430] sm:$0xff] }
 0x26b   : > { %v1306_v54 = vmul.f32 %v9920_v11, %v1152_v41  ;;  %3286 = vmatpush1.bf16.msra.mxu1 %v8164_v29  ;;  %3329 = vmatpush1.bf16.msra.mxu0 %v8166_v12  ;;  %v1330_v41 = vmul.f32 %v1327_v56, %v1195_v43  ;;  %v8148_v29 = vcombine.low %v2795_v37, %v2799_v39  ;;  %v10108_v12 = vpop.permute.xlu1 %2726  ;;  %v11300_v31 = vmov 51   ;;  %v2771_v44 = vld [vmem:[#allocation11 + $0x70] sm:$0xff] }
 0x26c   : > { %3287 = vmatprep.subr.bf16.mxu1 %v8157_v23  ;;  %3330 = vmatprep.subr.bf16.mxu0 %v8159_v58  ;;  %v8141_v38 = vcombine.high %v2787_v19, %v2791_v24  ;;  %v8143_v7 = vcombine.high %v2788_v36, %v2792_v1  ;;  %v2779_v23 = vld [vmem:[#allocation11 + $0x2f0] sm:$0xff]  ;;  %v8140_v39 = vcombine.low %v2787_v19, %v2791_v24  ;;  %v11299_v56 = vmov 54  }
 0x26d   : > { %v1308_v27 = vadd.f32 %v1306_v54, %v1294_v15  ;;  %8951 = vset.pattern.permute.xlu1 %v11296_v34  ;;  %v8142_v37 = vcombine.low %v2788_v36, %v2792_v1  ;;  %v8133_v43 = vcombine.high %v2779_v23, %v2783_v30  ;;  %v2775_v57 = vld [vmem:[#allocation11 + $0x1b0] sm:$0xff]  ;;  %v2772_v54 = vld [vmem:[#allocation11 + $0x78] sm:$0xff]  ;;  %v8132_v19 = vcombine.low %v2779_v23, %v2783_v30  ;;  %v3523_v1 = vld [vmem:[#allocation11 + $0x1340] sm:$0xff] }
 0x26e   : > { %5474 = vperm.xlu1 %8951, %v9974_v20   ;;  %8952 = vset.pattern.permute.xlu0 %v11300_v31  ;;  %v8125_v24 = vcombine.high %v2771_v44, %v2775_v57  ;;  %v3500_v31 = vld [vmem:[#allocation11 + $0xbc8] sm:$0xff] }
 0x26f   : > { %v1320_v11 = vadd.f32 %v1318_v40, %v1308_v27  ;;  %3288 = vmatpush1.bf16.msra.mxu1 %v8156_v14  ;;  %3331 = vmatpush1.bf16.msra.mxu0 %v8158_v17  ;;  %v2780_v27 = vld [vmem:[#allocation11 + $0x2f8] sm:$0xff]  ;;  %v10116_v15 = vpop.permute.xlu1 %2734 }
 0x270   : > { %3289 = vmatprep.subr.bf16.mxu1 %v8149_v60  ;;  %3332 = vmatprep.subr.bf16.mxu0 %v8151_v33  ;;  %v2784_v40 = vld [vmem:[#allocation11 + $0x438] sm:$0xff]  ;;  %11390 = vst [vmem:[#allocation48_spill] sm:$0xff] %v10116_v15  ;;  %v3519_v60 = vld [vmem:[#allocation11 + $0x1200] sm:$0xff] }
 0x271   : > { %v10110_v58 = vadd.f32 %v1330_v41, %v1320_v11  ;;  %5486 = vperm.xlu0 %8952, %v9974_v20   ;;  %v8135_v33 = vcombine.high %v2780_v27, %v2784_v40  ;;  %v2776_v14 = vld [vmem:[#allocation11 + $0x1b8] sm:$0xff]  ;;  %v8134_v36 = vcombine.low %v2780_v27, %v2784_v40  ;;  %v11294_v11 = vmov 53   ;;  %v3520_v41 = vld [vmem:[#allocation11 + $0x1208] sm:$0xff]  ;;  %v3511_v40 = vld [vmem:[#allocation11 + $0xf80] sm:$0xff] }
 0x272   : > { %8953 = vset.pattern.permute.xlu1 %v11295_v32  ;;  %v8127_v17 = vcombine.high %v2772_v54, %v2776_v14  ;;  %v8126_v23 = vcombine.low %v2772_v54, %v2776_v14  ;;  %v8241_v30 = vcombine.high %v3519_v60, %v3523_v1  ;;  %v10129_v14 = vsub.s32 4, %v10033_v13 }
 0x273   : > { %3290 = vmatpush1.bf16.msra.mxu1 %v8148_v29  ;;  %3333 = vmatpush1.bf16.msra.mxu0 %v8150_v28  ;;  %v3524_v29 = vld [vmem:[#allocation11 + $0x1348] sm:$0xff]  ;;  %v8124_v28 = vcombine.low %v2771_v44, %v2775_v57  ;;  %v8240_v44 = vcombine.low %v3519_v60, %v3523_v1  ;;  %v10141_v1 = vsub.s32 6, %v10033_v13 }
 0x274   : > { %3291 = vmatprep.subr.bf16.mxu1 %v8141_v38  ;;  %3334 = vmatprep.subr.bf16.mxu0 %v8143_v7  ;;  %v10122_v38 = vpop.permute.xlu1 %2746  ;;  %v11298_v7 = vmov 57   ;;  %v8243_v27 = vcombine.high %v3520_v41, %v3524_v29  ;;  %v8242_v57 = vcombine.low %v3520_v41, %v3524_v29  ;;  %v10147_v29 = vsub.s32 5, %v10033_v13 }
 0x275   : > { %5498 = vperm.xlu1 %8953, %v9974_v20   ;;  %8955 = vset.pattern.permute.xlu0 %v11299_v56  ;;  %11391 = vst [vmem:[#allocation49_spill] sm:$0xff] %v10122_v38  ;;  %v3499_v56 = vld [vmem:[#allocation11 + $0xbc0] sm:$0xff] }
 0x276   : > { %5522 = vperm.xlu0 %8955, %v9974_v20  }
 0x277   : > { %3292 = vmatpush1.bf16.msra.mxu1 %v8140_v39  ;;  %3335 = vmatpush1.bf16.msra.mxu0 %v8142_v37  ;;  %v3515_v39 = vld [vmem:[#allocation11 + $0x10c0] sm:$0xff]  ;;  %v3512_v37 = vld [vmem:[#allocation11 + $0xf88] sm:$0xff] }
 0x278   : > { %3293 = vmatprep.subr.bf16.mxu1 %v8133_v43  ;;  %3336 = vmatprep.subr.bf16.mxu0 %v8135_v33  ;;  %v3516_v43 = vld [vmem:[#allocation11 + $0x10c8] sm:$0xff]  ;;  %v11293_v33 = vmov 55   ;;  %v8233_v54 = vcombine.high %v3511_v40, %v3515_v39 }
 0x279   : > { %8954 = vset.pattern.permute.xlu1 %v11294_v11  ;;  %v8232_v11 = vcombine.low %v3511_v40, %v3515_v39  ;;  %v10168_v40 = vrot.slane %v10053_v48, %v10141_v1  ;;  %v10172_v39 = vrot.slane %v10053_v48, %v10147_v29 }
 0x27a   : > { %5510 = vperm.xlu1 %8954, %v9974_v20   ;;  %8958 = vset.pattern.permute.xlu0 %v11298_v7  ;;  %v10164_v7 = vrot.slane %v10053_v48, %v10129_v14 }
 0x27b   : > { %3294 = vmatpush1.bf16.msra.mxu1 %v8132_v19  ;;  %3337 = vmatpush1.bf16.msra.mxu0 %v8134_v36  ;;  %v8235_v19 = vcombine.high %v3512_v37, %v3516_v43  ;;  %v10131_v36 = vld [vmem:[#allocation11 + $0xd00] sm:$0xff]  ;;  %11398 = vst [vmem:[#allocation56_spill] sm:$0xff] %v10168_v40  ;;  %11399 = vst [vmem:[#allocation57_spill] sm:$0xff] %v10172_v39 }
 0x27c   : > { %3295 = vmatprep.subr.bf16.mxu1 %v8125_v24  ;;  %3338 = vmatprep.subr.bf16.mxu0 %v8127_v17  ;;  %v10133_v24 = vld [vmem:[#allocation11 + $0xe40] sm:$0xff]  ;;  %v10135_v17 = vpop.permute.xlu1 %2750  ;;  %11397 = vst [vmem:[#allocation55_spill] sm:$0xff] %v10164_v7 }
 0x27d   : > { %6156 = vperm.xlu0 %8958, %v9974_v20   ;;  %v8224_v15 = vcombine.low %v10131_v36, %v10133_v24 }
 0x27e   : > { %8956 = vset.pattern.permute.xlu1 %v11293_v33  ;;  %v11297_v33 = vmov 60  }
 0x27f   : > { %3296 = vmatpush1.bf16.msra.mxu1 %v8124_v28  ;;  %5534 = vperm.xlu1 %8956, %v9974_v20   ;;  %v10150_v28 = vsub.s32 7, %v10033_v13  ;;  %v8225_v13 = vcombine.high %v10131_v36, %v10133_v24  ;;  %v3491_v36 = vld [vmem:[#allocation11 + $0x940] sm:$0xff] }
 0x280   : > { %3339 = vmatpush1.bf16.msra.mxu0 %v8126_v23  ;;  %3889 = vmatprep.subr.bf16.mxu1 %v8241_v30  ;;  %v3504_v23 = vld [vmem:[#allocation11 + $0xd08] sm:$0xff] }
 0x281   : > { %3932 = vmatprep.subr.bf16.mxu0 %v8243_v27  ;;  %8961 = vset.pattern.permute.xlu0 %v11297_v33  ;;  %v3508_v30 = vld [vmem:[#allocation11 + $0xe48] sm:$0xff]  ;;  %v10154_v27 = vpop.permute.xlu0 %1346  ;;  %v8234_v33 = vcombine.low %v3512_v37, %v3516_v43  ;;  %v10176_v37 = vrot.slane %v10053_v48, %v10150_v28 }
 0x282   : > { %v10138_v60 = vpop.f32.mrf.mxu1  ;;  %v10143_v41 = vpop.f32.mrf.mxu0  ;;  %3314 = vmatmul.mubr.bf16.vlgmr.msra.gmra.mxu1 %v9882_v45  ;;  %6192 = vperm.xlu0 %8961, %v9974_v20   ;;  %11394 = vst [vmem:[#allocation52_spill] sm:$0xff] %v10154_v27  ;;  %v8227_v20 = vcombine.high %v3504_v23, %v3508_v30  ;;  %v8226_v27 = vcombine.low %v3504_v23, %v3508_v30 }
 0x283   : > { %11392 = vst [vmem:[#allocation50_spill] sm:$0xff] %v10138_v60  ;;  %11393 = vst [vmem:[#allocation51_spill] sm:$0xff] %v10143_v41  ;;  %3357 = vmatmul.mubr.bf16.vlgmr.msra.gmra.mxu0 %v9882_v45  ;;  %3890 = vmatpush1.bf16.msra.mxu1 %v8240_v44  ;;  %v3495_v44 = vld [vmem:[#allocation11 + $0xa80] sm:$0xff] }
 0x284   : > { %3933 = vmatpush1.bf16.msra.mxu0 %v8242_v57  ;;  %v10156_v32 = vpop.f32.mrf.mxu1  ;;  %v10158_v34 = vpop.f32.mrf.mxu0  ;;  %3891 = vmatprep.subr.bf16.mxu1 %v8233_v54  ;;  %11400 = vst [vmem:[#allocation58_spill] sm:$0xff] %v10176_v37  ;;  %v3496_v54 = vld [vmem:[#allocation11 + $0xa88] sm:$0xff]  ;;  %v3487_v60 = vld [vmem:[#allocation11 + $0x800] sm:$0xff] }
 0x285   : > { %11395 = vst [vmem:[#allocation53_spill] sm:$0xff] %v10156_v32  ;;  %11396 = vst [vmem:[#allocation54_spill] sm:$0xff] %v10158_v34  ;;  %3934 = vmatprep.subr.bf16.mxu0 %v8235_v19  ;;  %v11401_v19 = vmov 0   ;;  %v10183_v34 = vpop.permute.xlu1 %2762  ;;  %v8217_v32 = vcombine.high %v3495_v44, %v3499_v56  ;;  %v1363_v24 = vpop.permute.xlu0 %1362  ;;  %v8218_v23 = vcombine.low %v3496_v54, %v3500_v31  ;;  %v8209_v30 = vcombine.high %v3487_v60, %v3491_v36 }
 0x286   : > { %v1235_v43 = vpop.f32.mrf.mxu1  ;;  %v1278_v57 = vpop.f32.mrf.mxu0  ;;  %3921 = vmatprep.mubr.bf16.mxu1 %v11401_v19  ;;  %3964 = vmatprep.mubr.bf16.mxu0 %v11401_v19 }
 0x287   : > { %v1236_v38 = vadd.f32 %v1235_v43, %v10164_v7  ;;  %3892 = vmatpush1.bf16.msra.mxu1 %v8232_v11  ;;  %v1279_v22 = vadd.f32 %v1278_v57, %v10168_v40  ;;  %v8219_v11 = vcombine.high %v3496_v54, %v3500_v31  ;;  %v3488_v7 = vld [vmem:[#allocation11 + $0x808] sm:$0xff]  ;;  %v11303_v57 = vmov 56  }
 0x288   : > { %3935 = vmatpush1.bf16.msra.mxu0 %v8234_v33  ;;  %v1237_v48 = vpop.f32.mrf.mxu1  ;;  %v1280_v41 = vpop.f32.mrf.mxu0  ;;  %3893 = vmatprep.subr.bf16.mxu1 %v8225_v13  ;;  %v11305_v33 = vmov 63   ;;  %v10194_v40 = vld [vmem:[%s9786_s26] sm:$0xff]  ;;  %v8210_v31 = vcombine.low %v3488_v7, %v3492_v8  ;;  %v11309_v54 = vmov 58  }
 0x289   : > { %v1342_v53 = vmul.f32 %v9939_v0, %v1236_v38  ;;  %v1238_v42 = vadd.f32 %v1237_v48, %v10172_v39  ;;  %v1281_v43 = vadd.f32 %v1280_v41, %v10176_v37  ;;  %3936 = vmatprep.subr.bf16.mxu0 %v8227_v20  ;;  %8957 = vset.pattern.permute.xlu1 %v11303_v57  ;;  %v3479_v37 = vld [vmem:[#allocation11 + $0x580] sm:$0xff] }
 0x28a   : > { %8964 = vset.pattern.permute.xlu0 %v11305_v33  ;;  %v8216_v41 = vcombine.low %v3495_v44, %v3499_v56  ;;  %v1366_v13 = vmul.f32 %v1363_v24, %v1279_v22  ;;  %v8211_v48 = vcombine.high %v3488_v7, %v3492_v8  ;;  %v3483_v57 = vld [vmem:[#allocation11 + $0x6c0] sm:$0xff]  ;;  %6144 = vperm.xlu1 %8957, %v10194_v40   ;;  %v10197_v33 = vpop.permute.xlu1 %3368  ;;  %v3476_v24 = vld [vmem:[#allocation11 + $0x448] sm:$0xff] }
 0x28b   : > { %v1344_v0 = vadd.f32 %v1342_v53, %v10110_v58  ;;  %v1354_v38 = vmul.f32 %v9944_v9, %v1238_v42  ;;  %3894 = vmatpush1.bf16.msra.mxu1 %v8224_v15  ;;  %11402 = vst [vmem:[#allocation59_spill] sm:$0xff] %v10197_v33  ;;  %v3480_v53 = vld [vmem:[#allocation11 + $0x588] sm:$0xff]  ;;  %6228 = vperm.xlu0 %8964, %v10194_v40   ;;  %v3475_v44 = vld [vmem:[#allocation11 + $0x440] sm:$0xff] }
 0x28c   : > { %3937 = vmatpush1.bf16.msra.mxu0 %v8226_v27  ;;  %3895 = vmatprep.subr.bf16.mxu1 %v8217_v32  ;;  %v3484_v42 = vld [vmem:[#allocation11 + $0x6c8] sm:$0xff]  ;;  %v1378_v58 = vmul.f32 %v9957_v49, %v1281_v43  ;;  %v8208_v22 = vcombine.low %v3487_v60, %v3491_v36  ;;  %v8201_v32 = vcombine.high %v3479_v37, %v3483_v57  ;;  %v3471_v27 = vld [vmem:[#allocation11 + $0x300] sm:$0xff]  ;;  %v11312_v49 = vmov 66  }
 0x28d   : > { %v1356_v20 = vadd.f32 %v1354_v38, %v1344_v0  ;;  %3938 = vmatprep.subr.bf16.mxu0 %v8219_v11  ;;  %v8203_v56 = vcombine.high %v3480_v53, %v3484_v42  ;;  %v3472_v11 = vld [vmem:[#allocation11 + $0x308] sm:$0xff]  ;;  %v8200_v60 = vcombine.low %v3479_v37, %v3483_v57  ;;  %v8202_v7 = vcombine.low %v3480_v53, %v3484_v42  ;;  %v3463_v0 = vld [vmem:[#allocation11 + $0x80] sm:$0xff]  ;;  %v3525_v53 = vld [vmem:[#allocation11 + $0x1350] sm:$0xff] }
 0x28e   : > { %8959 = vset.pattern.permute.xlu1 %v11309_v54  ;;  %v10206_v8 = vpop.permute.xlu1 %3380  ;;  %v8193_v43 = vcombine.high %v3471_v27, %v3475_v44  ;;  %v8195_v36 = vcombine.high %v3472_v11, %v3476_v24  ;;  %v3467_v38 = vld [vmem:[#allocation11 + $0x1c0] sm:$0xff]  ;;  %v8194_v37 = vcombine.low %v3472_v11, %v3476_v24  ;;  %v3513_v11 = vld [vmem:[#allocation11 + $0xf90] sm:$0xff] }
 0x28f   : > { %v1368_v9 = vadd.f32 %v1366_v13, %v1356_v20  ;;  %3896 = vmatpush1.bf16.msra.mxu1 %v8216_v41  ;;  %6168 = vperm.xlu1 %8959, %v10194_v40   ;;  %11403 = vst [vmem:[#allocation60_spill] sm:$0xff] %v10206_v8  ;;  %v3464_v41 = vld [vmem:[#allocation11 + $0x88] sm:$0xff]  ;;  %v8192_v13 = vcombine.low %v3471_v27, %v3475_v44  ;;  %v3517_v24 = vld [vmem:[#allocation11 + $0x10d0] sm:$0xff] }
 0x290   : > { %3939 = vmatpush1.bf16.msra.mxu0 %v8218_v23  ;;  %3897 = vmatprep.subr.bf16.mxu1 %v8209_v30  ;;  %v3468_v23 = vld [vmem:[#allocation11 + $0x1c8] sm:$0xff]  ;;  %v11308_v30 = vmov 59   ;;  %v8185_v57 = vcombine.high %v3463_v0, %v3467_v38 }
 0x291   : > { %v10201_v15 = vadd.f32 %v1378_v58, %v1368_v9  ;;  %3940 = vmatprep.subr.bf16.mxu0 %v8211_v48  ;;  %8967 = vset.pattern.permute.xlu0 %v11312_v49  ;;  %v8187_v20 = vcombine.high %v3464_v41, %v3468_v23  ;;  %v3521_v48 = vld [vmem:[#allocation11 + $0x1210] sm:$0xff]  ;;  %v11311_v9 = vmov 69   ;;  %v3522_v58 = vld [vmem:[#allocation11 + $0x1218] sm:$0xff] }
 0x292   : > { %6862 = vperm.xlu0 %8967, %v10194_v40   ;;  %v10211_v42 = vpop.permute.xlu1 %3384  ;;  %v8245_v27 = vcombine.high %v3521_v48, %v3525_v53 }
 0x293   : > { %3898 = vmatpush1.bf16.msra.mxu1 %v8208_v22  ;;  %8960 = vset.pattern.permute.xlu1 %v11308_v30  ;;  %v3526_v22 = vld [vmem:[#allocation11 + $0x1358] sm:$0xff] }
 0x294   : > { %3941 = vmatpush1.bf16.msra.mxu0 %v8210_v31  ;;  %3899 = vmatprep.subr.bf16.mxu1 %v8201_v32  ;;  %v8184_v31 = vcombine.low %v3463_v0, %v3467_v38  ;;  %v11306_v32 = vmov 61   ;;  %v8247_v44 = vcombine.high %v3522_v58, %v3526_v22  ;;  %v8246_v38 = vcombine.low %v3522_v58, %v3526_v22  ;;  %v10230_v58 = vpop.permute.xlu0 %1980 }
 0x295   : > { %3942 = vmatprep.subr.bf16.mxu0 %v8203_v56  ;;  %6180 = vperm.xlu1 %8960, %v10194_v40   ;;  %v8186_v56 = vcombine.low %v3464_v41, %v3468_v23  ;;  %v8237_v41 = vcombine.high %v3513_v11, %v3517_v24  ;;  %11406 = vst [vmem:[#allocation63_spill] sm:$0xff] %v10230_v58 }
 0x296   : > { %8970 = vset.pattern.permute.xlu0 %v11311_v9  ;;  %v10218_v0 = vpop.permute.xlu1 %3396  ;;  %v8236_v22 = vcombine.low %v3513_v11, %v3517_v24  ;;  %v3501_v9 = vld [vmem:[#allocation11 + $0xbd0] sm:$0xff] }
 0x297   : > { %3900 = vmatpush1.bf16.msra.mxu1 %v8200_v60  ;;  %6898 = vperm.xlu0 %8970, %v10194_v40   ;;  %v3514_v60 = vld [vmem:[#allocation11 + $0xf98] sm:$0xff] }
 0x298   : > { %3943 = vmatpush1.bf16.msra.mxu0 %v8202_v7  ;;  %3901 = vmatprep.subr.bf16.mxu1 %v8193_v43  ;;  %v3518_v7 = vld [vmem:[#allocation11 + $0x10d8] sm:$0xff]  ;;  %v11310_v43 = vmov 72  }
 0x299   : > { %3944 = vmatprep.subr.bf16.mxu0 %v8195_v36  ;;  %8962 = vset.pattern.permute.xlu1 %v11306_v32  ;;  %v8244_v36 = vcombine.low %v3521_v48, %v3525_v53  ;;  %v8239_v23 = vcombine.high %v3514_v60, %v3518_v7  ;;  %v3506_v53 = vld [vmem:[#allocation11 + $0xd18] sm:$0xff] }
 0x29a   : > { %6204 = vperm.xlu1 %8962, %v10194_v40   ;;  %v10241_v49 = vpop.permute.xlu1 %3404 }
 0x29b   : > { %3902 = vmatpush1.bf16.msra.mxu1 %v8192_v13  ;;  %8973 = vset.pattern.permute.xlu0 %v11310_v43  ;;  %v3505_v13 = vld [vmem:[#allocation11 + $0xd10] sm:$0xff]  ;;  %11410 = vst [vmem:[#allocation67_spill] sm:$0xff] %v10241_v49 }
 0x29c   : > { %3945 = vmatpush1.bf16.msra.mxu0 %v8194_v37  ;;  %3903 = vmatprep.subr.bf16.mxu1 %v8185_v57  ;;  %v3509_v37 = vld [vmem:[#allocation11 + $0xe50] sm:$0xff]  ;;  %v11307_v57 = vmov 62  }
 0x29d   : > { %3946 = vmatprep.subr.bf16.mxu0 %v8187_v20  ;;  %7078 = vperm.xlu0 %8973, %v10194_v40   ;;  %v10222_v20 = vld [vmem:[#allocation13 + $0x8] sm:$0xff]  ;;  %v3497_v43 = vld [vmem:[#allocation11 + $0xa90] sm:$0xff]  ;;  %v8228_v49 = vcombine.low %v3505_v13, %v3509_v37 }
 0x29e   : > { %8963 = vset.pattern.permute.xlu1 %v11307_v57  ;;  %v8229_v57 = vcombine.high %v3505_v13, %v3509_v37  ;;  %v10239_v30 = vrot.slane %v10222_v20, %v10042_v35  ;;  %v10245_v11 = vrot.slane %v10222_v20, %v10045_v59  ;;  %v10249_v24 = vrot.slane %v10222_v20, %v10060_v52  ;;  %v3490_v13 = vld [vmem:[#allocation11 + $0x818] sm:$0xff] }
 0x29f   : > { %3904 = vmatpush1.bf16.msra.mxu1 %v8184_v31  ;;  %v3510_v31 = vld [vmem:[#allocation11 + $0xe58] sm:$0xff]  ;;  %6216 = vperm.xlu1 %8963, %v10194_v40  }
 0x2a0   : > { %3947 = vmatpush1.bf16.msra.mxu0 %v8186_v56  ;;  %3975 = vmatprep.subr.bf16.mxu1 %v8245_v27  ;;  %11409 = vst [vmem:[#allocation66_spill] sm:$0xff] %v10239_v30  ;;  %v8231_v54 = vcombine.high %v3506_v53, %v3510_v31  ;;  %11411 = vst [vmem:[#allocation68_spill] sm:$0xff] %v10245_v11  ;;  %v3494_v37 = vld [vmem:[#allocation11 + $0x958] sm:$0xff] }
 0x2a1   : > { %4018 = vmatprep.subr.bf16.mxu0 %v8247_v44  ;;  %v8238_v44 = vcombine.low %v3514_v60, %v3518_v7  ;;  %11412 = vst [vmem:[#allocation69_spill] sm:$0xff] %v10249_v24 }
 0x2a2   : > { %v10224_v32 = vpop.f32.mrf.mxu1  ;;  %v10226_v48 = vpop.f32.mrf.mxu0  ;;  %3922 = vmatmul.mubr.bf16.vlgmr.msra.gmra.mxu1 %v9882_v45 }
 0x2a3   : > { %11404 = vst [vmem:[#allocation61_spill] sm:$0xff] %v10224_v32  ;;  %11405 = vst [vmem:[#allocation62_spill] sm:$0xff] %v10226_v48  ;;  %3965 = vmatmul.mubr.bf16.vlgmr.msra.gmra.mxu0 %v9882_v45  ;;  %3976 = vmatpush1.bf16.msra.mxu1 %v8244_v36  ;;  %v3498_v36 = vld [vmem:[#allocation11 + $0xa98] sm:$0xff]  ;;  %v8230_v48 = vcombine.low %v3506_v53, %v3510_v31 }
 0x2a4   : > { %4019 = vmatpush1.bf16.msra.mxu0 %v8246_v38  ;;  %v10233_v56 = vpop.f32.mrf.mxu1  ;;  %v10235_v27 = vpop.f32.mrf.mxu0  ;;  %3977 = vmatprep.subr.bf16.mxu1 %v8237_v41  ;;  %v3502_v38 = vld [vmem:[#allocation11 + $0xbd8] sm:$0xff]  ;;  %v10255_v41 = vrot.slane %v10222_v20, %v10067_v47 }
 0x2a5   : > { %11407 = vst [vmem:[#allocation64_spill] sm:$0xff] %v10233_v56  ;;  %11408 = vst [vmem:[#allocation65_spill] sm:$0xff] %v10235_v27  ;;  %4020 = vmatprep.subr.bf16.mxu0 %v8239_v23  ;;  %4007 = vmatprep.mubr.bf16.mxu1 %v11401_v19  ;;  %v8221_v56 = vcombine.high %v3497_v43, %v3501_v9  ;;  %v8223_v62 = vcombine.high %v3498_v36, %v3502_v38 }
 0x2a6   : > { %v1845_v60 = vpop.f32.mrf.mxu1  ;;  %v1888_v7 = vpop.f32.mrf.mxu0  ;;  %4050 = vmatprep.mubr.bf16.mxu0 %v11401_v19  ;;  %11413 = vst [vmem:[#allocation70_spill] sm:$0xff] %v10255_v41 }
 0x2a7   : > { %v1846_v23 = vadd.f32 %v1845_v60, %v10239_v30  ;;  %3978 = vmatpush1.bf16.msra.mxu1 %v8236_v22  ;;  %v1889_v8 = vadd.f32 %v1888_v7, %v10245_v11  ;;  %v3493_v60 = vld [vmem:[#allocation11 + $0x950] sm:$0xff]  ;;  %v1997_v22 = vpop.permute.xlu0 %1996  ;;  %v11316_v7 = vmov 64   ;;  %v4181_v30 = vld [vmem:[#allocation11 + $0x820] sm:$0xff] }
 0x2a8   : > { %4021 = vmatpush1.bf16.msra.mxu0 %v8238_v44  ;;  %v1847_v33 = vpop.f32.mrf.mxu1  ;;  %v1890_v27 = vpop.f32.mrf.mxu0  ;;  %3979 = vmatprep.subr.bf16.mxu1 %v8229_v57  ;;  %v11414_v44 = vmov 39   ;;  %v8213_v31 = vcombine.high %v3489_v16, %v3493_v60  ;;  %v3485_v11 = vld [vmem:[#allocation11 + $0x6d0] sm:$0xff] }
 0x2a9   : > { %v1988_v58 = vmul.f32 %v9967_v63, %v1846_v23  ;;  %v1848_v32 = vadd.f32 %v1847_v33, %v10249_v24  ;;  %v1891_v39 = vadd.f32 %v1890_v27, %v10255_v41  ;;  %4022 = vmatprep.subr.bf16.mxu0 %v8231_v54  ;;  %8965 = vset.pattern.permute.xlu1 %v11316_v7  ;;  %v10265_v33 = vpop.permute.xlu1 %3416  ;;  %v3481_v7 = vld [vmem:[#allocation11 + $0x590] sm:$0xff] }
 0x2aa   : > { %8976 = vset.pattern.permute.xlu0 %v11414_v44  ;;  %v8220_v63 = vcombine.low %v3497_v43, %v3501_v9  ;;  %11415 = vst [vmem:[#allocation71_spill] sm:$0xff] %v10265_v33  ;;  %v8222_v54 = vcombine.low %v3498_v36, %v3502_v38  ;;  %v2012_v27 = vmul.f32 %v9981_v55, %v1889_v8  ;;  %v3477_v36 = vld [vmem:[#allocation11 + $0x450] sm:$0xff]  ;;  %v11321_v38 = vmov 65   ;;  %v3474_v44 = vld [vmem:[#allocation11 + $0x318] sm:$0xff] }
 0x2ab   : > { %v1990_v57 = vadd.f32 %v1988_v58, %v10201_v15  ;;  %v2000_v53 = vmul.f32 %v1997_v22, %v1848_v32  ;;  %3980 = vmatpush1.bf16.msra.mxu1 %v8228_v49  ;;  %v8215_v41 = vcombine.high %v3490_v13, %v3494_v37  ;;  %6838 = vperm.xlu1 %8965, %v10194_v40   ;;  %v3482_v15 = vld [vmem:[#allocation11 + $0x598] sm:$0xff] }
 0x2ac   : > { %4023 = vmatpush1.bf16.msra.mxu0 %v8230_v48  ;;  %3981 = vmatprep.subr.bf16.mxu1 %v8221_v56  ;;  %v3486_v32 = vld [vmem:[#allocation11 + $0x6d8] sm:$0xff]  ;;  %v2024_v43 = vmul.f32 %v9988_v6, %v1891_v39  ;;  %v8212_v48 = vcombine.low %v3489_v16, %v3493_v60  ;;  %v8214_v55 = vcombine.low %v3490_v13, %v3494_v37  ;;  %v3473_v56 = vld [vmem:[#allocation11 + $0x310] sm:$0xff]  ;;  %v11416_v6 = vmov 42  }
 0x2ad   : > { %v2002_v23 = vadd.f32 %v2000_v53, %v1990_v57  ;;  %4024 = vmatprep.subr.bf16.mxu0 %v8223_v62  ;;  %v10270_v49 = vld [vmem:[%s9786_s26 + $0x8] sm:$0xff]  ;;  %v8205_v62 = vcombine.high %v3481_v7, %v3485_v11  ;;  %v8207_v58 = vcombine.high %v3482_v15, %v3486_v32  ;;  %v10277_v22 = vpop.permute.xlu1 %3420  ;;  %v8204_v16 = vcombine.low %v3481_v7, %v3485_v11 }
 0x2ae   : > { %4150 = vperm.xlu0 %8976, %v10270_v49   ;;  %v3478_v57 = vld [vmem:[#allocation11 + $0x458] sm:$0xff]  ;;  %v8206_v39 = vcombine.low %v3482_v15, %v3486_v32  ;;  %v3465_v13 = vld [vmem:[#allocation11 + $0x90] sm:$0xff]  ;;  %v4213_v15 = vld [vmem:[#allocation11 + $0x1220] sm:$0xff] }
 0x2af   : > { %v2014_v9 = vadd.f32 %v2012_v27, %v2002_v23  ;;  %3982 = vmatpush1.bf16.msra.mxu1 %v8220_v63  ;;  %8966 = vset.pattern.permute.xlu1 %v11321_v38  ;;  %v8199_v60 = vcombine.high %v3474_v44, %v3478_v57  ;;  %v3469_v37 = vld [vmem:[#allocation11 + $0x1d0] sm:$0xff]  ;;  %v3466_v53 = vld [vmem:[#allocation11 + $0x98] sm:$0xff]  ;;  %v8198_v7 = vcombine.low %v3474_v44, %v3478_v57  ;;  %v4217_v32 = vld [vmem:[#allocation11 + $0x1360] sm:$0xff] }
 0x2b0   : > { %4025 = vmatpush1.bf16.msra.mxu0 %v8222_v54  ;;  %3983 = vmatprep.subr.bf16.mxu1 %v8213_v31  ;;  %v3470_v63 = vld [vmem:[#allocation11 + $0x1d8] sm:$0xff]  ;;  %v11320_v54 = vmov 67   ;;  %v8196_v31 = vcombine.low %v3473_v56, %v3477_v36  ;;  %v8189_v27 = vcombine.high %v3465_v13, %v3469_v37  ;;  %v4205_v57 = vld [vmem:[#allocation11 + $0xfa0] sm:$0xff] }
 0x2b1   : > { %v10274_v8 = vadd.f32 %v2024_v43, %v2014_v9  ;;  %4026 = vmatprep.subr.bf16.mxu0 %v8215_v41  ;;  %6850 = vperm.xlu1 %8966, %v10194_v40   ;;  %v8197_v41 = vcombine.high %v3473_v56, %v3477_v36  ;;  %v10284_v11 = vpop.permute.xlu1 %3432  ;;  %v8191_v23 = vcombine.high %v3466_v53, %v3470_v63  ;;  %v11417_v9 = vmov 45   ;;  %v4214_v43 = vld [vmem:[#allocation11 + $0x1228] sm:$0xff]  ;;  %v10289_v36 = vpop.permute.xlu0 %2016  ;;  %v4193_v38 = vld [vmem:[#allocation11 + $0xbe0] sm:$0xff] }
 0x2b2   : > { %8979 = vset.pattern.permute.xlu0 %v11416_v6  ;;  %v8305_v56 = vcombine.high %v4213_v15, %v4217_v32  ;;  %11418 = vst [vmem:[#allocation72_spill] sm:$0xff] %v10289_v36  ;;  %v4209_v6 = vld [vmem:[#allocation11 + $0x10e0] sm:$0xff] }
 0x2b3   : > { %3984 = vmatpush1.bf16.msra.mxu1 %v8212_v48  ;;  %4784 = vperm.xlu0 %8979, %v10270_v49   ;;  %v4218_v48 = vld [vmem:[#allocation11 + $0x1368] sm:$0xff] }
 0x2b4   : > { %4027 = vmatpush1.bf16.msra.mxu0 %v8214_v55  ;;  %3985 = vmatprep.subr.bf16.mxu1 %v8205_v62  ;;  %v8188_v55 = vcombine.low %v3465_v13, %v3469_v37  ;;  %v11318_v62 = vmov 68   ;;  %v8307_v44 = vcombine.high %v4214_v43, %v4218_v48  ;;  %v8304_v13 = vcombine.low %v4213_v15, %v4217_v32  ;;  %v4198_v15 = vld [vmem:[#allocation11 + $0xd28] sm:$0xff] }
 0x2b5   : > { %4028 = vmatprep.subr.bf16.mxu0 %v8207_v58  ;;  %8968 = vset.pattern.permute.xlu1 %v11320_v54  ;;  %v8190_v58 = vcombine.low %v3466_v53, %v3470_v63  ;;  %v8306_v37 = vcombine.low %v4214_v43, %v4218_v48  ;;  %v8297_v53 = vcombine.high %v4205_v57, %v4209_v6  ;;  %v2033_v63 = vpop.permute.xlu0 %2032  ;;  %v4202_v32 = vld [vmem:[#allocation11 + $0xe68] sm:$0xff]  ;;  %v4189_v54 = vld [vmem:[#allocation11 + $0xaa0] sm:$0xff] }
 0x2b6   : > { %6874 = vperm.xlu1 %8968, %v10194_v40   ;;  %v8296_v43 = vcombine.low %v4205_v57, %v4209_v6  ;;  %v10316_v57 = vrot.slane %v10222_v20, %v10141_v1  ;;  %v10320_v6 = vrot.slane %v10222_v20, %v10147_v29  ;;  %v8281_v36 = vcombine.high %v4189_v54, %v4193_v38 }
 0x2b7   : > { %3986 = vmatpush1.bf16.msra.mxu1 %v8204_v16  ;;  %8982 = vset.pattern.permute.xlu0 %v11417_v9  ;;  %v10292_v16 = vpop.permute.xlu1 %3440 }
 0x2b8   : > { %4029 = vmatpush1.bf16.msra.mxu0 %v8206_v39  ;;  %3987 = vmatprep.subr.bf16.mxu1 %v8197_v41  ;;  %11419 = vst [vmem:[#allocation73_spill] sm:$0xff] %v10292_v16  ;;  %v4206_v39 = vld [vmem:[#allocation11 + $0xfa8] sm:$0xff]  ;;  %11426 = vst [vmem:[#allocation79_spill] sm:$0xff] %v10316_v57 }
 0x2b9   : > { %4030 = vmatprep.subr.bf16.mxu0 %v8199_v60  ;;  %4820 = vperm.xlu0 %8982, %v10270_v49   ;;  %v4210_v41 = vld [vmem:[#allocation11 + $0x10e8] sm:$0xff]  ;;  %v11420_v60 = vmov 48   ;;  %11427 = vst [vmem:[#allocation80_spill] sm:$0xff] %v10320_v6 }
 0x2ba   : > { %8969 = vset.pattern.permute.xlu1 %v11318_v62 }
 0x2bb   : > { %3988 = vmatpush1.bf16.msra.mxu1 %v8196_v31  ;;  %6886 = vperm.xlu1 %8969, %v10194_v40   ;;  %v8299_v31 = vcombine.high %v4206_v39, %v4210_v41  ;;  %v10304_v48 = vpop.permute.xlu1 %3452 }
 0x2bc   : > { %4031 = vmatpush1.bf16.msra.mxu0 %v8198_v7  ;;  %3989 = vmatprep.subr.bf16.mxu1 %v8189_v27  ;;  %v4197_v7 = vld [vmem:[#allocation11 + $0xd20] sm:$0xff]  ;;  %11423 = vst [vmem:[#allocation76_spill] sm:$0xff] %v10304_v48 }
 0x2bd   : > { %4032 = vmatprep.subr.bf16.mxu0 %v8191_v23  ;;  %8985 = vset.pattern.permute.xlu0 %v11420_v60  ;;  %v4201_v27 = vld [vmem:[#allocation11 + $0xe60] sm:$0xff]  ;;  %v11319_v23 = vmov 70   ;;  %v10312_v60 = vrot.slane %v10222_v20, %v10129_v14 }
 0x2be   : > { %5454 = vperm.xlu0 %8985, %v10270_v49   ;;  %v8288_v16 = vcombine.low %v4197_v7, %v4201_v27 }
 0x2bf   : > { %3990 = vmatpush1.bf16.msra.mxu1 %v8188_v55  ;;  %8971 = vset.pattern.permute.xlu1 %v11319_v23  ;;  %v8291_v23 = vcombine.high %v4198_v15, %v4202_v32 }
 0x2c0   : > { %4033 = vmatpush1.bf16.msra.mxu0 %v8190_v58  ;;  %4583 = vmatprep.subr.bf16.mxu1 %v8305_v56  ;;  %v8298_v56 = vcombine.low %v4206_v39, %v4210_v41  ;;  %v4190_v39 = vld [vmem:[#allocation11 + $0xaa8] sm:$0xff] }
 0x2c1   : > { %4626 = vmatprep.subr.bf16.mxu0 %v8307_v44  ;;  %6910 = vperm.xlu1 %8971, %v10194_v40   ;;  %v8289_v44 = vcombine.high %v4197_v7, %v4201_v27  ;;  %v4194_v41 = vld [vmem:[#allocation11 + $0xbe8] sm:$0xff] }
 0x2c2   : > { %v10297_v9 = vpop.f32.mrf.mxu1  ;;  %v10299_v62 = vpop.f32.mrf.mxu0  ;;  %4008 = vmatmul.mubr.bf16.vlgmr.msra.gmra.mxu1 %v9882_v45  ;;  %v4182_v7 = vld [vmem:[#allocation11 + $0x828] sm:$0xff] }
 0x2c3   : > { %11421 = vst [vmem:[#allocation74_spill] sm:$0xff] %v10297_v9  ;;  %11422 = vst [vmem:[#allocation75_spill] sm:$0xff] %v10299_v62  ;;  %4051 = vmatmul.mubr.bf16.vlgmr.msra.gmra.mxu0 %v9882_v45  ;;  %4584 = vmatpush1.bf16.msra.mxu1 %v8304_v13  ;;  %v4186_v27 = vld [vmem:[#allocation11 + $0x968] sm:$0xff] }
 0x2c4   : > { %4627 = vmatpush1.bf16.msra.mxu0 %v8306_v37  ;;  %v10306_v55 = vpop.f32.mrf.mxu1  ;;  %v10308_v58 = vpop.f32.mrf.mxu0  ;;  %4585 = vmatprep.subr.bf16.mxu1 %v8297_v53 }
 0x2c5   : > { %11424 = vst [vmem:[#allocation77_spill] sm:$0xff] %v10306_v55  ;;  %11425 = vst [vmem:[#allocation78_spill] sm:$0xff] %v10308_v58  ;;  %4628 = vmatprep.subr.bf16.mxu0 %v8299_v31  ;;  %4615 = vmatprep.mubr.bf16.mxu1 %v11401_v19  ;;  %v10324_v53 = vpop.permute.xlu0 %2052  ;;  %v10328_v31 = vrot.slane %v10222_v20, %v10150_v28  ;;  %v8290_v55 = vcombine.low %v4198_v15, %v4202_v32 }
 0x2c6   : > { %v1931_v13 = vpop.f32.mrf.mxu1  ;;  %v1974_v37 = vpop.f32.mrf.mxu0  ;;  %4658 = vmatprep.mubr.bf16.mxu0 %v11401_v19  ;;  %11428 = vst [vmem:[#allocation81_spill] sm:$0xff] %v10324_v53  ;;  %v8283_v20 = vcombine.high %v4190_v39, %v4194_v41 }
 0x2c7   : > { %11429 = vst [vmem:[#allocation82_spill] sm:$0xff] %v10328_v31  ;;  %v1932_v48 = vadd.f32 %v1931_v13, %v10312_v60  ;;  %4586 = vmatpush1.bf16.msra.mxu1 %v8296_v43  ;;  %v1975_v33 = vadd.f32 %v1974_v37, %v10316_v57  ;;  %v10334_v13 = vpop.permute.xlu1 %3456  ;;  %v11325_v43 = vmov 71   ;;  %v4173_v37 = vld [vmem:[#allocation11 + $0x5a0] sm:$0xff] }
 0x2c8   : > { %4629 = vmatpush1.bf16.msra.mxu0 %v8298_v56  ;;  %v1933_v58 = vpop.f32.mrf.mxu1  ;;  %v1976_v62 = vpop.f32.mrf.mxu0  ;;  %4587 = vmatprep.subr.bf16.mxu1 %v8289_v44  ;;  %v8275_v44 = vcombine.high %v4182_v7, %v4186_v27 }
 0x2c9   : > { %v2036_v9 = vmul.f32 %v2033_v63, %v1932_v48  ;;  %v1934_v24 = vadd.f32 %v1933_v58, %v10320_v6  ;;  %v1977_v53 = vadd.f32 %v1976_v62, %v10328_v31  ;;  %4630 = vmatprep.subr.bf16.mxu0 %v8291_v23  ;;  %8972 = vset.pattern.permute.xlu1 %v11325_v43  ;;  %v2069_v32 = vpop.permute.xlu0 %2068  ;;  %v4177_v31 = vld [vmem:[#allocation11 + $0x6e0] sm:$0xff]  ;;  %v4174_v43 = vld [vmem:[#allocation11 + $0x5a8] sm:$0xff]  ;;  %v4188_v6 = vld [vmem:[#allocation11 + $0x978] sm:$0xff] }
 0x2ca   : > { %v8280_v63 = vcombine.low %v4189_v54, %v4193_v38  ;;  %v8282_v62 = vcombine.low %v4190_v39, %v4194_v41  ;;  %v8273_v23 = vcombine.high %v4181_v30, %v4185_v3  ;;  %v2060_v48 = vmul.f32 %v10004_v18, %v1975_v33  ;;  %6922 = vperm.xlu1 %8972, %v10194_v40   ;;  %v4166_v41 = vld [vmem:[#allocation11 + $0x328] sm:$0xff] }
 0x2cb   : > { %v2038_v56 = vadd.f32 %v2036_v9, %v10274_v8  ;;  %v2048_v15 = vmul.f32 %v10000_v2, %v1934_v24  ;;  %4588 = vmatpush1.bf16.msra.mxu1 %v8288_v16  ;;  %v4178_v8 = vld [vmem:[#allocation11 + $0x6e8] sm:$0xff]  ;;  %v11430_v9 = vmov 51   ;;  %v2072_v24 = vmul.f32 %v2069_v32, %v1977_v53  ;;  %v10342_v54 = vpop.permute.xlu1 %4066  ;;  %v4165_v16 = vld [vmem:[#allocation11 + $0x320] sm:$0xff] }
 0x2cc   : > { %4631 = vmatpush1.bf16.msra.mxu0 %v8290_v55  ;;  %4589 = vmatprep.subr.bf16.mxu1 %v8281_v36  ;;  %v8272_v38 = vcombine.low %v4181_v30, %v4185_v3  ;;  %v8274_v18 = vcombine.low %v4182_v7, %v4186_v27  ;;  %v8265_v33 = vcombine.high %v4173_v37, %v4177_v31  ;;  %v4169_v55 = vld [vmem:[#allocation11 + $0x460] sm:$0xff]  ;;  %v11431_v39 = vmov 37   ;;  %v4170_v53 = vld [vmem:[#allocation11 + $0x468] sm:$0xff] }
 0x2cd   : > { %v2050_v58 = vadd.f32 %v2048_v15, %v2038_v56  ;;  %4632 = vmatprep.subr.bf16.mxu0 %v8283_v20  ;;  %8988 = vset.pattern.permute.xlu0 %v11430_v9  ;;  %v8267_v40 = vcombine.high %v4174_v43, %v4178_v8  ;;  %v8264_v3 = vcombine.low %v4173_v37, %v4177_v31  ;;  %v11432_v30 = vmov 54   ;;  %v4157_v56 = vld [vmem:[#allocation11 + $0xa0] sm:$0xff]  ;;  %v4158_v32 = vld [vmem:[#allocation11 + $0xa8] sm:$0xff]  ;;  %v4219_v37 = vld [vmem:[#allocation11 + $0x1370] sm:$0xff] }
 0x2ce   : > { %5490 = vperm.xlu0 %8988, %v10270_v49   ;;  %8974 = vset.pattern.permute.xlu1 %v11431_v39  ;;  %v8266_v20 = vcombine.low %v4174_v43, %v4178_v8  ;;  %v8257_v7 = vcombine.high %v4165_v16, %v4169_v55  ;;  %v8259_v27 = vcombine.high %v4166_v41, %v4170_v53  ;;  %v4161_v15 = vld [vmem:[#allocation11 + $0x1e0] sm:$0xff]  ;;  %v11435_v8 = vmov 57   ;;  %v4216_v9 = vld [vmem:[#allocation11 + $0x1238] sm:$0xff]  ;;  %v4211_v39 = vld [vmem:[#allocation11 + $0x10f0] sm:$0xff] }
 0x2cf   : > { %v2062_v2 = vadd.f32 %v2060_v48, %v2050_v58  ;;  %4590 = vmatpush1.bf16.msra.mxu1 %v8280_v63  ;;  %4126 = vperm.xlu1 %8974, %v10270_v49   ;;  %v10350_v63 = vpop.permute.xlu1 %4074  ;;  %v8256_v31 = vcombine.low %v4165_v16, %v4169_v55  ;;  %v8258_v43 = vcombine.low %v4166_v41, %v4170_v53  ;;  %v4207_v55 = vld [vmem:[#allocation11 + $0xfb0] sm:$0xff]  ;;  %v4208_v41 = vld [vmem:[#allocation11 + $0xfb8] sm:$0xff] }
 0x2d0   : > { %4633 = vmatpush1.bf16.msra.mxu0 %v8282_v62  ;;  %4591 = vmatprep.subr.bf16.mxu1 %v8273_v23  ;;  %11433 = vst [vmem:[#allocation83_spill] sm:$0xff] %v10350_v63  ;;  %v4162_v62 = vld [vmem:[#allocation11 + $0x1e8] sm:$0xff]  ;;  %v11434_v23 = vmov 38   ;;  %v8249_v48 = vcombine.high %v4157_v56, %v4161_v15  ;;  %v4212_v53 = vld [vmem:[#allocation11 + $0x10f8] sm:$0xff] }
 0x2d1   : > { %v10345_v36 = vadd.f32 %v2072_v24, %v2062_v2  ;;  %4634 = vmatprep.subr.bf16.mxu0 %v8275_v44  ;;  %v8251_v58 = vcombine.high %v4158_v32, %v4162_v62  ;;  %v4215_v44 = vld [vmem:[#allocation11 + $0x1230] sm:$0xff]  ;;  %v4220_v2 = vld [vmem:[#allocation11 + $0x1378] sm:$0xff]  ;;  %v8248_v24 = vcombine.low %v4157_v56, %v4161_v15 }
 0x2d2   : > { %8991 = vset.pattern.permute.xlu0 %v11432_v30  ;;  %v8311_v16 = vcombine.high %v4216_v9, %v4220_v2  ;;  %v8308_v30 = vcombine.low %v4215_v44, %v4219_v37  ;;  %v4199_v56 = vld [vmem:[#allocation11 + $0xd30] sm:$0xff] }
 0x2d3   : > { %4592 = vmatpush1.bf16.msra.mxu1 %v8272_v38  ;;  %5526 = vperm.xlu0 %8991, %v10270_v49   ;;  %v10357_v38 = vpop.permute.xlu1 %4086  ;;  %v4203_v15 = vld [vmem:[#allocation11 + $0xe70] sm:$0xff] }
 0x2d4   : > { %4635 = vmatpush1.bf16.msra.mxu0 %v8274_v18  ;;  %4593 = vmatprep.subr.bf16.mxu1 %v8265_v33  ;;  %11436 = vst [vmem:[#allocation84_spill] sm:$0xff] %v10357_v38  ;;  %v11437_v18 = vmov 40   ;;  %v8250_v33 = vcombine.low %v4158_v32, %v4162_v62  ;;  %v11439_v62 = vmov 41  }
 0x2d5   : > { %4636 = vmatprep.subr.bf16.mxu0 %v8267_v40  ;;  %8975 = vset.pattern.permute.xlu1 %v11434_v23  ;;  %v8309_v40 = vcombine.high %v4215_v44, %v4219_v37  ;;  %v10366_v23 = vld [vmem:[#allocation13 + $0x10] sm:$0xff]  ;;  %v10375_v44 = vpop.permute.xlu0 %2686  ;;  %v8300_v37 = vcombine.low %v4207_v55, %v4211_v39 }
 0x2d6   : > { %4138 = vperm.xlu1 %8975, %v10270_v49   ;;  %11442 = vst [vmem:[#allocation87_spill] sm:$0xff] %v10375_v44 }
 0x2d7   : > { %4594 = vmatpush1.bf16.msra.mxu1 %v8264_v3  ;;  %8994 = vset.pattern.permute.xlu0 %v11435_v8  ;;  %v11438_v3 = vmov 60   ;;  %v10363_v32 = vpop.permute.xlu1 %4090 }
 0x2d8   : > { %4637 = vmatpush1.bf16.msra.mxu0 %v8266_v20  ;;  %4595 = vmatprep.subr.bf16.mxu1 %v8257_v7  ;;  %v8310_v20 = vcombine.low %v4216_v9, %v4220_v2  ;;  %v8301_v7 = vcombine.high %v4207_v55, %v4211_v39  ;;  %v8302_v2 = vcombine.low %v4208_v41, %v4212_v53 }
 0x2d9   : > { %4638 = vmatprep.subr.bf16.mxu0 %v8259_v27  ;;  %6160 = vperm.xlu0 %8994, %v10270_v49   ;;  %v8303_v27 = vcombine.high %v4208_v41, %v4212_v53  ;;  %v10393_v41 = vrot.slane %v10366_v23, %v10060_v52  ;;  %v10397_v53 = vrot.slane %v10366_v23, %v10067_v47 }
 0x2da   : > { %8977 = vset.pattern.permute.xlu1 %v11437_v18  ;;  %v10383_v18 = vrot.slane %v10366_v23, %v10042_v35 }
 0x2db   : > { %4596 = vmatpush1.bf16.msra.mxu1 %v8256_v31  ;;  %4760 = vperm.xlu1 %8977, %v10270_v49   ;;  %11447 = vst [vmem:[#allocation92_spill] sm:$0xff] %v10397_v53 }
 0x2dc   : > { %4639 = vmatpush1.bf16.msra.mxu0 %v8258_v43  ;;  %4597 = vmatprep.subr.bf16.mxu1 %v8249_v48  ;;  %v4200_v48 = vld [vmem:[#allocation11 + $0xd38] sm:$0xff]  ;;  %11445 = vst [vmem:[#allocation90_spill] sm:$0xff] %v10383_v18 }
 0x2dd   : > { %4640 = vmatprep.subr.bf16.mxu0 %v8251_v58  ;;  %8997 = vset.pattern.permute.xlu0 %v11438_v3  ;;  %v4204_v58 = vld [vmem:[#allocation11 + $0xe78] sm:$0xff]  ;;  %v10387_v3 = vrot.slane %v10366_v23, %v10045_v59 }
 0x2de   : > { %6196 = vperm.xlu0 %8997, %v10270_v49  }
 0x2df   : > { %4598 = vmatpush1.bf16.msra.mxu1 %v8248_v24  ;;  %8978 = vset.pattern.permute.xlu1 %v11439_v62  ;;  %v8293_v24 = vcombine.high %v4199_v56, %v4203_v15  ;;  %11446 = vst [vmem:[#allocation91_spill] sm:$0xff] %v10387_v3  ;;  %v10400_v62 = vpop.permute.xlu1 %4102 }
 0x2e0   : > { %4641 = vmatpush1.bf16.msra.mxu0 %v8250_v33  ;;  %4669 = vmatprep.subr.bf16.mxu1 %v8309_v40  ;;  %v8295_v33 = vcombine.high %v4200_v48, %v4204_v58  ;;  %v4191_v40 = vld [vmem:[#allocation11 + $0xab0] sm:$0xff] }
 0x2e1   : > { %4712 = vmatprep.subr.bf16.mxu0 %v8311_v16  ;;  %4772 = vperm.xlu1 %8978, %v10270_v49   ;;  %v4195_v16 = vld [vmem:[#allocation11 + $0xbf0] sm:$0xff] }
 0x2e2   : > { %v10368_v31 = vpop.f32.mrf.mxu1  ;;  %v10370_v43 = vpop.f32.mrf.mxu0  ;;  %4616 = vmatmul.mubr.bf16.vlgmr.msra.gmra.mxu1 %v9882_v45  ;;  %v8285_v44 = vcombine.high %v4191_v40, %v4195_v16 }
 0x2e3   : > { %11440 = vst [vmem:[#allocation85_spill] sm:$0xff] %v10368_v31  ;;  %11441 = vst [vmem:[#allocation86_spill] sm:$0xff] %v10370_v43  ;;  %4659 = vmatmul.mubr.bf16.vlgmr.msra.gmra.mxu0 %v9882_v45  ;;  %4670 = vmatpush1.bf16.msra.mxu1 %v8308_v30  ;;  %v4192_v30 = vld [vmem:[#allocation11 + $0xab8] sm:$0xff]  ;;  %v8294_v43 = vcombine.low %v4200_v48, %v4204_v58  ;;  %v8284_v58 = vcombine.low %v4191_v40, %v4195_v16 }
 0x2e4   : > { %4713 = vmatpush1.bf16.msra.mxu0 %v8310_v20  ;;  %v10377_v8 = vpop.f32.mrf.mxu1  ;;  %v10379_v9 = vpop.f32.mrf.mxu0  ;;  %4671 = vmatprep.subr.bf16.mxu1 %v8301_v7  ;;  %v4196_v20 = vld [vmem:[#allocation11 + $0xbf8] sm:$0xff] }
 0x2e5   : > { %11443 = vst [vmem:[#allocation88_spill] sm:$0xff] %v10377_v8  ;;  %11444 = vst [vmem:[#allocation89_spill] sm:$0xff] %v10379_v9  ;;  %4714 = vmatprep.subr.bf16.mxu0 %v8303_v27  ;;  %4701 = vmatprep.mubr.bf16.mxu1 %v11401_v19  ;;  %v8292_v27 = vcombine.low %v4199_v56, %v4203_v15  ;;  %v4187_v56 = vld [vmem:[#allocation11 + $0x970] sm:$0xff]  ;;  %v2703_v15 = vpop.permute.xlu0 %2702 }
 0x2e6   : > { %v2539_v55 = vpop.f32.mrf.mxu1  ;;  %v2582_v39 = vpop.f32.mrf.mxu0  ;;  %4744 = vmatprep.mubr.bf16.mxu0 %v11401_v19 }
 0x2e7   : > { %v2540_v7 = vadd.f32 %v2539_v55, %v10383_v18  ;;  %4672 = vmatpush1.bf16.msra.mxu1 %v8300_v37  ;;  %v2583_v38 = vadd.f32 %v2582_v39, %v10387_v3  ;;  %v8287_v55 = vcombine.high %v4192_v30, %v4196_v20  ;;  %v4183_v37 = vld [vmem:[#allocation11 + $0x830] sm:$0xff]  ;;  %v4184_v18 = vld [vmem:[#allocation11 + $0x838] sm:$0xff]  ;;  %v11448_v39 = vmov 43   ;;  %v10409_v3 = vpop.permute.xlu1 %4110 }
 0x2e8   : > { %4715 = vmatpush1.bf16.msra.mxu0 %v8302_v2  ;;  %v2541_v63 = vpop.f32.mrf.mxu1  ;;  %v2584_v9 = vpop.f32.mrf.mxu0  ;;  %4673 = vmatprep.subr.bf16.mxu1 %v8293_v24  ;;  %11449 = vst [vmem:[#allocation93_spill] sm:$0xff] %v10409_v3 }
 0x2e9   : > { %v2682_v8 = vmul.f32 %v10019_v25, %v2540_v7  ;;  %v2542_v31 = vadd.f32 %v2541_v63, %v10393_v41  ;;  %v2585_v57 = vadd.f32 %v2584_v9, %v10397_v53  ;;  %4716 = vmatprep.subr.bf16.mxu0 %v8295_v33  ;;  %8980 = vset.pattern.permute.xlu1 %v11448_v39  ;;  %v4175_v7 = vld [vmem:[#allocation11 + $0x5b0] sm:$0xff]  ;;  %v4176_v39 = vld [vmem:[#allocation11 + $0x5b8] sm:$0xff] }
 0x2ea   : > { %v8286_v25 = vcombine.low %v4192_v30, %v4196_v20  ;;  %v8277_v63 = vcombine.high %v4183_v37, %v4187_v56  ;;  %v2706_v9 = vmul.f32 %v2703_v15, %v2583_v38  ;;  %v8279_v33 = vcombine.high %v4184_v18, %v4188_v6  ;;  %v4179_v53 = vld [vmem:[#allocation11 + $0x6f0] sm:$0xff]  ;;  %4796 = vperm.xlu1 %8980, %v10270_v49   ;;  %v4172_v15 = vld [vmem:[#allocation11 + $0x478] sm:$0xff] }
 0x2eb   : > { %v2684_v2 = vadd.f32 %v2682_v8, %v10345_v36  ;;  %v2694_v48 = vmul.f32 %v10025_v46, %v2542_v31  ;;  %4674 = vmatpush1.bf16.msra.mxu1 %v8292_v27  ;;  %v4180_v36 = vld [vmem:[#allocation11 + $0x6f8] sm:$0xff]  ;;  %v11450_v8 = vmov 63   ;;  %v2718_v31 = vmul.f32 %v10097_v21, %v2585_v57  ;;  %v4167_v30 = vld [vmem:[#allocation11 + $0x330] sm:$0xff]  ;;  %v10419_v57 = vpop.permute.xlu1 %4122 }
 0x2ec   : > { %4717 = vmatpush1.bf16.msra.mxu0 %v8294_v43  ;;  %4675 = vmatprep.subr.bf16.mxu1 %v8285_v44  ;;  %v8276_v43 = vcombine.low %v4183_v37, %v4187_v56  ;;  %v8278_v38 = vcombine.low %v4184_v18, %v4188_v6  ;;  %v8269_v44 = vcombine.high %v4175_v7, %v4179_v53  ;;  %v4171_v20 = vld [vmem:[#allocation11 + $0x470] sm:$0xff]  ;;  %v11451_v27 = vmov 44  }
 0x2ed   : > { %v2696_v24 = vadd.f32 %v2694_v48, %v2684_v2  ;;  %4718 = vmatprep.subr.bf16.mxu0 %v8287_v55  ;;  %9000 = vset.pattern.permute.xlu0 %v11450_v8  ;;  %v8271_v16 = vcombine.high %v4176_v39, %v4180_v36  ;;  %v4168_v55 = vld [vmem:[#allocation11 + $0x338] sm:$0xff]  ;;  %v8268_v21 = vcombine.low %v4175_v7, %v4179_v53  ;;  %v11453_v37 = vmov 66   ;;  %v4159_v2 = vld [vmem:[#allocation11 + $0xb0] sm:$0xff]  ;;  %v4907_v7 = vld [vmem:[#allocation11 + $0x1240] sm:$0xff] }
 0x2ee   : > { %6232 = vperm.xlu0 %9000, %v10270_v49   ;;  %8981 = vset.pattern.permute.xlu1 %v11451_v27  ;;  %11452 = vst [vmem:[#allocation94_spill] sm:$0xff] %v10419_v57  ;;  %v8270_v6 = vcombine.low %v4176_v39, %v4180_v36  ;;  %v8261_v18 = vcombine.high %v4167_v30, %v4171_v20  ;;  %v4163_v48 = vld [vmem:[#allocation11 + $0x1f0] sm:$0xff]  ;;  %v4911_v39 = vld [vmem:[#allocation11 + $0x1380] sm:$0xff]  ;;  %v11456_v8 = vmov 69  }
 0x2ef   : > { %v2708_v46 = vadd.f32 %v2706_v9, %v2696_v24  ;;  %4676 = vmatpush1.bf16.msra.mxu1 %v8284_v58  ;;  %4808 = vperm.xlu1 %8981, %v10270_v49   ;;  %v8263_v56 = vcombine.high %v4168_v55, %v4172_v15  ;;  %v4160_v58 = vld [vmem:[#allocation11 + $0xb8] sm:$0xff]  ;;  %v8260_v53 = vcombine.low %v4167_v30, %v4171_v20  ;;  %v10425_v36 = vpop.permute.xlu1 %4134  ;;  %v4899_v20 = vld [vmem:[#allocation11 + $0xfc0] sm:$0xff] }
 0x2f0   : > { %4719 = vmatpush1.bf16.msra.mxu0 %v8286_v25  ;;  %4677 = vmatprep.subr.bf16.mxu1 %v8277_v63  ;;  %v4164_v25 = vld [vmem:[#allocation11 + $0x1f8] sm:$0xff]  ;;  %v11454_v63 = vmov 46   ;;  %v8262_v9 = vcombine.low %v4168_v55, %v4172_v15  ;;  %v8253_v24 = vcombine.high %v4159_v2, %v4163_v48  ;;  %11455 = vst [vmem:[#allocation95_spill] sm:$0xff] %v10425_v36  ;;  %v4903_v27 = vld [vmem:[#allocation11 + $0x1100] sm:$0xff]  ;;  %v4900_v55 = vld [vmem:[#allocation11 + $0xfc8] sm:$0xff] }
 0x2f1   : > { %v10415_v40 = vadd.f32 %v2718_v31, %v2708_v46  ;;  %4720 = vmatprep.subr.bf16.mxu0 %v8279_v33  ;;  %v8255_v33 = vcombine.high %v4160_v58, %v4164_v25  ;;  %v4908_v46 = vld [vmem:[#allocation11 + $0x1248] sm:$0xff] }
 0x2f2   : > { %9003 = vset.pattern.permute.xlu0 %v11453_v37  ;;  %v4912_v31 = vld [vmem:[#allocation11 + $0x1388] sm:$0xff]  ;;  %v8368_v37 = vcombine.low %v4907_v7, %v4911_v39 }
 0x2f3   : > { %4678 = vmatpush1.bf16.msra.mxu1 %v8276_v43  ;;  %6866 = vperm.xlu0 %9003, %v10270_v49   ;;  %v8252_v43 = vcombine.low %v4159_v2, %v4163_v48  ;;  %v8371_v30 = vcombine.high %v4908_v46, %v4912_v31  ;;  %v4904_v15 = vld [vmem:[#allocation11 + $0x1108] sm:$0xff]  ;;  %v10435_v2 = vpop.permute.xlu0 %2722 }
 0x2f4   : > { %4721 = vmatpush1.bf16.msra.mxu0 %v8278_v38  ;;  %4679 = vmatprep.subr.bf16.mxu1 %v8269_v44  ;;  %v11457_v38 = vmov 47   ;;  %v8254_v44 = vcombine.low %v4160_v58, %v4164_v25  ;;  %11460 = vst [vmem:[#allocation97_spill] sm:$0xff] %v10435_v2  ;;  %v8363_v48 = vcombine.high %v4900_v55, %v4904_v15  ;;  %v4891_v58 = vld [vmem:[#allocation11 + $0xd40] sm:$0xff] }
 0x2f5   : > { %4722 = vmatprep.subr.bf16.mxu0 %v8271_v16  ;;  %8983 = vset.pattern.permute.xlu1 %v11454_v63  ;;  %v8369_v16 = vcombine.high %v4907_v7, %v4911_v39  ;;  %v4895_v25 = vld [vmem:[#allocation11 + $0xe80] sm:$0xff]  ;;  %v11461_v63 = vmov 49   ;;  %v8360_v7 = vcombine.low %v4899_v20, %v4903_v27 }
 0x2f6   : > { %4832 = vperm.xlu1 %8983, %v10270_v49   ;;  %v4875_v2 = vld [vmem:[#allocation11 + $0x840] sm:$0xff] }
 0x2f7   : > { %4680 = vmatpush1.bf16.msra.mxu1 %v8268_v21  ;;  %9006 = vset.pattern.permute.xlu0 %v11456_v8  ;;  %v11458_v21 = vmov 72  }
 0x2f8   : > { %4723 = vmatpush1.bf16.msra.mxu0 %v8270_v6  ;;  %4681 = vmatprep.subr.bf16.mxu1 %v8261_v18  ;;  %v10432_v6 = vpop.permute.xlu1 %4756  ;;  %v8370_v18 = vcombine.low %v4908_v46, %v4912_v31  ;;  %v8362_v46 = vcombine.low %v4900_v55, %v4904_v15  ;;  %v8353_v31 = vcombine.high %v4891_v58, %v4895_v25  ;;  %v2739_v55 = vpop.permute.xlu0 %2738 }
 0x2f9   : > { %4724 = vmatprep.subr.bf16.mxu0 %v8263_v56  ;;  %6902 = vperm.xlu0 %9006, %v10270_v49   ;;  %11459 = vst [vmem:[#allocation96_spill] sm:$0xff] %v10432_v6  ;;  %v8361_v56 = vcombine.high %v4899_v20, %v4903_v27  ;;  %v10457_v20 = vrot.slane %v10366_v23, %v10141_v1 }
 0x2fa   : > { %8984 = vset.pattern.permute.xlu1 %v11457_v38  ;;  %v10463_v15 = vrot.slane %v10366_v23, %v10147_v29 }
 0x2fb   : > { %4682 = vmatpush1.bf16.msra.mxu1 %v8260_v53  ;;  %4844 = vperm.xlu1 %8984, %v10270_v49   ;;  %11467 = vst [vmem:[#allocation103_spill] sm:$0xff] %v10457_v20 }
 0x2fc   : > { %4725 = vmatpush1.bf16.msra.mxu0 %v8262_v9  ;;  %4683 = vmatprep.subr.bf16.mxu1 %v8253_v24  ;;  %v4892_v24 = vld [vmem:[#allocation11 + $0xd48] sm:$0xff]  ;;  %11468 = vst [vmem:[#allocation104_spill] sm:$0xff] %v10463_v15 }
 0x2fd   : > { %4726 = vmatprep.subr.bf16.mxu0 %v8255_v33  ;;  %9009 = vset.pattern.permute.xlu0 %v11458_v21  ;;  %v4896_v33 = vld [vmem:[#allocation11 + $0xe88] sm:$0xff] }
 0x2fe   : > { %7082 = vperm.xlu0 %9009, %v10270_v49   ;;  %v8355_v38 = vcombine.high %v4892_v24, %v4896_v33  ;;  %v8354_v57 = vcombine.low %v4892_v24, %v4896_v33 }
 0x2ff   : > { %4684 = vmatpush1.bf16.msra.mxu1 %v8252_v43  ;;  %8986 = vset.pattern.permute.xlu1 %v11461_v63  ;;  %v10451_v43 = vrot.slane %v10366_v23, %v10129_v14  ;;  %v8352_v63 = vcombine.low %v4891_v58, %v4895_v25  ;;  %v4880_v58 = vld [vmem:[#allocation11 + $0x988] sm:$0xff]  ;;  %v11470_v25 = vmov 50  }
 0x300   : > { %4727 = vmatpush1.bf16.msra.mxu0 %v8254_v44  ;;  %5277 = vmatprep.subr.bf16.mxu1 %v8369_v16  ;;  %v4883_v44 = vld [vmem:[#allocation11 + $0xac0] sm:$0xff] }
 0x301   : > { %5320 = vmatprep.subr.bf16.mxu0 %v8371_v30  ;;  %5466 = vperm.xlu1 %8986, %v10270_v49   ;;  %v4887_v16 = vld [vmem:[#allocation11 + $0xc00] sm:$0xff]  ;;  %v10453_v30 = vpop.permute.xlu1 %4768 }
 0x302   : > { %v10438_v53 = vpop.f32.mrf.mxu1  ;;  %v10440_v9 = vpop.f32.mrf.mxu0  ;;  %4702 = vmatmul.mubr.bf16.vlgmr.msra.gmra.mxu1 %v9882_v45  ;;  %11466 = vst [vmem:[#allocation102_spill] sm:$0xff] %v10453_v30  ;;  %v8345_v3 = vcombine.high %v4883_v44, %v4887_v16  ;;  %v8344_v24 = vcombine.low %v4883_v44, %v4887_v16 }
 0x303   : > { %11462 = vst [vmem:[#allocation98_spill] sm:$0xff] %v10438_v53  ;;  %11463 = vst [vmem:[#allocation99_spill] sm:$0xff] %v10440_v9  ;;  %4745 = vmatmul.mubr.bf16.vlgmr.msra.gmra.mxu0 %v9882_v45  ;;  %5278 = vmatpush1.bf16.msra.mxu1 %v8368_v37  ;;  %v4884_v37 = vld [vmem:[#allocation11 + $0xac8] sm:$0xff]  ;;  %v4877_v53 = vld [vmem:[#allocation11 + $0x850] sm:$0xff] }
 0x304   : > { %5321 = vmatpush1.bf16.msra.mxu0 %v8370_v18  ;;  %v10445_v39 = vpop.f32.mrf.mxu1  ;;  %v10447_v8 = vpop.f32.mrf.mxu0  ;;  %5279 = vmatprep.subr.bf16.mxu1 %v8361_v56  ;;  %v4888_v18 = vld [vmem:[#allocation11 + $0xc08] sm:$0xff]  ;;  %v10467_v56 = vrot.slane %v10366_v23, %v10150_v28 }
 0x305   : > { %11464 = vst [vmem:[#allocation100_spill] sm:$0xff] %v10445_v39  ;;  %11465 = vst [vmem:[#allocation101_spill] sm:$0xff] %v10447_v8  ;;  %5322 = vmatprep.subr.bf16.mxu0 %v8363_v48  ;;  %5309 = vmatprep.mubr.bf16.mxu1 %v11401_v19  ;;  %v8347_v23 = vcombine.high %v4884_v37, %v4888_v18  ;;  %v10476_v33 = vpop.permute.xlu1 %4792 }
 0x306   : > { %v2625_v27 = vpop.f32.mrf.mxu1  ;;  %v2668_v21 = vpop.f32.mrf.mxu0  ;;  %5352 = vmatprep.mubr.bf16.mxu0 %v11401_v19  ;;  %11469 = vst [vmem:[#allocation105_spill] sm:$0xff] %v10467_v56  ;;  %8987 = vset.pattern.permute.xlu1 %v11470_v25  ;;  %11471 = vst [vmem:[#allocation106_spill] sm:$0xff] %v10476_v33  ;;  %v4871_v25 = vld [vmem:[#allocation11 + $0x700] sm:$0xff] }
 0x307   : > { %v2626_v48 = vadd.f32 %v2625_v27, %v10451_v43  ;;  %5280 = vmatpush1.bf16.msra.mxu1 %v8360_v7  ;;  %v2669_v30 = vadd.f32 %v2668_v21, %v10457_v20  ;;  %v4879_v27 = vld [vmem:[#allocation11 + $0x980] sm:$0xff]  ;;  %v4876_v7 = vld [vmem:[#allocation11 + $0x848] sm:$0xff]  ;;  %5478 = vperm.xlu1 %8987, %v10270_v49  }
 0x308   : > { %5323 = vmatpush1.bf16.msra.mxu0 %v8362_v46  ;;  %v2627_v6 = vpop.f32.mrf.mxu1  ;;  %v2670_v36 = vpop.f32.mrf.mxu0  ;;  %5281 = vmatprep.subr.bf16.mxu1 %v8353_v31 }
 0x309   : > { %v2730_v8 = vmul.f32 %v10108_v12, %v2626_v48  ;;  %v2628_v9 = vadd.f32 %v2627_v6, %v10463_v15  ;;  %v2671_v39 = vadd.f32 %v2670_v36, %v10467_v56  ;;  %5324 = vmatprep.subr.bf16.mxu0 %v8355_v38  ;;  %v8346_v12 = vcombine.low %v4884_v37, %v4888_v18  ;;  %v10478_v36 = vpop.permute.xlu0 %2758  ;;  %v4867_v56 = vld [vmem:[#allocation11 + $0x5c0] sm:$0xff] }
 0x30a   : > { %v8337_v6 = vcombine.high %v4875_v2, %v4879_v27  ;;  %11472 = vst [vmem:[#allocation107_spill] sm:$0xff] %v10478_v36  ;;  %v2754_v31 = vmul.f32 %v10135_v17, %v2669_v30  ;;  %v8339_v48 = vcombine.high %v4876_v7, %v4880_v58  ;;  %v8329_v16 = vcombine.high %v4867_v56, %v4871_v25  ;;  %v4859_v30 = vld [vmem:[#allocation11 + $0x340] sm:$0xff] }
 0x30b   : > { %v2732_v46 = vadd.f32 %v2730_v8, %v10415_v40  ;;  %v2742_v21 = vmul.f32 %v2739_v55, %v2628_v9  ;;  %5282 = vmatpush1.bf16.msra.mxu1 %v8352_v63  ;;  %v4868_v40 = vld [vmem:[#allocation11 + $0x5c8] sm:$0xff]  ;;  %v2766_v44 = vmul.f32 %v10183_v34, %v2671_v39  ;;  %v4863_v18 = vld [vmem:[#allocation11 + $0x480] sm:$0xff]  ;;  %v10487_v63 = vpop.permute.xlu1 %4804 }
 0x30c   : > { %5325 = vmatpush1.bf16.msra.mxu0 %v8354_v57  ;;  %5283 = vmatprep.subr.bf16.mxu1 %v8345_v3  ;;  %v4872_v9 = vld [vmem:[#allocation11 + $0x708] sm:$0xff]  ;;  %v8336_v3 = vcombine.low %v4875_v2, %v4879_v27  ;;  %v8338_v57 = vcombine.low %v4876_v7, %v4880_v58  ;;  %11473 = vst [vmem:[#allocation108_spill] sm:$0xff] %v10487_v63  ;;  %v4851_v58 = vld [vmem:[#allocation11 + $0xc0] sm:$0xff]  ;;  %v4889_v63 = vld [vmem:[#allocation11 + $0xc10] sm:$0xff] }
 0x30d   : > { %v2744_v38 = vadd.f32 %v2742_v21, %v2732_v46  ;;  %5326 = vmatprep.subr.bf16.mxu0 %v8347_v23  ;;  %v8331_v17 = vcombine.high %v4868_v40, %v4872_v9  ;;  %v10485_v55 = vpop.permute.xlu0 %3372  ;;  %v11474_v23 = vmov 52   ;;  %v4860_v46 = vld [vmem:[#allocation11 + $0x348] sm:$0xff]  ;;  %v8328_v2 = vcombine.low %v4867_v56, %v4871_v25  ;;  %v4855_v21 = vld [vmem:[#allocation11 + $0x200] sm:$0xff] }
 0x30e   : > { %8989 = vset.pattern.permute.xlu1 %v11474_v23  ;;  %v4864_v34 = vld [vmem:[#allocation11 + $0x488] sm:$0xff]  ;;  %v8330_v39 = vcombine.low %v4868_v40, %v4872_v9  ;;  %v8321_v27 = vcombine.high %v4859_v30, %v4863_v18  ;;  %v8313_v25 = vcombine.high %v4851_v58, %v4855_v21  ;;  %v4909_v9 = vld [vmem:[#allocation11 + $0x1250] sm:$0xff] }
 0x30f   : > { %v2756_v8 = vadd.f32 %v2754_v31, %v2744_v38  ;;  %5284 = vmatpush1.bf16.msra.mxu1 %v8344_v24  ;;  %5502 = vperm.xlu1 %8989, %v10270_v49   ;;  %v8323_v7 = vcombine.high %v4860_v46, %v4864_v34  ;;  %v4852_v24 = vld [vmem:[#allocation11 + $0xc8] sm:$0xff]  ;;  %v8320_v31 = vcombine.low %v4859_v30, %v4863_v18  ;;  %v4901_v23 = vld [vmem:[#allocation11 + $0xfd0] sm:$0xff] }
 0x310   : > { %5327 = vmatpush1.bf16.msra.mxu0 %v8346_v12  ;;  %5285 = vmatprep.subr.bf16.mxu1 %v8337_v6  ;;  %v4856_v12 = vld [vmem:[#allocation11 + $0x208] sm:$0xff]  ;;  %v11475_v6 = vmov 53   ;;  %v8322_v56 = vcombine.low %v4860_v46, %v4864_v34  ;;  %v4905_v46 = vld [vmem:[#allocation11 + $0x1110] sm:$0xff] }
 0x311   : > { %v10483_v37 = vadd.f32 %v2766_v44, %v2756_v8  ;;  %5328 = vmatprep.subr.bf16.mxu0 %v8339_v48  ;;  %v10492_v38 = vpop.permute.xlu0 %3392  ;;  %v10494_v48 = vpop.permute.xlu1 %4828  ;;  %v8315_v40 = vcombine.high %v4852_v24, %v4856_v12  ;;  %v4913_v8 = vld [vmem:[#allocation11 + $0x1390] sm:$0xff]  ;;  %v4910_v44 = vld [vmem:[#allocation11 + $0x1258] sm:$0xff] }
 0x312   : > { %11476 = vst [vmem:[#allocation109_spill] sm:$0xff] %v10492_v38  ;;  %11477 = vst [vmem:[#allocation110_spill] sm:$0xff] %v10494_v48  ;;  %v8373_v30 = vcombine.high %v4909_v9, %v4913_v8  ;;  %v4885_v48 = vld [vmem:[#allocation11 + $0xad0] sm:$0xff] }
 0x313   : > { %5286 = vmatpush1.bf16.msra.mxu1 %v8336_v3  ;;  %8990 = vset.pattern.permute.xlu1 %v11475_v6  ;;  %v4914_v3 = vld [vmem:[#allocation11 + $0x1398] sm:$0xff]  ;;  %v4893_v6 = vld [vmem:[#allocation11 + $0xd50] sm:$0xff] }
 0x314   : > { %5329 = vmatpush1.bf16.msra.mxu0 %v8338_v57  ;;  %5287 = vmatprep.subr.bf16.mxu1 %v8329_v16  ;;  %v8312_v57 = vcombine.low %v4851_v58, %v4855_v21  ;;  %v8375_v18 = vcombine.high %v4910_v44, %v4914_v3  ;;  %v8374_v21 = vcombine.low %v4910_v44, %v4914_v3 }
 0x315   : > { %5330 = vmatprep.subr.bf16.mxu0 %v8331_v17  ;;  %5514 = vperm.xlu1 %8990, %v10270_v49   ;;  %v10497_v16 = vpop.permute.xlu0 %3408  ;;  %v11478_v17 = vmov 55   ;;  %v8314_v49 = vcombine.low %v4852_v24, %v4856_v12  ;;  %v10500_v34 = vpop.permute.xlu1 %4840  ;;  %v8365_v24 = vcombine.high %v4901_v23, %v4905_v46  ;;  %v8364_v44 = vcombine.low %v4901_v23, %v4905_v46 }
 0x316   : > { %11479 = vst [vmem:[#allocation111_spill] sm:$0xff] %v10500_v34 }
 0x317   : > { %5288 = vmatpush1.bf16.msra.mxu1 %v8328_v2  ;;  %v10503_v2 = vld [vmem:[%s9786_s26 + $0x8] sm:$0xff]  ;;  %s7113_s26 = sld [smem:[#allocation4 + %s7112_s27]] }
 0x318   : > { %5331 = vmatpush1.bf16.msra.mxu0 %v8330_v39  ;;  %5289 = vmatprep.subr.bf16.mxu1 %v8321_v27  ;;  %v4902_v39 = vld [vmem:[#allocation11 + $0xfd8] sm:$0xff] }
 0x319   : > { %5332 = vmatprep.subr.bf16.mxu0 %v8323_v7  ;;  %8992 = vset.pattern.permute.xlu1 %v11478_v17  ;;  %v4906_v27 = vld [vmem:[#allocation11 + $0x1118] sm:$0xff]  ;;  %v8372_v7 = vcombine.low %v4909_v9, %v4913_v8  ;;  %v10506_v58 = vpop.permute.xlu0 %3428  ;;  %v10517_v3 = vpop.permute.xlu1 %5462 }
 0x31a   : > { %5538 = vperm.xlu1 %8992, %v10503_v2   ;;  %11480 = vst [vmem:[#allocation112_spill] sm:$0xff] %v10506_v58  ;;  %v8367_v12 = vcombine.high %v4902_v39, %v4906_v27  ;;  %v4894_v9 = vld [vmem:[#allocation11 + $0xd58] sm:$0xff]  ;;  %11484 = vst [vmem:[#allocation115_spill] sm:$0xff] %v10517_v3 }
 0x31b   : > { %5290 = vmatpush1.bf16.msra.mxu1 %v8320_v31  ;;  %v4897_v31 = vld [vmem:[#allocation11 + $0xe90] sm:$0xff]  ;;  %v4898_v8 = vld [vmem:[#allocation11 + $0xe98] sm:$0xff] }
 0x31c   : > { %5333 = vmatpush1.bf16.msra.mxu0 %v8322_v56  ;;  %5291 = vmatprep.subr.bf16.mxu1 %v8313_v25  ;;  %v11481_v56 = vmov 56   ;;  %v10509_v25 = vld [vmem:[#allocation13 + $0x18] sm:$0xff]  ;;  %v8359_v34 = vcombine.high %v4894_v9, %v4898_v8  ;;  %v8356_v33 = vcombine.low %v4893_v6, %v4897_v31 }
 0x31d   : > { %5334 = vmatprep.subr.bf16.mxu0 %v8315_v40  ;;  %v10531_v23 = vrot.slane %v10509_v25, %v10045_v59  ;;  %v4886_v3 = vld [vmem:[#allocation11 + $0xad8] sm:$0xff]  ;;  %s7114_s25 = scalar_lea.vmem [#allocation2], %s7113_s26  ;;  %s7152_s26 = sadd.s32 8, %s11172_s21 }
 0x31e   : > { %8993 = vset.pattern.permute.xlu1 %v11481_v56  ;;  %v10525_v56 = vrot.slane %v10509_v25, %v10042_v35 }
 0x31f   : > { %5292 = vmatpush1.bf16.msra.mxu1 %v8312_v57  ;;  %11487 = vst [vmem:[#allocation118_spill] sm:$0xff] %v10531_v23  ;;  %6148 = vperm.xlu1 %8993, %v10503_v2  }
 0x320   : > { %5335 = vmatpush1.bf16.msra.mxu0 %v8314_v49  ;;  %5363 = vmatprep.subr.bf16.mxu1 %v8373_v30  ;;  %v8366_v30 = vcombine.low %v4902_v39, %v4906_v27  ;;  %v10537_v39 = vrot.slane %v10509_v25, %v10060_v52  ;;  %v10541_v27 = vrot.slane %v10509_v25, %v10067_v47 }
 0x321   : > { %5406 = vmatprep.subr.bf16.mxu0 %v8375_v18  ;;  %v8357_v18 = vcombine.high %v4893_v6, %v4897_v31  ;;  %v4882_v6 = vld [vmem:[#allocation11 + $0x998] sm:$0xff]  ;;  %v10548_v31 = vpop.permute.xlu1 %5474 }
 0x322   : > { %v10511_v40 = vpop.f32.mrf.mxu1  ;;  %v10513_v17 = vpop.f32.mrf.mxu0  ;;  %5310 = vmatmul.mubr.bf16.vlgmr.msra.gmra.mxu1 %v9882_v45  ;;  %11488 = vst [vmem:[#allocation119_spill] sm:$0xff] %v10541_v27  ;;  %11489 = vst [vmem:[#allocation120_spill] sm:$0xff] %v10548_v31  ;;  %v4873_v31 = vld [vmem:[#allocation11 + $0x710] sm:$0xff] }
 0x323   : > { %11482 = vst [vmem:[#allocation113_spill] sm:$0xff] %v10511_v40  ;;  %11483 = vst [vmem:[#allocation114_spill] sm:$0xff] %v10513_v17  ;;  %5353 = vmatmul.mubr.bf16.vlgmr.msra.gmra.mxu0 %v9882_v45  ;;  %5364 = vmatpush1.bf16.msra.mxu1 %v8372_v7  ;;  %v10527_v7 = vpop.permute.xlu0 %3444  ;;  %v8358_v17 = vcombine.low %v4894_v9, %v4898_v8 }
 0x324   : > { %5407 = vmatpush1.bf16.msra.mxu0 %v8374_v21  ;;  %v10519_v57 = vpop.f32.mrf.mxu1  ;;  %v10521_v49 = vpop.f32.mrf.mxu0  ;;  %5365 = vmatprep.subr.bf16.mxu1 %v8365_v24  ;;  %v4890_v24 = vld [vmem:[#allocation11 + $0xc18] sm:$0xff] }
 0x325   : > { %11485 = vst [vmem:[#allocation116_spill] sm:$0xff] %v10519_v57  ;;  %11486 = vst [vmem:[#allocation117_spill] sm:$0xff] %v10521_v49  ;;  %5408 = vmatprep.subr.bf16.mxu0 %v8367_v12  ;;  %5395 = vmatprep.mubr.bf16.mxu1 %v11401_v19  ;;  %v8349_v57 = vcombine.high %v4885_v48, %v4889_v63  ;;  %v8351_v15 = vcombine.high %v4886_v3, %v4890_v24 }
 0x326   : > { %v3233_v46 = vpop.f32.mrf.mxu1  ;;  %v3276_v21 = vpop.f32.mrf.mxu0  ;;  %5438 = vmatprep.mubr.bf16.mxu0 %v11401_v19 }
 0x327   : > { %v3234_v12 = vadd.f32 %v3233_v46, %v10525_v56  ;;  %5366 = vmatpush1.bf16.msra.mxu1 %v8364_v44  ;;  %v3277_v58 = vadd.f32 %v3276_v21, %v10531_v23  ;;  %v4881_v46 = vld [vmem:[#allocation11 + $0x990] sm:$0xff]  ;;  %v4878_v44 = vld [vmem:[#allocation11 + $0x858] sm:$0xff] }
 0x328   : > { %5409 = vmatpush1.bf16.msra.mxu0 %v8366_v30  ;;  %v3235_v38 = vpop.f32.mrf.mxu1  ;;  %v3278_v49 = vpop.f32.mrf.mxu0  ;;  %5367 = vmatprep.subr.bf16.mxu1 %v8357_v18  ;;  %v8341_v8 = vcombine.high %v4877_v53, %v4881_v46  ;;  %v8343_v21 = vcombine.high %v4878_v44, %v4882_v6  ;;  %v4874_v23 = vld [vmem:[#allocation11 + $0x718] sm:$0xff] }
 0x329   : > { %v3376_v36 = vmul.f32 %v10485_v55, %v3234_v12  ;;  %v3236_v40 = vadd.f32 %v3235_v38, %v10537_v39  ;;  %v3279_v20 = vadd.f32 %v3278_v49, %v10541_v27  ;;  %5410 = vmatprep.subr.bf16.mxu0 %v8359_v34  ;;  %v8348_v55 = vcombine.low %v4885_v48, %v4889_v63  ;;  %v10553_v34 = vpop.permute.xlu0 %4062  ;;  %v4869_v12 = vld [vmem:[#allocation11 + $0x5d0] sm:$0xff]  ;;  %v4870_v27 = vld [vmem:[#allocation11 + $0x5d8] sm:$0xff]  ;;  %v10559_v48 = vpop.permute.xlu1 %5498 }
 0x32a   : > { %v8350_v38 = vcombine.low %v4886_v3, %v4890_v24  ;;  %11490 = vst [vmem:[#allocation121_spill] sm:$0xff] %v10553_v34  ;;  %v3400_v49 = vmul.f32 %v10218_v0, %v3277_v58  ;;  %v8342_v63 = vcombine.low %v4878_v44, %v4882_v6  ;;  %v8333_v0 = vcombine.high %v4869_v12, %v4873_v31  ;;  %v4862_v3 = vld [vmem:[#allocation11 + $0x358] sm:$0xff]  ;;  %v4853_v6 = vld [vmem:[#allocation11 + $0xd0] sm:$0xff] }
 0x32b   : > { %v3378_v30 = vadd.f32 %v3376_v36, %v10483_v37  ;;  %v3388_v9 = vmul.f32 %v10211_v42, %v3236_v40  ;;  %5368 = vmatpush1.bf16.msra.mxu1 %v8356_v33  ;;  %v11491_v36 = vmov 58   ;;  %v3412_v33 = vmul.f32 %v10497_v16, %v3279_v20  ;;  %11492 = vst [vmem:[#allocation122_spill] sm:$0xff] %v10559_v48  ;;  %v4861_v40 = vld [vmem:[#allocation11 + $0x350] sm:$0xff] }
 0x32c   : > { %5411 = vmatpush1.bf16.msra.mxu0 %v8358_v17  ;;  %5369 = vmatprep.subr.bf16.mxu1 %v8349_v57  ;;  %v8340_v37 = vcombine.low %v4877_v53, %v4881_v46  ;;  %v8335_v58 = vcombine.high %v4870_v27, %v4874_v23  ;;  %v4865_v17 = vld [vmem:[#allocation11 + $0x490] sm:$0xff]  ;;  %v4866_v57 = vld [vmem:[#allocation11 + $0x498] sm:$0xff]  ;;  %v8332_v53 = vcombine.low %v4869_v12, %v4873_v31  ;;  %v11493_v20 = vmov 59  }
 0x32d   : > { %v3390_v18 = vadd.f32 %v3388_v9, %v3378_v30  ;;  %5412 = vmatprep.subr.bf16.mxu0 %v8351_v15  ;;  %8995 = vset.pattern.permute.xlu1 %v11491_v36  ;;  %v10563_v24 = vpop.permute.xlu0 %4078  ;;  %v8334_v16 = vcombine.low %v4870_v27, %v4874_v23  ;;  %v8325_v46 = vcombine.high %v4861_v40, %v4865_v17  ;;  %v4857_v30 = vld [vmem:[#allocation11 + $0x210] sm:$0xff]  ;;  %v4854_v9 = vld [vmem:[#allocation11 + $0xd8] sm:$0xff]  ;;  %v5601_v27 = vld [vmem:[#allocation11 + $0x1260] sm:$0xff]  ;;  %v11496_v12 = vmov 61  }
 0x32e   : > { %6172 = vperm.xlu1 %8995, %v10503_v2   ;;  %v8327_v44 = vcombine.high %v4862_v3, %v4866_v57  ;;  %v8326_v31 = vcombine.low %v4862_v3, %v4866_v57  ;;  %v5602_v36 = vld [vmem:[#allocation11 + $0x1268] sm:$0xff] }
 0x32f   : > { %v3402_v42 = vadd.f32 %v3400_v49, %v3390_v18  ;;  %5370 = vmatpush1.bf16.msra.mxu1 %v8348_v55  ;;  %v4858_v55 = vld [vmem:[#allocation11 + $0x218] sm:$0xff]  ;;  %v8317_v49 = vcombine.high %v4853_v6, %v4857_v30  ;;  %v5594_v3 = vld [vmem:[#allocation11 + $0xfe8] sm:$0xff] }
 0x330   : > { %5413 = vmatpush1.bf16.msra.mxu0 %v8350_v38  ;;  %5371 = vmatprep.subr.bf16.mxu1 %v8341_v8  ;;  %v10567_v38 = vpop.permute.xlu1 %5510  ;;  %v8324_v8 = vcombine.low %v4861_v40, %v4865_v17  ;;  %v8319_v23 = vcombine.high %v4854_v9, %v4858_v55  ;;  %v5593_v40 = vld [vmem:[#allocation11 + $0xfe0] sm:$0xff]  ;;  %v5598_v57 = vld [vmem:[#allocation11 + $0x1128] sm:$0xff] }
 0x331   : > { %v10561_v15 = vadd.f32 %v3412_v33, %v3402_v42  ;;  %5414 = vmatprep.subr.bf16.mxu0 %v8343_v21  ;;  %11494 = vst [vmem:[#allocation123_spill] sm:$0xff] %v10567_v38  ;;  %v10569_v18 = vpop.permute.xlu0 %4098  ;;  %v5605_v21 = vld [vmem:[#allocation11 + $0x13a0] sm:$0xff]  ;;  %v5606_v42 = vld [vmem:[#allocation11 + $0x13a8] sm:$0xff]  ;;  %v8316_v33 = vcombine.low %v4853_v6, %v4857_v30  ;;  %v8427_v6 = vcombine.high %v5594_v3, %v5598_v57 }
 0x332   : > { %8996 = vset.pattern.permute.xlu1 %v11493_v20  ;;  %11495 = vst [vmem:[#allocation124_spill] sm:$0xff] %v10569_v18  ;;  %v5597_v17 = vld [vmem:[#allocation11 + $0x1120] sm:$0xff]  ;;  %v11498_v20 = vmov 62  }
 0x333   : > { %5372 = vmatpush1.bf16.msra.mxu1 %v8340_v37  ;;  %6184 = vperm.xlu1 %8996, %v10503_v2   ;;  %v8318_v37 = vcombine.low %v4854_v9, %v4858_v55  ;;  %v5585_v30 = vld [vmem:[#allocation11 + $0xd60] sm:$0xff] }
 0x334   : > { %5415 = vmatpush1.bf16.msra.mxu0 %v8342_v63  ;;  %5373 = vmatprep.subr.bf16.mxu1 %v8333_v0  ;;  %v8433_v63 = vcombine.high %v5601_v27, %v5605_v21  ;;  %v10573_v0 = vpop.permute.xlu1 %5534  ;;  %v5589_v9 = vld [vmem:[#allocation11 + $0xea0] sm:$0xff] }
 0x335   : > { %5416 = vmatprep.subr.bf16.mxu0 %v8335_v58  ;;  %11497 = vst [vmem:[#allocation125_spill] sm:$0xff] %v10573_v0  ;;  %v8435_v58 = vcombine.high %v5602_v36, %v5606_v42  ;;  %v8416_v0 = vcombine.low %v5585_v30, %v5589_v9 }
 0x337   : > { %5374 = vmatpush1.bf16.msra.mxu1 %v8332_v53  ;;  %8998 = vset.pattern.permute.xlu1 %v11496_v12  ;;  %v10575_v53 = vpop.permute.xlu0 %4114  ;;  %v8426_v12 = vcombine.low %v5594_v3, %v5598_v57  ;;  %v5578_v57 = vld [vmem:[#allocation11 + $0xae8] sm:$0xff] }
 0x338   : > { %5417 = vmatpush1.bf16.msra.mxu0 %v8334_v16  ;;  %5375 = vmatprep.subr.bf16.mxu1 %v8325_v46  ;;  %v8432_v16 = vcombine.low %v5601_v27, %v5605_v21  ;;  %v8434_v46 = vcombine.low %v5602_v36, %v5606_v42  ;;  %v8424_v27 = vcombine.low %v5593_v40, %v5597_v17 }
 0x339   : > { %5418 = vmatprep.subr.bf16.mxu0 %v8327_v44  ;;  %6208 = vperm.xlu1 %8998, %v10503_v2   ;;  %v8425_v44 = vcombine.high %v5593_v40, %v5597_v17  ;;  %v8417_v36 = vcombine.high %v5585_v30, %v5589_v9  ;;  %v10600_v40 = vrot.slane %v10509_v25, %v10141_v1  ;;  %v5573_v30 = vld [vmem:[#allocation11 + $0x9a0] sm:$0xff] }
 0x33a   : > { %v10604_v17 = vrot.slane %v10509_v25, %v10147_v29 }
 0x33b   : > { %5376 = vmatpush1.bf16.msra.mxu1 %v8324_v8  ;;  %v5586_v8 = vld [vmem:[#allocation11 + $0xd68] sm:$0xff]  ;;  %v10589_v42 = vpop.permute.xlu0 %4146  ;;  %11503 = vst [vmem:[#allocation130_spill] sm:$0xff] %v10600_v40 }
 0x33c   : > { %5419 = vmatpush1.bf16.msra.mxu0 %v8326_v31  ;;  %5377 = vmatprep.subr.bf16.mxu1 %v8317_v49  ;;  %v5590_v31 = vld [vmem:[#allocation11 + $0xea8] sm:$0xff]  ;;  %v10582_v49 = vpop.permute.xlu1 %6144  ;;  %11501 = vst [vmem:[#allocation128_spill] sm:$0xff] %v10589_v42 }
 0x33d   : > { %5420 = vmatprep.subr.bf16.mxu0 %v8319_v23  ;;  %8999 = vset.pattern.permute.xlu1 %v11498_v20  ;;  %11499 = vst [vmem:[#allocation126_spill] sm:$0xff] %v10582_v49  ;;  %v5581_v20 = vld [vmem:[#allocation11 + $0xc20] sm:$0xff]  ;;  %v8418_v42 = vcombine.low %v5586_v8, %v5590_v31 }
 0x33e   : > { %6220 = vperm.xlu1 %8999, %v10503_v2  }
 0x33f   : > { %5378 = vmatpush1.bf16.msra.mxu1 %v8316_v33  ;;  %v10593_v33 = vrot.slane %v10509_v25, %v10129_v14 }
 0x340   : > { %5421 = vmatpush1.bf16.msra.mxu0 %v8318_v37  ;;  %5971 = vmatprep.subr.bf16.mxu1 %v8433_v63  ;;  %v8419_v63 = vcombine.high %v5586_v8, %v5590_v31  ;;  %v10615_v34 = vpop.permute.xlu1 %6168 }
 0x341   : > { %6014 = vmatprep.subr.bf16.mxu0 %v8435_v58  ;;  %v5577_v58 = vld [vmem:[#allocation11 + $0xae0] sm:$0xff]  ;;  %11506 = vst [vmem:[#allocation132_spill] sm:$0xff] %v10615_v34 }
 0x342   : > { %v10579_v55 = vpop.f32.mrf.mxu1  ;;  %5396 = vmatmul.mubr.bf16.vlgmr.msra.gmra.mxu1 %v9882_v45  ;;  %v8409_v18 = vcombine.high %v5577_v58, %v5581_v20 }
 0x343   : > { %v10584_v23 = vpop.f32.mrf.mxu0  ;;  %5439 = vmatmul.mubr.bf16.vlgmr.msra.gmra.mxu0 %v9882_v45  ;;  %5972 = vmatpush1.bf16.msra.mxu1 %v8432_v16  ;;  %v5582_v16 = vld [vmem:[#allocation11 + $0xc28] sm:$0xff] }
 0x344   : > { %11500 = vst [vmem:[#allocation127_spill] sm:$0xff] %v10584_v23  ;;  %6015 = vmatpush1.bf16.msra.mxu0 %v8434_v46  ;;  %v10587_v21 = vpop.f32.mrf.mxu1  ;;  %5973 = vmatprep.subr.bf16.mxu1 %v8425_v44  ;;  %v11504_v46 = vmov 64   ;;  %v10610_v44 = vrot.slane %v10509_v25, %v10150_v28  ;;  %v5570_v23 = vld [vmem:[#allocation11 + $0x868] sm:$0xff] }
 0x345   : > { %v10595_v37 = vpop.f32.mrf.mxu0  ;;  %6016 = vmatprep.subr.bf16.mxu0 %v8427_v6  ;;  %6003 = vmatprep.mubr.bf16.mxu1 %v11401_v19 }
 0x346   : > { %11502 = vst [vmem:[#allocation129_spill] sm:$0xff] %v10595_v37  ;;  %v3319_v3 = vpop.f32.mrf.mxu1  ;;  %6046 = vmatprep.mubr.bf16.mxu0 %v11401_v19  ;;  %9001 = vset.pattern.permute.xlu1 %v11504_v46  ;;  %11505 = vst [vmem:[#allocation131_spill] sm:$0xff] %v10610_v44 }
 0x347   : > { %v3320_v6 = vadd.f32 %v3319_v3, %v10593_v33  ;;  %v3362_v49 = vpop.f32.mrf.mxu0  ;;  %5974 = vmatpush1.bf16.msra.mxu1 %v8424_v27  ;;  %6842 = vperm.xlu1 %9001, %v10503_v2   ;;  %v8411_v3 = vcombine.high %v5578_v57, %v5582_v16  ;;  %v5569_v27 = vld [vmem:[#allocation11 + $0x860] sm:$0xff] }
 0x348   : > { %v3363_v38 = vadd.f32 %v3362_v49, %v10600_v40  ;;  %6017 = vmatpush1.bf16.msra.mxu0 %v8426_v12  ;;  %v3321_v48 = vpop.f32.mrf.mxu1  ;;  %5975 = vmatprep.subr.bf16.mxu1 %v8417_v36  ;;  %v5574_v49 = vld [vmem:[#allocation11 + $0x9a8] sm:$0xff]  ;;  %v10620_v12 = vpop.permute.xlu0 %4780  ;;  %v8408_v36 = vcombine.low %v5577_v58, %v5581_v20  ;;  %v5565_v40 = vld [vmem:[#allocation11 + $0x720] sm:$0xff] }
 0x349   : > { %v3424_v46 = vmul.f32 %v10277_v22, %v3320_v6  ;;  %v3322_v25 = vadd.f32 %v3321_v48, %v10604_v17  ;;  %v3364_v37 = vpop.f32.mrf.mxu0  ;;  %6018 = vmatprep.subr.bf16.mxu0 %v8419_v63  ;;  %11507 = vst [vmem:[#allocation133_spill] sm:$0xff] %v10620_v12  ;;  %v11508_v22 = vmov 65   ;;  %v8410_v48 = vcombine.low %v5578_v57, %v5582_v16  ;;  %v5553_v16 = vld [vmem:[#allocation11 + $0x360] sm:$0xff] }
 0x34a   : > { %v3365_v9 = vadd.f32 %v3364_v37, %v10610_v44  ;;  %v8401_v63 = vcombine.high %v5569_v27, %v5573_v30  ;;  %v3448_v6 = vmul.f32 %v10527_v7, %v3363_v38  ;;  %v8403_v37 = vcombine.high %v5570_v23, %v5574_v49  ;;  %v5561_v44 = vld [vmem:[#allocation11 + $0x5e0] sm:$0xff] }
 0x34b   : > { %v3426_v8 = vadd.f32 %v3424_v46, %v10561_v15  ;;  %v3436_v31 = vmul.f32 %v10284_v11, %v3322_v25  ;;  %5976 = vmatpush1.bf16.msra.mxu1 %v8416_v0  ;;  %9002 = vset.pattern.permute.xlu1 %v11508_v22  ;;  %v5562_v15 = vld [vmem:[#allocation11 + $0x5e8] sm:$0xff]  ;;  %v10627_v11 = vpop.permute.xlu1 %6180  ;;  %v8393_v7 = vcombine.high %v5561_v44, %v5565_v40  ;;  %v5557_v25 = vld [vmem:[#allocation11 + $0x4a0] sm:$0xff] }
 0x34c   : > { %6019 = vmatpush1.bf16.msra.mxu0 %v8418_v42  ;;  %5977 = vmatprep.subr.bf16.mxu1 %v8409_v18  ;;  %v5566_v46 = vld [vmem:[#allocation11 + $0x728] sm:$0xff]  ;;  %11509 = vst [vmem:[#allocation134_spill] sm:$0xff] %v10627_v11  ;;  %v3460_v58 = vmul.f32 %v10334_v13, %v3365_v9  ;;  %v8400_v18 = vcombine.low %v5569_v27, %v5573_v30  ;;  %v10630_v38 = vpop.permute.xlu0 %4816 }
 0x34d   : > { %v3438_v34 = vadd.f32 %v3436_v31, %v3426_v8  ;;  %6020 = vmatprep.subr.bf16.mxu0 %v8411_v3  ;;  %6854 = vperm.xlu1 %9002, %v10503_v2   ;;  %v8402_v42 = vcombine.low %v5570_v23, %v5574_v49  ;;  %11510 = vst [vmem:[#allocation135_spill] sm:$0xff] %v10630_v38  ;;  %v11511_v3 = vmov 67   ;;  %v5554_v8 = vld [vmem:[#allocation11 + $0x368] sm:$0xff]  ;;  %v5545_v49 = vld [vmem:[#allocation11 + $0xe0] sm:$0xff] }
 0x34e   : > { %v8395_v57 = vcombine.high %v5562_v15, %v5566_v46  ;;  %v8392_v13 = vcombine.low %v5561_v44, %v5565_v40  ;;  %v8394_v23 = vcombine.low %v5562_v15, %v5566_v46  ;;  %v8385_v27 = vcombine.high %v5553_v16, %v5557_v25  ;;  %v5549_v31 = vld [vmem:[#allocation11 + $0x220] sm:$0xff]  ;;  %v5550_v22 = vld [vmem:[#allocation11 + $0x228] sm:$0xff]  ;;  %v5603_v15 = vld [vmem:[#allocation11 + $0x1270] sm:$0xff] }
 0x34f   : > { %v3450_v0 = vadd.f32 %v3448_v6, %v3438_v34  ;;  %5978 = vmatpush1.bf16.msra.mxu1 %v8408_v36  ;;  %v5558_v34 = vld [vmem:[#allocation11 + $0x4a8] sm:$0xff]  ;;  %v10636_v30 = vpop.permute.xlu1 %6204  ;;  %v8384_v6 = vcombine.low %v5553_v16, %v5557_v25  ;;  %v8377_v44 = vcombine.high %v5545_v49, %v5549_v31  ;;  %v5607_v46 = vld [vmem:[#allocation11 + $0x13b0] sm:$0xff] }
 0x350   : > { %6021 = vmatpush1.bf16.msra.mxu0 %v8410_v48  ;;  %5979 = vmatprep.subr.bf16.mxu1 %v8401_v63  ;;  %11512 = vst [vmem:[#allocation136_spill] sm:$0xff] %v10636_v30  ;;  %v8387_v9 = vcombine.high %v5554_v8, %v5558_v34  ;;  %v5546_v36 = vld [vmem:[#allocation11 + $0xe8] sm:$0xff]  ;;  %v10638_v48 = vpop.permute.xlu0 %5450  ;;  %v11514_v63 = vmov 68   ;;  %v8386_v40 = vcombine.low %v5554_v8, %v5558_v34  ;;  %v5595_v8 = vld [vmem:[#allocation11 + $0xff0] sm:$0xff] }
 0x351   : > { %v10632_v20 = vadd.f32 %v3460_v58, %v3450_v0  ;;  %6022 = vmatprep.subr.bf16.mxu0 %v8403_v37  ;;  %9004 = vset.pattern.permute.xlu1 %v11511_v3  ;;  %11513 = vst [vmem:[#allocation137_spill] sm:$0xff] %v10638_v48  ;;  %v8379_v37 = vcombine.high %v5546_v36, %v5550_v22  ;;  %v5604_v0 = vld [vmem:[#allocation11 + $0x1278] sm:$0xff]  ;;  %v5599_v34 = vld [vmem:[#allocation11 + $0x1130] sm:$0xff] }
 0x352   : > { %6878 = vperm.xlu1 %9004, %v10503_v2   ;;  %v5608_v58 = vld [vmem:[#allocation11 + $0x13b8] sm:$0xff]  ;;  %v8437_v16 = vcombine.high %v5603_v15, %v5607_v46 }
 0x353   : > { %5980 = vmatpush1.bf16.msra.mxu1 %v8400_v18  ;;  %v10642_v18 = vpop.permute.xlu1 %6216  ;;  %v8439_v3 = vcombine.high %v5604_v0, %v5608_v58 }
 0x354   : > { %6023 = vmatpush1.bf16.msra.mxu0 %v8402_v42  ;;  %5981 = vmatprep.subr.bf16.mxu1 %v8393_v7  ;;  %11515 = vst [vmem:[#allocation138_spill] sm:$0xff] %v10642_v18  ;;  %v8376_v42 = vcombine.low %v5545_v49, %v5549_v31  ;;  %v11516_v7 = vmov 70   ;;  %v10645_v25 = vpop.permute.xlu0 %5486  ;;  %v8429_v49 = vcombine.high %v5595_v8, %v5599_v34 }
 0x355   : > { %6024 = vmatprep.subr.bf16.mxu0 %v8395_v57  ;;  %v8378_v57 = vcombine.low %v5546_v36, %v5550_v22  ;;  %11517 = vst [vmem:[#allocation139_spill] sm:$0xff] %v10645_v25  ;;  %v5587_v22 = vld [vmem:[#allocation11 + $0xd70] sm:$0xff] }
 0x356   : > { %9005 = vset.pattern.permute.xlu1 %v11514_v63  ;;  %v5591_v63 = vld [vmem:[#allocation11 + $0xeb0] sm:$0xff] }
 0x357   : > { %5982 = vmatpush1.bf16.msra.mxu1 %v8392_v13  ;;  %6890 = vperm.xlu1 %9005, %v10503_v2   ;;  %v5596_v13 = vld [vmem:[#allocation11 + $0xff8] sm:$0xff]  ;;  %v10648_v31 = vpop.permute.xlu1 %6838  ;;  %v8420_v30 = vcombine.low %v5587_v22, %v5591_v63 }
 0x358   : > { %6025 = vmatpush1.bf16.msra.mxu0 %v8394_v23  ;;  %5983 = vmatprep.subr.bf16.mxu1 %v8385_v27  ;;  %v5600_v23 = vld [vmem:[#allocation11 + $0x1138] sm:$0xff]  ;;  %v8436_v27 = vcombine.low %v5603_v15, %v5607_v46  ;;  %11518 = vst [vmem:[#allocation140_spill] sm:$0xff] %v10648_v31  ;;  %v10656_v46 = vpop.permute.xlu0 %5522  ;;  %v5583_v31 = vld [vmem:[#allocation11 + $0xc30] sm:$0xff] }
 0x359   : > { %6026 = vmatprep.subr.bf16.mxu0 %v8387_v9  ;;  %v8438_v9 = vcombine.low %v5604_v0, %v5608_v58  ;;  %v8431_v36 = vcombine.high %v5596_v13, %v5600_v23  ;;  %v5592_v15 = vld [vmem:[#allocation11 + $0xeb8] sm:$0xff]  ;;  %11520 = vst [vmem:[#allocation141_spill] sm:$0xff] %v10656_v46  ;;  %v8428_v58 = vcombine.low %v5595_v8, %v5599_v34 }
 0x35b   : > { %5984 = vmatpush1.bf16.msra.mxu1 %v8384_v6  ;;  %9007 = vset.pattern.permute.xlu1 %v11516_v7  ;;  %v11519_v6 = vmov 71   ;;  %v8430_v7 = vcombine.low %v5596_v13, %v5600_v23  ;;  %v5584_v13 = vld [vmem:[#allocation11 + $0xc38] sm:$0xff]  ;;  %v10675_v23 = vpop.permute.xlu1 %6850 }
 0x35c   : > { %6027 = vmatpush1.bf16.msra.mxu0 %v8386_v40  ;;  %5985 = vmatprep.subr.bf16.mxu1 %v8377_v44  ;;  %v10651_v40 = vld [vmem:[#allocation13 + $0x20] sm:$0xff]  ;;  %11524 = vst [vmem:[#allocation145_spill] sm:$0xff] %v10675_v23  ;;  %v10688_v48 = vpop.permute.xlu0 %6156 }
 0x35d   : > { %6028 = vmatprep.subr.bf16.mxu0 %v8379_v37  ;;  %6914 = vperm.xlu1 %9007, %v10503_v2   ;;  %v5588_v37 = vld [vmem:[#allocation11 + $0xd78] sm:$0xff]  ;;  %v10673_v8 = vrot.slane %v10651_v40, %v10045_v59  ;;  %11526 = vst [vmem:[#allocation147_spill] sm:$0xff] %v10688_v48  ;;  %v5567_v48 = vld [vmem:[#allocation11 + $0x730] sm:$0xff] }
 0x35e   : > { %v8422_v23 = vcombine.low %v5588_v37, %v5592_v15 }
 0x35f   : > { %5986 = vmatpush1.bf16.msra.mxu1 %v8376_v42 }
 0x360   : > { %6029 = vmatpush1.bf16.msra.mxu0 %v8378_v57  ;;  %6057 = vmatprep.subr.bf16.mxu1 %v8437_v16  ;;  %v8421_v57 = vcombine.high %v5587_v22, %v5591_v63  ;;  %v10666_v16 = vrot.slane %v10651_v40, %v10042_v35  ;;  %v5572_v63 = vld [vmem:[#allocation11 + $0x878] sm:$0xff] }
 0x361   : > { %6100 = vmatprep.subr.bf16.mxu0 %v8439_v3  ;;  %9008 = vset.pattern.permute.xlu1 %v11519_v6  ;;  %v5579_v6 = vld [vmem:[#allocation11 + $0xaf0] sm:$0xff] }
 0x362   : > { %v10653_v44 = vpop.f32.mrf.mxu1  ;;  %6004 = vmatmul.mubr.bf16.vlgmr.msra.gmra.mxu1 %v9882_v45  ;;  %6926 = vperm.xlu1 %9008, %v10503_v2   ;;  %v8423_v2 = vcombine.high %v5588_v37, %v5592_v15  ;;  %v8413_v25 = vcombine.high %v5579_v6, %v5583_v31  ;;  %v8412_v15 = vcombine.low %v5579_v6, %v5583_v31 }
 0x363   : > { %v10659_v0 = vpop.f32.mrf.mxu0  ;;  %6047 = vmatmul.mubr.bf16.vlgmr.msra.gmra.mxu0 %v9882_v45  ;;  %6058 = vmatpush1.bf16.msra.mxu1 %v8436_v27  ;;  %v5580_v27 = vld [vmem:[#allocation11 + $0xaf8] sm:$0xff] }
 0x364   : > { %11521 = vst [vmem:[#allocation142_spill] sm:$0xff] %v10659_v0  ;;  %6101 = vmatpush1.bf16.msra.mxu0 %v8438_v9  ;;  %v10662_v42 = vpop.f32.mrf.mxu1  ;;  %6059 = vmatprep.subr.bf16.mxu1 %v8429_v49  ;;  %v10680_v9 = vrot.slane %v10651_v40, %v10060_v52  ;;  %v10684_v49 = vrot.slane %v10651_v40, %v10067_v47 }
 0x365   : > { %11522 = vst [vmem:[#allocation143_spill] sm:$0xff] %v10662_v42  ;;  %v10668_v3 = vpop.f32.mrf.mxu0  ;;  %6102 = vmatprep.subr.bf16.mxu0 %v8431_v36  ;;  %6089 = vmatprep.mubr.bf16.mxu1 %v11401_v19  ;;  %v8415_v0 = vcombine.high %v5580_v27, %v5584_v13  ;;  %v5575_v42 = vld [vmem:[#allocation11 + $0x9b0] sm:$0xff] }
 0x366   : > { %11523 = vst [vmem:[#allocation144_spill] sm:$0xff] %v10668_v3  ;;  %v3927_v34 = vpop.f32.mrf.mxu1  ;;  %6132 = vmatprep.mubr.bf16.mxu0 %v11401_v19  ;;  %11525 = vst [vmem:[#allocation146_spill] sm:$0xff] %v10684_v49 }
 0x367   : > { %v3928_v36 = vadd.f32 %v3927_v34, %v10666_v16  ;;  %v3970_v18 = vpop.f32.mrf.mxu0  ;;  %6060 = vmatpush1.bf16.msra.mxu1 %v8428_v58  ;;  %v5571_v34 = vld [vmem:[#allocation11 + $0x870] sm:$0xff] }
 0x368   : > { %v3971_v11 = vadd.f32 %v3970_v18, %v10673_v8  ;;  %6103 = vmatpush1.bf16.msra.mxu0 %v8430_v7  ;;  %v3929_v46 = vpop.f32.mrf.mxu1  ;;  %6061 = vmatprep.subr.bf16.mxu1 %v8421_v57  ;;  %v5576_v18 = vld [vmem:[#allocation11 + $0x9b8] sm:$0xff]  ;;  %v8405_v7 = vcombine.high %v5571_v34, %v5575_v42 }
 0x369   : > { %v4070_v38 = vmul.f32 %v10342_v54, %v3928_v36  ;;  %v3930_v12 = vadd.f32 %v3929_v46, %v10680_v9  ;;  %v3972_v3 = vpop.f32.mrf.mxu0  ;;  %6104 = vmatprep.subr.bf16.mxu0 %v8423_v2  ;;  %v8414_v54 = vcombine.low %v5580_v27, %v5584_v13  ;;  %v10695_v46 = vpop.permute.xlu1 %6874  ;;  %v8407_v36 = vcombine.high %v5572_v63, %v5576_v18  ;;  %v5556_v13 = vld [vmem:[#allocation11 + $0x378] sm:$0xff] }
 0x36a   : > { %v3973_v22 = vadd.f32 %v3972_v3, %v10684_v49  ;;  %11527 = vst [vmem:[#allocation148_spill] sm:$0xff] %v10695_v46  ;;  %v4094_v57 = vmul.f32 %v10363_v32, %v3971_v11  ;;  %v5563_v3 = vld [vmem:[#allocation11 + $0x5f0] sm:$0xff]  ;;  %v10698_v49 = vpop.permute.xlu0 %6192 }
 0x36b   : > { %v4072_v58 = vadd.f32 %v4070_v38, %v10632_v20  ;;  %v4082_v37 = vmul.f32 %v10563_v24, %v3930_v12  ;;  %6062 = vmatpush1.bf16.msra.mxu1 %v8420_v30  ;;  %11528 = vst [vmem:[#allocation149_spill] sm:$0xff] %v10698_v49  ;;  %v5564_v38 = vld [vmem:[#allocation11 + $0x5f8] sm:$0xff]  ;;  %v8404_v30 = vcombine.low %v5571_v34, %v5575_v42  ;;  %v5555_v11 = vld [vmem:[#allocation11 + $0x370] sm:$0xff] }
 0x36c   : > { %6105 = vmatpush1.bf16.msra.mxu0 %v8422_v23  ;;  %6063 = vmatprep.subr.bf16.mxu1 %v8413_v25  ;;  %v5568_v20 = vld [vmem:[#allocation11 + $0x738] sm:$0xff]  ;;  %v4106_v12 = vmul.f32 %v10400_v62, %v3973_v22  ;;  %v8406_v25 = vcombine.low %v5572_v63, %v5576_v18  ;;  %v8397_v31 = vcombine.high %v5563_v3, %v5567_v48  ;;  %v5547_v63 = vld [vmem:[#allocation11 + $0xf0] sm:$0xff] }
 0x36d   : > { %v4084_v2 = vadd.f32 %v4082_v37, %v4072_v58  ;;  %6106 = vmatprep.subr.bf16.mxu0 %v8415_v0  ;;  %v8399_v32 = vcombine.high %v5564_v38, %v5568_v20  ;;  %v5559_v0 = vld [vmem:[#allocation11 + $0x4b0] sm:$0xff]  ;;  %v10703_v27 = vpop.permute.xlu1 %6886  ;;  %v5560_v23 = vld [vmem:[#allocation11 + $0x4b8] sm:$0xff]  ;;  %v8396_v58 = vcombine.low %v5563_v3, %v5567_v48  ;;  %v8398_v62 = vcombine.low %v5564_v38, %v5568_v20  ;;  %v6299_v3 = vld [vmem:[#allocation11 + $0x13c0] sm:$0xff] }
 0x36e   : > { %11529 = vst [vmem:[#allocation150_spill] sm:$0xff] %v10703_v27  ;;  %v10705_v42 = vpop.permute.xlu0 %6228  ;;  %v8389_v34 = vcombine.high %v5555_v11, %v5559_v0  ;;  %v8391_v22 = vcombine.high %v5556_v13, %v5560_v23  ;;  %v5551_v18 = vld [vmem:[#allocation11 + $0x230] sm:$0xff]  ;;  %v5548_v37 = vld [vmem:[#allocation11 + $0xf8] sm:$0xff]  ;;  %v6296_v20 = vld [vmem:[#allocation11 + $0x1288] sm:$0xff] }
 0x36f   : > { %v4096_v24 = vadd.f32 %v4094_v57, %v4084_v2  ;;  %6064 = vmatpush1.bf16.msra.mxu1 %v8412_v15  ;;  %11530 = vst [vmem:[#allocation151_spill] sm:$0xff] %v10705_v42  ;;  %v5552_v15 = vld [vmem:[#allocation11 + $0x238] sm:$0xff]  ;;  %v8381_v48 = vcombine.high %v5547_v63, %v5551_v18 }
 0x370   : > { %6107 = vmatpush1.bf16.msra.mxu0 %v8414_v54  ;;  %6065 = vmatprep.subr.bf16.mxu1 %v8405_v7  ;;  %v8388_v54 = vcombine.low %v5555_v11, %v5559_v0  ;;  %v8390_v7 = vcombine.low %v5556_v13, %v5560_v23  ;;  %v8383_v2 = vcombine.high %v5548_v37, %v5552_v15  ;;  %v6291_v11 = vld [vmem:[#allocation11 + $0x1140] sm:$0xff]  ;;  %v6288_v13 = vld [vmem:[#allocation11 + $0x1008] sm:$0xff] }
 0x371   : > { %v10701_v6 = vadd.f32 %v4106_v12, %v4096_v24  ;;  %6108 = vmatprep.subr.bf16.mxu0 %v8407_v36  ;;  %v10707_v57 = vpop.permute.xlu1 %6910  ;;  %v6295_v36 = vld [vmem:[#allocation11 + $0x1280] sm:$0xff]  ;;  %v6300_v24 = vld [vmem:[#allocation11 + $0x13c8] sm:$0xff]  ;;  %v8380_v12 = vcombine.low %v5547_v63, %v5551_v18 }
 0x372   : > { %11531 = vst [vmem:[#allocation152_spill] sm:$0xff] %v10707_v57  ;;  %v10709_v38 = vpop.permute.xlu0 %6862  ;;  %v6292_v23 = vld [vmem:[#allocation11 + $0x1148] sm:$0xff]  ;;  %v6279_v18 = vld [vmem:[#allocation11 + $0xd80] sm:$0xff] }
 0x373   : > { %6066 = vmatpush1.bf16.msra.mxu1 %v8404_v30  ;;  %11532 = vst [vmem:[#allocation153_spill] sm:$0xff] %v10709_v38  ;;  %v8382_v30 = vcombine.low %v5548_v37, %v5552_v15  ;;  %v8491_v63 = vcombine.high %v6288_v13, %v6292_v23  ;;  %v6283_v37 = vld [vmem:[#allocation11 + $0xec0] sm:$0xff] }
 0x374   : > { %6109 = vmatpush1.bf16.msra.mxu0 %v8406_v25  ;;  %6067 = vmatprep.subr.bf16.mxu1 %v8397_v31  ;;  %v8497_v25 = vcombine.high %v6295_v36, %v6299_v3  ;;  %v8499_v31 = vcombine.high %v6296_v20, %v6300_v24 }
 0x375   : > { %6110 = vmatprep.subr.bf16.mxu0 %v8399_v32  ;;  %v6287_v32 = vld [vmem:[#allocation11 + $0x1000] sm:$0xff]  ;;  %v10711_v0 = vpop.permute.xlu1 %6922 }
 0x376   : > { %11533 = vst [vmem:[#allocation154_spill] sm:$0xff] %v10711_v0  ;;  %v6275_v0 = vld [vmem:[#allocation11 + $0xc40] sm:$0xff] }
 0x377   : > { %6068 = vmatpush1.bf16.msra.mxu1 %v8396_v58  ;;  %v8496_v58 = vcombine.low %v6295_v36, %v6299_v3 }
 0x378   : > { %6111 = vmatpush1.bf16.msra.mxu0 %v8398_v62  ;;  %6069 = vmatprep.subr.bf16.mxu1 %v8389_v34  ;;  %v10713_v62 = vpop.permute.xlu0 %6898  ;;  %v8498_v34 = vcombine.low %v6296_v20, %v6300_v24  ;;  %v8490_v20 = vcombine.low %v6288_v13, %v6292_v23  ;;  %v8481_v24 = vcombine.high %v6279_v18, %v6283_v37  ;;  %v6272_v23 = vld [vmem:[#allocation11 + $0xb08] sm:$0xff] }
 0x379   : > { %6112 = vmatprep.subr.bf16.mxu0 %v8391_v22  ;;  %11534 = vst [vmem:[#allocation155_spill] sm:$0xff] %v10713_v62  ;;  %v8489_v22 = vcombine.high %v6287_v32, %v6291_v11  ;;  %v4127_v36 = vpop.permute.xlu1 %4126  ;;  %v8480_v62 = vcombine.low %v6279_v18, %v6283_v37  ;;  %v6264_v18 = vld [vmem:[#allocation11 + $0x888] sm:$0xff] }
 0x37a   : > { %v6268_v37 = vld [vmem:[#allocation11 + $0x9c8] sm:$0xff] }
 0x37b   : > { %6070 = vmatpush1.bf16.msra.mxu1 %v8388_v54  ;;  %v6280_v54 = vld [vmem:[#allocation11 + $0xd88] sm:$0xff] }
 0x37c   : > { %6113 = vmatpush1.bf16.msra.mxu0 %v8390_v7  ;;  %6071 = vmatprep.subr.bf16.mxu1 %v8381_v48  ;;  %v6284_v7 = vld [vmem:[#allocation11 + $0xec8] sm:$0xff] }
 0x37d   : > { %6114 = vmatprep.subr.bf16.mxu0 %v8383_v2  ;;  %v8488_v2 = vcombine.low %v6287_v32, %v6291_v11  ;;  %v10732_v32 = vrot.slane %v10651_v40, %v10141_v1  ;;  %v10734_v11 = vpop.permute.xlu0 %7078  ;;  %v8482_v46 = vcombine.low %v6280_v54, %v6284_v7 }
 0x37e   : > { %11541 = vst [vmem:[#allocation162_spill] sm:$0xff] %v10734_v11 }
 0x37f   : > { %6072 = vmatpush1.bf16.msra.mxu1 %v8380_v12  ;;  %v10725_v12 = vrot.slane %v10651_v40, %v10129_v14  ;;  %11540 = vst [vmem:[#allocation161_spill] sm:$0xff] %v10732_v32 }
 0x380   : > { %6115 = vmatpush1.bf16.msra.mxu0 %v8382_v30  ;;  %6665 = vmatprep.subr.bf16.mxu1 %v8497_v25  ;;  %v8483_v25 = vcombine.high %v6280_v54, %v6284_v7 }
 0x381   : > { %6708 = vmatprep.subr.bf16.mxu0 %v8499_v31  ;;  %11538 = vst [vmem:[#allocation159_spill] sm:$0xff] %v10725_v12  ;;  %v6271_v31 = vld [vmem:[#allocation11 + $0xb00] sm:$0xff]  ;;  %v4151_v7 = vpop.permute.xlu0 %4150 }
 0x382   : > { %v10715_v15 = vpop.f32.mrf.mxu1  ;;  %6090 = vmatmul.mubr.bf16.vlgmr.msra.gmra.mxu1 %v9882_v45  ;;  %v8473_v38 = vcombine.high %v6271_v31, %v6275_v0  ;;  %v8472_v54 = vcombine.low %v6271_v31, %v6275_v0  ;;  %v6247_v0 = vld [vmem:[#allocation11 + $0x380] sm:$0xff]  ;;  %v6252_v31 = vld [vmem:[#allocation11 + $0x4c8] sm:$0xff] }
 0x383   : > { %11535 = vst [vmem:[#allocation156_spill] sm:$0xff] %v10715_v15  ;;  %v10718_v48 = vpop.f32.mrf.mxu0  ;;  %6133 = vmatmul.mubr.bf16.vlgmr.msra.gmra.mxu0 %v9882_v45  ;;  %6666 = vmatpush1.bf16.msra.mxu1 %v8496_v58  ;;  %v6276_v58 = vld [vmem:[#allocation11 + $0xc48] sm:$0xff] }
 0x384   : > { %11536 = vst [vmem:[#allocation157_spill] sm:$0xff] %v10718_v48  ;;  %6709 = vmatpush1.bf16.msra.mxu0 %v8498_v34  ;;  %v10721_v3 = vpop.f32.mrf.mxu1  ;;  %6667 = vmatprep.subr.bf16.mxu1 %v8489_v22  ;;  %v10739_v34 = vrot.slane %v10651_v40, %v10147_v29  ;;  %v10743_v22 = vrot.slane %v10651_v40, %v10150_v28  ;;  %v6263_v48 = vld [vmem:[#allocation11 + $0x880] sm:$0xff]  ;;  %v6256_v15 = vld [vmem:[#allocation11 + $0x608] sm:$0xff] }
 0x385   : > { %11537 = vst [vmem:[#allocation158_spill] sm:$0xff] %v10721_v3  ;;  %v10727_v30 = vpop.f32.mrf.mxu0  ;;  %6710 = vmatprep.subr.bf16.mxu0 %v8491_v63  ;;  %6697 = vmatprep.mubr.bf16.mxu1 %v11401_v19  ;;  %v8475_v40 = vcombine.high %v6272_v23, %v6276_v58  ;;  %v6267_v3 = vld [vmem:[#allocation11 + $0x9c0] sm:$0xff] }
 0x386   : > { %11539 = vst [vmem:[#allocation160_spill] sm:$0xff] %v10727_v30  ;;  %v4013_v13 = vpop.f32.mrf.mxu1  ;;  %6740 = vmatprep.mubr.bf16.mxu0 %v11401_v19  ;;  %11542 = vst [vmem:[#allocation163_spill] sm:$0xff] %v10739_v34 }
 0x387   : > { %11543 = vst [vmem:[#allocation164_spill] sm:$0xff] %v10743_v22  ;;  %v4014_v63 = vadd.f32 %v4013_v13, %v10725_v12  ;;  %v4056_v57 = vpop.f32.mrf.mxu0  ;;  %6668 = vmatpush1.bf16.msra.mxu1 %v8488_v2  ;;  %v4139_v13 = vpop.permute.xlu1 %4138 }
 0x388   : > { %v4057_v11 = vadd.f32 %v4056_v57, %v10732_v32  ;;  %6711 = vmatpush1.bf16.msra.mxu0 %v8490_v20  ;;  %v4015_v27 = vpop.f32.mrf.mxu1  ;;  %6669 = vmatprep.subr.bf16.mxu1 %v8481_v24  ;;  %v6255_v32 = vld [vmem:[#allocation11 + $0x600] sm:$0xff] }
 0x389   : > { %v4118_v42 = vmul.f32 %v10575_v53, %v4014_v63  ;;  %v4016_v49 = vadd.f32 %v4015_v27, %v10739_v34  ;;  %v4058_v30 = vpop.f32.mrf.mxu0  ;;  %6712 = vmatprep.subr.bf16.mxu0 %v8483_v25  ;;  %v8474_v53 = vcombine.low %v6272_v23, %v6276_v58  ;;  %v8465_v27 = vcombine.high %v6263_v48, %v6267_v3  ;;  %v6259_v34 = vld [vmem:[#allocation11 + $0x740] sm:$0xff] }
 0x38a   : > { %v4059_v2 = vadd.f32 %v4058_v30, %v10743_v22  ;;  %v4142_v24 = vmul.f32 %v4139_v13, %v4057_v11  ;;  %v8467_v63 = vcombine.high %v6264_v18, %v6268_v37  ;;  %v6260_v30 = vld [vmem:[#allocation11 + $0x748] sm:$0xff]  ;;  %v8456_v11 = vcombine.low %v6255_v32, %v6259_v34 }
 0x38b   : > { %v4120_v57 = vadd.f32 %v4118_v42, %v10701_v6  ;;  %v4130_v20 = vmul.f32 %v4127_v36, %v4016_v49  ;;  %6670 = vmatpush1.bf16.msra.mxu1 %v8480_v62  ;;  %v8464_v6 = vcombine.low %v6263_v48, %v6267_v3  ;;  %v8466_v49 = vcombine.low %v6264_v18, %v6268_v37  ;;  %v6251_v62 = vld [vmem:[#allocation11 + $0x4c0] sm:$0xff]  ;;  %v6248_v36 = vld [vmem:[#allocation11 + $0x388] sm:$0xff] }
 0x38c   : > { %6713 = vmatpush1.bf16.msra.mxu0 %v8482_v46  ;;  %6671 = vmatprep.subr.bf16.mxu1 %v8473_v38  ;;  %v4154_v12 = vmul.f32 %v4151_v7, %v4059_v2  ;;  %v8457_v42 = vcombine.high %v6255_v32, %v6259_v34  ;;  %v8459_v38 = vcombine.high %v6256_v15, %v6260_v30  ;;  %v6239_v3 = vld [vmem:[#allocation11 + $0x100] sm:$0xff]  ;;  %v6240_v13 = vld [vmem:[#allocation11 + $0x108] sm:$0xff]  ;;  %v6301_v32 = vld [vmem:[#allocation11 + $0x13d0] sm:$0xff] }
 0x38d   : > { %v4132_v25 = vadd.f32 %v4130_v20, %v4120_v57  ;;  %6714 = vmatprep.subr.bf16.mxu0 %v8475_v40  ;;  %v8458_v23 = vcombine.low %v6256_v15, %v6260_v30  ;;  %v8449_v58 = vcombine.high %v6247_v0, %v6251_v62  ;;  %v8451_v48 = vcombine.high %v6248_v36, %v6252_v31  ;;  %v6243_v40 = vld [vmem:[#allocation11 + $0x240] sm:$0xff]  ;;  %v6244_v2 = vld [vmem:[#allocation11 + $0x248] sm:$0xff]  ;;  %v6297_v57 = vld [vmem:[#allocation11 + $0x1290] sm:$0xff] }
 0x38e   : > { %v8441_v18 = vcombine.high %v6239_v3, %v6243_v40  ;;  %v8443_v37 = vcombine.high %v6240_v13, %v6244_v2  ;;  %v6298_v34 = vld [vmem:[#allocation11 + $0x1298] sm:$0xff]  ;;  %v8440_v15 = vcombine.low %v6239_v3, %v6243_v40  ;;  %v8501_v7 = vcombine.high %v6297_v57, %v6301_v32 }
 0x38f   : > { %v4144_v22 = vadd.f32 %v4142_v24, %v4132_v25  ;;  %6672 = vmatpush1.bf16.msra.mxu1 %v8472_v54  ;;  %v6302_v20 = vld [vmem:[#allocation11 + $0x13d8] sm:$0xff]  ;;  %v8442_v54 = vcombine.low %v6240_v13, %v6244_v2  ;;  %v6293_v24 = vld [vmem:[#allocation11 + $0x1150] sm:$0xff]  ;;  %v8500_v30 = vcombine.low %v6297_v57, %v6301_v32  ;;  %v1148_v2 = vadd.f32 %v10064_v5, %v10083_v4 }
 0x390   : > { %6715 = vmatpush1.bf16.msra.mxu0 %v8474_v53  ;;  %6673 = vmatprep.subr.bf16.mxu1 %v8465_v27  ;;  %v8503_v53 = vcombine.high %v6298_v34, %v6302_v20  ;;  %v6289_v27 = vld [vmem:[#allocation11 + $0x1010] sm:$0xff]  ;;  %v6290_v25 = vld [vmem:[#allocation11 + $0x1018] sm:$0xff]  ;;  %v1146_v32 = vadd.f32 %v10055_v50, %v10074_v26 }
 0x391   : > { %v10751_v46 = vadd.f32 %v4154_v12, %v4144_v22  ;;  %6716 = vmatprep.subr.bf16.mxu0 %v8467_v63  ;;  %v8448_v12 = vcombine.low %v6247_v0, %v6251_v62  ;;  %v8450_v22 = vcombine.low %v6248_v36, %v6252_v31  ;;  %v6294_v63 = vld [vmem:[#allocation11 + $0x1158] sm:$0xff]  ;;  %v6281_v0 = vld [vmem:[#allocation11 + $0xd90] sm:$0xff]  ;;  %v10753_v36 = vld [vmem:[#allocation13 + $0x28] sm:$0xff] }
 0x392   : > { %v6285_v62 = vld [vmem:[#allocation11 + $0xed0] sm:$0xff]  ;;  %v8494_v40 = vcombine.low %v6290_v25, %v6294_v63 }
 0x393   : > { %6674 = vmatpush1.bf16.msra.mxu1 %v8464_v6  ;;  %v4761_v6 = vpop.permute.xlu1 %4760  ;;  %v8485_v13 = vcombine.high %v6281_v0, %v6285_v62  ;;  %v6277_v57 = vld [vmem:[#allocation11 + $0xc50] sm:$0xff] }
 0x394   : > { %6717 = vmatpush1.bf16.msra.mxu0 %v8466_v49  ;;  %6675 = vmatprep.subr.bf16.mxu1 %v8457_v42  ;;  %v8502_v49 = vcombine.low %v6298_v34, %v6302_v20  ;;  %v8493_v42 = vcombine.high %v6289_v27, %v6293_v24  ;;  %v10776_v34 = vrot.slane %v10753_v36, %v10045_v59  ;;  %v6274_v20 = vld [vmem:[#allocation11 + $0xb18] sm:$0xff] }
 0x395   : > { %6718 = vmatprep.subr.bf16.mxu0 %v8459_v38  ;;  %v8495_v38 = vcombine.high %v6290_v25, %v6294_v63 }
 0x396   : > { %11547 = vst [vmem:[#allocation168_spill] sm:$0xff] %v10776_v34 }
 0x397   : > { %6676 = vmatpush1.bf16.msra.mxu1 %v8456_v11  ;;  %v6282_v11 = vld [vmem:[#allocation11 + $0xd98] sm:$0xff]  ;;  %v4773_v5 = vpop.permute.xlu1 %4772 }
 0x398   : > { %6719 = vmatpush1.bf16.msra.mxu0 %v8458_v23  ;;  %6677 = vmatprep.subr.bf16.mxu1 %v8449_v58  ;;  %v6286_v23 = vld [vmem:[#allocation11 + $0xed8] sm:$0xff] }
 0x399   : > { %6720 = vmatprep.subr.bf16.mxu0 %v8451_v48  ;;  %v8492_v48 = vcombine.low %v6289_v27, %v6293_v24  ;;  %v8486_v25 = vcombine.low %v6282_v11, %v6286_v23 }
 0x39b   : > { %6678 = vmatpush1.bf16.msra.mxu1 %v8448_v12  ;;  %v10767_v12 = vrot.slane %v10753_v36, %v10042_v35 }
 0x39c   : > { %6721 = vmatpush1.bf16.msra.mxu0 %v8450_v22  ;;  %6679 = vmatprep.subr.bf16.mxu1 %v8441_v18  ;;  %v8487_v18 = vcombine.high %v6282_v11, %v6286_v23  ;;  %v11550_v11 = vld [vmem:[#allocation42_spill] sm:$0xff] }
 0x39d   : > { %6722 = vmatprep.subr.bf16.mxu0 %v8443_v37  ;;  %v6273_v37 = vld [vmem:[#allocation11 + $0xb10] sm:$0xff]  ;;  %v1293_v23 = vmul.f32 %v11550_v11, %v1146_v32  ;;  %v11553_v11 = vld [vmem:[#allocation45_spill] sm:$0xff] }
 0x39e   : > { %v8477_v63 = vcombine.high %v6273_v37, %v6277_v57  ;;  %v11552_v32 = vld [vmem:[#allocation47_spill] sm:$0xff] }
 0x39f   : > { %6680 = vmatpush1.bf16.msra.mxu1 %v8440_v15  ;;  %v6278_v15 = vld [vmem:[#allocation11 + $0xc58] sm:$0xff] }
 0x3a0   : > { %6723 = vmatpush1.bf16.msra.mxu0 %v8442_v54  ;;  %6751 = vmatprep.subr.bf16.mxu1 %v8501_v7  ;;  %v10781_v54 = vrot.slane %v10753_v36, %v10060_v52  ;;  %v10785_v7 = vrot.slane %v10753_v36, %v10067_v47 }
 0x3a1   : > { %6794 = vmatprep.subr.bf16.mxu0 %v8503_v53  ;;  %v8484_v53 = vcombine.low %v6281_v0, %v6285_v62  ;;  %v1189_v0 = vadd.f32 %v10057_v51, %v10078_v10  ;;  %v4785_v62 = vpop.permute.xlu0 %4784 }
 0x3a2   : > { %v10755_v31 = vpop.f32.mrf.mxu1  ;;  %6698 = vmatmul.mubr.bf16.vlgmr.msra.gmra.mxu1 %v9882_v45  ;;  %11548 = vst [vmem:[#allocation169_spill] sm:$0xff] %v10781_v54  ;;  %11549 = vst [vmem:[#allocation170_spill] sm:$0xff] %v10785_v7 }
 0x3a3   : > { %v10758_v58 = vpop.f32.mrf.mxu0  ;;  %6741 = vmatmul.mubr.bf16.vlgmr.msra.gmra.mxu0 %v9882_v45  ;;  %6752 = vmatpush1.bf16.msra.mxu1 %v8500_v30  ;;  %v1305_v30 = vmul.f32 %v9915_v61, %v1148_v2  ;;  %v8476_v2 = vcombine.low %v6273_v37, %v6277_v57  ;;  %v11554_v37 = vld [vmem:[#allocation55_spill] sm:$0xff]  ;;  %v11555_v57 = vld [vmem:[#allocation50_spill] sm:$0xff] }
 0x3a4   : > { %11544 = vst [vmem:[#allocation165_spill] sm:$0xff] %v10758_v58  ;;  %6795 = vmatpush1.bf16.msra.mxu0 %v8502_v49  ;;  %v10761_v3 = vpop.f32.mrf.mxu1  ;;  %6753 = vmatprep.subr.bf16.mxu1 %v8493_v42  ;;  %v6265_v58 = vld [vmem:[#allocation11 + $0x890] sm:$0xff] }
 0x3a5   : > { %11545 = vst [vmem:[#allocation166_spill] sm:$0xff] %v10761_v3  ;;  %v10769_v22 = vpop.f32.mrf.mxu0  ;;  %6796 = vmatprep.subr.bf16.mxu0 %v8495_v38  ;;  %6783 = vmatprep.mubr.bf16.mxu1 %v11401_v19  ;;  %v11551_v3 = vld [vmem:[#allocation46_spill] sm:$0xff] }
 0x3a6   : > { %11546 = vst [vmem:[#allocation167_spill] sm:$0xff] %v10769_v22  ;;  %v4621_v4 = vpop.f32.mrf.mxu1  ;;  %6826 = vmatprep.mubr.bf16.mxu0 %v11401_v19  ;;  %v8479_v22 = vcombine.high %v6274_v20, %v6278_v15 }
 0x3a7   : > { %v4622_v26 = vadd.f32 %v4621_v4, %v10767_v12  ;;  %v4664_v50 = vpop.f32.mrf.mxu0  ;;  %6754 = vmatpush1.bf16.msra.mxu1 %v8492_v48  ;;  %v6269_v4 = vld [vmem:[#allocation11 + $0x9d0] sm:$0xff] }
 0x3a8   : > { %v4665_v27 = vadd.f32 %v4664_v50, %v10776_v34  ;;  %6797 = vmatpush1.bf16.msra.mxu0 %v8494_v40  ;;  %v4623_v24 = vpop.f32.mrf.mxu1  ;;  %6755 = vmatprep.subr.bf16.mxu1 %v8485_v13  ;;  %v6266_v40 = vld [vmem:[#allocation11 + $0x898] sm:$0xff]  ;;  %v8469_v50 = vcombine.high %v6265_v58, %v6269_v4 }
 0x3a9   : > { %v4764_v49 = vmul.f32 %v4761_v6, %v4622_v26  ;;  %v4624_v42 = vadd.f32 %v4623_v24, %v10781_v54  ;;  %v4666_v38 = vpop.f32.mrf.mxu0  ;;  %6798 = vmatprep.subr.bf16.mxu0 %v8487_v18  ;;  %v6270_v13 = vld [vmem:[#allocation11 + $0x9d8] sm:$0xff]  ;;  %v4797_v26 = vpop.permute.xlu1 %4796  ;;  %v8478_v18 = vcombine.low %v6274_v20, %v6278_v15  ;;  %v1307_v24 = vadd.f32 %v1305_v30, %v1293_v23 }
 0x3aa   : > { %v4667_v48 = vadd.f32 %v4666_v38, %v10785_v7  ;;  %v4788_v34 = vmul.f32 %v4785_v62, %v4665_v27  ;;  %v8471_v10 = vcombine.high %v6266_v40, %v6270_v13  ;;  %v6257_v38 = vld [vmem:[#allocation11 + $0x610] sm:$0xff]  ;;  %v1317_v54 = vmul.f32 %v11551_v3, %v1189_v0  ;;  %v6250_v62 = vld [vmem:[#allocation11 + $0x398] sm:$0xff] }
 0x3ab   : > { %v4766_v61 = vadd.f32 %v4764_v49, %v10751_v46  ;;  %v4776_v6 = vmul.f32 %v4773_v5, %v4624_v42  ;;  %6756 = vmatpush1.bf16.msra.mxu1 %v8484_v53  ;;  %v6261_v7 = vld [vmem:[#allocation11 + $0x750] sm:$0xff]  ;;  %v1191_v46 = vadd.f32 %v11553_v11, %v11552_v32  ;;  %v6258_v5 = vld [vmem:[#allocation11 + $0x618] sm:$0xff]  ;;  %v8468_v15 = vcombine.low %v6265_v58, %v6269_v4  ;;  %v11557_v32 = vld [vmem:[#allocation33_spill] sm:$0xff] }
 0x3ac   : > { %6799 = vmatpush1.bf16.msra.mxu0 %v8486_v25  ;;  %6757 = vmatprep.subr.bf16.mxu1 %v8477_v63  ;;  %v6262_v53 = vld [vmem:[#allocation11 + $0x758] sm:$0xff]  ;;  %v1232_v25 = vadd.f32 %v11555_v57, %v11554_v37  ;;  %v4800_v20 = vmul.f32 %v4797_v26, %v4667_v48  ;;  %v8461_v27 = vcombine.high %v6257_v38, %v6261_v7  ;;  %v6249_v42 = vld [vmem:[#allocation11 + $0x390] sm:$0xff]  ;;  %v11558_v58 = vld [vmem:[#allocation57_spill] sm:$0xff] }
 0x3ad   : > { %v4778_v51 = vadd.f32 %v4776_v6, %v4766_v61  ;;  %6800 = vmatprep.subr.bf16.mxu0 %v8479_v22  ;;  %v8470_v22 = vcombine.low %v6266_v40, %v6270_v13  ;;  %v1319_v30 = vadd.f32 %v1317_v54, %v1307_v24  ;;  %v8463_v3 = vcombine.high %v6258_v5, %v6262_v53  ;;  %v6253_v0 = vld [vmem:[#allocation11 + $0x4d0] sm:$0xff]  ;;  %v6254_v23 = vld [vmem:[#allocation11 + $0x4d8] sm:$0xff]  ;;  %v11559_v4 = vld [vmem:[#allocation53_spill] sm:$0xff] }
 0x3ae   : > { %v11556_v61 = vld [vmem:[#allocation32_spill] sm:$0xff]  ;;  %v8460_v48 = vcombine.low %v6257_v38, %v6261_v7  ;;  %v8462_v54 = vcombine.low %v6258_v5, %v6262_v53  ;;  %v8453_v40 = vcombine.high %v6249_v42, %v6253_v0  ;;  %v8455_v26 = vcombine.high %v6250_v62, %v6254_v23 }
 0x3af   : > { %v4790_v63 = vadd.f32 %v4788_v34, %v4778_v51  ;;  %6758 = vmatpush1.bf16.msra.mxu1 %v8476_v2  ;;  %v1329_v6 = vmul.f32 %v11556_v61, %v1191_v46  ;;  %v1341_v34 = vmul.f32 %v11557_v32, %v1232_v25  ;;  %v1234_v2 = vadd.f32 %v11559_v4, %v11558_v58  ;;  %v6242_v24 = vld [vmem:[#allocation11 + $0x118] sm:$0xff]  ;;  %v6947_v5 = vld [vmem:[#allocation11 + $0x12a0] sm:$0xff]  ;;  %v11565_v61 = vld [vmem:[#allocation54_spill] sm:$0xff] }
 0x3b0   : > { %6801 = vmatpush1.bf16.msra.mxu0 %v8478_v18  ;;  %6759 = vmatprep.subr.bf16.mxu1 %v8469_v50  ;;  %v6241_v18 = vld [vmem:[#allocation11 + $0x110] sm:$0xff]  ;;  %v6246_v51 = vld [vmem:[#allocation11 + $0x258] sm:$0xff]  ;;  %v8452_v11 = vcombine.low %v6249_v42, %v6253_v0  ;;  %v8454_v7 = vcombine.low %v6250_v62, %v6254_v23  ;;  %v6948_v53 = vld [vmem:[#allocation11 + $0x13e0] sm:$0xff] }
 0x3b1   : > { %v10801_v49 = vadd.f32 %v4800_v20, %v4790_v63  ;;  %6802 = vmatprep.subr.bf16.mxu0 %v8471_v10  ;;  %v1331_v13 = vadd.f32 %v1329_v6, %v1319_v30  ;;  %v6245_v50 = vld [vmem:[#allocation11 + $0x250] sm:$0xff]  ;;  %v11560_v46 = vld [vmem:[#allocation52_spill] sm:$0xff]  ;;  %v8447_v57 = vcombine.high %v6242_v24, %v6246_v51  ;;  %v8519_v30 = vcombine.high %v6947_v5, %v6948_v53 }
 0x3b2   : > { %v1353_v37 = vmul.f32 %v11560_v46, %v1234_v2  ;;  %v8445_v38 = vcombine.high %v6241_v18, %v6245_v50  ;;  %v11561_v25 = vld [vmem:[#allocation56_spill] sm:$0xff]  ;;  %v11562_v63 = vld [vmem:[#allocation51_spill] sm:$0xff]  ;;  %v11563_v0 = vld [vmem:[#allocation34_spill] sm:$0xff]  ;;  %v8518_v58 = vcombine.low %v6947_v5, %v6948_v53  ;;  %v4809_v2 = vpop.permute.xlu1 %4808  ;;  %v10830_v53 = vrot.slane %v10753_v36, %v10129_v14 }
 0x3b3   : > { %6760 = vmatpush1.bf16.msra.mxu1 %v8468_v15  ;;  %v1343_v10 = vadd.f32 %v1341_v34, %v1331_v13  ;;  %v1275_v20 = vadd.f32 %v11562_v63, %v11561_v25  ;;  %v8444_v15 = vcombine.low %v6241_v18, %v6245_v50  ;;  %v6946_v42 = vld [vmem:[#allocation11 + $0x1160] sm:$0xff]  ;;  %v11564_v23 = vld [vmem:[#allocation58_spill] sm:$0xff]  ;;  %v11569_v50 = vld [vmem:[#allocation63_spill] sm:$0xff] }
 0x3b4   : > { %6803 = vmatpush1.bf16.msra.mxu0 %v8470_v22  ;;  %6761 = vmatprep.subr.bf16.mxu1 %v8461_v27  ;;  %v8446_v27 = vcombine.low %v6242_v24, %v6246_v51  ;;  %v1277_v6 = vadd.f32 %v11565_v61, %v11564_v23  ;;  %v11566_v32 = vld [vmem:[#allocation66_spill] sm:$0xff]  ;;  %v11567_v34 = vld [vmem:[#allocation61_spill] sm:$0xff]  ;;  %v11573_v61 = vld [vmem:[#allocation68_spill] sm:$0xff] }
 0x3b5   : > { %6804 = vmatprep.subr.bf16.mxu0 %v8463_v3  ;;  %v1355_v22 = vadd.f32 %v1353_v37, %v1343_v10  ;;  %v6945_v3 = vld [vmem:[#allocation11 + $0x1020] sm:$0xff]  ;;  %v1365_v62 = vmul.f32 %v11563_v0, %v1275_v20 }
 0x3b6   : > { %v6944_v13 = vld [vmem:[#allocation11 + $0xee0] sm:$0xff] }
 0x3b7   : > { %6762 = vmatpush1.bf16.msra.mxu1 %v8460_v48  ;;  %v1842_v48 = vadd.f32 %v11567_v34, %v11566_v32  ;;  %v1367_v4 = vadd.f32 %v1365_v62, %v1355_v22  ;;  %v11570_v51 = vld [vmem:[#allocation69_spill] sm:$0xff]  ;;  %v11571_v10 = vld [vmem:[#allocation64_spill] sm:$0xff]  ;;  %v10848_v34 = vrot.slane %v10753_v36, %v10150_v28 }
 0x3b8   : > { %6805 = vmatpush1.bf16.msra.mxu0 %v8462_v54  ;;  %6763 = vmatprep.subr.bf16.mxu1 %v8453_v40  ;;  %v8517_v54 = vcombine.high %v6945_v3, %v6946_v42  ;;  %v6943_v40 = vld [vmem:[#allocation11 + $0xda0] sm:$0xff] }
 0x3b9   : > { %6806 = vmatprep.subr.bf16.mxu0 %v8455_v26  ;;  %v11568_v26 = vld [vmem:[#allocation35_spill] sm:$0xff]  ;;  %v1987_v24 = vmul.f32 %v11569_v50, %v1842_v48  ;;  %v8515_v5 = vcombine.high %v6943_v40, %v6944_v13  ;;  %v6941_v63 = vld [vmem:[#allocation11 + $0xb20] sm:$0xff]  ;;  %v8514_v23 = vcombine.low %v6943_v40, %v6944_v13 }
 0x3ba   : > { %v1377_v18 = vmul.f32 %v11568_v26, %v1277_v6  ;;  %v6942_v20 = vld [vmem:[#allocation11 + $0xc60] sm:$0xff]  ;;  %v11574_v6 = vld [vmem:[#allocation62_spill] sm:$0xff] }
 0x3bb   : > { %6764 = vmatpush1.bf16.msra.mxu1 %v8452_v11  ;;  %v1844_v11 = vadd.f32 %v11571_v10, %v11570_v51  ;;  %v11572_v22 = vld [vmem:[#allocation36_spill] sm:$0xff]  ;;  %v1885_v32 = vadd.f32 %v11574_v6, %v11573_v61 }
 0x3bc   : > { %6807 = vmatpush1.bf16.msra.mxu0 %v8454_v7  ;;  %6765 = vmatprep.subr.bf16.mxu1 %v8445_v38  ;;  %v8516_v7 = vcombine.low %v6945_v3, %v6946_v42  ;;  %v1379_v38 = vadd.f32 %v1377_v18, %v1367_v4  ;;  %v4833_v3 = vpop.permute.xlu1 %4832  ;;  %v4821_v4 = vpop.permute.xlu0 %4820  ;;  %v6940_v51 = vld [vmem:[#allocation11 + $0x9e0] sm:$0xff] }
 0x3bd   : > { %6808 = vmatprep.subr.bf16.mxu0 %v8447_v57 }
 0x3bf   : > { %6766 = vmatpush1.bf16.msra.mxu1 %v8444_v15  ;;  %v1989_v15 = vadd.f32 %v1987_v24, %v1379_v38  ;;  %v6939_v24 = vld [vmem:[#allocation11 + $0x8a0] sm:$0xff] }
 0x3c0   : > { %6809 = vmatpush1.bf16.msra.mxu0 %v8446_v27  ;;  %7036 = vmatprep.subr.bf16.mxu1 %v8519_v30  ;;  %v1999_v27 = vmul.f32 %v11572_v22, %v1844_v11  ;;  %v10837_v30 = vrot.slane %v10753_v36, %v10141_v1  ;;  %v11576_v22 = vld [vmem:[#allocation70_spill] sm:$0xff]  ;;  %v8511_v61 = vcombine.high %v6939_v24, %v6940_v51 }
 0x3c2   : > { %v10819_v46 = vpop.f32.mrf.mxu1  ;;  %6784 = vmatmul.mubr.bf16.vlgmr.msra.gmra.mxu1 %v9882_v45  ;;  %v2001_v40 = vadd.f32 %v1999_v27, %v1989_v15  ;;  %v6937_v27 = vld [vmem:[#allocation11 + $0x620] sm:$0xff] }
 0x3c3   : > { %v10822_v37 = vpop.f32.mrf.mxu0  ;;  %6827 = vmatmul.mubr.bf16.vlgmr.msra.gmra.mxu0 %v9882_v45  ;;  %7037 = vmatpush1.bf16.msra.mxu1 %v8518_v58 }
 0x3c4   : > { %v10825_v57 = vpop.f32.mrf.mxu1  ;;  %7038 = vmatprep.subr.bf16.mxu1 %v8517_v54  ;;  %7068 = vmatprep.mubr.bf16.mxu1 %v11401_v19  ;;  %v10841_v19 = vrot.slane %v10753_v36, %v10147_v29  ;;  %v8513_v54 = vcombine.high %v6941_v63, %v6942_v20  ;;  %v8512_v36 = vcombine.low %v6941_v63, %v6942_v20  ;;  %v11579_v20 = vld [vmem:[#allocation72_spill] sm:$0xff] }
 0x3c5   : > { %v10832_v25 = vpop.f32.mrf.mxu0  ;;  %v8510_v63 = vcombine.low %v6939_v24, %v6940_v51  ;;  %v6933_v51 = vld [vmem:[#allocation11 + $0x120] sm:$0xff] }
 0x3c6   : > { %v4707_v42 = vpop.f32.mrf.mxu1 }
 0x3c7   : > { %v4708_v0 = vadd.f32 %v4707_v42, %v10830_v53  ;;  %v4750_v62 = vpop.f32.mrf.mxu0  ;;  %7039 = vmatpush1.bf16.msra.mxu1 %v8516_v7  ;;  %v11575_v7 = vld [vmem:[#allocation37_spill] sm:$0xff] }
 0x3c8   : > { %v4751_v48 = vadd.f32 %v4750_v62, %v10837_v30  ;;  %v4709_v58 = vpop.f32.mrf.mxu1  ;;  %7040 = vmatprep.subr.bf16.mxu1 %v8515_v5  ;;  %v2011_v38 = vmul.f32 %v11575_v7, %v1885_v32  ;;  %v11577_v42 = vld [vmem:[#allocation65_spill] sm:$0xff]  ;;  %v4845_v62 = vpop.permute.xlu1 %4844  ;;  %v11580_v32 = vld [vmem:[#allocation38_spill] sm:$0xff] }
 0x3c9   : > { %v4812_v26 = vmul.f32 %v4809_v2, %v4708_v0  ;;  %v4710_v18 = vadd.f32 %v4709_v58, %v10841_v19  ;;  %v4752_v50 = vpop.f32.mrf.mxu0  ;;  %v1887_v5 = vadd.f32 %v11577_v42, %v11576_v22  ;;  %v11578_v2 = vld [vmem:[#allocation74_spill] sm:$0xff]  ;;  %v6938_v58 = vld [vmem:[#allocation11 + $0x760] sm:$0xff] }
 0x3ca   : > { %v4753_v13 = vadd.f32 %v4752_v50, %v10848_v34  ;;  %v1928_v0 = vadd.f32 %v11578_v2, %v10312_v60  ;;  %v4836_v6 = vmul.f32 %v4833_v3, %v4751_v48  ;;  %v2013_v50 = vadd.f32 %v2011_v38, %v2001_v40  ;;  %v11582_v7 = vld [vmem:[#allocation77_spill] sm:$0xff]  ;;  %v11584_v38 = vld [vmem:[#allocation79_spill] sm:$0xff] }
 0x3cb   : > { %v4814_v10 = vadd.f32 %v4812_v26, %v10801_v49  ;;  %v4824_v11 = vmul.f32 %v4821_v4, %v4710_v18  ;;  %7041 = vmatpush1.bf16.msra.mxu1 %v8514_v23  ;;  %v2023_v23 = vmul.f32 %v11579_v20, %v1887_v5  ;;  %v11581_v18 = vld [vmem:[#allocation80_spill] sm:$0xff]  ;;  %v8509_v60 = vcombine.high %v6937_v27, %v6938_v58  ;;  %v11585_v5 = vld [vmem:[#allocation75_spill] sm:$0xff] }
 0x3cc   : > { %7042 = vmatprep.subr.bf16.mxu1 %v8513_v54  ;;  %v4848_v49 = vmul.f32 %v4845_v62, %v4753_v13  ;;  %v2035_v26 = vmul.f32 %v11580_v32, %v1928_v0  ;;  %v1930_v22 = vadd.f32 %v11582_v7, %v11581_v18  ;;  %v6935_v54 = vld [vmem:[#allocation11 + $0x3a0] sm:$0xff]  ;;  %v11583_v13 = vld [vmem:[#allocation39_spill] sm:$0xff]  ;;  %v1971_v2 = vadd.f32 %v11585_v5, %v11584_v38  ;;  %v5467_v38 = vpop.permute.xlu1 %5466 }
 0x3cd   : > { %v4826_v15 = vadd.f32 %v4824_v11, %v4814_v10  ;;  %v6936_v42 = vld [vmem:[#allocation11 + $0x4e0] sm:$0xff]  ;;  %v2025_v48 = vadd.f32 %v2023_v23, %v2013_v50  ;;  %v8508_v10 = vcombine.low %v6937_v27, %v6938_v58  ;;  %v11587_v50 = vld [vmem:[#allocation82_spill] sm:$0xff] }
 0x3ce   : > { %v2047_v11 = vmul.f32 %v11583_v13, %v1930_v22  ;;  %v8507_v24 = vcombine.high %v6935_v54, %v6936_v42  ;;  %v8506_v0 = vcombine.low %v6935_v54, %v6936_v42  ;;  %v11589_v58 = vld [vmem:[#allocation90_spill] sm:$0xff]  ;;  %v11591_v32 = vld [vmem:[#allocation40_spill] sm:$0xff]  ;;  %v11592_v18 = vld [vmem:[#allocation41_spill] sm:$0xff] }
 0x3cf   : > { %v4838_v4 = vadd.f32 %v4836_v6, %v4826_v15  ;;  %7043 = vmatpush1.bf16.msra.mxu1 %v8512_v36  ;;  %v2037_v40 = vadd.f32 %v2035_v26, %v2025_v48  ;;  %v6934_v36 = vld [vmem:[#allocation11 + $0x260] sm:$0xff]  ;;  %v11594_v48 = vld [vmem:[#allocation87_spill] sm:$0xff] }
 0x3d0   : > { %7044 = vmatprep.subr.bf16.mxu1 %v8511_v61  ;;  %v8505_v61 = vcombine.high %v6933_v51, %v6934_v36  ;;  %v11586_v6 = vld [vmem:[#allocation81_spill] sm:$0xff]  ;;  %v8504_v20 = vcombine.low %v6933_v51, %v6934_v36  ;;  %v11593_v22 = vld [vmem:[#allocation88_spill] sm:$0xff] }
 0x3d1   : > { %v4850_v3 = vadd.f32 %v4848_v49, %v4838_v4  ;;  %v2049_v62 = vadd.f32 %v2047_v11, %v2037_v40  ;;  %v2059_v15 = vmul.f32 %v11586_v6, %v1971_v2  ;;  %v11588_v49 = vld [vmem:[#allocation78_spill] sm:$0xff]  ;;  %v11590_v4 = vld [vmem:[#allocation85_spill] sm:$0xff]  ;;  %v11595_v11 = vld [vmem:[#allocation91_spill] sm:$0xff] }
 0x3d2   : > { %v1973_v27 = vadd.f32 %v11588_v49, %v11587_v50  ;;  %v10876_v40 = vld [vmem:[#allocation13 + $0x30] sm:$0xff] }
 0x3d3   : > { %7045 = vmatpush1.bf16.msra.mxu1 %v8510_v63  ;;  %v2536_v63 = vadd.f32 %v11590_v4, %v11589_v58  ;;  %v2061_v23 = vadd.f32 %v2059_v15, %v2049_v62  ;;  %v10895_v62 = vrot.slane %v10876_v40, %v10045_v59  ;;  %v11600_v6 = vld [vmem:[#allocation43_spill] sm:$0xff]  ;;  %v10900_v50 = vrot.slane %v10876_v40, %v10060_v52  ;;  %v11601_v58 = vld [vmem:[#allocation92_spill] sm:$0xff]  ;;  %v11602_v4 = vld [vmem:[#allocation89_spill] sm:$0xff] }
 0x3d4   : > { %7046 = vmatprep.subr.bf16.mxu1 %v8509_v60  ;;  %v2071_v26 = vmul.f32 %v11591_v32, %v1973_v27  ;;  %v2538_v60 = vadd.f32 %v11593_v22, %v10393_v41  ;;  %v10889_v41 = vrot.slane %v10876_v40, %v10042_v35  ;;  %v10909_v32 = vrot.slane %v10876_v40, %v10067_v47 }
 0x3d5   : > { %v2681_v7 = vmul.f32 %v11592_v18, %v2536_v63  ;;  %11599 = vst [vmem:[#allocation47_spill] sm:$0xff] %v10895_v62  ;;  %v2581_v63 = vadd.f32 %v11602_v4, %v11601_v58  ;;  %v11607_v58 = vld [vmem:[#allocation100_spill] sm:$0xff] }
 0x3d6   : > { %v2073_v54 = vadd.f32 %v2071_v26, %v2061_v23 }
 0x3d7   : > { %7047 = vmatpush1.bf16.msra.mxu1 %v8508_v10  ;;  %v2693_v10 = vmul.f32 %v11594_v48, %v2538_v60 }
 0x3d8   : > { %7048 = vmatprep.subr.bf16.mxu1 %v8507_v24  ;;  %v2683_v42 = vadd.f32 %v2681_v7, %v2073_v54  ;;  %v11596_v24 = vld [vmem:[#allocation86_spill] sm:$0xff] }
 0x3d9   : > { %v2579_v51 = vadd.f32 %v11596_v24, %v11595_v11  ;;  %v11604_v24 = vld [vmem:[#allocation44_spill] sm:$0xff] }
 0x3db   : > { %7049 = vmatpush1.bf16.msra.mxu1 %v8506_v0  ;;  %v2695_v0 = vadd.f32 %v2693_v10, %v2683_v42  ;;  %v2705_v15 = vmul.f32 %v11600_v6, %v2579_v51  ;;  %v5479_v42 = vpop.permute.xlu1 %5478  ;;  %v2717_v51 = vmul.f32 %v11604_v24, %v2581_v63  ;;  %v11606_v6 = vld [vmem:[#allocation104_spill] sm:$0xff]  ;;  %v11611_v63 = vld [vmem:[#allocation49_spill] sm:$0xff] }
 0x3dc   : > { %7050 = vmatprep.subr.bf16.mxu1 %v8505_v61  ;;  %v2624_v4 = vadd.f32 %v11607_v58, %v11606_v6  ;;  %v11613_v24 = vld [vmem:[#allocation101_spill] sm:$0xff] }
 0x3dd   : > { %v2707_v54 = vadd.f32 %v2705_v15, %v2695_v0  ;;  %v11608_v0 = vld [vmem:[#allocation48_spill] sm:$0xff]  ;;  %v11614_v6 = vld [vmem:[#allocation113_spill] sm:$0xff] }
 0x3de   : > { %v2741_v15 = vmul.f32 %v11608_v0, %v2624_v4  ;;  %v11618_v4 = vld [vmem:[#allocation60_spill] sm:$0xff] }
 0x3df   : > { %7051 = vmatpush1.bf16.msra.mxu1 %v8504_v20  ;;  %v11603_v20 = vld [vmem:[#allocation98_spill] sm:$0xff] }
 0x3e0   : > { %v2622_v23 = vadd.f32 %v11603_v20, %v10451_v43  ;;  %v11605_v43 = vld [vmem:[#allocation97_spill] sm:$0xff] }
 0x3e2   : > { %v10878_v13 = vpop.f32.mrf.mxu1  ;;  %7069 = vmatmul.mubr.bf16.vlgmr.msra.gmra.mxu1 %v9882_v45  ;;  %v5455_v45 = vpop.permute.xlu0 %5454 }
 0x3e3   : > { %v10883_v36 = vpop.f32.mrf.mxu0 }
 0x3e4   : > { %11597 = vst [vmem:[#allocation42_spill] sm:$0xff] %v10883_v36  ;;  %v10885_v5 = vpop.f32.mrf.mxu1 }
 0x3e5   : > { %v10891_v2 = vpop.f32.mrf.mxu0 }
 0x3e6   : > { %11598 = vst [vmem:[#allocation46_spill] sm:$0xff] %v10891_v2  ;;  %v5315_v61 = vpop.f32.mrf.mxu1  ;;  %v5491_v20 = vpop.permute.xlu0 %5490 }
 0x3e7   : > { %v5316_v49 = vadd.f32 %v5315_v61, %v10889_v41  ;;  %v5358_v27 = vpop.f32.mrf.mxu0  ;;  %v2729_v61 = vmul.f32 %v11605_v43, %v2622_v23  ;;  %v11612_v23 = vld [vmem:[#allocation105_spill] sm:$0xff] }
 0x3e8   : > { %v5359_v26 = vadd.f32 %v5358_v27, %v10895_v62  ;;  %v5317_v18 = vpop.f32.mrf.mxu1  ;;  %v2667_v43 = vadd.f32 %v11613_v24, %v11612_v23 }
 0x3e9   : > { %v5458_v7 = vmul.f32 %v5455_v45, %v5316_v49  ;;  %v5318_v22 = vadd.f32 %v5317_v18, %v10900_v50  ;;  %v5360_v60 = vpop.f32.mrf.mxu0  ;;  %v2719_v45 = vadd.f32 %v2717_v51, %v2707_v54  ;;  %v11615_v54 = vld [vmem:[#allocation107_spill] sm:$0xff] }
 0x3ea   : > { %v5361_v48 = vadd.f32 %v5360_v60, %v10909_v32  ;;  %v5482_v27 = vmul.f32 %v5479_v42, %v5359_v26  ;;  %v11609_v60 = vld [vmem:[#allocation103_spill] sm:$0xff]  ;;  %v3230_v26 = vadd.f32 %v11614_v6, %v10525_v56 }
 0x3eb   : > { %v5460_v10 = vadd.f32 %v5458_v7, %v4850_v3  ;;  %v5470_v11 = vmul.f32 %v5467_v38, %v5318_v22  ;;  %v2731_v36 = vadd.f32 %v2729_v61, %v2719_v45  ;;  %v11610_v3 = vld [vmem:[#allocation99_spill] sm:$0xff] }
 0x3ec   : > { %v5494_v18 = vmul.f32 %v5491_v20, %v5361_v48  ;;  %v2665_v38 = vadd.f32 %v11610_v3, %v11609_v60  ;;  %v11616_v48 = vld [vmem:[#allocation59_spill] sm:$0xff]  ;;  %v11619_v20 = vld [vmem:[#allocation118_spill] sm:$0xff] }
 0x3ed   : > { %v5472_v2 = vadd.f32 %v5470_v11, %v5460_v10  ;;  %v2743_v7 = vadd.f32 %v2741_v15, %v2731_v36  ;;  %v3375_v10 = vmul.f32 %v11616_v48, %v3230_v26  ;;  %v11617_v11 = vld [vmem:[#allocation116_spill] sm:$0xff]  ;;  %v11621_v56 = vld [vmem:[#allocation119_spill] sm:$0xff]  ;;  %v11622_v15 = vld [vmem:[#allocation117_spill] sm:$0xff] }
 0x3ee   : > { %v2753_v22 = vmul.f32 %v11611_v63, %v2665_v38  ;;  %v3232_v51 = vadd.f32 %v11617_v11, %v10537_v39  ;;  %v3275_v60 = vadd.f32 %v11622_v15, %v11621_v56  ;;  %v11623_v38 = vld [vmem:[#allocation109_spill] sm:$0xff]  ;;  %v3316_v39 = vadd.f32 %v10579_v55, %v10593_v33  ;;  %v11626_v48 = vld [vmem:[#allocation71_spill] sm:$0xff] }
 0x3ef   : > { %v5484_v49 = vadd.f32 %v5482_v27, %v5472_v2  ;;  %v2765_v2 = vmul.f32 %v11615_v54, %v2667_v43  ;;  %v11620_v27 = vld [vmem:[#allocation114_spill] sm:$0xff]  ;;  %v10952_v43 = vrot.slane %v10876_v40, %v10141_v1  ;;  %v10957_v55 = vrot.slane %v10876_v40, %v10147_v29 }
 0x3f0   : > { %v2755_v42 = vadd.f32 %v2753_v22, %v2743_v7  ;;  %v3387_v36 = vmul.f32 %v11618_v4, %v3232_v51  ;;  %v3273_v45 = vadd.f32 %v11620_v27, %v11619_v20  ;;  %v10946_v22 = vrot.slane %v10876_v40, %v10129_v14 }
 0x3f1   : > { %v5496_v62 = vadd.f32 %v5494_v18, %v5484_v49  ;;  %v5503_v49 = vpop.permute.xlu1 %5502  ;;  %v3318_v11 = vadd.f32 %v10587_v21, %v10604_v17  ;;  %v10965_v51 = vrot.slane %v10876_v40, %v10150_v28 }
 0x3f2   : > { %v2767_v61 = vadd.f32 %v2765_v2, %v2755_v42  ;;  %v3399_v7 = vmul.f32 %v11623_v38, %v3273_v45  ;;  %v11625_v42 = vld [vmem:[#allocation67_spill] sm:$0xff]  ;;  %v5527_v45 = vpop.permute.xlu0 %5526  ;;  %v11627_v38 = vld [vmem:[#allocation112_spill] sm:$0xff] }
 0x3f3   : > { %v3411_v54 = vmul.f32 %v11625_v42, %v3275_v60  ;;  %v3435_v21 = vmul.f32 %v11627_v38, %v3318_v11 }
 0x3f4   : > { %v3377_v58 = vadd.f32 %v3375_v10, %v2767_v61  ;;  %v3423_v10 = vmul.f32 %v11626_v48, %v3316_v39  ;;  %v11628_v39 = vld [vmem:[#allocation130_spill] sm:$0xff] }
 0x3f5   : > { %v5515_v6 = vpop.permute.xlu1 %5514 }
 0x3f6   : > { %v3389_v18 = vadd.f32 %v3387_v36, %v3377_v58 }
 0x3f8   : > { %v3401_v24 = vadd.f32 %v3399_v7, %v3389_v18 }
 0x3f9   : > { %v5539_v17 = vpop.permute.xlu1 %5538 }
 0x3fa   : > { %v3413_v27 = vadd.f32 %v3411_v54, %v3401_v24  ;;  %v11631_v54 = vld [vmem:[#allocation131_spill] sm:$0xff] }
 0x3fc   : > { %v3425_v60 = vadd.f32 %v3423_v10, %v3413_v27  ;;  %v11633_v10 = vld [vmem:[#allocation76_spill] sm:$0xff] }
 0x402   : > { %v10933_v0 = vpop.f32.mrf.mxu1 }
 0x403   : > { %v10937_v3 = vpop.f32.mrf.mxu0 }
 0x404   : > { %v10942_v63 = vpop.f32.mrf.mxu1 }
 0x405   : > { %v10948_v23 = vpop.f32.mrf.mxu0 }
 0x406   : > { %11624 = vst [vmem:[#allocation45_spill] sm:$0xff] %v10948_v23  ;;  %v5401_v26 = vpop.f32.mrf.mxu1  ;;  %v11632_v23 = vld [vmem:[#allocation129_spill] sm:$0xff] }
 0x407   : > { %v5402_v33 = vadd.f32 %v5401_v26, %v10946_v22  ;;  %v5444_v2 = vpop.f32.mrf.mxu0  ;;  %v11629_v26 = vld [vmem:[#allocation127_spill] sm:$0xff] }
 0x408   : > { %v5445_v61 = vadd.f32 %v5444_v2, %v10952_v43  ;;  %v5403_v58 = vpop.f32.mrf.mxu1  ;;  %v3359_v42 = vadd.f32 %v11629_v26, %v11628_v39  ;;  %v11642_v39 = vld [vmem:[#allocation156_spill] sm:$0xff] }
 0x409   : > { %v5506_v4 = vmul.f32 %v5503_v49, %v5402_v33  ;;  %v5404_v36 = vadd.f32 %v5403_v58, %v10957_v55  ;;  %v5446_v20 = vpop.f32.mrf.mxu0  ;;  %v3437_v33 = vadd.f32 %v3435_v21, %v3425_v60  ;;  %v11630_v58 = vld [vmem:[#allocation73_spill] sm:$0xff]  ;;  %v11637_v60 = vld [vmem:[#allocation142_spill] sm:$0xff] }
 0x40a   : > { %v5447_v18 = vadd.f32 %v5446_v20, %v10965_v51  ;;  %v5530_v7 = vmul.f32 %v5527_v45, %v5445_v61  ;;  %v3447_v24 = vmul.f32 %v11630_v58, %v3359_v42  ;;  %v3361_v20 = vadd.f32 %v11632_v23, %v11631_v54  ;;  %v11634_v61 = vld [vmem:[#allocation121_spill] sm:$0xff]  ;;  %v11638_v23 = vld [vmem:[#allocation84_spill] sm:$0xff]  ;;  %v6149_v42 = vpop.permute.xlu1 %6148 }
 0x40b   : > { %v5508_v56 = vadd.f32 %v5506_v4, %v5496_v62  ;;  %v5518_v15 = vmul.f32 %v5515_v6, %v5404_v36  ;;  %v3924_v62 = vadd.f32 %v10653_v44, %v10666_v16  ;;  %v11635_v36 = vld [vmem:[#allocation143_spill] sm:$0xff]  ;;  %v3967_v38 = vadd.f32 %v11637_v60, %v10673_v8  ;;  %v11640_v44 = vld [vmem:[#allocation144_spill] sm:$0xff]  ;;  %v11645_v8 = vld [vmem:[#allocation93_spill] sm:$0xff] }
 0x40c   : > { %v5542_v49 = vmul.f32 %v5539_v17, %v5447_v18  ;;  %v3449_v6 = vadd.f32 %v3447_v24, %v3437_v33  ;;  %v3459_v11 = vmul.f32 %v11633_v10, %v3361_v20  ;;  %v3926_v27 = vadd.f32 %v11635_v36, %v10680_v9  ;;  %v11644_v58 = vld [vmem:[#allocation124_spill] sm:$0xff]  ;;  %v11646_v20 = vld [vmem:[#allocation163_spill] sm:$0xff] }
 0x40d   : > { %v5520_v40 = vadd.f32 %v5518_v15, %v5508_v56  ;;  %v4069_v4 = vmul.f32 %v11634_v61, %v3924_v62  ;;  %v11636_v56 = vld [vmem:[#allocation83_spill] sm:$0xff]  ;;  %v4093_v17 = vmul.f32 %v11638_v23, %v3967_v38  ;;  %v11647_v62 = vld [vmem:[#allocation158_spill] sm:$0xff] }
 0x40e   : > { %v3461_v45 = vadd.f32 %v3459_v11, %v3449_v6  ;;  %v4081_v15 = vmul.f32 %v11636_v56, %v3926_v27  ;;  %v4012_v6 = vadd.f32 %v11647_v62, %v11646_v20  ;;  %v6173_v27 = vpop.permute.xlu1 %6172  ;;  %v11650_v38 = vld [vmem:[#allocation94_spill] sm:$0xff] }
 0x40f   : > { %v5532_v2 = vadd.f32 %v5530_v7, %v5520_v40  ;;  %v11639_v7 = vld [vmem:[#allocation146_spill] sm:$0xff]  ;;  %v11641_v40 = vld [vmem:[#allocation159_spill] sm:$0xff] }
 0x410   : > { %v4071_v18 = vadd.f32 %v4069_v4, %v3461_v45  ;;  %v3969_v16 = vadd.f32 %v11640_v44, %v11639_v7  ;;  %v4010_v26 = vadd.f32 %v11642_v39, %v11641_v40  ;;  %v6161_v44 = vpop.permute.xlu0 %6160 }
 0x411   : > { %v5544_v48 = vadd.f32 %v5542_v49, %v5532_v2  ;;  %v10990_v49 = vld [vmem:[#allocation13 + $0x38] sm:$0xff] }
 0x412   : > { %v4083_v21 = vadd.f32 %v4081_v15, %v4071_v18  ;;  %v4105_v24 = vmul.f32 %v11644_v58, %v3969_v16  ;;  %v4117_v54 = vmul.f32 %v11645_v8, %v4010_v26  ;;  %v11004_v11 = vrot.slane %v10990_v49, %v10042_v35  ;;  %v11651_v26 = vld [vmem:[#allocation161_spill] sm:$0xff]  ;;  %v6185_v62 = vpop.permute.xlu1 %6184 }
 0x413   : > { %v11010_v36 = vrot.slane %v10990_v49, %v10045_v59  ;;  %v11014_v18 = vrot.slane %v10990_v49, %v10060_v52  ;;  %v11020_v23 = vrot.slane %v10990_v49, %v10067_v47 }
 0x414   : > { %v4095_v2 = vadd.f32 %v4093_v17, %v4083_v21  ;;  %v4129_v21 = vmul.f32 %v11650_v38, %v4012_v6 }
 0x415   : > { %11649 = vst [vmem:[#allocation32_spill] sm:$0xff] %v11010_v36 }
 0x416   : > { %v4107_v4 = vadd.f32 %v4105_v24, %v4095_v2  ;;  %v11652_v2 = vld [vmem:[#allocation157_spill] sm:$0xff] }
 0x417   : > { %v4053_v58 = vadd.f32 %v11652_v2, %v11651_v26  ;;  %v11656_v2 = vld [vmem:[#allocation128_spill] sm:$0xff] }
 0x418   : > { %v4119_v60 = vadd.f32 %v4117_v54, %v4107_v4 }
 0x41a   : > { %v4131_v20 = vadd.f32 %v4129_v21, %v4119_v60  ;;  %v11658_v60 = vld [vmem:[#allocation169_spill] sm:$0xff]  ;;  %v11659_v21 = vld [vmem:[#allocation166_spill] sm:$0xff] }
 0x422   : > { %v10992_v9 = vpop.f32.mrf.mxu1 }
 0x423   : > { %v10994_v33 = vpop.f32.mrf.mxu0 }
 0x424   : > { %11643 = vst [vmem:[#allocation55_spill] sm:$0xff] %v10994_v33  ;;  %v11000_v10 = vpop.f32.mrf.mxu1 }
 0x425   : > { %v11006_v61 = vpop.f32.mrf.mxu0 }
 0x426   : > { %11648 = vst [vmem:[#allocation50_spill] sm:$0xff] %v11006_v61  ;;  %v6009_v45 = vpop.f32.mrf.mxu1  ;;  %v11655_v61 = vld [vmem:[#allocation160_spill] sm:$0xff] }
 0x427   : > { %v6010_v56 = vadd.f32 %v6009_v45, %v11004_v11  ;;  %v6052_v15 = vpop.f32.mrf.mxu0  ;;  %v11653_v45 = vld [vmem:[#allocation95_spill] sm:$0xff] }
 0x428   : > { %v6053_v17 = vadd.f32 %v6052_v15, %v11010_v36  ;;  %v6011_v7 = vpop.f32.mrf.mxu1  ;;  %v4141_v38 = vmul.f32 %v11653_v45, %v4053_v58  ;;  %v11654_v15 = vld [vmem:[#allocation164_spill] sm:$0xff] }
 0x429   : > { %v6152_v16 = vmul.f32 %v6149_v42, %v6010_v56  ;;  %v6012_v40 = vadd.f32 %v6011_v7, %v11014_v18  ;;  %v6054_v39 = vpop.f32.mrf.mxu0  ;;  %v4055_v33 = vadd.f32 %v11655_v61, %v11654_v15  ;;  %v4618_v42 = vadd.f32 %v10755_v31, %v10767_v12  ;;  %v11662_v61 = vld [vmem:[#allocation165_spill] sm:$0xff]  ;;  %v11667_v15 = vld [vmem:[#allocation108_spill] sm:$0xff] }
 0x42a   : > { %v6055_v24 = vadd.f32 %v6054_v39, %v11020_v23  ;;  %v6176_v6 = vmul.f32 %v6173_v27, %v6053_v17  ;;  %v4143_v36 = vadd.f32 %v4141_v38, %v4131_v20  ;;  %v4620_v27 = vadd.f32 %v11659_v21, %v11658_v60  ;;  %v11663_v31 = vld [vmem:[#allocation133_spill] sm:$0xff]  ;;  %v11665_v20 = vld [vmem:[#allocation167_spill] sm:$0xff]  ;;  %v6209_v60 = vpop.permute.xlu1 %6208 }
 0x42b   : > { %v6154_v8 = vadd.f32 %v6152_v16, %v5544_v48  ;;  %v6164_v54 = vmul.f32 %v6161_v44, %v6012_v40  ;;  %v4153_v39 = vmul.f32 %v11656_v2, %v4055_v33  ;;  %v11657_v48 = vld [vmem:[#allocation96_spill] sm:$0xff]  ;;  %v11660_v40 = vld [vmem:[#allocation102_spill] sm:$0xff]  ;;  %v4704_v33 = vadd.f32 %v10819_v46, %v10830_v53 }
 0x42c   : > { %v6188_v56 = vmul.f32 %v6185_v62, %v6055_v24  ;;  %v4763_v44 = vmul.f32 %v11657_v48, %v4618_v42  ;;  %v4775_v58 = vmul.f32 %v11660_v40, %v4620_v27  ;;  %v11664_v24 = vld [vmem:[#allocation170_spill] sm:$0xff]  ;;  %v4706_v42 = vadd.f32 %v10825_v57, %v10841_v19  ;;  %v11668_v48 = vld [vmem:[#allocation135_spill] sm:$0xff]  ;;  %v6197_v27 = vpop.permute.xlu0 %6196 }
 0x42d   : > { %v6166_v4 = vadd.f32 %v6164_v54, %v6154_v8  ;;  %v4155_v17 = vadd.f32 %v4153_v39, %v4143_v36  ;;  %v11661_v8 = vld [vmem:[#allocation168_spill] sm:$0xff]  ;;  %v4663_v62 = vadd.f32 %v11665_v20, %v11664_v24  ;;  %v4811_v36 = vmul.f32 %v11667_v15, %v4704_v33 }
 0x42e   : > { %v4661_v54 = vadd.f32 %v11662_v61, %v11661_v8  ;;  %v11057_v46 = vrot.slane %v10990_v49, %v10129_v14  ;;  %v4747_v57 = vadd.f32 %v10822_v37, %v10837_v30  ;;  %v11065_v19 = vrot.slane %v10990_v49, %v10141_v1  ;;  %v6221_v33 = vpop.permute.xlu1 %6220 }
 0x42f   : > { %v6178_v7 = vadd.f32 %v6176_v6, %v6166_v4  ;;  %v4765_v16 = vadd.f32 %v4763_v44, %v4155_v17  ;;  %v11666_v4 = vld [vmem:[#allocation106_spill] sm:$0xff]  ;;  %v4823_v44 = vmul.f32 %v11668_v48, %v4706_v42  ;;  %v11074_v61 = vrot.slane %v10990_v49, %v10150_v28  ;;  %v11671_v48 = vld [vmem:[#allocation137_spill] sm:$0xff] }
 0x430   : > { %v4787_v12 = vmul.f32 %v11663_v31, %v4661_v54  ;;  %v4799_v38 = vmul.f32 %v11666_v4, %v4663_v62  ;;  %v4749_v20 = vadd.f32 %v10832_v25, %v10848_v34  ;;  %v5312_v62 = vadd.f32 %v10878_v13, %v10889_v41  ;;  %v6233_v15 = vpop.permute.xlu0 %6232 }
 0x431   : > { %v6190_v26 = vadd.f32 %v6188_v56, %v6178_v7  ;;  %v4777_v45 = vadd.f32 %v4775_v58, %v4765_v16  ;;  %v11069_v16 = vrot.slane %v10990_v49, %v10147_v29 }
 0x433   : > { %v4789_v6 = vadd.f32 %v4787_v12, %v4777_v45  ;;  %v11669_v12 = vld [vmem:[#allocation110_spill] sm:$0xff] }
 0x434   : > { %v4835_v24 = vmul.f32 %v11669_v12, %v4747_v57  ;;  %v5314_v57 = vadd.f32 %v10885_v5, %v10900_v50  ;;  %v11677_v50 = vld [vmem:[#allocation139_spill] sm:$0xff] }
 0x435   : > { %v4801_v56 = vadd.f32 %v4799_v38, %v4789_v6 }
 0x437   : > { %v4813_v39 = vadd.f32 %v4811_v36, %v4801_v56  ;;  %v11670_v56 = vld [vmem:[#allocation111_spill] sm:$0xff] }
 0x439   : > { %v4825_v8 = vadd.f32 %v4823_v44, %v4813_v39  ;;  %v4847_v39 = vmul.f32 %v11670_v56, %v4749_v20  ;;  %v5457_v44 = vmul.f32 %v11671_v48, %v5312_v62  ;;  %v5400_v62 = vadd.f32 %v10942_v63, %v10957_v55  ;;  %v11680_v55 = vld [vmem:[#allocation141_spill] sm:$0xff] }
 0x43a   : > { %v11681_v48 = vld [vmem:[#allocation45_spill] sm:$0xff] }
 0x43b   : > { %v4837_v38 = vadd.f32 %v4835_v24, %v4825_v8  ;;  %v11678_v24 = vld [vmem:[#allocation122_spill] sm:$0xff] }
 0x442   : > { %v11048_v7 = vpop.f32.mrf.mxu1 }
 0x443   : > { %v11050_v2 = vpop.f32.mrf.mxu0 }
 0x444   : > { %v11053_v21 = vpop.f32.mrf.mxu1 }
 0x445   : > { %v11059_v53 = vpop.f32.mrf.mxu0 }
 0x446   : > { %v6095_v17 = vpop.f32.mrf.mxu1 }
 0x447   : > { %v6096_v40 = vadd.f32 %v6095_v17, %v11057_v46  ;;  %v6138_v58 = vpop.f32.mrf.mxu0  ;;  %v11672_v17 = vld [vmem:[#allocation115_spill] sm:$0xff] }
 0x448   : > { %v6139_v37 = vadd.f32 %v6138_v58, %v11065_v19  ;;  %v6097_v30 = vpop.f32.mrf.mxu1 }
 0x449   : > { %v6200_v54 = vmul.f32 %v6197_v27, %v6096_v40  ;;  %v6098_v45 = vadd.f32 %v6097_v30, %v11069_v16  ;;  %v6140_v31 = vpop.f32.mrf.mxu0  ;;  %v4849_v27 = vadd.f32 %v4847_v39, %v4837_v38  ;;  %v5469_v40 = vmul.f32 %v11672_v17, %v5314_v57  ;;  %v6843_v38 = vpop.permute.xlu1 %6842 }
 0x44a   : > { %v6141_v6 = vadd.f32 %v6140_v31, %v11074_v61  ;;  %v6224_v36 = vmul.f32 %v6221_v33, %v6139_v37  ;;  %v11675_v37 = vld [vmem:[#allocation120_spill] sm:$0xff]  ;;  %v5398_v31 = vadd.f32 %v10933_v0, %v10946_v22 }
 0x44b   : > { %v6202_v49 = vadd.f32 %v6200_v54, %v6190_v26  ;;  %v6212_v4 = vmul.f32 %v6209_v60, %v6098_v45  ;;  %v5459_v41 = vadd.f32 %v5457_v44, %v4849_v27  ;;  %v11673_v26 = vld [vmem:[#allocation47_spill] sm:$0xff]  ;;  %v11674_v60 = vld [vmem:[#allocation42_spill] sm:$0xff]  ;;  %v5443_v44 = vadd.f32 %v11681_v48, %v10965_v51 }
 0x44c   : > { %v6236_v34 = vmul.f32 %v6233_v15, %v6141_v6  ;;  %v5355_v58 = vadd.f32 %v11674_v60, %v11673_v26  ;;  %v11676_v54 = vld [vmem:[#allocation46_spill] sm:$0xff]  ;;  %v5505_v20 = vmul.f32 %v11678_v24, %v5398_v31  ;;  %v5441_v15 = vadd.f32 %v10937_v3, %v10952_v43 }
 0x44d   : > { %v6214_v42 = vadd.f32 %v6212_v4, %v6202_v49  ;;  %v5471_v8 = vadd.f32 %v5469_v40, %v5459_v41  ;;  %v5357_v45 = vadd.f32 %v11676_v54, %v10909_v32  ;;  %v11679_v49 = vld [vmem:[#allocation123_spill] sm:$0xff]  ;;  %v11103_v32 = vld [vmem:[#allocation13 + $0x40] sm:$0xff]  ;;  %v6006_v3 = vadd.f32 %v10992_v9, %v11004_v11  ;;  %v6855_v57 = vpop.permute.xlu1 %6854  ;;  %v11688_v48 = vld [vmem:[#allocation50_spill] sm:$0xff] }
 0x44e   : > { %v5481_v30 = vmul.f32 %v11675_v37, %v5355_v58  ;;  %v5517_v4 = vmul.f32 %v11679_v49, %v5400_v62  ;;  %v6308_v56 = vrot.slane %v11103_v32, %v10042_v35  ;;  %v5529_v39 = vmul.f32 %v11680_v55, %v5441_v15  ;;  %v11682_v58 = vld [vmem:[#allocation125_spill] sm:$0xff]  ;;  %v11683_v37 = vld [vmem:[#allocation126_spill] sm:$0xff]  ;;  %v11686_v15 = vld [vmem:[#allocation55_spill] sm:$0xff] }
 0x44f   : > { %v6226_v25 = vadd.f32 %v6224_v36, %v6214_v42  ;;  %v5493_v12 = vmul.f32 %v11677_v50, %v5357_v45  ;;  %v11120_v43 = vrot.slane %v11103_v32, %v10045_v59  ;;  %v11126_v40 = vrot.slane %v11103_v32, %v10067_v47  ;;  %v6867_v45 = vpop.permute.xlu0 %6866 }
 0x450   : > { %v5483_v5 = vadd.f32 %v5481_v30, %v5471_v8  ;;  %v5541_v8 = vmul.f32 %v11682_v58, %v5443_v44  ;;  %v6151_v30 = vmul.f32 %v11683_v37, %v6006_v3  ;;  %v6008_v54 = vadd.f32 %v11000_v10, %v11014_v18  ;;  %v11687_v10 = vld [vmem:[#allocation132_spill] sm:$0xff] }
 0x451   : > { %v6238_v13 = vadd.f32 %v6236_v34, %v6226_v25  ;;  %v6312_v34 = vrot.slane %v11103_v32, %v10060_v52  ;;  %v6092_v44 = vadd.f32 %v11048_v7, %v11057_v46  ;;  %v6137_v7 = vadd.f32 %v11059_v53, %v11074_v61 }
 0x452   : > { %v5495_v33 = vadd.f32 %v5493_v12, %v5483_v5  ;;  %v6879_v12 = vpop.permute.xlu1 %6878  ;;  %v6332_v53 = vrot.slane %v11103_v32, %v10141_v1  ;;  %v6328_v61 = vrot.slane %v11103_v32, %v10147_v29 }
 0x454   : > { %v5507_v6 = vadd.f32 %v5505_v20, %v5495_v33  ;;  %v11684_v33 = vld [vmem:[#allocation147_spill] sm:$0xff] }
 0x456   : > { %v5519_v22 = vadd.f32 %v5517_v4, %v5507_v6  ;;  %v6163_v6 = vmul.f32 %v11684_v33, %v6008_v54  ;;  %v6336_v33 = vrot.slane %v11103_v32, %v10150_v28 }
 0x458   : > { %v5531_v17 = vadd.f32 %v5529_v39, %v5519_v22 }
 0x45a   : > { %v5543_v47 = vadd.f32 %v5541_v8, %v5531_v17  ;;  %v6094_v17 = vadd.f32 %v11053_v21, %v11069_v16  ;;  %v11692_v8 = vld [vmem:[#allocation138_spill] sm:$0xff]  ;;  %v6324_v21 = vrot.slane %v11103_v32, %v10129_v14  ;;  %v6903_v14 = vpop.permute.xlu0 %6902  ;;  %v11696_v32 = vld [vmem:[#allocation153_spill] sm:$0xff] }
 0x45c   : > { %v6153_v62 = vadd.f32 %v6151_v30, %v5543_v47  ;;  %v11694_v47 = vld [vmem:[#allocation140_spill] sm:$0xff] }
 0x45e   : > { %v6165_v39 = vadd.f32 %v6163_v6, %v6153_v62 }
 0x462   : > { %v6699_v36 = vpop.f32.mrf.mxu1 }
 0x463   : > { %v11105_v0 = vpop.f32.mrf.mxu0  ;;  %v6700_v46 = vadd.f32 %v6699_v36, %v6308_v56 }
 0x464   : > { %v11107_v42 = vpop.f32.mrf.mxu1  ;;  %v6743_v29 = vadd.f32 %v11105_v0, %v11120_v43 }
 0x465   : > { %v11111_v63 = vpop.f32.mrf.mxu0 }
 0x466   : > { %v6703_v25 = vpop.f32.mrf.mxu1 }
 0x467   : > { %v6704_v27 = vadd.f32 %v6703_v25, %v6308_v56  ;;  %v6746_v41 = vpop.f32.mrf.mxu0 }
 0x468   : > { %v6747_v51 = vadd.f32 %v6746_v41, %v11120_v43  ;;  %v6705_v26 = vpop.f32.mrf.mxu1  ;;  %v11699_v43 = vld [vmem:[#allocation155_spill] sm:$0xff] }
 0x469   : > { %v6846_v9 = vmul.f32 %v6843_v38, %v6704_v27  ;;  %v6706_v11 = vadd.f32 %v6705_v26, %v6312_v34  ;;  %v6748_v60 = vpop.f32.mrf.mxu0  ;;  %v11685_v38 = vld [vmem:[#allocation32_spill] sm:$0xff]  ;;  %v11690_v27 = vld [vmem:[#allocation149_spill] sm:$0xff] }
 0x46a   : > { %v6749_v31 = vadd.f32 %v6748_v60, %v11126_v40  ;;  %v6870_v24 = vmul.f32 %v6867_v45, %v6747_v51  ;;  %v6049_v22 = vadd.f32 %v11686_v15, %v11685_v38  ;;  %v6199_v41 = vmul.f32 %v11690_v27, %v6092_v44 }
 0x46b   : > { %v6848_v5 = vadd.f32 %v6846_v9, %v6238_v13  ;;  %v6858_v50 = vmul.f32 %v6855_v57, %v6706_v11  ;;  %v6051_v13 = vadd.f32 %v11688_v48, %v11020_v23  ;;  %v11689_v57 = vld [vmem:[#allocation134_spill] sm:$0xff]  ;;  %v11691_v9 = vld [vmem:[#allocation136_spill] sm:$0xff]  ;;  %v6135_v60 = vadd.f32 %v11050_v2, %v11065_v19  ;;  %v6891_v23 = vpop.permute.xlu1 %6890 }
 0x46c   : > { %v6882_v4 = vmul.f32 %v6879_v12, %v6749_v31  ;;  %v6175_v18 = vmul.f32 %v11687_v10, %v6049_v22  ;;  %v6211_v11 = vmul.f32 %v11691_v9, %v6094_v17  ;;  %v6845_v2 = vmul.f32 %v11694_v47, %v6700_v46  ;;  %v11702_v47 = vld [vmem:[#allocation162_spill] sm:$0xff] }
 0x46d   : > { %v6860_v20 = vadd.f32 %v6858_v50, %v6848_v5  ;;  %v6187_v25 = vmul.f32 %v11689_v57, %v6051_v13  ;;  %v6223_v37 = vmul.f32 %v11692_v8, %v6135_v60  ;;  %v11693_v5 = vld [vmem:[#allocation151_spill] sm:$0xff]  ;;  %v6745_v57 = vadd.f32 %v11111_v63, %v11126_v40  ;;  %v11700_v40 = vld [vmem:[#allocation152_spill] sm:$0xff] }
 0x46e   : > { %v6177_v3 = vadd.f32 %v6175_v18, %v6165_v39  ;;  %v6235_v50 = vmul.f32 %v11693_v5, %v6137_v7 }
 0x46f   : > { %v6872_v49 = vadd.f32 %v6870_v24, %v6860_v20  ;;  %v6915_v19 = vpop.permute.xlu1 %6914  ;;  %v6702_v24 = vadd.f32 %v11107_v42, %v6312_v34  ;;  %v11695_v42 = vld [vmem:[#allocation145_spill] sm:$0xff] }
 0x470   : > { %v6189_v51 = vadd.f32 %v6187_v25, %v6177_v3  ;;  %v6869_v3 = vmul.f32 %v11696_v32, %v6743_v29 }
 0x471   : > { %v6884_v55 = vadd.f32 %v6882_v4, %v6872_v49  ;;  %v6857_v34 = vmul.f32 %v11695_v42, %v6702_v24  ;;  %v7083_v24 = vpop.permute.xlu0 %7082 }
 0x472   : > { %v6201_v26 = vadd.f32 %v6199_v41, %v6189_v51  ;;  %v11698_v51 = vld [vmem:[#allocation150_spill] sm:$0xff] }
 0x473   : > { %v6927_v10 = vpop.permute.xlu1 %6926 }
 0x474   : > { %v6213_v58 = vadd.f32 %v6211_v11, %v6201_v26 }
 0x476   : > { %v6225_v45 = vadd.f32 %v6223_v37, %v6213_v58 }
 0x478   : > { %v6237_v20 = vadd.f32 %v6235_v50, %v6225_v45  ;;  %v11701_v45 = vld [vmem:[#allocation154_spill] sm:$0xff] }
 0x47a   : > { %v6847_v15 = vadd.f32 %v6845_v2, %v6237_v20 }
 0x47c   : > { %v6859_v13 = vadd.f32 %v6857_v34, %v6847_v15 }
 0x47e   : > { %v6871_v41 = vadd.f32 %v6869_v3, %v6859_v13 }
 0x482   : > { %v6785_v30 = vpop.f32.mrf.mxu1 }
 0x483   : > { %v6828_v54 = vpop.f32.mrf.mxu0  ;;  %v6786_v25 = vadd.f32 %v6785_v30, %v6324_v21 }
 0x484   : > { %v6787_v31 = vpop.f32.mrf.mxu1  ;;  %v6829_v58 = vadd.f32 %v6828_v54, %v6332_v53  ;;  %v7092_v54 = vld [vmem:[%s7091_s19] sm:$0x1] }
 0x485   : > { %v6830_v16 = vpop.f32.mrf.mxu0  ;;  %v6893_v26 = vmul.f32 %v11698_v51, %v6786_v25  ;;  %v6788_v9 = vadd.f32 %v6787_v31, %v6328_v61 }
 0x486   : > { %v6789_v12 = vpop.f32.mrf.mxu1  ;;  %v6917_v8 = vmul.f32 %v11700_v40, %v6829_v58  ;;  %v6831_v37 = vadd.f32 %v6830_v16, %v6336_v33 }
 0x487   : > { %v6790_v36 = vadd.f32 %v6789_v12, %v6324_v21  ;;  %v6832_v56 = vpop.f32.mrf.mxu0  ;;  %v6905_v60 = vmul.f32 %v11699_v43, %v6788_v9 }
 0x488   : > { %v6791_v62 = vpop.f32.mrf.mxu1  ;;  %v6833_v49 = vadd.f32 %v6832_v56, %v6332_v53  ;;  %v6929_v31 = vmul.f32 %v11701_v45, %v6831_v37 }
 0x489   : > { %v6894_v6 = vmul.f32 %v6891_v23, %v6790_v36  ;;  %v6792_v4 = vadd.f32 %v6791_v62, %v6328_v61  ;;  %v6834_v38 = vpop.f32.mrf.mxu0  ;;  %v6949_v23 = vld [vmem:[#allocation13 + $0x48] sm:$0xff] }
 0x48a   : > { %v6835_v22 = vadd.f32 %v6834_v38, %v6336_v33  ;;  %v6918_v18 = vmul.f32 %v6915_v19, %v6833_v49  ;;  %v6954_v7 = vrot.slane %v6949_v23, %v10042_v35 }
 0x48b   : > { %v6896_v1 = vadd.f32 %v6894_v6, %v6884_v55  ;;  %v6906_v39 = vmul.f32 %v6903_v14, %v6792_v4  ;;  %v11697_v55 = vld [vmem:[#allocation148_spill] sm:$0xff] }
 0x48c   : > { %v6930_v44 = vmul.f32 %v6927_v10, %v6835_v22  ;;  %v6881_v17 = vmul.f32 %v11697_v55, %v6745_v57 }
 0x48d   : > { %v6908_v48 = vadd.f32 %v6906_v39, %v6896_v1 }
 0x48e   : > { %v6883_v11 = vadd.f32 %v6881_v17, %v6871_v41 }
 0x48f   : > { %v6920_v28 = vadd.f32 %v6918_v18, %v6908_v48 }
 0x490   : > { %v6895_v0 = vadd.f32 %v6893_v26, %v6883_v11 }
 0x491   : > { %v6932_v27 = vadd.f32 %v6930_v44, %v6920_v28 }
 0x492   : > { %v6907_v63 = vadd.f32 %v6905_v60, %v6895_v0 }
 0x494   : > { %v6919_v46 = vadd.f32 %v6917_v8, %v6907_v63 }
 0x496   : > { %v6931_v50 = vadd.f32 %v6929_v31, %v6919_v46 }
 0x4a2   : > { %v7070_v30 = vpop.f32.mrf.mxu1 }
 0x4a3   : > { %v7071_v21 = vadd.f32 %v7070_v30, %v6954_v7 }
 0x4a4   : > { %v7072_v5 = vpop.f32.mrf.mxu1 }
 0x4a5   : > { %v7085_v2 = vmul.f32 %v11702_v47, %v7071_v21 }
 0x4a6   : > { %v7073_v19 = vpop.f32.mrf.mxu1 }
 0x4a7   : > { %v7087_v12 = vadd.f32 %v7085_v2, %v6931_v50  ;;  %v7074_v16 = vadd.f32 %v7073_v19, %v6954_v7 }
 0x4a8   : > { %v7075_v53 = vpop.f32.mrf.mxu1 }
 0x4a9   : > { %v7093_v61 = vadd.f32 %v7092_v54, %v7087_v12  ;;  %v7086_v36 = vmul.f32 %v7083_v24, %v7074_v16  ;;  %v7100_v20 = vrot.slane %v7087_v12, 1  ;;  %v7108_v33 = vrot.slane %v7087_v12, 2 }
 0x4aa   : > { %v7116_v4 = vrot.slane %v7087_v12, 3  ;;  %v7124_v42 = vrot.slane %v7087_v12, 4  ;;  %v7132_v1 = vrot.slane %v7087_v12, 5  ;;  %v7140_v29 = vrot.slane %v7087_v12, 6 }
 0x4ab   : > { %7094 = vst [vmem:[%s7091_s19] sm:$0x1] %v7093_v61  ;;  %v11181_v56 = vadd.f32 %v7086_v36, %v6932_v27  ;;  %s7136_s19 = sadd.s32 6, %s11172_s21  ;;  %v7148_v13 = vrot.slane %v7087_v12, 7 }
 0x4ac   : > { %s7137_s14 = sld [smem:[#allocation4 + %s7136_s19]] }
 0x4ad   : > { %v7163_v57 = vrot.slane %v11181_v56, 1  ;;  %v7171_v41 = vrot.slane %v11181_v56, 2  ;;  %v7179_v51 = vrot.slane %v11181_v56, 3  ;;  %v7187_v11 = vrot.slane %v11181_v56, 4 }
 0x4ae   : > { %v7195_v60 = vrot.slane %v11181_v56, 5  ;;  %v7203_v63 = vrot.slane %v11181_v56, 6  ;;  %v7211_v37 = vrot.slane %v11181_v56, 7 }
 0x4b2   : > { %v7098_v62 = vld [vmem:[%s7097_s4] sm:$0x1]  ;;  %s7138_s27 = scalar_lea.vmem [#allocation2], %s7137_s14  ;;  %s7175_s14 = sadd.s32 11, %s11172_s21 }
 0x4b3   : > { %v7102_v14 = vadd.f32 %v7100_v20, %v7098_v62 }
 0x4b5   : > { %7103 = vst [vmem:[%s7097_s4] sm:$0x1] %v7102_v14  ;;  %s7145_s4 = sld [smem:[#allocation4 + %s7144_s3]] }
 0x4bb   : > { %s7146_s0 = scalar_lea.vmem [#allocation2], %s7145_s4  ;;  %s7183_s4 = sadd.s32 12, %s11172_s21 }
 0x4bc   : > { %v7107_v6 = vld [vmem:[%s7106_s17] sm:$0x1] }
 0x4bd   : > { %v7110_v49 = vadd.f32 %v7108_v33, %v7107_v6 }
 0x4bf   : > { %7111 = vst [vmem:[%s7106_s17] sm:$0x1] %v7110_v49  ;;  %s7153_s17 = sld [smem:[#allocation4 + %s7152_s26]] }
 0x4c5   : > { %s7154_s20 = scalar_lea.vmem [#allocation2], %s7153_s17  ;;  %s7191_s17 = sadd.s32 13, %s11172_s21 }
 0x4c6   : > { %v7115_v38 = vld [vmem:[%s7114_s25] sm:$0x1] }
 0x4c7   : > { %v7118_v15 = vadd.f32 %v7116_v4, %v7115_v38 }
 0x4c9   : > { %7119 = vst [vmem:[%s7114_s25] sm:$0x1] %v7118_v15  ;;  %s7159_s25 = sld [smem:[#allocation4 + %s7158_s24]] }
 0x4cf   : > { %s7160_s19 = scalar_lea.vmem [#allocation2], %s7159_s25  ;;  %s7199_s25 = sadd.s32 14, %s11172_s21 }
 0x4d0   : > { %v7123_v34 = vld [vmem:[%s7122_s22] sm:$0x1] }
 0x4d1   : > { %v7126_v22 = vadd.f32 %v7124_v42, %v7123_v34 }
 0x4d3   : > { %7127 = vst [vmem:[%s7122_s22] sm:$0x1] %v7126_v22  ;;  %s7168_s22 = sld [smem:[#allocation4 + %s7167_s28]] }
 0x4d9   : > { %s7169_s3 = scalar_lea.vmem [#allocation2], %s7168_s22  ;;  %s7207_s22 = sadd.s32 15, %s11172_s21 }
 0x4da   : > { %v7131_v39 = vld [vmem:[%s7130_s15] sm:$0x1] }
 0x4db   : > { %v7134_v10 = vadd.f32 %v7132_v1, %v7131_v39 }
 0x4dd   : > { %7135 = vst [vmem:[%s7130_s15] sm:$0x1] %v7134_v10  ;;  %s7176_s15 = sld [smem:[#allocation4 + %s7175_s14]] }
 0x4e3   : > { %s7177_s26 = scalar_lea.vmem [#allocation2], %s7176_s15 }
 0x4e4   : > { %v7139_v18 = vld [vmem:[%s7138_s27] sm:$0x1] }
 0x4e5   : > { %v7142_v48 = vadd.f32 %v7140_v29, %v7139_v18 }
 0x4e7   : > { %7143 = vst [vmem:[%s7138_s27] sm:$0x1] %v7142_v48  ;;  %s7184_s27 = sld [smem:[#allocation4 + %s7183_s4]] }
 0x4ed   : > { %s7185_s24 = scalar_lea.vmem [#allocation2], %s7184_s27 }
 0x4ee   : > { %v7147_v44 = vld [vmem:[%s7146_s0] sm:$0x1] }
 0x4ef   : > { %v7150_v28 = vadd.f32 %v7148_v13, %v7147_v44 }
 0x4f1   : > { %7151 = vst [vmem:[%s7146_s0] sm:$0x1] %v7150_v28  ;;  %s7192_s0 = sld [smem:[#allocation4 + %s7191_s17]] }
 0x4f7   : > { %s7193_s28 = scalar_lea.vmem [#allocation2], %s7192_s0 }
 0x4f8   : > { %v7155_v32 = vld [vmem:[%s7154_s20] sm:$0x1] }
 0x4f9   : > { %v7156_v3 = vadd.f32 %v7155_v32, %v11181_v56 }
 0x4fb   : > { %7157 = vst [vmem:[%s7154_s20] sm:$0x1] %v7156_v3  ;;  %s7200_s20 = sld [smem:[#allocation4 + %s7199_s25]] }
 0x501   : > { %s7201_s14 = scalar_lea.vmem [#allocation2], %s7200_s20 }
 0x502   : > { %v7161_v25 = vld [vmem:[%s7160_s19] sm:$0x1] }
 0x503   : > { %v7165_v27 = vadd.f32 %v7163_v57, %v7161_v25 }
 0x505   : > { %7166 = vst [vmem:[%s7160_s19] sm:$0x1] %v7165_v27  ;;  %s7208_s19 = sld [smem:[#allocation4 + %s7207_s22]] }
 0x50b   : > { %s7209_s15 = scalar_lea.vmem [#allocation2], %s7208_s19 }
 0x50c   : > { %v7170_v55 = vld [vmem:[%s7169_s3] sm:$0x1] }
 0x50d   : > { %v7173_v17 = vadd.f32 %v7171_v41, %v7170_v55 }
 0x50f   : > { %7174 = vst [vmem:[%s7169_s3] sm:$0x1] %v7173_v17 }
 0x516   : > { %v7178_v26 = vld [vmem:[%s7177_s26] sm:$0x1] }
 0x517   : > { %v7181_v9 = vadd.f32 %v7179_v51, %v7178_v26 }
 0x519   : > { %7182 = vst [vmem:[%s7177_s26] sm:$0x1] %v7181_v9 }
 0x520   : > { %v7186_v0 = vld [vmem:[%s7185_s24] sm:$0x1] }
 0x521   : > { %v7189_v43 = vadd.f32 %v7187_v11, %v7186_v0 }
 0x523   : > { %7190 = vst [vmem:[%s7185_s24] sm:$0x1] %v7189_v43 }
 0x52a   : > { %v7194_v58 = vld [vmem:[%s7193_s28] sm:$0x1] }
 0x52b   : > { %v7197_v23 = vadd.f32 %v7195_v60, %v7194_v58 }
 0x52d   : > { %7198 = vst [vmem:[%s7193_s28] sm:$0x1] %v7197_v23 }
 0x534   : > { %v7202_v40 = vld [vmem:[%s7201_s14] sm:$0x1] }
 0x535   : > { %v7205_v8 = vadd.f32 %v7203_v63, %v7202_v40 }
 0x537   : > { %7206 = vst [vmem:[%s7201_s14] sm:$0x1] %v7205_v8 }
 0x53d   : > { %7218 = sbr.rel (%p8521_p10) target bundleno = 1667 (0x683), region = 120 }
 0x53e   : > { %v7210_v7 = vld [vmem:[%s7209_s15] sm:$0x1] }
 0x53f   : > { %v7213_v46 = vadd.f32 %v7211_v37, %v7210_v7 }
 0x541   : > { %7214 = vst [vmem:[%s7209_s15] sm:$0x1] %v7213_v46 }
 0x542   : > { %v7280_v30 = vld [vmem:[#allocation17 + $0x170] sm:$0xff]  ;;  %v7279_v45 = vld [vmem:[#allocation17 + $0x168] sm:$0xff]  ;;  %v7277_v31 = vld [vmem:[#allocation17 + $0x158] sm:$0xff]  ;;  %v9509_v5 = vmov 0.0  }
 0x543   : > { %7299 = vmatprep.subr.mxu0 %v7280_v30  ;;  %v7276_v21 = vld [vmem:[#allocation17 + $0x150] sm:$0xff]  ;;  %7363 = vmatprep.mubr.f32.mxu0 %v9509_v5  ;;  %v7274_v50 = vld [vmem:[#allocation17 + $0x140] sm:$0xff]  ;;  %v7273_v47 = vld [vmem:[#allocation17 + $0x138] sm:$0xff] }
 0x544   : > { %7300 = vmatpush1.msra.mxu0 %v7279_v45  ;;  %v7271_v2 = vld [vmem:[#allocation17 + $0x128] sm:$0xff]  ;;  %v7270_v54 = vld [vmem:[#allocation17 + $0x120] sm:$0xff]  ;;  %v7268_v19 = vld [vmem:[#allocation17 + $0x110] sm:$0xff] }
 0x545   : > { %7301 = vmatprep.subr.mxu0 %v7277_v31  ;;  %v7267_v12 = vld [vmem:[#allocation17 + $0x108] sm:$0xff]  ;;  %v7265_v16 = vld [vmem:[#allocation17 + $0xf8] sm:$0xff]  ;;  %v7264_v24 = vld [vmem:[#allocation17 + $0xf0] sm:$0xff] }
 0x546   : > { %7302 = vmatpush1.msra.mxu0 %v7276_v21  ;;  %v7262_v53 = vld [vmem:[#allocation17 + $0xe0] sm:$0xff]  ;;  %v7261_v61 = vld [vmem:[#allocation17 + $0xd8] sm:$0xff]  ;;  %v7259_v56 = vld [vmem:[#allocation17 + $0xc8] sm:$0xff] }
 0x547   : > { %7303 = vmatprep.subr.mxu0 %v7274_v50  ;;  %v7281_v36 = vld [vmem:[#allocation17 + $0x178] sm:$0xff]  ;;  %v7278_v20 = vld [vmem:[#allocation17 + $0x160] sm:$0xff]  ;;  %v7275_v14 = vld [vmem:[#allocation17 + $0x148] sm:$0xff] }
 0x548   : > { %7304 = vmatpush1.msra.mxu0 %v7273_v47  ;;  %8576 = vmatprep.subr.mxu1 %v7281_v36  ;;  %v7258_v62 = vld [vmem:[#allocation17 + $0xc0] sm:$0xff]  ;;  %v7256_v33 = vld [vmem:[#allocation17 + $0xb0] sm:$0xff]  ;;  %v7255_v6 = vld [vmem:[#allocation17 + $0xa8] sm:$0xff] }
 0x549   : > { %7305 = vmatprep.subr.mxu0 %v7271_v2  ;;  %8577 = vmatpush3.msra.mxu1 %v7281_v36  ;;  %v7272_v49 = vld [vmem:[#allocation17 + $0x130] sm:$0xff]  ;;  %v7253_v4 = vld [vmem:[#allocation17 + $0x98] sm:$0xff]  ;;  %v7250_v42 = vld [vmem:[#allocation17 + $0x80] sm:$0xff] }
 0x54a   : > { %7306 = vmatpush1.msra.mxu0 %v7270_v54  ;;  %8578 = vmatprep.subr.mxu1 %v7278_v20  ;;  %v7252_v38 = vld [vmem:[#allocation17 + $0x90] sm:$0xff]  ;;  %v7269_v15 = vld [vmem:[#allocation17 + $0x118] sm:$0xff]  ;;  %v7266_v22 = vld [vmem:[#allocation17 + $0x100] sm:$0xff] }
 0x54b   : > { %7307 = vmatprep.subr.mxu0 %v7268_v19  ;;  %8579 = vmatpush3.msra.mxu1 %v7278_v20  ;;  %v7249_v34 = vld [vmem:[#allocation17 + $0x78] sm:$0xff]  ;;  %v7247_v1 = vld [vmem:[#allocation17 + $0x68] sm:$0xff]  ;;  %v7246_v39 = vld [vmem:[#allocation17 + $0x60] sm:$0xff] }
 0x54c   : > { %7308 = vmatpush1.msra.mxu0 %v7267_v12  ;;  %8580 = vmatprep.subr.mxu1 %v7275_v14  ;;  %v7263_v10 = vld [vmem:[#allocation17 + $0xe8] sm:$0xff]  ;;  %v7244_v29 = vld [vmem:[#allocation17 + $0x50] sm:$0xff]  ;;  %v7241_v28 = vld [vmem:[#allocation17 + $0x38] sm:$0xff] }
 0x54d   : > { %7309 = vmatprep.subr.mxu0 %v7265_v16  ;;  %8581 = vmatpush3.msra.mxu1 %v7275_v14  ;;  %v7219_v18 = vld [vmem:[#allocation2] sm:$0xff]  ;;  %v8522_v48 = vld [vmem:[#allocation14] ss:$0 sm:$0xff]  ;;  %v7260_v44 = vld [vmem:[#allocation17 + $0xd0] sm:$0xff] }
 0x54e   : > { %7310 = vmatpush1.msra.mxu0 %v7264_v24  ;;  %8582 = vmatprep.subr.mxu1 %v7272_v49  ;;  %v7243_v13 = vld [vmem:[#allocation17 + $0x48] sm:$0xff]  ;;  %v7240_v32 = vld [vmem:[#allocation17 + $0x30] sm:$0xff]  ;;  %v11207_v3 = vadd.f32 %v8522_v48, %v7219_v18  ;;  %v7257_v57 = vld [vmem:[#allocation17 + $0xb8] sm:$0xff] }
 0x54f   : > { %7311 = vmatprep.subr.mxu0 %v7262_v53  ;;  %8583 = vmatpush3.msra.mxu1 %v7272_v49  ;;  %v7238_v25 = vld [vmem:[#allocation17 + $0x20] sm:$0xff]  ;;  %v7237_v27 = vld [vmem:[#allocation17 + $0x18] sm:$0xff]  ;;  %v7235_v55 = vld [vmem:[#allocation17 + $0x8] sm:$0xff] }
 0x550   : > { %7312 = vmatpush1.msra.mxu0 %v7261_v61  ;;  %8584 = vmatprep.subr.mxu1 %v7269_v15  ;;  %v7254_v41 = vld [vmem:[#allocation17 + $0xa0] sm:$0xff]  ;;  %v7230_v51 = vmax.f32 %v11207_v3, 0.0  ;;  %v7251_v26 = vld [vmem:[#allocation17 + $0x88] sm:$0xff]  ;;  %v7497_v9 = vld [vmem:[#allocation19 + $0x170] sm:$0xff] }
 0x551   : > { %7313 = vmatprep.subr.mxu0 %v7259_v56  ;;  %8585 = vmatpush3.msra.mxu1 %v7269_v15  ;;  %v7234_v17 = vld [vmem:[#allocation17] sm:$0xff]  ;;  %v7220_v11 = vld [vmem:[#allocation2 + $0x8] sm:$0xff]  ;;  %v7494_v43 = vld [vmem:[#allocation19 + $0x158] sm:$0xff] }
 0x552   : > { %7314 = vmatpush1.msra.mxu0 %v7258_v62  ;;  %8586 = vmatprep.subr.mxu1 %v7266_v22  ;;  %v7496_v0 = vld [vmem:[#allocation19 + $0x168] sm:$0xff]  ;;  %v7248_v60 = vld [vmem:[#allocation17 + $0x70] sm:$0xff]  ;;  %v7229_v23 = vadd.f32 %v8522_v48, %v7220_v11  ;;  %v7491_v63 = vld [vmem:[#allocation19 + $0x140] sm:$0xff] }
 0x553   : > { %7315 = vmatprep.subr.mxu0 %v7256_v33  ;;  %8587 = vmatpush3.msra.mxu1 %v7266_v22  ;;  %v7493_v58 = vld [vmem:[#allocation19 + $0x150] sm:$0xff]  ;;  %v7245_v40 = vld [vmem:[#allocation17 + $0x58] sm:$0xff]  ;;  %v7488_v37 = vld [vmem:[#allocation19 + $0x128] sm:$0xff] }
 0x554   : > { %7316 = vmatpush1.msra.mxu0 %v7255_v6  ;;  %8588 = vmatprep.subr.mxu1 %v7263_v10  ;;  %v7490_v8 = vld [vmem:[#allocation19 + $0x138] sm:$0xff]  ;;  %v7487_v7 = vld [vmem:[#allocation19 + $0x120] sm:$0xff]  ;;  %v7231_v46 = vmax.f32 %v7229_v23, 0.0  ;;  %v7485_v45 = vld [vmem:[#allocation19 + $0x110] sm:$0xff] }
 0x555   : > { %7317 = vmatprep.subr.mxu0 %v7253_v4  ;;  %8589 = vmatpush3.msra.mxu1 %v7263_v10  ;;  %v7242_v30 = vld [vmem:[#allocation17 + $0x40] sm:$0xff]  ;;  %v7484_v31 = vld [vmem:[#allocation19 + $0x108] sm:$0xff]  ;;  %v7482_v21 = vld [vmem:[#allocation19 + $0xf8] sm:$0xff] }
 0x556   : > { %7318 = vmatpush1.msra.mxu0 %v7252_v38  ;;  %8590 = vmatprep.subr.mxu1 %v7260_v44  ;;  %v7239_v50 = vld [vmem:[#allocation17 + $0x28] sm:$0xff]  ;;  %v7481_v47 = vld [vmem:[#allocation19 + $0xf0] sm:$0xff]  ;;  %v7479_v2 = vld [vmem:[#allocation19 + $0xe0] sm:$0xff] }
 0x557   : > { %7319 = vmatprep.subr.mxu0 %v7250_v42  ;;  %8591 = vmatpush3.msra.mxu1 %v7260_v44  ;;  %v7236_v54 = vld [vmem:[#allocation17 + $0x10] sm:$0xff]  ;;  %v7478_v19 = vld [vmem:[#allocation19 + $0xd8] sm:$0xff]  ;;  %v7476_v12 = vld [vmem:[#allocation19 + $0xc8] sm:$0xff] }
 0x558   : > { %7320 = vmatpush1.msra.mxu0 %v7249_v34  ;;  %8592 = vmatprep.subr.mxu1 %v7257_v57  ;;  %v7475_v16 = vld [vmem:[#allocation19 + $0xc0] sm:$0xff]  ;;  %v7473_v24 = vld [vmem:[#allocation19 + $0xb0] sm:$0xff]  ;;  %v7498_v53 = vld [vmem:[#allocation19 + $0x178] sm:$0xff] }
 0x559   : > { %7321 = vmatprep.subr.mxu0 %v7247_v1  ;;  %8593 = vmatpush3.msra.mxu1 %v7257_v57  ;;  %v7472_v61 = vld [vmem:[#allocation19 + $0xa8] sm:$0xff]  ;;  %v7470_v36 = vld [vmem:[#allocation19 + $0x98] sm:$0xff]  ;;  %v7469_v56 = vld [vmem:[#allocation19 + $0x90] sm:$0xff] }
 0x55a   : > { %7322 = vmatpush1.msra.mxu0 %v7246_v39  ;;  %8594 = vmatprep.subr.mxu1 %v7254_v41  ;;  %v7495_v20 = vld [vmem:[#allocation19 + $0x160] sm:$0xff]  ;;  %v7466_v14 = vld [vmem:[#allocation19 + $0x78] sm:$0xff]  ;;  %v7492_v33 = vld [vmem:[#allocation19 + $0x148] sm:$0xff] }
 0x55b   : > { %7323 = vmatprep.subr.mxu0 %v7244_v29  ;;  %8595 = vmatpush3.msra.mxu1 %v7254_v41  ;;  %v7467_v62 = vld [vmem:[#allocation19 + $0x80] sm:$0xff]  ;;  %v7464_v6 = vld [vmem:[#allocation19 + $0x68] sm:$0xff]  ;;  %v7489_v4 = vld [vmem:[#allocation19 + $0x130] sm:$0xff] }
 0x55c   : > { %7324 = vmatpush1.msra.mxu0 %v7243_v13  ;;  %8596 = vmatprep.subr.mxu1 %v7251_v26  ;;  %v7463_v49 = vld [vmem:[#allocation19 + $0x60] sm:$0xff]  ;;  %v7461_v38 = vld [vmem:[#allocation19 + $0x50] sm:$0xff]  ;;  %v7460_v15 = vld [vmem:[#allocation19 + $0x48] sm:$0xff] }
 0x55d   : > { %7325 = vmatprep.subr.mxu0 %v7241_v28  ;;  %8597 = vmatpush3.msra.mxu1 %v7251_v26  ;;  %v7486_v42 = vld [vmem:[#allocation19 + $0x118] sm:$0xff]  ;;  %v7457_v22 = vld [vmem:[#allocation19 + $0x30] sm:$0xff]  ;;  %v7483_v1 = vld [vmem:[#allocation19 + $0x100] sm:$0xff] }
 0x55e   : > { %7326 = vmatpush1.msra.mxu0 %v7240_v32  ;;  %8598 = vmatprep.subr.mxu1 %v7248_v60  ;;  %v7458_v34 = vld [vmem:[#allocation19 + $0x38] sm:$0xff]  ;;  %v7455_v39 = vld [vmem:[#allocation19 + $0x20] sm:$0xff]  ;;  %v7480_v29 = vld [vmem:[#allocation19 + $0xe8] sm:$0xff] }
 0x55f   : > { %7327 = vmatprep.subr.mxu0 %v7238_v25  ;;  %8599 = vmatpush3.msra.mxu1 %v7248_v60  ;;  %v7454_v10 = vld [vmem:[#allocation19 + $0x18] sm:$0xff]  ;;  %v7452_v18 = vld [vmem:[#allocation19 + $0x8] sm:$0xff]  ;;  %v7451_v48 = vld [vmem:[#allocation19] sm:$0xff] }
 0x560   : > { %7328 = vmatpush1.msra.mxu0 %v7237_v27  ;;  %8600 = vmatprep.subr.mxu1 %v7245_v40  ;;  %v7477_v13 = vld [vmem:[#allocation19 + $0xd0] sm:$0xff]  ;;  %v7474_v28 = vld [vmem:[#allocation19 + $0xb8] sm:$0xff]  ;;  %v7471_v32 = vld [vmem:[#allocation19 + $0xa0] sm:$0xff] }
 0x561   : > { %7329 = vmatprep.subr.mxu0 %v7235_v55  ;;  %8601 = vmatpush3.msra.mxu1 %v7245_v40  ;;  %v11216_v44 = vld [vmem:[#allocation16] sm:$0xff]  ;;  %v11220_v3 = vld [vmem:[#allocation16 + $0x8] sm:$0xff]  ;;  %v7468_v57 = vld [vmem:[#allocation19 + $0x88] sm:$0xff] }
 0x562   : > { %7330 = vmatpush1.msra.mxu0 %v7234_v17  ;;  %8602 = vmatprep.subr.mxu1 %v7242_v30  ;;  %v7465_v25 = vld [vmem:[#allocation19 + $0x70] sm:$0xff]  ;;  %v7462_v27 = vld [vmem:[#allocation19 + $0x58] sm:$0xff]  ;;  %v7459_v41 = vld [vmem:[#allocation19 + $0x40] sm:$0xff] }
 0x563   : > { %7364 = vmatmul.mubr.f32.vlgmr.msra.gmra.mxu0 %v7230_v51  ;;  %7516 = vmatprep.subr.mxu0 %v7497_v9  ;;  %v7453_v55 = vld [vmem:[#allocation19 + $0x10] sm:$0xff]  ;;  %v7282_v26 = vld [vmem:[#allocation20] sm:$0x7]  ;;  %v7499_v11 = vld [vmem:[#allocation22] sm:$0x7] }
 0x564   : > { %7517 = vmatpush1.msra.mxu0 %v7496_v0  ;;  %7369 = vmatprep.mubr.f32.mxu0 %v9509_v5  ;;  %v7287_v0 = vrot.slane %v7282_v26, %v10042_v35  ;;  %v7508_v40 = vrot.slane %v7499_v11, %v10060_v52 }
 0x565   : > { %7518 = vmatprep.subr.mxu0 %v7494_v43  ;;  %8603 = vmatpush3.msra.mxu1 %v7242_v30  ;;  %v7504_v43 = vrot.slane %v7499_v11, %v10042_v35 }
 0x566   : > { %7519 = vmatpush1.msra.mxu0 %v7493_v58  ;;  %8604 = vmatprep.subr.mxu1 %v7239_v50 }
 0x567   : > { %7520 = vmatprep.subr.mxu0 %v7491_v63  ;;  %7370 = vmatmul.mubr.f32.gmra.mxu0 %v7231_v46 }
 0x568   : > { %7521 = vmatpush1.msra.mxu0 %v7490_v8  ;;  %8605 = vmatpush3.msra.mxu1 %v7239_v50 }
 0x569   : > { %7522 = vmatprep.subr.mxu0 %v7488_v37  ;;  %8606 = vmatprep.subr.mxu1 %v7236_v54  ;;  %v7291_v37 = vrot.slane %v7282_v26, %v10060_v52 }
 0x56a   : > { %7523 = vmatpush1.msra.mxu0 %v7487_v7  ;;  %8607 = vmatpush3.msra.mxu1 %v7236_v54 }
 0x56b   : > { %7524 = vmatprep.subr.mxu0 %v7485_v45  ;;  %7580 = vmatprep.mubr.f32.mxu0 %v9509_v5 }
 0x56c   : > { %7525 = vmatpush1.msra.mxu0 %v7484_v31  ;;  %8608 = vmatprep.mubr.f32.mxu1 %v7230_v51 }
 0x56d   : > { %7526 = vmatprep.subr.mxu0 %v7482_v21  ;;  %8611 = vmatprep.subr.mxu1 %v7498_v53 }
 0x56e   : > { %7527 = vmatpush1.msra.mxu0 %v7481_v47  ;;  %8609 = vmatmul.mubr.f32.vlgmr.msra.gmra.mxu1 %v7231_v46 }
 0x56f   : > { %7528 = vmatprep.subr.mxu0 %v7479_v2  ;;  %8612 = vmatpush3.msra.mxu1 %v7498_v53 }
 0x570   : > { %7529 = vmatpush1.msra.mxu0 %v7478_v19  ;;  %8613 = vmatprep.subr.mxu1 %v7495_v20 }
 0x571   : > { %7530 = vmatprep.subr.mxu0 %v7476_v12  ;;  %8614 = vmatpush3.msra.mxu1 %v7495_v20 }
 0x572   : > { %7531 = vmatpush1.msra.mxu0 %v7475_v16  ;;  %8615 = vmatprep.subr.mxu1 %v7492_v33 }
 0x573   : > { %7532 = vmatprep.subr.mxu0 %v7473_v24  ;;  %8616 = vmatpush3.msra.mxu1 %v7492_v33  ;;  %v7512_v33 = vrot.slane %v7499_v11, %v10045_v59 }
 0x574   : > { %7533 = vmatpush1.msra.mxu0 %v7472_v61  ;;  %8617 = vmatprep.subr.mxu1 %v7489_v4 }
 0x575   : > { %7534 = vmatprep.subr.mxu0 %v7470_v36  ;;  %8618 = vmatpush3.msra.mxu1 %v7489_v4 }
 0x576   : > { %7535 = vmatpush1.msra.mxu0 %v7469_v56  ;;  %8619 = vmatprep.subr.mxu1 %v7486_v42 }
 0x577   : > { %7536 = vmatprep.subr.mxu0 %v7467_v62  ;;  %8620 = vmatpush3.msra.mxu1 %v7486_v42 }
 0x578   : > { %7537 = vmatpush1.msra.mxu0 %v7466_v14  ;;  %8621 = vmatprep.subr.mxu1 %v7483_v1 }
 0x579   : > { %7538 = vmatprep.subr.mxu0 %v7464_v6  ;;  %8622 = vmatpush3.msra.mxu1 %v7483_v1 }
 0x57a   : > { %7539 = vmatpush1.msra.mxu0 %v7463_v49  ;;  %8623 = vmatprep.subr.mxu1 %v7480_v29 }
 0x57b   : > { %7540 = vmatprep.subr.mxu0 %v7461_v38  ;;  %8624 = vmatpush3.msra.mxu1 %v7480_v29 }
 0x57c   : > { %7541 = vmatpush1.msra.mxu0 %v7460_v15  ;;  %8625 = vmatprep.subr.mxu1 %v7477_v13  ;;  %v7295_v15 = vrot.slane %v7282_v26, %v10045_v59 }
 0x57d   : > { %7542 = vmatprep.subr.mxu0 %v7458_v34  ;;  %8626 = vmatpush3.msra.mxu1 %v7477_v13 }
 0x57e   : > { %7543 = vmatpush1.msra.mxu0 %v7457_v22  ;;  %8627 = vmatprep.subr.mxu1 %v7474_v28 }
 0x57f   : > { %7544 = vmatprep.subr.mxu0 %v7455_v39  ;;  %8628 = vmatpush3.msra.mxu1 %v7474_v28 }
 0x580   : > { %7545 = vmatpush1.msra.mxu0 %v7454_v10  ;;  %8643 = vmatprep.mubr.f32.mxu1 %v11216_v44 }
 0x581   : > { %7546 = vmatprep.subr.mxu0 %v7452_v18  ;;  %8629 = vmatprep.subr.mxu1 %v7471_v32 }
 0x582   : > { %7547 = vmatpush1.msra.mxu0 %v7451_v48  ;;  %8630 = vmatpush3.msra.mxu1 %v7471_v32 }
 0x583   : > { %7581 = vmatmul.mubr.f32.vlgmr.msra.gmra.mxu0 %v11216_v44  ;;  %8631 = vmatprep.subr.mxu1 %v7468_v57 }
 0x584   : > { %7586 = vmatprep.mubr.f32.mxu0 %v9509_v5  ;;  %8632 = vmatpush3.msra.mxu1 %v7468_v57  ;;  %v7456_v5 = vld [vmem:[#allocation19 + $0x28] sm:$0xff] }
 0x585   : > { %8633 = vmatprep.subr.mxu1 %v7465_v25 }
 0x586   : > { %8634 = vmatpush3.msra.mxu1 %v7465_v25 }
 0x587   : > { %7587 = vmatmul.mubr.f32.gmra.mxu0 %v11220_v3  ;;  %8635 = vmatprep.subr.mxu1 %v7462_v27 }
 0x588   : > { %8636 = vmatpush3.msra.mxu1 %v7462_v27 }
 0x589   : > { %8637 = vmatprep.subr.mxu1 %v7459_v41 }
 0x58a   : > { %8638 = vmatpush3.msra.mxu1 %v7459_v41 }
 0x58b   : > { %8639 = vmatprep.subr.mxu1 %v7456_v5 }
 0x58c   : > { %8640 = vmatpush3.msra.mxu1 %v7456_v5 }
 0x58d   : > { %8641 = vmatprep.subr.mxu1 %v7453_v55 }
 0x58e   : > { %8642 = vmatpush3.msra.mxu1 %v7453_v55 }
 0x58f   : > { %8644 = vmatmul.mubr.f32.vlgmr.msra.gmra.mxu1 %v11220_v3 }
 0x623   : > { %v7365_v17 = vpop.f32.mrf.mxu0 }
 0x624   : > { %v7366_v23 = vadd.f32 %v7365_v17, %v7287_v0 }
 0x625   : > { %v7367_v51 = vpop.f32.mrf.mxu0 }
 0x626   : > { %v7368_v47 = vadd.f32 %v7367_v51, %v7291_v37 }
 0x627   : > { %v7371_v9 = vpop.f32.mrf.mxu0 }
 0x628   : > { %v7372_v30 = vadd.f32 %v7371_v9, %v7287_v0 }
 0x629   : > { %v7373_v60 = vpop.f32.mrf.mxu0 }
 0x62a   : > { %v7374_v12 = vadd.f32 %v7373_v60, %v7291_v37 }
 0x62e   : > { %v8610_v61 = vpop.f32.mrf.mxu1 }
 0x62f   : > { %v7448_v48 = vadd.f32 %v8610_v61, %v7295_v15 }
 0x630   : > { %v7442_v20 = vpop.f32.mrf.mxu1 }
 0x631   : > { %v7443_v1 = vadd.f32 %v7442_v20, %v7295_v15 }
 0x643   : > { %v7582_v58 = vpop.f32.mrf.mxu0 }
 0x644   : > { %v7583_v63 = vadd.f32 %v7582_v58, %v7504_v43 }
 0x645   : > { %v7584_v8 = vpop.f32.mrf.mxu0 }
 0x646   : > { %v7668_v7 = vadd.f32 %v7583_v63, %v7366_v23  ;;  %v7585_v31 = vadd.f32 %v7584_v8, %v7508_v40 }
 0x647   : > { %v7588_v46 = vpop.f32.mrf.mxu0 }
 0x648   : > { %v8523_v45 = vmul.f32 -1.442695, %v7668_v7  ;;  %v7589_v21 = vadd.f32 %v7588_v46, %v7504_v43  ;;  %v7682_v54 = vadd.f32 %v7585_v31, %v7368_v47 }
 0x649   : > { %v7590_v50 = vpop.f32.mrf.mxu0 }
 0x64a   : > { %9015 = vpow2.f32 %v8523_v45  ;;  %v7669_v2 = vadd.f32 %v7589_v21, %v7372_v30  ;;  %v7591_v35 = vadd.f32 %v7590_v50, %v7508_v40  ;;  %v8525_v24 = vmul.f32 -1.442695, %v7682_v54 }
 0x64c   : > { %v8524_v19 = vmul.f32 -1.442695, %v7669_v2  ;;  %v7683_v16 = vadd.f32 %v7591_v35, %v7374_v12 }
 0x64e   : > { %9017 = vpow2.f32 %v8524_v19  ;;  %v8526_v53 = vmul.f32 -1.442695, %v7683_v16 }
 0x64f   : > { %9019 = vpow2.f32 %v8525_v24  ;;  %v8645_v14 = vpop.f32.mrf.mxu1 }
 0x650   : > { %9021 = vpow2.f32 %v8526_v53  ;;  %v7665_v10 = vadd.f32 %v8645_v14, %v7512_v33 }
 0x651   : > { %v7659_v49 = vpop.f32.mrf.mxu1 }
 0x652   : > { %v7660_v42 = vadd.f32 %v7659_v49, %v7512_v33 }
 0x657   : > { %v9016_v52 = vpop.eup %9015 }
 0x658   : > { %v7676_v36 = vadd.f32 1.0, %v9016_v52 }
 0x65a   : > { %9023 = vrcp.f32 %v7676_v36 }
 0x65b   : > { %v9018_v56 = vpop.eup %9017 }
 0x65c   : > { %v7677_v62 = vadd.f32 1.0, %v9018_v56  ;;  %v9020_v6 = vpop.eup %9019 }
 0x65d   : > { %v9022_v4 = vpop.eup %9021  ;;  %v7690_v38 = vadd.f32 1.0, %v9020_v6 }
 0x65e   : > { %9025 = vrcp.f32 %v7677_v62  ;;  %v7691_v22 = vadd.f32 1.0, %v9022_v4 }
 0x65f   : > { %9027 = vrcp.f32 %v7690_v38 }
 0x660   : > { %9029 = vrcp.f32 %v7691_v22 }
 0x667   : > { %v9024_v34 = vpop.eup %9023 }
 0x668   : > { %v7696_v39 = vmul.f32 %v9024_v34, %v7660_v42 }
 0x66a   : > { %v7698_v29 = vadd.f32 %v7696_v39, %v7443_v1 }
 0x66b   : > { %v9026_v18 = vpop.eup %9025 }
 0x66c   : > { %v7697_v13 = vmul.f32 %v9026_v18, %v7665_v10  ;;  %9031 = vtanh.f32 %v7698_v29  ;;  %v9028_v32 = vpop.eup %9027 }
 0x66d   : > { %v9030_v57 = vpop.eup %9029  ;;  %v7702_v25 = vsub.f32 1.0, %v9028_v32  ;;  %v7706_v59 = vmul.f32 %v9028_v32, %v11216_v44 }
 0x66e   : > { %v7699_v28 = vadd.f32 %v7697_v13, %v7448_v48  ;;  %v7703_v5 = vsub.f32 1.0, %v9030_v57  ;;  %v7707_v51 = vmul.f32 %v9030_v57, %v11220_v3 }
 0x670   : > { %9033 = vtanh.f32 %v7699_v28 }
 0x679   : > { %v9032_v27 = vpop.eup %9031 }
 0x67a   : > { %v7704_v41 = vmul.f32 %v9032_v27, %v7702_v25 }
 0x67c   : > { %v7708_v55 = vadd.f32 %v7706_v59, %v7704_v41 }
 0x67d   : > { %v9034_v17 = vpop.eup %9033 }
 0x67e   : > { %v7705_v26 = vmul.f32 %v9034_v17, %v7703_v5  ;;  %7710 = vst [vmem:[#allocation23] sm:$0xff] %v7708_v55 }
 0x680   : > { %v7709_v9 = vadd.f32 %v7707_v51, %v7705_v26 }
 0x682   : > { %7711 = vst [vmem:[#allocation23 + $0x8] sm:$0xff] %v7709_v9 }
 0x683 PF: > { %p8748_p9 = scmp.eq.s32.totalorder %s9607_s16, 1  ;;  %s9510_s21 = smov [#allocation23]  }
 0x684   : > { %s7718_s3 = sshll.u32 %s9510_s21, 4  ;;  %s7719_s3 = int_to_ptr.vmem [resolvable:$true] %s7718_s3 }
 0x685   : > { %s9331_s4 = scalar_lea.vmem %s7719_s3, 256  ;;  %p9338_p7 = scmp.lt.s32.totalorder %s7719_s3, %s7719_s3 }
 0x686   : > { %p9332_p13 = scmp.ne.s32.totalorder %s7719_s3, %s9331_s4  ;;  %p9339_p3 = scmp.lt.s32.totalorder %s9331_s4, %s9331_s4 }
 0x688   : > { %p9333_p6 = pnand %p9332_p13, %p8748_p9  ;;  %p9340_p4 = por %p9339_p3, %p9338_p7 }
 0x68a   : > { %p9334_p1 = pneg %p9333_p6 }
 0x68c   : > { %p9341_p0 = pnand %p9340_p4, %p9334_p1 }
 0x68e   : > { %9344 = shalt.err (!%p9341_p0)
}
 0x68f   : > { %s9511_s27 = smov 128   ;;  %s9512_s26 = smov 8  }
 0x690   : > { %8689 = dma.vmem_to_hbm [thread:$0]  (%p8748_p9), %s7719_s3, 256, %s11271_s13, [#allocation7], %s9511_s27, %s9511_s27, %s9512_s26  }
 0x691   : > { %9398 = dma.done.wait (%p8748_p9), [#allocation7], 256  }
 0x692   : > { %9400 = vsyncadd (%p8748_p9), [#allocation7], 4294967040 }
 0x693 PF: > { %p33_p5 = scmp.ge.s32.totalorder %s9726_s23, 4   ;;  %s11703_s28 = smov %s9407_s29 }
 0x694   : > { %s11704_s29 = smov %s9411_s30  ;;  %s11705_s30 = smov %s9738_s18 }
 0x695   : > { %s11706_s14 = smov %s9726_s23  ;;  %35 = sbr.rel (!%p33_p5) target bundleno = 16 (0x10), region = 172 }
 0x69a   :  { %7734 = vsyncpa [#allocation6], 1 }
 0x69b   :  { %7736 = vsyncpa [#allocation6 + $0x1], 1 }
 0x69c   :  { %7737 = vsyncpa [#allocation9], 1 }
 0x69d   :  { %7738 = vsyncpa [#allocation12], 1 }
 0x69e   :  { %7739 = vsyncpa [#allocation15], 1 }
 0x69f   :  { %7740 = vsyncpa [#allocation18], 1 }
 0x6a0   :  { %7741 = vsyncpa [#allocation21], 1 }
 0x6a1   :  { %7742 = vsyncpa [#allocation7], 1 }
 0x6a2   :  { %7744 = vsyncpa [#allocation7 + $0x1], 1 }

</bundles_post_ra>
